<compile_context>
chip_gen: v7x
topology: tpu7x:2x2x1
jax: 0.10.0
libtpu: 0.0.40
codegen_flags: <defaults>
</compile_context>

<pallas_src>
import functools

import jax
import jax.numpy as jnp
from jax import lax
from jax.experimental import pallas as pl
from jax.experimental.pallas import tpu as pltpu


# ----------------------------------------------------------------------------
# Fused SSH kernel: one (batch, row-tile) grid cell per invocation.
# ----------------------------------------------------------------------------
def _ssh_fused_kernel(
    xc_ref, u0_ref, u1_ref, u2_ref, d0_ref, d1_ref, d2_ref,
    w1_ref, sb1_ref,      # stage 1: [conv5X5_1 (C4) | conv3X3 (C2)]
    w2_ref, sb2_ref,      # stage 2: [conv7X7_2 (C4) | conv5X5_2 (C4)]
    w3_ref, sb3_ref,      # stage 3: conv7x7_3 (C4)
    o_ref,
    *, H, W, Wp, TH, C4, slope,
):
    # Slab convention: flat index m = j*Wp + q; buffer row j <-> image row
    # (origin + j); position q holds original column (q + drift).  The input
    # has drift -3 (3 left zero-pad columns); every conv stage adds +1 drift.
    # A 3x3/pad-1 conv is then 9 accumulating matmuls over slices at the
    # non-negative offsets dy*Wp + dx.
    t = pl.program_id(1)
    r0 = t * TH                                       # first image row of tile

    NR0, NR1, NR2 = TH + 9, TH + 6, TH + 3            # slab / y1 / y2 rows
    L = TH * Wp

    # ---- input slab: 3 up-halo rows, TH center rows, 3 down-halo rows, plus
    #      3 zero filler rows (slack so every static tap slice is in-bounds;
    #      their values only ever reach don't-care outputs). ------------------
    def halo(ref, img_row):
        keep = jnp.logical_and(img_row >= 0, img_row < H)
        v = ref[0]                                     # (1, Wp, Cin)
        return v * keep.astype(v.dtype)                # zero out-of-image rows

    xc = xc_ref[0]                                     # (TH, Wp, Cin)
    cin = xc.shape[-1]
    fill = jnp.zeros((3, Wp, cin), xc.dtype)
    x_ext = jnp.concatenate(
        [halo(u0_ref, r0 - 3), halo(u1_ref, r0 - 2), halo(u2_ref, r0 - 1),
         xc,
         halo(d0_ref, r0 + TH), halo(d1_ref, r0 + TH + 1),
         halo(d2_ref, r0 + TH + 2), fill],
        axis=0)                                        # (TH+9, Wp, Cin)
    x_slab = x_ext.reshape(NR0 * Wp, cin)

    # ---- helpers -------------------------------------------------------------
    def conv9(slab, w_ref, rows_out):
        """3x3 conv as 9 accumulating matmuls (no patch buffer)."""
        l_out = rows_out * Wp
        acc = None
        for dy in range(3):
            for dx in range(3):
                off = dy * Wp + dx
                p = jnp.dot(slab[off:off + l_out, :], w_ref[3 * dy + dx],
                            preferred_element_type=jnp.float32)
                acc = p if acc is None else acc + p
        return acc

    def bn(acc, sb_ref):
        return acc * sb_ref[0:1, :] + sb_ref[1:2, :]

    def lrelu(v):
        return jnp.where(v >= 0.0, v, slope * v)

    def mask_cast(y, rows, row_origin, col_lo, col_hi):
        """Zero invalid rows/cols (conv zero padding) and cast to bf16."""
        c = y.shape[-1]
        y3d = y.reshape(rows, Wp, c)
        row = lax.broadcasted_iota(jnp.int32, (rows, 1, 1), 0) + row_origin
        col = lax.broadcasted_iota(jnp.int32, (1, Wp, 1), 1)
        keep = (row >= 0) & (row < H) & (col >= col_lo) & (col < col_hi)
        y3d = y3d * keep.astype(y3d.dtype)
        return y3d.reshape(rows * Wp, c).astype(jnp.bfloat16)

    # ---- stage 1: conv5X5_1 + conv3X3 share the input (fused matmul) --------
    y1 = bn(conv9(x_slab, w1_ref, NR1), sb1_ref)       # (NR1*Wp, C4+C2) f32
    # stage-2 input: lrelu'd conv5X5_1 part, drift -2 -> valid cols [2, W+2)
    b2 = mask_cast(lrelu(y1[:, :C4]), NR1, r0 - 2, 2, W + 2)

    # ---- stage 2: conv7X7_2 + conv5X5_2 share conv5X5_1 (fused matmul) ------
    y2 = bn(conv9(b2, w2_ref, NR2), sb2_ref)           # (NR2*Wp, 2*C4) f32
    # stage-3 input: lrelu'd conv7X7_2 part, drift -1 -> valid cols [1, W+1)
    b3 = mask_cast(lrelu(y2[:, :C4]), NR2, r0 - 1, 1, W + 1)

    # ---- stage 3: conv7x7_3 --------------------------------------------------
    y7 = bn(conv9(b3, w3_ref, TH), sb3_ref)            # (TH*Wp, C4) f32

    # ---- fused relu(cat(...)); one lane-dense store per tile ----------------
    # Per-branch drifts are undone by the static column slices below.
    y3 = y1[2 * Wp:2 * Wp + L, C4:].reshape(TH, Wp, -1)[:, 2:W + 2, :]
    y5 = y2[Wp:Wp + L, C4:].reshape(TH, Wp, -1)[:, 1:W + 1, :]
    y7 = y7.reshape(TH, Wp, -1)[:, 0:W, :]
    out = jnp.maximum(jnp.concatenate([y3, y5, y7], axis=-1), 0.0)
    o_ref[0] = out.astype(o_ref.dtype)


# ----------------------------------------------------------------------------
# Wrapper
# ----------------------------------------------------------------------------
def ssh_forward(x_nchw, params, out_channel, row_tile=8):
    """SSH forward (eval-mode BN) via one fused Pallas kernel; NCHW in/out."""
    N, Cin, H, W = x_nchw.shape
    assert out_channel % 4 == 0
    C2, C4 = out_channel // 2, out_channel // 4
    leaky = 0.1 if out_channel <= 64 else 0.0

    # Row tile: largest divisor of H not exceeding row_tile.
    TH = 1
    for d in range(1, min(row_tile, H) + 1):
        if H % d == 0:
            TH = d
    T = H // TH

    # Padded width: 3 left zero cols (for the drift scheme) + >=1 right zero
    # col, rounded to a multiple of 8 so flatten / Wp-strided slices stay
    # sublane aligned.
    Wp = ((W + 4 + 7) // 8) * 8

    # Layout pass: NCHW -> NHWC + bf16 cast + column zero pad (fused by XLA).
    x = jnp.transpose(x_nchw, (0, 2, 3, 1)).astype(jnp.bfloat16)
    xp = jnp.pad(x, ((0, 0), (0, 0), (3, Wp - W - 3), (0, 0)))

    def prep(names):
        ws, ss, bs = zip(*(params[k] for k in names))
        w = jnp.concatenate(list(ws), axis=-1)                 # (3,3,ci,co)
        w = w.reshape(9, w.shape[2], w.shape[3]).astype(jnp.bfloat16)
        sb = jnp.stack([jnp.concatenate(list(ss)),
                        jnp.concatenate(list(bs))]).astype(jnp.float32)
        return w, sb

    w1, sb1 = prep(["conv5X5_1", "conv3X3"])    # channels [C4 | C2]
    w2, sb2 = prep(["conv7X7_2", "conv5X5_2"])  # channels [C4 | C4]
    w3, sb3 = prep(["conv7x7_3"])               # channels [C4]

    kernel = functools.partial(_ssh_fused_kernel, H=H, W=W, Wp=Wp, TH=TH,
                               C4=C4, slope=leaky)

    # Exact halo fetch: six clamped single-row blocks (out-of-image rows are
    # zero-masked in the kernel, which also implements the conv H padding).
    halo_up = [
        pl.BlockSpec((1, 1, Wp, Cin),
                     (lambda n, t, i=i: (n, jnp.maximum(t * TH - 3 + i, 0), 0, 0)))
        for i in range(3)]
    halo_dn = [
        pl.BlockSpec((1, 1, Wp, Cin),
                     (lambda n, t, i=i: (n, jnp.minimum(t * TH + TH + i, H - 1), 0, 0)))
        for i in range(3)]

    def const_spec(shape):
        nd = len(shape)
        return pl.BlockSpec(shape, lambda n, t, _nd=nd: (0,) * _nd)

    flops = 2 * N * H * W * 9 * (Cin * (C2 + C4) + C4 * 2 * C4 + C4 * C4)
    bytes_accessed = (xp.size * 2 + N * H * W * out_channel * 4
                      + 2 * (w1.size + w2.size + w3.size))

    out = pl.pallas_call(
        kernel,
        out_shape=jax.ShapeDtypeStruct((N, H, W, out_channel), jnp.float32),
        grid=(N, T),
        in_specs=[pl.BlockSpec((1, TH, Wp, Cin), lambda n, t: (n, t, 0, 0))]
                 + halo_up + halo_dn
                 + [const_spec(w1.shape), const_spec(sb1.shape),
                    const_spec(w2.shape), const_spec(sb2.shape),
                    const_spec(w3.shape), const_spec(sb3.shape)],
        out_specs=pl.BlockSpec((1, TH, W, out_channel),
                               lambda n, t: (n, t, 0, 0)),
        compiler_params=pltpu.CompilerParams(
            dimension_semantics=("parallel", "parallel")),
        cost_estimate=pl.CostEstimate(flops=flops, transcendentals=0,
                                      bytes_accessed=bytes_accessed),
    )(xp, xp, xp, xp, xp, xp, xp, w1, sb1, w2, sb2, w3, sb3)

    return jnp.transpose(out, (0, 3, 1, 2))                    # NHWC -> NCHW


# ----------------------------------------------------------------------------
# Parameter construction (deterministic, synthetic; BN folded in eval mode)
# ----------------------------------------------------------------------------
def _make_conv_bn_params(key, cin, cout, eps=1e-5):
    kw, kg, kb, km, kv = jax.random.split(key, 5)
    w = jax.random.normal(kw, (3, 3, cin, cout), jnp.float32) * 0.1   # HWIO
    gamma = 1.0 + 0.1 * jax.random.normal(kg, (cout,), jnp.float32)
    beta = 0.1 * jax.random.normal(kb, (cout,), jnp.float32)
    mean = 0.1 * jax.random.normal(km, (cout,), jnp.float32)
    var = jax.random.uniform(kv, (cout,), jnp.float32, 0.5, 1.5)
    scale = gamma / jnp.sqrt(var + eps)
    bias = beta - mean * scale
    return w, scale, bias


def make_ssh_params(key, in_channel, out_channel):
    assert out_channel % 4 == 0
    keys = jax.random.split(key, 5)
    return {
        "conv3X3":   _make_conv_bn_params(keys[0], in_channel, out_channel // 2),
        "conv5X5_1": _make_conv_bn_params(keys[1], in_channel, out_channel // 4),
        "conv5X5_2": _make_conv_bn_params(keys[2], out_channel // 4, out_channel // 4),
        "conv7X7_2": _make_conv_bn_params(keys[3], out_channel // 4, out_channel // 4),
        "conv7x7_3": _make_conv_bn_params(keys[4], out_channel // 4, out_channel // 4),
    }


# ----------------------------------------------------------------------------
# Pure-JAX reference (lax.conv, mirroring the bf16 operand quantization)
# ----------------------------------------------------------------------------
def _ref_conv_bn(x, w, scale, bias):
    y = lax.conv_general_dilated(
        x.astype(jnp.bfloat16), w.astype(jnp.bfloat16),
        window_strides=(1, 1), padding="SAME",
        dimension_numbers=("NHWC", "HWIO", "NHWC"),
        preferred_element_type=jnp.float32)
    return y * scale + bias


def ssh_forward_ref(x_nchw, params, out_channel):
    leaky = 0.1 if out_channel <= 64 else 0.0
    lrelu = lambda v: jnp.where(v >= 0.0, v, leaky * v)
    x = jnp.transpose(x_nchw, (0, 2, 3, 1))
    c3 = _ref_conv_bn(x, *params["conv3X3"])
    c51 = lrelu(_ref_conv_bn(x, *params["conv5X5_1"]))
    c5 = _ref_conv_bn(c51, *params["conv5X5_2"])
    c72 = lrelu(_ref_conv_bn(c51, *params["conv7X7_2"]))
    c7 = _ref_conv_bn(c72, *params["conv7x7_3"])
    out = jnp.maximum(jnp.concatenate([c3, c5, c7], axis=-1), 0.0)
    return jnp.transpose(out, (0, 3, 1, 2))


if __name__ == "__main__":
    key = jax.random.PRNGKey(0)
    k_x, k_p = jax.random.split(key)

    N, in_channel, H, W = 2, 8, 16, 16
    out_channel = 16                  # % 4 == 0, <= 64 -> leaky slope 0.1

    x = jax.random.normal(k_x, (N, in_channel, H, W), jnp.float32)   # NCHW
    params = make_ssh_params(k_p, in_channel, out_channel)

    # Multi-tile path (T = 2): exercises the single-row halo fetch + masking.
    fwd = jax.jit(functools.partial(ssh_forward, out_channel=out_channel,
                                    row_tile=8))
    out = jax.block_until_ready(fwd(x, params))
    assert out.shape == (N, out_channel, H, W), out.shape
    ref = jax.block_until_ready(ssh_forward_ref(x, params, out_channel))
    err = float(jnp.max(jnp.abs(out - ref)))
    assert jnp.allclose(out, ref, rtol=5e-3, atol=5e-3), err

    # Single-tile path (T = 1) with a non-multiple-of-8 width.
    x2 = jax.random.normal(jax.random.PRNGKey(1), (1, in_channel, H, 12),
                           jnp.float32)
    fwd2 = jax.jit(functools.partial(ssh_forward, out_channel=out_channel,
                                     row_tile=16))
    out2 = jax.block_until_ready(fwd2(x2, params))
    ref2 = jax.block_until_ready(ssh_forward_ref(x2, params, out_channel))
    err2 = float(jnp.max(jnp.abs(out2 - ref2)))
    assert jnp.allclose(out2, ref2, rtol=5e-3, atol=5e-3), err2

    print("KERNEL_OK")
</pallas_src>

<mosaic_0001>
module attributes {stable_mosaic.version = 11 : i64} {
  func.func @_ssh_fused_kernel(%arg0: i32, %arg1: i32, %arg2: memref<1x8x24x8xbf16, #tpu.memory_space<vmem>>, %arg3: memref<1x1x24x8xbf16, #tpu.memory_space<vmem>>, %arg4: memref<1x1x24x8xbf16, #tpu.memory_space<vmem>>, %arg5: memref<1x1x24x8xbf16, #tpu.memory_space<vmem>>, %arg6: memref<1x1x24x8xbf16, #tpu.memory_space<vmem>>, %arg7: memref<1x1x24x8xbf16, #tpu.memory_space<vmem>>, %arg8: memref<1x1x24x8xbf16, #tpu.memory_space<vmem>>, %arg9: memref<9x8x12xbf16, #tpu.memory_space<vmem>>, %arg10: memref<2x12xf32, #tpu.memory_space<vmem>>, %arg11: memref<9x4x8xbf16, #tpu.memory_space<vmem>>, %arg12: memref<2x8xf32, #tpu.memory_space<vmem>>, %arg13: memref<9x4x4xbf16, #tpu.memory_space<vmem>>, %arg14: memref<2x4xf32, #tpu.memory_space<vmem>>, %arg15: memref<1x8x16x16xf32, #tpu.memory_space<vmem>>) attributes {dimension_semantics = [#tpu.dimension_semantics<parallel>, #tpu.dimension_semantics<parallel>], iteration_bounds = array<i64: 2, 2>, scalar_prefetch = 0 : i64, scratch_operands = 0 : i64, tpu.core_type = #tpu.core_type<tc>, window_params = [{transform_indices = @transform_0, window_bounds = array<i64: 1, 8, 24, 8>}, {transform_indices = @transform_1, window_bounds = array<i64: 1, 1, 24, 8>}, {transform_indices = @transform_2, window_bounds = array<i64: 1, 1, 24, 8>}, {transform_indices = @transform_3, window_bounds = array<i64: 1, 1, 24, 8>}, {transform_indices = @transform_4, window_bounds = array<i64: 1, 1, 24, 8>}, {transform_indices = @transform_5, window_bounds = array<i64: 1, 1, 24, 8>}, {transform_indices = @transform_6, window_bounds = array<i64: 1, 1, 24, 8>}, {pipeline_mode = #tpu.pipeline_mode<synchronous>, transform_indices = @transform_7, window_bounds = array<i64: 9, 8, 12>}, {pipeline_mode = #tpu.pipeline_mode<synchronous>, transform_indices = @transform_8, window_bounds = array<i64: 2, 12>}, {pipeline_mode = #tpu.pipeline_mode<synchronous>, transform_indices = @transform_9, window_bounds = array<i64: 9, 4, 8>}, {pipeline_mode = #tpu.pipeline_mode<synchronous>, transform_indices = @transform_10, window_bounds = array<i64: 2, 8>}, {pipeline_mode = #tpu.pipeline_mode<synchronous>, transform_indices = @transform_11, window_bounds = array<i64: 9, 4, 4>}, {pipeline_mode = #tpu.pipeline_mode<synchronous>, transform_indices = @transform_12, window_bounds = array<i64: 2, 4>}, {transform_indices = @transform_13, window_bounds = array<i64: 1, 8, 16, 16>}]} {
    %c8_i32 = arith.constant 8 : i32
    %0 = arith.muli %arg1, %c8_i32 : i32
    %c0 = arith.constant 0 : index
    %c0_0 = arith.constant 0 : index
    %c0_1 = arith.constant 0 : index
    %c0_2 = arith.constant 0 : index
    %1 = vector.load %arg2[%c0, %c0_0, %c0_1, %c0_2] : memref<1x8x24x8xbf16, #tpu.memory_space<vmem>>, vector<1x8x24x8xbf16>
    %2 = vector.shape_cast %1 : vector<1x8x24x8xbf16> to vector<8x24x8xbf16>
    %cst = arith.constant 0.000000e+00 : bf16
    %3 = vector.broadcast %cst : bf16 to vector<3x24x8xbf16>
    %c3_i32 = arith.constant 3 : i32
    %4 = arith.subi %0, %c3_i32 : i32
    %c0_i32 = arith.constant 0 : i32
    %5 = arith.cmpi sge, %4, %c0_i32 : i32
    %c16_i32 = arith.constant 16 : i32
    %6 = arith.cmpi slt, %4, %c16_i32 : i32
    %7 = arith.andi %5, %6 : i1
    %c0_3 = arith.constant 0 : index
    %c0_4 = arith.constant 0 : index
    %c0_5 = arith.constant 0 : index
    %c0_6 = arith.constant 0 : index
    %8 = vector.load %arg3[%c0_3, %c0_4, %c0_5, %c0_6] : memref<1x1x24x8xbf16, #tpu.memory_space<vmem>>, vector<1x1x24x8xbf16>
    %9 = vector.shape_cast %8 : vector<1x1x24x8xbf16> to vector<1x24x8xbf16>
    %10 = arith.extui %7 : i1 to i32
    %11 = arith.sitofp %10 : i32 to f32
    %12 = arith.truncf %11 : f32 to bf16
    %13 = vector.broadcast %12 : bf16 to vector<1x24x8xbf16>
    %14 = arith.mulf %9, %13 : vector<1x24x8xbf16>
    %c2_i32 = arith.constant 2 : i32
    %15 = arith.subi %0, %c2_i32 : i32
    %c0_i32_7 = arith.constant 0 : i32
    %16 = arith.cmpi sge, %15, %c0_i32_7 : i32
    %c16_i32_8 = arith.constant 16 : i32
    %17 = arith.cmpi slt, %15, %c16_i32_8 : i32
    %18 = arith.andi %16, %17 : i1
    %c0_9 = arith.constant 0 : index
    %c0_10 = arith.constant 0 : index
    %c0_11 = arith.constant 0 : index
    %c0_12 = arith.constant 0 : index
    %19 = vector.load %arg4[%c0_9, %c0_10, %c0_11, %c0_12] : memref<1x1x24x8xbf16, #tpu.memory_space<vmem>>, vector<1x1x24x8xbf16>
    %20 = vector.shape_cast %19 : vector<1x1x24x8xbf16> to vector<1x24x8xbf16>
    %21 = arith.extui %18 : i1 to i32
    %22 = arith.sitofp %21 : i32 to f32
    %23 = arith.truncf %22 : f32 to bf16
    %24 = vector.broadcast %23 : bf16 to vector<1x24x8xbf16>
    %25 = arith.mulf %20, %24 : vector<1x24x8xbf16>
    %c1_i32 = arith.constant 1 : i32
    %26 = arith.subi %0, %c1_i32 : i32
    %c0_i32_13 = arith.constant 0 : i32
    %27 = arith.cmpi sge, %26, %c0_i32_13 : i32
    %c16_i32_14 = arith.constant 16 : i32
    %28 = arith.cmpi slt, %26, %c16_i32_14 : i32
    %29 = arith.andi %27, %28 : i1
    %c0_15 = arith.constant 0 : index
    %c0_16 = arith.constant 0 : index
    %c0_17 = arith.constant 0 : index
    %c0_18 = arith.constant 0 : index
    %30 = vector.load %arg5[%c0_15, %c0_16, %c0_17, %c0_18] : memref<1x1x24x8xbf16, #tpu.memory_space<vmem>>, vector<1x1x24x8xbf16>
    %31 = vector.shape_cast %30 : vector<1x1x24x8xbf16> to vector<1x24x8xbf16>
    %32 = arith.extui %29 : i1 to i32
    %33 = arith.sitofp %32 : i32 to f32
    %34 = arith.truncf %33 : f32 to bf16
    %35 = vector.broadcast %34 : bf16 to vector<1x24x8xbf16>
    %36 = arith.mulf %31, %35 : vector<1x24x8xbf16>
    %c8_i32_19 = arith.constant 8 : i32
    %37 = arith.addi %0, %c8_i32_19 : i32
    %c0_i32_20 = arith.constant 0 : i32
    %38 = arith.cmpi sge, %37, %c0_i32_20 : i32
    %c16_i32_21 = arith.constant 16 : i32
    %39 = arith.cmpi slt, %37, %c16_i32_21 : i32
    %40 = arith.andi %38, %39 : i1
    %c0_22 = arith.constant 0 : index
    %c0_23 = arith.constant 0 : index
    %c0_24 = arith.constant 0 : index
    %c0_25 = arith.constant 0 : index
    %41 = vector.load %arg6[%c0_22, %c0_23, %c0_24, %c0_25] : memref<1x1x24x8xbf16, #tpu.memory_space<vmem>>, vector<1x1x24x8xbf16>
    %42 = vector.shape_cast %41 : vector<1x1x24x8xbf16> to vector<1x24x8xbf16>
    %43 = arith.extui %40 : i1 to i32
    %44 = arith.sitofp %43 : i32 to f32
    %45 = arith.truncf %44 : f32 to bf16
    %46 = vector.broadcast %45 : bf16 to vector<1x24x8xbf16>
    %47 = arith.mulf %42, %46 : vector<1x24x8xbf16>
    %c8_i32_26 = arith.constant 8 : i32
    %48 = arith.addi %0, %c8_i32_26 : i32
    %c1_i32_27 = arith.constant 1 : i32
    %49 = arith.addi %48, %c1_i32_27 : i32
    %c0_i32_28 = arith.constant 0 : i32
    %50 = arith.cmpi sge, %49, %c0_i32_28 : i32
    %c16_i32_29 = arith.constant 16 : i32
    %51 = arith.cmpi slt, %49, %c16_i32_29 : i32
    %52 = arith.andi %50, %51 : i1
    %c0_30 = arith.constant 0 : index
    %c0_31 = arith.constant 0 : index
    %c0_32 = arith.constant 0 : index
    %c0_33 = arith.constant 0 : index
    %53 = vector.load %arg7[%c0_30, %c0_31, %c0_32, %c0_33] : memref<1x1x24x8xbf16, #tpu.memory_space<vmem>>, vector<1x1x24x8xbf16>
    %54 = vector.shape_cast %53 : vector<1x1x24x8xbf16> to vector<1x24x8xbf16>
    %55 = arith.extui %52 : i1 to i32
    %56 = arith.sitofp %55 : i32 to f32
    %57 = arith.truncf %56 : f32 to bf16
    %58 = vector.broadcast %57 : bf16 to vector<1x24x8xbf16>
    %59 = arith.mulf %54, %58 : vector<1x24x8xbf16>
    %c8_i32_34 = arith.constant 8 : i32
    %60 = arith.addi %0, %c8_i32_34 : i32
    %c2_i32_35 = arith.constant 2 : i32
    %61 = arith.addi %60, %c2_i32_35 : i32
    %c0_i32_36 = arith.constant 0 : i32
    %62 = arith.cmpi sge, %61, %c0_i32_36 : i32
    %c16_i32_37 = arith.constant 16 : i32
    %63 = arith.cmpi slt, %61, %c16_i32_37 : i32
    %64 = arith.andi %62, %63 : i1
    %c0_38 = arith.constant 0 : index
    %c0_39 = arith.constant 0 : index
    %c0_40 = arith.constant 0 : index
    %c0_41 = arith.constant 0 : index
    %65 = vector.load %arg8[%c0_38, %c0_39, %c0_40, %c0_41] : memref<1x1x24x8xbf16, #tpu.memory_space<vmem>>, vector<1x1x24x8xbf16>
    %66 = vector.shape_cast %65 : vector<1x1x24x8xbf16> to vector<1x24x8xbf16>
    %67 = arith.extui %64 : i1 to i32
    %68 = arith.sitofp %67 : i32 to f32
    %69 = arith.truncf %68 : f32 to bf16
    %70 = vector.broadcast %69 : bf16 to vector<1x24x8xbf16>
    %71 = arith.mulf %66, %70 : vector<1x24x8xbf16>
    %72 = tpu.concatenate %14, %25, %36, %2, %47, %59, %71, %3 in 0 : vector<1x24x8xbf16>, vector<1x24x8xbf16>, vector<1x24x8xbf16>, vector<8x24x8xbf16>, vector<1x24x8xbf16>, vector<1x24x8xbf16>, vector<1x24x8xbf16>, vector<3x24x8xbf16> -> vector<17x24x8xbf16>
    %73 = vector.shape_cast %72 : vector<17x24x8xbf16> to vector<408x8xbf16>
    %74 = vector.extract_strided_slice %73 {offsets = [0, 0], sizes = [336, 8], strides = [1, 1]} : vector<408x8xbf16> to vector<336x8xbf16>
    %c0_42 = arith.constant 0 : index
    %c0_43 = arith.constant 0 : index
    %c0_44 = arith.constant 0 : index
    %75 = vector.load %arg9[%c0_42, %c0_43, %c0_44] : memref<9x8x12xbf16, #tpu.memory_space<vmem>>, vector<1x8x12xbf16>
    %76 = vector.shape_cast %75 : vector<1x8x12xbf16> to vector<8x12xbf16>
    %cst_45 = arith.constant dense<0.000000e+00> : vector<336x12xf32>
    %77 = tpu.matmul %74, %76, %cst_45 {dimension_numbers = #tpu.dot_dimension_numbers<[1], [0], [0], [1], [0, 0, 1, 1], [], []>} : vector<336x8xbf16>, vector<8x12xbf16>, vector<336x12xf32> -> vector<336x12xf32>
    %78 = vector.extract_strided_slice %73 {offsets = [1, 0], sizes = [336, 8], strides = [1, 1]} : vector<408x8xbf16> to vector<336x8xbf16>
    %c1 = arith.constant 1 : index
    %c0_46 = arith.constant 0 : index
    %c0_47 = arith.constant 0 : index
    %79 = vector.load %arg9[%c1, %c0_46, %c0_47] : memref<9x8x12xbf16, #tpu.memory_space<vmem>>, vector<1x8x12xbf16>
    %80 = vector.shape_cast %79 : vector<1x8x12xbf16> to vector<8x12xbf16>
    %cst_48 = arith.constant dense<0.000000e+00> : vector<336x12xf32>
    %81 = tpu.matmul %78, %80, %cst_48 {dimension_numbers = #tpu.dot_dimension_numbers<[1], [0], [0], [1], [0, 0, 1, 1], [], []>} : vector<336x8xbf16>, vector<8x12xbf16>, vector<336x12xf32> -> vector<336x12xf32>
    %82 = arith.addf %77, %81 : vector<336x12xf32>
    %83 = vector.extract_strided_slice %73 {offsets = [2, 0], sizes = [336, 8], strides = [1, 1]} : vector<408x8xbf16> to vector<336x8xbf16>
    %c2 = arith.constant 2 : index
    %c0_49 = arith.constant 0 : index
    %c0_50 = arith.constant 0 : index
    %84 = vector.load %arg9[%c2, %c0_49, %c0_50] : memref<9x8x12xbf16, #tpu.memory_space<vmem>>, vector<1x8x12xbf16>
    %85 = vector.shape_cast %84 : vector<1x8x12xbf16> to vector<8x12xbf16>
    %cst_51 = arith.constant dense<0.000000e+00> : vector<336x12xf32>
    %86 = tpu.matmul %83, %85, %cst_51 {dimension_numbers = #tpu.dot_dimension_numbers<[1], [0], [0], [1], [0, 0, 1, 1], [], []>} : vector<336x8xbf16>, vector<8x12xbf16>, vector<336x12xf32> -> vector<336x12xf32>
    %87 = arith.addf %82, %86 : vector<336x12xf32>
    %88 = vector.extract_strided_slice %73 {offsets = [24, 0], sizes = [336, 8], strides = [1, 1]} : vector<408x8xbf16> to vector<336x8xbf16>
    %c3 = arith.constant 3 : index
    %c0_52 = arith.constant 0 : index
    %c0_53 = arith.constant 0 : index
    %89 = vector.load %arg9[%c3, %c0_52, %c0_53] : memref<9x8x12xbf16, #tpu.memory_space<vmem>>, vector<1x8x12xbf16>
    %90 = vector.shape_cast %89 : vector<1x8x12xbf16> to vector<8x12xbf16>
    %cst_54 = arith.constant dense<0.000000e+00> : vector<336x12xf32>
    %91 = tpu.matmul %88, %90, %cst_54 {dimension_numbers = #tpu.dot_dimension_numbers<[1], [0], [0], [1], [0, 0, 1, 1], [], []>} : vector<336x8xbf16>, vector<8x12xbf16>, vector<336x12xf32> -> vector<336x12xf32>
    %92 = arith.addf %87, %91 : vector<336x12xf32>
    %93 = vector.extract_strided_slice %73 {offsets = [25, 0], sizes = [336, 8], strides = [1, 1]} : vector<408x8xbf16> to vector<336x8xbf16>
    %c4 = arith.constant 4 : index
    %c0_55 = arith.constant 0 : index
    %c0_56 = arith.constant 0 : index
    %94 = vector.load %arg9[%c4, %c0_55, %c0_56] : memref<9x8x12xbf16, #tpu.memory_space<vmem>>, vector<1x8x12xbf16>
    %95 = vector.shape_cast %94 : vector<1x8x12xbf16> to vector<8x12xbf16>
    %cst_57 = arith.constant dense<0.000000e+00> : vector<336x12xf32>
    %96 = tpu.matmul %93, %95, %cst_57 {dimension_numbers = #tpu.dot_dimension_numbers<[1], [0], [0], [1], [0, 0, 1, 1], [], []>} : vector<336x8xbf16>, vector<8x12xbf16>, vector<336x12xf32> -> vector<336x12xf32>
    %97 = arith.addf %92, %96 : vector<336x12xf32>
    %98 = vector.extract_strided_slice %73 {offsets = [26, 0], sizes = [336, 8], strides = [1, 1]} : vector<408x8xbf16> to vector<336x8xbf16>
    %c5 = arith.constant 5 : index
    %c0_58 = arith.constant 0 : index
    %c0_59 = arith.constant 0 : index
    %99 = vector.load %arg9[%c5, %c0_58, %c0_59] : memref<9x8x12xbf16, #tpu.memory_space<vmem>>, vector<1x8x12xbf16>
    %100 = vector.shape_cast %99 : vector<1x8x12xbf16> to vector<8x12xbf16>
    %cst_60 = arith.constant dense<0.000000e+00> : vector<336x12xf32>
    %101 = tpu.matmul %98, %100, %cst_60 {dimension_numbers = #tpu.dot_dimension_numbers<[1], [0], [0], [1], [0, 0, 1, 1], [], []>} : vector<336x8xbf16>, vector<8x12xbf16>, vector<336x12xf32> -> vector<336x12xf32>
    %102 = arith.addf %97, %101 : vector<336x12xf32>
    %103 = vector.extract_strided_slice %73 {offsets = [48, 0], sizes = [336, 8], strides = [1, 1]} : vector<408x8xbf16> to vector<336x8xbf16>
    %c6 = arith.constant 6 : index
    %c0_61 = arith.constant 0 : index
    %c0_62 = arith.constant 0 : index
    %104 = vector.load %arg9[%c6, %c0_61, %c0_62] : memref<9x8x12xbf16, #tpu.memory_space<vmem>>, vector<1x8x12xbf16>
    %105 = vector.shape_cast %104 : vector<1x8x12xbf16> to vector<8x12xbf16>
    %cst_63 = arith.constant dense<0.000000e+00> : vector<336x12xf32>
    %106 = tpu.matmul %103, %105, %cst_63 {dimension_numbers = #tpu.dot_dimension_numbers<[1], [0], [0], [1], [0, 0, 1, 1], [], []>} : vector<336x8xbf16>, vector<8x12xbf16>, vector<336x12xf32> -> vector<336x12xf32>
    %107 = arith.addf %102, %106 : vector<336x12xf32>
    %108 = vector.extract_strided_slice %73 {offsets = [49, 0], sizes = [336, 8], strides = [1, 1]} : vector<408x8xbf16> to vector<336x8xbf16>
    %c7 = arith.constant 7 : index
    %c0_64 = arith.constant 0 : index
    %c0_65 = arith.constant 0 : index
    %109 = vector.load %arg9[%c7, %c0_64, %c0_65] : memref<9x8x12xbf16, #tpu.memory_space<vmem>>, vector<1x8x12xbf16>
    %110 = vector.shape_cast %109 : vector<1x8x12xbf16> to vector<8x12xbf16>
    %cst_66 = arith.constant dense<0.000000e+00> : vector<336x12xf32>
    %111 = tpu.matmul %108, %110, %cst_66 {dimension_numbers = #tpu.dot_dimension_numbers<[1], [0], [0], [1], [0, 0, 1, 1], [], []>} : vector<336x8xbf16>, vector<8x12xbf16>, vector<336x12xf32> -> vector<336x12xf32>
    %112 = arith.addf %107, %111 : vector<336x12xf32>
    %113 = vector.extract_strided_slice %73 {offsets = [50, 0], sizes = [336, 8], strides = [1, 1]} : vector<408x8xbf16> to vector<336x8xbf16>
    %c8 = arith.constant 8 : index
    %c0_67 = arith.constant 0 : index
    %c0_68 = arith.constant 0 : index
    %114 = vector.load %arg9[%c8, %c0_67, %c0_68] : memref<9x8x12xbf16, #tpu.memory_space<vmem>>, vector<1x8x12xbf16>
    %115 = vector.shape_cast %114 : vector<1x8x12xbf16> to vector<8x12xbf16>
    %cst_69 = arith.constant dense<0.000000e+00> : vector<336x12xf32>
    %116 = tpu.matmul %113, %115, %cst_69 {dimension_numbers = #tpu.dot_dimension_numbers<[1], [0], [0], [1], [0, 0, 1, 1], [], []>} : vector<336x8xbf16>, vector<8x12xbf16>, vector<336x12xf32> -> vector<336x12xf32>
    %117 = arith.addf %112, %116 : vector<336x12xf32>
    %c0_70 = arith.constant 0 : index
    %c0_71 = arith.constant 0 : index
    %118 = vector.load %arg10[%c0_70, %c0_71] : memref<2x12xf32, #tpu.memory_space<vmem>>, vector<1x12xf32>
    %119 = vector.broadcast %118 : vector<1x12xf32> to vector<336x12xf32>
    %120 = arith.mulf %117, %119 : vector<336x12xf32>
    %c1_72 = arith.constant 1 : index
    %c0_73 = arith.constant 0 : index
    %121 = vector.load %arg10[%c1_72, %c0_73] : memref<2x12xf32, #tpu.memory_space<vmem>>, vector<1x12xf32>
    %122 = vector.broadcast %121 : vector<1x12xf32> to vector<336x12xf32>
    %123 = arith.addf %120, %122 : vector<336x12xf32>
    %124 = vector.extract_strided_slice %123 {offsets = [0, 0], sizes = [336, 4], strides = [1, 1]} : vector<336x12xf32> to vector<336x4xf32>
    %cst_74 = arith.constant 0.000000e+00 : f32
    %125 = vector.broadcast %cst_74 : f32 to vector<336x4xf32>
    %126 = arith.cmpf oge, %124, %125 : vector<336x4xf32>
    %cst_75 = arith.constant 1.000000e-01 : f32
    %127 = vector.broadcast %cst_75 : f32 to vector<336x4xf32>
    %128 = arith.mulf %127, %124 : vector<336x4xf32>
    %129 = arith.select %126, %124, %128 : vector<336x4xi1>, vector<336x4xf32>
    %c2_i32_76 = arith.constant 2 : i32
    %130 = arith.subi %0, %c2_i32_76 : i32
    %131 = vector.shape_cast %129 : vector<336x4xf32> to vector<14x24x4xf32>
    %132 = tpu.iota {dimensions = array<i32: 0>} : vector<14x1x1xi32>
    %133 = vector.broadcast %130 : i32 to vector<14x1x1xi32>
    %134 = arith.addi %132, %133 : vector<14x1x1xi32>
    %135 = tpu.iota {dimensions = array<i32: 1>} : vector<1x24x1xi32>
    %c0_i32_77 = arith.constant 0 : i32
    %136 = vector.broadcast %c0_i32_77 : i32 to vector<14x1x1xi32>
    %137 = arith.cmpi sge, %134, %136 : vector<14x1x1xi32>
    %c16_i32_78 = arith.constant 16 : i32
    %138 = vector.broadcast %c16_i32_78 : i32 to vector<14x1x1xi32>
    %139 = arith.cmpi slt, %134, %138 : vector<14x1x1xi32>
    %140 = arith.andi %137, %139 : vector<14x1x1xi1>
    %c2_i32_79 = arith.constant 2 : i32
    %141 = vector.broadcast %c2_i32_79 : i32 to vector<1x24x1xi32>
    %142 = arith.cmpi sge, %135, %141 : vector<1x24x1xi32>
    %143 = vector.broadcast %140 : vector<14x1x1xi1> to vector<14x24x1xi1>
    %144 = vector.broadcast %142 : vector<1x24x1xi1> to vector<14x24x1xi1>
    %145 = arith.andi %143, %144 : vector<14x24x1xi1>
    %c18_i32 = arith.constant 18 : i32
    %146 = vector.broadcast %c18_i32 : i32 to vector<1x24x1xi32>
    %147 = arith.cmpi slt, %135, %146 : vector<1x24x1xi32>
    %148 = vector.broadcast %147 : vector<1x24x1xi1> to vector<14x24x1xi1>
    %149 = arith.andi %145, %148 : vector<14x24x1xi1>
    %150 = arith.extui %149 : vector<14x24x1xi1> to vector<14x24x1xi32>
    %151 = arith.sitofp %150 : vector<14x24x1xi32> to vector<14x24x1xf32>
    %152 = vector.broadcast %151 : vector<14x24x1xf32> to vector<14x24x4xf32>
    %153 = arith.mulf %131, %152 : vector<14x24x4xf32>
    %154 = vector.shape_cast %153 : vector<14x24x4xf32> to vector<336x4xf32>
    %155 = arith.truncf %154 : vector<336x4xf32> to vector<336x4xbf16>
    %156 = vector.extract_strided_slice %155 {offsets = [0, 0], sizes = [264, 4], strides = [1, 1]} : vector<336x4xbf16> to vector<264x4xbf16>
    %c0_80 = arith.constant 0 : index
    %c0_81 = arith.constant 0 : index
    %c0_82 = arith.constant 0 : index
    %157 = vector.load %arg11[%c0_80, %c0_81, %c0_82] : memref<9x4x8xbf16, #tpu.memory_space<vmem>>, vector<1x4x8xbf16>
    %158 = vector.shape_cast %157 : vector<1x4x8xbf16> to vector<4x8xbf16>
    %cst_83 = arith.constant dense<0.000000e+00> : vector<264x8xf32>
    %159 = tpu.matmul %156, %158, %cst_83 {dimension_numbers = #tpu.dot_dimension_numbers<[1], [0], [0], [1], [0, 0, 1, 1], [], []>} : vector<264x4xbf16>, vector<4x8xbf16>, vector<264x8xf32> -> vector<264x8xf32>
    %160 = vector.extract_strided_slice %155 {offsets = [1, 0], sizes = [264, 4], strides = [1, 1]} : vector<336x4xbf16> to vector<264x4xbf16>
    %c1_84 = arith.constant 1 : index
    %c0_85 = arith.constant 0 : index
    %c0_86 = arith.constant 0 : index
    %161 = vector.load %arg11[%c1_84, %c0_85, %c0_86] : memref<9x4x8xbf16, #tpu.memory_space<vmem>>, vector<1x4x8xbf16>
    %162 = vector.shape_cast %161 : vector<1x4x8xbf16> to vector<4x8xbf16>
    %cst_87 = arith.constant dense<0.000000e+00> : vector<264x8xf32>
    %163 = tpu.matmul %160, %162, %cst_87 {dimension_numbers = #tpu.dot_dimension_numbers<[1], [0], [0], [1], [0, 0, 1, 1], [], []>} : vector<264x4xbf16>, vector<4x8xbf16>, vector<264x8xf32> -> vector<264x8xf32>
    %164 = arith.addf %159, %163 : vector<264x8xf32>
    %165 = vector.extract_strided_slice %155 {offsets = [2, 0], sizes = [264, 4], strides = [1, 1]} : vector<336x4xbf16> to vector<264x4xbf16>
    %c2_88 = arith.constant 2 : index
    %c0_89 = arith.constant 0 : index
    %c0_90 = arith.constant 0 : index
    %166 = vector.load %arg11[%c2_88, %c0_89, %c0_90] : memref<9x4x8xbf16, #tpu.memory_space<vmem>>, vector<1x4x8xbf16>
    %167 = vector.shape_cast %166 : vector<1x4x8xbf16> to vector<4x8xbf16>
    %cst_91 = arith.constant dense<0.000000e+00> : vector<264x8xf32>
    %168 = tpu.matmul %165, %167, %cst_91 {dimension_numbers = #tpu.dot_dimension_numbers<[1], [0], [0], [1], [0, 0, 1, 1], [], []>} : vector<264x4xbf16>, vector<4x8xbf16>, vector<264x8xf32> -> vector<264x8xf32>
    %169 = arith.addf %164, %168 : vector<264x8xf32>
    %170 = vector.extract_strided_slice %155 {offsets = [24, 0], sizes = [264, 4], strides = [1, 1]} : vector<336x4xbf16> to vector<264x4xbf16>
    %c3_92 = arith.constant 3 : index
    %c0_93 = arith.constant 0 : index
    %c0_94 = arith.constant 0 : index
    %171 = vector.load %arg11[%c3_92, %c0_93, %c0_94] : memref<9x4x8xbf16, #tpu.memory_space<vmem>>, vector<1x4x8xbf16>
    %172 = vector.shape_cast %171 : vector<1x4x8xbf16> to vector<4x8xbf16>
    %cst_95 = arith.constant dense<0.000000e+00> : vector<264x8xf32>
    %173 = tpu.matmul %170, %172, %cst_95 {dimension_numbers = #tpu.dot_dimension_numbers<[1], [0], [0], [1], [0, 0, 1, 1], [], []>} : vector<264x4xbf16>, vector<4x8xbf16>, vector<264x8xf32> -> vector<264x8xf32>
    %174 = arith.addf %169, %173 : vector<264x8xf32>
    %175 = vector.extract_strided_slice %155 {offsets = [25, 0], sizes = [264, 4], strides = [1, 1]} : vector<336x4xbf16> to vector<264x4xbf16>
    %c4_96 = arith.constant 4 : index
    %c0_97 = arith.constant 0 : index
    %c0_98 = arith.constant 0 : index
    %176 = vector.load %arg11[%c4_96, %c0_97, %c0_98] : memref<9x4x8xbf16, #tpu.memory_space<vmem>>, vector<1x4x8xbf16>
    %177 = vector.shape_cast %176 : vector<1x4x8xbf16> to vector<4x8xbf16>
    %cst_99 = arith.constant dense<0.000000e+00> : vector<264x8xf32>
    %178 = tpu.matmul %175, %177, %cst_99 {dimension_numbers = #tpu.dot_dimension_numbers<[1], [0], [0], [1], [0, 0, 1, 1], [], []>} : vector<264x4xbf16>, vector<4x8xbf16>, vector<264x8xf32> -> vector<264x8xf32>
    %179 = arith.addf %174, %178 : vector<264x8xf32>
    %180 = vector.extract_strided_slice %155 {offsets = [26, 0], sizes = [264, 4], strides = [1, 1]} : vector<336x4xbf16> to vector<264x4xbf16>
    %c5_100 = arith.constant 5 : index
    %c0_101 = arith.constant 0 : index
    %c0_102 = arith.constant 0 : index
    %181 = vector.load %arg11[%c5_100, %c0_101, %c0_102] : memref<9x4x8xbf16, #tpu.memory_space<vmem>>, vector<1x4x8xbf16>
    %182 = vector.shape_cast %181 : vector<1x4x8xbf16> to vector<4x8xbf16>
    %cst_103 = arith.constant dense<0.000000e+00> : vector<264x8xf32>
    %183 = tpu.matmul %180, %182, %cst_103 {dimension_numbers = #tpu.dot_dimension_numbers<[1], [0], [0], [1], [0, 0, 1, 1], [], []>} : vector<264x4xbf16>, vector<4x8xbf16>, vector<264x8xf32> -> vector<264x8xf32>
    %184 = arith.addf %179, %183 : vector<264x8xf32>
    %185 = vector.extract_strided_slice %155 {offsets = [48, 0], sizes = [264, 4], strides = [1, 1]} : vector<336x4xbf16> to vector<264x4xbf16>
    %c6_104 = arith.constant 6 : index
    %c0_105 = arith.constant 0 : index
    %c0_106 = arith.constant 0 : index
    %186 = vector.load %arg11[%c6_104, %c0_105, %c0_106] : memref<9x4x8xbf16, #tpu.memory_space<vmem>>, vector<1x4x8xbf16>
    %187 = vector.shape_cast %186 : vector<1x4x8xbf16> to vector<4x8xbf16>
    %cst_107 = arith.constant dense<0.000000e+00> : vector<264x8xf32>
    %188 = tpu.matmul %185, %187, %cst_107 {dimension_numbers = #tpu.dot_dimension_numbers<[1], [0], [0], [1], [0, 0, 1, 1], [], []>} : vector<264x4xbf16>, vector<4x8xbf16>, vector<264x8xf32> -> vector<264x8xf32>
    %189 = arith.addf %184, %188 : vector<264x8xf32>
    %190 = vector.extract_strided_slice %155 {offsets = [49, 0], sizes = [264, 4], strides = [1, 1]} : vector<336x4xbf16> to vector<264x4xbf16>
    %c7_108 = arith.constant 7 : index
    %c0_109 = arith.constant 0 : index
    %c0_110 = arith.constant 0 : index
    %191 = vector.load %arg11[%c7_108, %c0_109, %c0_110] : memref<9x4x8xbf16, #tpu.memory_space<vmem>>, vector<1x4x8xbf16>
    %192 = vector.shape_cast %191 : vector<1x4x8xbf16> to vector<4x8xbf16>
    %cst_111 = arith.constant dense<0.000000e+00> : vector<264x8xf32>
    %193 = tpu.matmul %190, %192, %cst_111 {dimension_numbers = #tpu.dot_dimension_numbers<[1], [0], [0], [1], [0, 0, 1, 1], [], []>} : vector<264x4xbf16>, vector<4x8xbf16>, vector<264x8xf32> -> vector<264x8xf32>
    %194 = arith.addf %189, %193 : vector<264x8xf32>
    %195 = vector.extract_strided_slice %155 {offsets = [50, 0], sizes = [264, 4], strides = [1, 1]} : vector<336x4xbf16> to vector<264x4xbf16>
    %c8_112 = arith.constant 8 : index
    %c0_113 = arith.constant 0 : index
    %c0_114 = arith.constant 0 : index
    %196 = vector.load %arg11[%c8_112, %c0_113, %c0_114] : memref<9x4x8xbf16, #tpu.memory_space<vmem>>, vector<1x4x8xbf16>
    %197 = vector.shape_cast %196 : vector<1x4x8xbf16> to vector<4x8xbf16>
    %cst_115 = arith.constant dense<0.000000e+00> : vector<264x8xf32>
    %198 = tpu.matmul %195, %197, %cst_115 {dimension_numbers = #tpu.dot_dimension_numbers<[1], [0], [0], [1], [0, 0, 1, 1], [], []>} : vector<264x4xbf16>, vector<4x8xbf16>, vector<264x8xf32> -> vector<264x8xf32>
    %199 = arith.addf %194, %198 : vector<264x8xf32>
    %c0_116 = arith.constant 0 : index
    %c0_117 = arith.constant 0 : index
    %200 = vector.load %arg12[%c0_116, %c0_117] : memref<2x8xf32, #tpu.memory_space<vmem>>, vector<1x8xf32>
    %201 = vector.broadcast %200 : vector<1x8xf32> to vector<264x8xf32>
    %202 = arith.mulf %199, %201 : vector<264x8xf32>
    %c1_118 = arith.constant 1 : index
    %c0_119 = arith.constant 0 : index
    %203 = vector.load %arg12[%c1_118, %c0_119] : memref<2x8xf32, #tpu.memory_space<vmem>>, vector<1x8xf32>
    %204 = vector.broadcast %203 : vector<1x8xf32> to vector<264x8xf32>
    %205 = arith.addf %202, %204 : vector<264x8xf32>
    %206 = vector.extract_strided_slice %205 {offsets = [0, 0], sizes = [264, 4], strides = [1, 1]} : vector<264x8xf32> to vector<264x4xf32>
    %cst_120 = arith.constant 0.000000e+00 : f32
    %207 = vector.broadcast %cst_120 : f32 to vector<264x4xf32>
    %208 = arith.cmpf oge, %206, %207 : vector<264x4xf32>
    %cst_121 = arith.constant 1.000000e-01 : f32
    %209 = vector.broadcast %cst_121 : f32 to vector<264x4xf32>
    %210 = arith.mulf %209, %206 : vector<264x4xf32>
    %211 = arith.select %208, %206, %210 : vector<264x4xi1>, vector<264x4xf32>
    %c1_i32_122 = arith.constant 1 : i32
    %212 = arith.subi %0, %c1_i32_122 : i32
    %213 = vector.shape_cast %211 : vector<264x4xf32> to vector<11x24x4xf32>
    %214 = tpu.iota {dimensions = array<i32: 0>} : vector<11x1x1xi32>
    %215 = vector.broadcast %212 : i32 to vector<11x1x1xi32>
    %216 = arith.addi %214, %215 : vector<11x1x1xi32>
    %217 = tpu.iota {dimensions = array<i32: 1>} : vector<1x24x1xi32>
    %c0_i32_123 = arith.constant 0 : i32
    %218 = vector.broadcast %c0_i32_123 : i32 to vector<11x1x1xi32>
    %219 = arith.cmpi sge, %216, %218 : vector<11x1x1xi32>
    %c16_i32_124 = arith.constant 16 : i32
    %220 = vector.broadcast %c16_i32_124 : i32 to vector<11x1x1xi32>
    %221 = arith.cmpi slt, %216, %220 : vector<11x1x1xi32>
    %222 = arith.andi %219, %221 : vector<11x1x1xi1>
    %c1_i32_125 = arith.constant 1 : i32
    %223 = vector.broadcast %c1_i32_125 : i32 to vector<1x24x1xi32>
    %224 = arith.cmpi sge, %217, %223 : vector<1x24x1xi32>
    %225 = vector.broadcast %222 : vector<11x1x1xi1> to vector<11x24x1xi1>
    %226 = vector.broadcast %224 : vector<1x24x1xi1> to vector<11x24x1xi1>
    %227 = arith.andi %225, %226 : vector<11x24x1xi1>
    %c17_i32 = arith.constant 17 : i32
    %228 = vector.broadcast %c17_i32 : i32 to vector<1x24x1xi32>
    %229 = arith.cmpi slt, %217, %228 : vector<1x24x1xi32>
    %230 = vector.broadcast %229 : vector<1x24x1xi1> to vector<11x24x1xi1>
    %231 = arith.andi %227, %230 : vector<11x24x1xi1>
    %232 = arith.extui %231 : vector<11x24x1xi1> to vector<11x24x1xi32>
    %233 = arith.sitofp %232 : vector<11x24x1xi32> to vector<11x24x1xf32>
    %234 = vector.broadcast %233 : vector<11x24x1xf32> to vector<11x24x4xf32>
    %235 = arith.mulf %213, %234 : vector<11x24x4xf32>
    %236 = vector.shape_cast %235 : vector<11x24x4xf32> to vector<264x4xf32>
    %237 = arith.truncf %236 : vector<264x4xf32> to vector<264x4xbf16>
    %238 = vector.extract_strided_slice %237 {offsets = [0, 0], sizes = [192, 4], strides = [1, 1]} : vector<264x4xbf16> to vector<192x4xbf16>
    %c0_126 = arith.constant 0 : index
    %c0_127 = arith.constant 0 : index
    %c0_128 = arith.constant 0 : index
    %239 = vector.load %arg13[%c0_126, %c0_127, %c0_128] : memref<9x4x4xbf16, #tpu.memory_space<vmem>>, vector<1x4x4xbf16>
    %240 = vector.shape_cast %239 : vector<1x4x4xbf16> to vector<4x4xbf16>
    %cst_129 = arith.constant dense<0.000000e+00> : vector<192x4xf32>
    %241 = tpu.matmul %238, %240, %cst_129 {dimension_numbers = #tpu.dot_dimension_numbers<[1], [0], [0], [1], [0, 0, 1, 1], [], []>} : vector<192x4xbf16>, vector<4x4xbf16>, vector<192x4xf32> -> vector<192x4xf32>
    %242 = vector.extract_strided_slice %237 {offsets = [1, 0], sizes = [192, 4], strides = [1, 1]} : vector<264x4xbf16> to vector<192x4xbf16>
    %c1_130 = arith.constant 1 : index
    %c0_131 = arith.constant 0 : index
    %c0_132 = arith.constant 0 : index
    %243 = vector.load %arg13[%c1_130, %c0_131, %c0_132] : memref<9x4x4xbf16, #tpu.memory_space<vmem>>, vector<1x4x4xbf16>
    %244 = vector.shape_cast %243 : vector<1x4x4xbf16> to vector<4x4xbf16>
    %cst_133 = arith.constant dense<0.000000e+00> : vector<192x4xf32>
    %245 = tpu.matmul %242, %244, %cst_133 {dimension_numbers = #tpu.dot_dimension_numbers<[1], [0], [0], [1], [0, 0, 1, 1], [], []>} : vector<192x4xbf16>, vector<4x4xbf16>, vector<192x4xf32> -> vector<192x4xf32>
    %246 = arith.addf %241, %245 : vector<192x4xf32>
    %247 = vector.extract_strided_slice %237 {offsets = [2, 0], sizes = [192, 4], strides = [1, 1]} : vector<264x4xbf16> to vector<192x4xbf16>
    %c2_134 = arith.constant 2 : index
    %c0_135 = arith.constant 0 : index
    %c0_136 = arith.constant 0 : index
    %248 = vector.load %arg13[%c2_134, %c0_135, %c0_136] : memref<9x4x4xbf16, #tpu.memory_space<vmem>>, vector<1x4x4xbf16>
    %249 = vector.shape_cast %248 : vector<1x4x4xbf16> to vector<4x4xbf16>
    %cst_137 = arith.constant dense<0.000000e+00> : vector<192x4xf32>
    %250 = tpu.matmul %247, %249, %cst_137 {dimension_numbers = #tpu.dot_dimension_numbers<[1], [0], [0], [1], [0, 0, 1, 1], [], []>} : vector<192x4xbf16>, vector<4x4xbf16>, vector<192x4xf32> -> vector<192x4xf32>
    %251 = arith.addf %246, %250 : vector<192x4xf32>
    %252 = vector.extract_strided_slice %237 {offsets = [24, 0], sizes = [192, 4], strides = [1, 1]} : vector<264x4xbf16> to vector<192x4xbf16>
    %c3_138 = arith.constant 3 : index
    %c0_139 = arith.constant 0 : index
    %c0_140 = arith.constant 0 : index
    %253 = vector.load %arg13[%c3_138, %c0_139, %c0_140] : memref<9x4x4xbf16, #tpu.memory_space<vmem>>, vector<1x4x4xbf16>
    %254 = vector.shape_cast %253 : vector<1x4x4xbf16> to vector<4x4xbf16>
    %cst_141 = arith.constant dense<0.000000e+00> : vector<192x4xf32>
    %255 = tpu.matmul %252, %254, %cst_141 {dimension_numbers = #tpu.dot_dimension_numbers<[1], [0], [0], [1], [0, 0, 1, 1], [], []>} : vector<192x4xbf16>, vector<4x4xbf16>, vector<192x4xf32> -> vector<192x4xf32>
    %256 = arith.addf %251, %255 : vector<192x4xf32>
    %257 = vector.extract_strided_slice %237 {offsets = [25, 0], sizes = [192, 4], strides = [1, 1]} : vector<264x4xbf16> to vector<192x4xbf16>
    %c4_142 = arith.constant 4 : index
    %c0_143 = arith.constant 0 : index
    %c0_144 = arith.constant 0 : index
    %258 = vector.load %arg13[%c4_142, %c0_143, %c0_144] : memref<9x4x4xbf16, #tpu.memory_space<vmem>>, vector<1x4x4xbf16>
    %259 = vector.shape_cast %258 : vector<1x4x4xbf16> to vector<4x4xbf16>
    %cst_145 = arith.constant dense<0.000000e+00> : vector<192x4xf32>
    %260 = tpu.matmul %257, %259, %cst_145 {dimension_numbers = #tpu.dot_dimension_numbers<[1], [0], [0], [1], [0, 0, 1, 1], [], []>} : vector<192x4xbf16>, vector<4x4xbf16>, vector<192x4xf32> -> vector<192x4xf32>
    %261 = arith.addf %256, %260 : vector<192x4xf32>
    %262 = vector.extract_strided_slice %237 {offsets = [26, 0], sizes = [192, 4], strides = [1, 1]} : vector<264x4xbf16> to vector<192x4xbf16>
    %c5_146 = arith.constant 5 : index
    %c0_147 = arith.constant 0 : index
    %c0_148 = arith.constant 0 : index
    %263 = vector.load %arg13[%c5_146, %c0_147, %c0_148] : memref<9x4x4xbf16, #tpu.memory_space<vmem>>, vector<1x4x4xbf16>
    %264 = vector.shape_cast %263 : vector<1x4x4xbf16> to vector<4x4xbf16>
    %cst_149 = arith.constant dense<0.000000e+00> : vector<192x4xf32>
    %265 = tpu.matmul %262, %264, %cst_149 {dimension_numbers = #tpu.dot_dimension_numbers<[1], [0], [0], [1], [0, 0, 1, 1], [], []>} : vector<192x4xbf16>, vector<4x4xbf16>, vector<192x4xf32> -> vector<192x4xf32>
    %266 = arith.addf %261, %265 : vector<192x4xf32>
    %267 = vector.extract_strided_slice %237 {offsets = [48, 0], sizes = [192, 4], strides = [1, 1]} : vector<264x4xbf16> to vector<192x4xbf16>
    %c6_150 = arith.constant 6 : index
    %c0_151 = arith.constant 0 : index
    %c0_152 = arith.constant 0 : index
    %268 = vector.load %arg13[%c6_150, %c0_151, %c0_152] : memref<9x4x4xbf16, #tpu.memory_space<vmem>>, vector<1x4x4xbf16>
    %269 = vector.shape_cast %268 : vector<1x4x4xbf16> to vector<4x4xbf16>
    %cst_153 = arith.constant dense<0.000000e+00> : vector<192x4xf32>
    %270 = tpu.matmul %267, %269, %cst_153 {dimension_numbers = #tpu.dot_dimension_numbers<[1], [0], [0], [1], [0, 0, 1, 1], [], []>} : vector<192x4xbf16>, vector<4x4xbf16>, vector<192x4xf32> -> vector<192x4xf32>
    %271 = arith.addf %266, %270 : vector<192x4xf32>
    %272 = vector.extract_strided_slice %237 {offsets = [49, 0], sizes = [192, 4], strides = [1, 1]} : vector<264x4xbf16> to vector<192x4xbf16>
    %c7_154 = arith.constant 7 : index
    %c0_155 = arith.constant 0 : index
    %c0_156 = arith.constant 0 : index
    %273 = vector.load %arg13[%c7_154, %c0_155, %c0_156] : memref<9x4x4xbf16, #tpu.memory_space<vmem>>, vector<1x4x4xbf16>
    %274 = vector.shape_cast %273 : vector<1x4x4xbf16> to vector<4x4xbf16>
    %cst_157 = arith.constant dense<0.000000e+00> : vector<192x4xf32>
    %275 = tpu.matmul %272, %274, %cst_157 {dimension_numbers = #tpu.dot_dimension_numbers<[1], [0], [0], [1], [0, 0, 1, 1], [], []>} : vector<192x4xbf16>, vector<4x4xbf16>, vector<192x4xf32> -> vector<192x4xf32>
    %276 = arith.addf %271, %275 : vector<192x4xf32>
    %277 = vector.extract_strided_slice %237 {offsets = [50, 0], sizes = [192, 4], strides = [1, 1]} : vector<264x4xbf16> to vector<192x4xbf16>
    %c8_158 = arith.constant 8 : index
    %c0_159 = arith.constant 0 : index
    %c0_160 = arith.constant 0 : index
    %278 = vector.load %arg13[%c8_158, %c0_159, %c0_160] : memref<9x4x4xbf16, #tpu.memory_space<vmem>>, vector<1x4x4xbf16>
    %279 = vector.shape_cast %278 : vector<1x4x4xbf16> to vector<4x4xbf16>
    %cst_161 = arith.constant dense<0.000000e+00> : vector<192x4xf32>
    %280 = tpu.matmul %277, %279, %cst_161 {dimension_numbers = #tpu.dot_dimension_numbers<[1], [0], [0], [1], [0, 0, 1, 1], [], []>} : vector<192x4xbf16>, vector<4x4xbf16>, vector<192x4xf32> -> vector<192x4xf32>
    %281 = arith.addf %276, %280 : vector<192x4xf32>
    %c0_162 = arith.constant 0 : index
    %c0_163 = arith.constant 0 : index
    %282 = vector.load %arg14[%c0_162, %c0_163] : memref<2x4xf32, #tpu.memory_space<vmem>>, vector<1x4xf32>
    %283 = vector.broadcast %282 : vector<1x4xf32> to vector<192x4xf32>
    %284 = arith.mulf %281, %283 : vector<192x4xf32>
    %c1_164 = arith.constant 1 : index
    %c0_165 = arith.constant 0 : index
    %285 = vector.load %arg14[%c1_164, %c0_165] : memref<2x4xf32, #tpu.memory_space<vmem>>, vector<1x4xf32>
    %286 = vector.broadcast %285 : vector<1x4xf32> to vector<192x4xf32>
    %287 = arith.addf %284, %286 : vector<192x4xf32>
    %288 = vector.extract_strided_slice %123 {offsets = [48, 4], sizes = [192, 8], strides = [1, 1]} : vector<336x12xf32> to vector<192x8xf32>
    %289 = vector.shape_cast %288 : vector<192x8xf32> to vector<8x24x8xf32>
    %290 = vector.extract_strided_slice %289 {offsets = [0, 2, 0], sizes = [8, 16, 8], strides = [1, 1, 1]} : vector<8x24x8xf32> to vector<8x16x8xf32>
    %291 = vector.extract_strided_slice %205 {offsets = [24, 4], sizes = [192, 4], strides = [1, 1]} : vector<264x8xf32> to vector<192x4xf32>
    %292 = vector.shape_cast %291 : vector<192x4xf32> to vector<8x24x4xf32>
    %293 = vector.extract_strided_slice %292 {offsets = [0, 1, 0], sizes = [8, 16, 4], strides = [1, 1, 1]} : vector<8x24x4xf32> to vector<8x16x4xf32>
    %294 = vector.shape_cast %287 : vector<192x4xf32> to vector<8x24x4xf32>
    %295 = vector.extract_strided_slice %294 {offsets = [0, 0, 0], sizes = [8, 16, 4], strides = [1, 1, 1]} : vector<8x24x4xf32> to vector<8x16x4xf32>
    %296 = tpu.concatenate %290, %293, %295 in 2 : vector<8x16x8xf32>, vector<8x16x4xf32>, vector<8x16x4xf32> -> vector<8x16x16xf32>
    %cst_166 = arith.constant 0.000000e+00 : f32
    %297 = vector.broadcast %cst_166 : f32 to vector<8x16x16xf32>
    %298 = arith.maximumf %296, %297 : vector<8x16x16xf32>
    %c0_167 = arith.constant 0 : index
    %c0_168 = arith.constant 0 : index
    %c0_169 = arith.constant 0 : index
    %c0_170 = arith.constant 0 : index
    %299 = vector.load %arg15[%c0_167, %c0_168, %c0_169, %c0_170] : memref<1x8x16x16xf32, #tpu.memory_space<vmem>>, vector<1x8x16x16xf32>
    %300 = vector.shape_cast %299 : vector<1x8x16x16xf32> to vector<8x16x16xf32>
    %301 = vector.shape_cast %298 : vector<8x16x16xf32> to vector<1x8x16x16xf32>
    tpu.vector_store %arg15[%c0_167, %c0_168, %c0_169, %c0_170], %301 {strides = array<i32>} : memref<1x8x16x16xf32, #tpu.memory_space<vmem>>, vector<1x8x16x16xf32>,
    return
  }
  func.func @transform_0(%arg0: i32, %arg1: i32) -> (i32, i32, i32, i32) {
    %c0_i32 = arith.constant 0 : i32
    %c0_i32_0 = arith.constant 0 : i32
    %c0_i32_1 = arith.constant 0 : i32
    return %arg0, %arg1, %c0_i32, %c0_i32_0 : i32, i32, i32, i32
  }
  func.func @transform_1(%arg0: i32, %arg1: i32) -> (i32, i32, i32, i32) {
    %c8_i32 = arith.constant 8 : i32
    %0 = arith.muli %arg1, %c8_i32 : i32
    %c3_i32 = arith.constant 3 : i32
    %1 = arith.subi %0, %c3_i32 : i32
    %c0_i32 = arith.constant 0 : i32
    %2 = arith.addi %1, %c0_i32 : i32
    %c0_i32_0 = arith.constant 0 : i32
    %3 = arith.maxsi %2, %c0_i32_0 : i32
    %c0_i32_1 = arith.constant 0 : i32
    %c0_i32_2 = arith.constant 0 : i32
    %c0_i32_3 = arith.constant 0 : i32
    return %arg0, %3, %c0_i32_1, %c0_i32_2 : i32, i32, i32, i32
  }
  func.func @transform_2(%arg0: i32, %arg1: i32) -> (i32, i32, i32, i32) {
    %c8_i32 = arith.constant 8 : i32
    %0 = arith.muli %arg1, %c8_i32 : i32
    %c3_i32 = arith.constant 3 : i32
    %1 = arith.subi %0, %c3_i32 : i32
    %c1_i32 = arith.constant 1 : i32
    %2 = arith.addi %1, %c1_i32 : i32
    %c0_i32 = arith.constant 0 : i32
    %3 = arith.maxsi %2, %c0_i32 : i32
    %c0_i32_0 = arith.constant 0 : i32
    %c0_i32_1 = arith.constant 0 : i32
    %c0_i32_2 = arith.constant 0 : i32
    return %arg0, %3, %c0_i32_0, %c0_i32_1 : i32, i32, i32, i32
  }
  func.func @transform_3(%arg0: i32, %arg1: i32) -> (i32, i32, i32, i32) {
    %c8_i32 = arith.constant 8 : i32
    %0 = arith.muli %arg1, %c8_i32 : i32
    %c3_i32 = arith.constant 3 : i32
    %1 = arith.subi %0, %c3_i32 : i32
    %c2_i32 = arith.constant 2 : i32
    %2 = arith.addi %1, %c2_i32 : i32
    %c0_i32 = arith.constant 0 : i32
    %3 = arith.maxsi %2, %c0_i32 : i32
    %c0_i32_0 = arith.constant 0 : i32
    %c0_i32_1 = arith.constant 0 : i32
    %c0_i32_2 = arith.constant 0 : i32
    return %arg0, %3, %c0_i32_0, %c0_i32_1 : i32, i32, i32, i32
  }
  func.func @transform_4(%arg0: i32, %arg1: i32) -> (i32, i32, i32, i32) {
    %c8_i32 = arith.constant 8 : i32
    %0 = arith.muli %arg1, %c8_i32 : i32
    %c8_i32_0 = arith.constant 8 : i32
    %1 = arith.addi %0, %c8_i32_0 : i32
    %c0_i32 = arith.constant 0 : i32
    %2 = arith.addi %1, %c0_i32 : i32
    %c15_i32 = arith.constant 15 : i32
    %3 = arith.minsi %2, %c15_i32 : i32
    %c0_i32_1 = arith.constant 0 : i32
    %c0_i32_2 = arith.constant 0 : i32
    %c0_i32_3 = arith.constant 0 : i32
    return %arg0, %3, %c0_i32_1, %c0_i32_2 : i32, i32, i32, i32
  }
  func.func @transform_5(%arg0: i32, %arg1: i32) -> (i32, i32, i32, i32) {
    %c8_i32 = arith.constant 8 : i32
    %0 = arith.muli %arg1, %c8_i32 : i32
    %c8_i32_0 = arith.constant 8 : i32
    %1 = arith.addi %0, %c8_i32_0 : i32
    %c1_i32 = arith.constant 1 : i32
    %2 = arith.addi %1, %c1_i32 : i32
    %c15_i32 = arith.constant 15 : i32
    %3 = arith.minsi %2, %c15_i32 : i32
    %c0_i32 = arith.constant 0 : i32
    %c0_i32_1 = arith.constant 0 : i32
    %c0_i32_2 = arith.constant 0 : i32
    return %arg0, %3, %c0_i32, %c0_i32_1 : i32, i32, i32, i32
  }
  func.func @transform_6(%arg0: i32, %arg1: i32) -> (i32, i32, i32, i32) {
    %c8_i32 = arith.constant 8 : i32
    %0 = arith.muli %arg1, %c8_i32 : i32
    %c8_i32_0 = arith.constant 8 : i32
    %1 = arith.addi %0, %c8_i32_0 : i32
    %c2_i32 = arith.constant 2 : i32
    %2 = arith.addi %1, %c2_i32 : i32
    %c15_i32 = arith.constant 15 : i32
    %3 = arith.minsi %2, %c15_i32 : i32
    %c0_i32 = arith.constant 0 : i32
    %c0_i32_1 = arith.constant 0 : i32
    %c0_i32_2 = arith.constant 0 : i32
    return %arg0, %3, %c0_i32, %c0_i32_1 : i32, i32, i32, i32
  }
  func.func @transform_7(%arg0: i32, %arg1: i32) -> (i32, i32, i32) {
    %c0_i32 = arith.constant 0 : i32
    %c0_i32_0 = arith.constant 0 : i32
    %c0_i32_1 = arith.constant 0 : i32
    %c0_i32_2 = arith.constant 0 : i32
    return %c0_i32, %c0_i32_0, %c0_i32_1 : i32, i32, i32
  }
  func.func @transform_8(%arg0: i32, %arg1: i32) -> (i32, i32) {
    %c0_i32 = arith.constant 0 : i32
    %c0_i32_0 = arith.constant 0 : i32
    %c0_i32_1 = arith.constant 0 : i32
    return %c0_i32, %c0_i32_0 : i32, i32
  }
  func.func @transform_9(%arg0: i32, %arg1: i32) -> (i32, i32, i32) {
    %c0_i32 = arith.constant 0 : i32
    %c0_i32_0 = arith.constant 0 : i32
    %c0_i32_1 = arith.constant 0 : i32
    %c0_i32_2 = arith.constant 0 : i32
    return %c0_i32, %c0_i32_0, %c0_i32_1 : i32, i32, i32
  }
  func.func @transform_10(%arg0: i32, %arg1: i32) -> (i32, i32) {
    %c0_i32 = arith.constant 0 : i32
    %c0_i32_0 = arith.constant 0 : i32
    %c0_i32_1 = arith.constant 0 : i32
    return %c0_i32, %c0_i32_0 : i32, i32
  }
  func.func @transform_11(%arg0: i32, %arg1: i32) -> (i32, i32, i32) {
    %c0_i32 = arith.constant 0 : i32
    %c0_i32_0 = arith.constant 0 : i32
    %c0_i32_1 = arith.constant 0 : i32
    %c0_i32_2 = arith.constant 0 : i32
    return %c0_i32, %c0_i32_0, %c0_i32_1 : i32, i32, i32
  }
  func.func @transform_12(%arg0: i32, %arg1: i32) -> (i32, i32) {
    %c0_i32 = arith.constant 0 : i32
    %c0_i32_0 = arith.constant 0 : i32
    %c0_i32_1 = arith.constant 0 : i32
    return %c0_i32, %c0_i32_0 : i32, i32
  }
  func.func @transform_13(%arg0: i32, %arg1: i32) -> (i32, i32, i32, i32) {
    %c0_i32 = arith.constant 0 : i32
    %c0_i32_0 = arith.constant 0 : i32
    %c0_i32_1 = arith.constant 0 : i32
    return %arg0, %arg1, %c0_i32, %c0_i32_0 : i32, i32, i32, i32
  }
}

</mosaic_0001>

<bundles_post_ra>
// kernel: ssh_forward.1
= control target key start
LH: loop header
LB: loop body
LE: loop exit
PB: predicated region body
PF: predicated region fallthrough
CT: control target
= control target key end

     0   :  { %s14244_s25 = smov 0   ;;  %s14246_s26 = smov 0   ;;  %s18325_s0 = inlined_call_operand.vmem [shape: bf16[2,16,24,8], index: 0, kind: input, shape index: {}, may-alias: {0,1,2,3,4,5,6}]   ;;  %s18326_s1 = inlined_call_operand.vmem [shape: bf16[2,16,24,8], index: 1, kind: input, shape index: {}, may-alias: {0,1,2,3,4,5,6}]   ;;  %s18327_s2 = inlined_call_operand.vmem [shape: bf16[2,16,24,8], index: 2, kind: input, shape index: {}, may-alias: {0,1,2,3,4,5,6}]   ;;  %s18328_s3 = inlined_call_operand.vmem [shape: bf16[2,16,24,8], index: 3, kind: input, shape index: {}, may-alias: {0,1,2,3,4,5,6}]   ;;  %s18329_s4 = inlined_call_operand.vmem [shape: bf16[2,16,24,8], index: 4, kind: input, shape index: {}, may-alias: {0,1,2,3,4,5,6}]   ;;  %s18330_s5 = inlined_call_operand.vmem [shape: bf16[2,16,24,8], index: 5, kind: input, shape index: {}, may-alias: {0,1,2,3,4,5,6}]   ;;  %s18331_s6 = inlined_call_operand.vmem [shape: bf16[2,16,24,8], index: 6, kind: input, shape index: {}, may-alias: {0,1,2,3,4,5,6}]   ;;  %s18332_s7 = inlined_call_operand.vmem [shape: bf16[9,8,12], index: 7, kind: input, shape index: {}]   ;;  %s18333_s8 = inlined_call_operand.vmem [shape: f32[2,12], index: 8, kind: input, shape index: {}]   ;;  %s18334_s9 = inlined_call_operand.vmem [shape: bf16[9,4,8], index: 9, kind: input, shape index: {}]   ;;  %s18335_s10 = inlined_call_operand.vmem [shape: f32[2,8], index: 10, kind: input, shape index: {}]   ;;  %s18336_s11 = inlined_call_operand.vmem [shape: bf16[9,4,4], index: 11, kind: input, shape index: {}]   ;;  %s18337_s12 = inlined_call_operand.vmem [shape: f32[2,4], index: 12, kind: input, shape index: {}]   ;;  %s18338_s13 = inlined_call_operand.vmem [shape: f32[2,16,16,16], index: 13, kind: output, shape index: {}]  }
   0x1   :  { %18404 = sst [smem:[#allocation45_spill]] %s18326_s1  ;;  %s14248_s27 = smov 0  }
   0x2   :  { %18405 = sst [smem:[#allocation46_spill]] %s18335_s10  ;;  %s14250_s28 = smov 0  }
   0x3   :  { %18406 = sst [smem:[#allocation47_spill]] %s18337_s12  ;;  %s14252_s29 = smov 0  }
   0x4   :  { %18407 = sst [smem:[#allocation48_spill]] %s18338_s13 }
   0x5 LB: > { %18408 = sst [smem:[#allocation2_spill]] %s14158_s27  ;;  %s32_s30 = sadd.s32 1, %s14158_s27  ;;  %s14166_s29 = sphi %s14252_s29, %s23_s29   ;;  %s14162_s28 = sphi %s14250_s28, %s18670_s28   ;;  %s14158_s27 = sphi %s14248_s27, %s18669_s27   ;;  %s14154_s26 = sphi %s14246_s26, %s18668_s26   ;;  %s14150_s25 = sphi %s14244_s25, %s18667_s25  }
   0x6   : > { %18409 = sst [smem:[#allocation3_spill]] %s14162_s28  ;;  %s35_s14 = sadd.s32 1, %s14162_s28 }
   0x7   : > { %18410 = sst [smem:[#allocation4_spill]] %s14166_s29  ;;  %p33_p0 = scmp.ge.s32.totalorder %s32_s30, 2 }
   0x8   : > { %p9939_p1 = scmp.ge.s32.totalorder %s14166_s29, 1  ;;  %p601_p2 = scmp.lt.s32.totalorder %s14166_s29, 5 }
   0x9   : > { %s18672_s30 = smov (%p33_p0, %s32_s30), 0  ;;  %s18674_s14 = smov (!%p33_p0, %s35_s14), %s14162_s28 }
   0xa   : > { %18411 = sst [smem:[#allocation5_spill]] %s18672_s30  ;;  %p602_p3 = pnand %p9939_p1, %p601_p2 }
   0xb   : > { %p37_p4 = scmp.ge.s32.totalorder %s18674_s14, 2 }
   0xc   : > { %605 = sbr.rel (%p602_p3) target bundleno = 3791 (0xecf), region = 72 }
   0xd   : > { %s18676_s14 = smov (%p37_p4, %s18674_s14), 0 }
   0xe   : > { %18412 = sst [smem:[#allocation6_spill]] %s18676_s14 }
  0x13   : > { %v9993_v0 = vld [vmem:[%s18332_s7 + $0x4] sm:$0xf]  ;;  %vm1393_vm0 = vcmask 1043456   ;;  %s14277_s17 = sshll.u32 %s14150_s25, 3  ;;  %v18344_v1 = vmov 0.0   ;;  %vm14169_vm1 = vmmov 0  }
  0x14   : > { %11072 = vmatprep.subr.bf16.mxu0 %v18344_v1  ;;  %v1395_v2 = vsel %vm1393_vm0, %v9993_v0, 0  ;;  %11074 = vmatprep.mubr.msk.bf16.mxu0 %vm14169_vm1, %v18344_v1  ;;  %p734_p5 = scmp.lt.s32.totalorder %s14154_s26, 1  ;;  %p736_p6 = scmp.lt.s32.totalorder %s14277_s17, 15  ;;  %v1045_v25 = vld [vmem:[%s18332_s7] sm:$0xf]  ;;  %vm18384_vm3 = vcmask 64512  }
  0x15   : > { %11073 = vmatpush3.bf16.msra.mxu0 %v1395_v2  ;;  %s14285_s18 = sadd.s32 4294967293, %s14277_s17  ;;  %12710 = vmatprep.subr.bf16.mxu1 %v18344_v1  ;;  %s14297_s20 = sadd.s32 4294967294, %s14277_s17  ;;  %vm1156_vm2 = vsmask.f32 7424  ;;  %v1639_v29 = vsel %vm1393_vm0, %v1045_v25, 0  ;;  %vm1842_vm4 = vcmask 1046528  }
  0x16   : > { %11158 = vmatprep.subr.bf16.mxu0 %v18344_v1  ;;  %s18678_s26 = smov (!%p734_p5, %s14154_s26), 1  ;;  %11884 = vmatprep.mubr.msk.bf16.mxu1 %vm14169_vm1, %v18344_v1  ;;  %p746_p7 = scmp.gt.s32.totalorder %s14285_s18, 0  ;;  %vm4774_vm5 = vcmask 1041408  }
  0x17   : > { %s14292_s19 = scalar_select %p736_p6, %s14277_s17, 15 }
  0x18   : > { %p9944_p8 = scmp.lt.s32.totalorder %s14285_s18, 15  ;;  %p763_p9 = scmp.gt.s32.totalorder %s14297_s20, 0 }
  0x19   : > { %s747_s21 = scalar_select %p746_p7, %s14285_s18, 0 }
  0x1a   : > { %s14301_s22 = smul.u32 48, %s18678_s26  ;;  %p9951_p10 = scmp.lt.s32.totalorder %s14297_s20, 15 }
  0x1b   : > { %s9980_s23 = sshll.u32 %s14292_s19, 1  ;;  %s18680_s21 = smov (!%p9944_p8, %s747_s21), 15 }
  0x1c   : > { %s764_s24 = scalar_select %p763_p9, %s14297_s20, 0 }
  0x1d   : > { %s14049_s25 = smul.u32 3, %s18680_s21  ;;  %s9981_s15 = sshll.u32 %s18678_s26, 5 }
  0x1e   : > { %s18682_s24 = smov (!%p9951_p10, %s764_s24), 15  ;;  %s14307_s14 = sadd.s32 %s9981_s15, %s9980_s23 }
  0x1f   : > { %s754_s16 = sadd.s32 %s14049_s25, %s14301_s22  ;;  %18413 = sst [smem:[#allocation7_spill]] %s14307_s14 }
  0x20   : > { %s14050_s30 = smul.u32 3, %s18682_s24  ;;  %s9949_s28 = sshll.u32 %s754_s16, 2 }
  0x21   : > { %p884_p11 = scmp.ge.s32.totalorder %s14285_s18, 0  ;;  %s18414_s1 = sld [smem:[#allocation45_spill]] }
  0x22   : > { %s771_s27 = sadd.s32 %s14050_s30, %s14301_s22  ;;  %p885_p12 = scmp.lt.s32.totalorder %s14285_s18, 16 }
  0x23   : > { %p911_p13 = scmp.ge.s32.totalorder %s14297_s20, 0  ;;  %p912_p0 = scmp.lt.s32.totalorder %s14297_s20, 16 }
  0x24   : > { %s9956_s10 = sshll.u32 %s771_s27, 2  ;;  %p886_p1 = pnand %p885_p12, %p884_p11 }
  0x25   : > { %p913_p2 = pnand %p912_p0, %p911_p13  ;;  %s14320_s26 = sadd.s32 4294967295, %s14277_s17 }
  0x26   : > { %s9985_s21 = scalar_select %p886_p1, 0, 1 }
  0x27   : > { %s14314_s12 = scalar_lea.vmem %s18414_s1, %s9949_s28  ;;  %s14325_s25 = scalar_lea.vmem %s18327_s2, %s9956_s10 }
  0x28   : > { %s9987_s23 = scalar_select %p913_p2, 0, 1  ;;  %v888_v3 = vld [vmem:[%s14314_s12] sm:$0xf]  ;;  %v889_v4 = vld [vmem:[%s14314_s12 + $0x4] sm:$0xf] }
  0x29   : > { %s892_s13 = scvt.s32.f32 %s9985_s21  ;;  %p780_p3 = scmp.gt.s32.totalorder %s14320_s26, 0  ;;  %v890_v6 = vld [vmem:[%s14314_s12 + $0x8] sm:$0xf]  ;;  %v915_v9 = vld [vmem:[%s14325_s25] sm:$0xf] }
  0x2a   : > { %s919_s28 = scvt.s32.f32 %s9987_s23  ;;  %p938_p4 = scmp.ge.s32.totalorder %s14320_s26, 0  ;;  %v916_v11 = vld [vmem:[%s14325_s25 + $0x4] sm:$0xf]  ;;  %v917_v12 = vld [vmem:[%s14325_s25 + $0x8] sm:$0xf] }
  0x2b   : > { %s895_s29 = sshrl.u32 %s892_s13, 16  ;;  %p894_p5 = scmp.ne.f32.partialorder %s892_s13, %s892_s13 }
  0x2c   : > { %s896_s27 = sand.u32 1, %s895_s29  ;;  %s922_s15 = sshrl.u32 %s919_s28, 16 }
  0x2d   : > { %s897_s18 = sadd.s32 32767, %s896_s27  ;;  %s923_s1 = sand.u32 1, %s922_s15 }
  0x2e   : > { %s898_s16 = sadd.s32 %s897_s18, %s892_s13  ;;  %s924_s24 = sadd.s32 32767, %s923_s1 }
  0x2f   : > { %s899_s14 = sand.u32 4294901760, %s898_s16  ;;  %p921_p6 = scmp.ne.f32.partialorder %s919_s28, %s919_s28 }
  0x30   : > { %s18684_s14 = smov (%p894_p5, %s899_s14), 2143289344  ;;  %s925_s10 = sadd.s32 %s924_s24, %s919_s28 }
  0x31   : > { %s902_s21 = sshrl.u32 %s18684_s14, 16  ;;  %s926_s23 = sand.u32 4294901760, %s925_s10 }
  0x32   : > { %s903_s30 = sshll.u32 %s902_s21, 16  ;;  %p939_p7 = scmp.lt.s32.totalorder %s14320_s26, 16 }
  0x33   : > { %s904_s13 = sor.u32 %s903_s30, %s902_s21  ;;  %p9958_p8 = scmp.lt.s32.totalorder %s14320_s26, 15 }
  0x34   : > { %v905_v5 = vstv %s904_s13  ;;  %s18686_s23 = smov (%p921_p6, %s926_s23), 2143289344  ;;  %p14340_p9 = pnand %p939_p7, %p938_p4 }
  0x35   : > { %v907_v7 = vmul.bf16 %v905_v5, %v888_v3  ;;  %v908_v8 = vmul.bf16 %v905_v5, %v889_v4  ;;  %s781_s1 = scalar_select %p780_p3, %s14320_s26, 0  ;;  %v909_v13 = vmul.bf16 %v905_v5, %v890_v6 }
  0x36   : > { %s929_s14 = sshrl.u32 %s18686_s23, 16  ;;  %s14047_s18 = smul.u32 3, %s14292_s19 }
  0x37   : > { %s930_s29 = sshll.u32 %s929_s14, 16  ;;  %v14344_v10 = vcombine.low %v907_v7, %v908_v8  ;;  %s18688_s1 = smov (!%p9958_p8, %s781_s1), 15 }
  0x38   : > { %s931_s12 = sor.u32 %s930_s29, %s929_s14  ;;  %s14051_s25 = smul.u32 3, %s18688_s1 }
  0x39   : > { %v932_v14 = vstv %s931_s12  ;;  %v1160_v15 = vshll.u32 %v14344_v10, 16  ;;  %v1158_v17 = vshrl.u32 %v14344_v10, 16  ;;  %s9989_s27 = scalar_select %p14340_p9, 0, 1 }
  0x3a   : > { %v14351_v16 = vmul.bf16 %v932_v14, %v915_v9  ;;  %v14354_v18 = vmul.bf16 %v932_v14, %v916_v11  ;;  %v14356_v19 = vmul.bf16 %v932_v14, %v917_v12  ;;  %s788_s16 = sadd.s32 %s14051_s25, %s14301_s22  ;;  %s740_s23 = sadd.s32 %s14301_s22, %s14047_s18 }
  0x3b   : > { %v1162_v20 = vrot.slane %v1160_v15, 1  ;;  %s946_s15 = scvt.s32.f32 %s9989_s27  ;;  %s9963_s19 = sshll.u32 %s788_s16, 2 }
  0x3c   : > { %v14362_v21 = vcombine.low %v909_v13, %v14351_v16  ;;  %v14366_v22 = vcombine.low %v14354_v18, %v14356_v19  ;;  %s9941_s1 = sshll.u32 %s740_s23, 2  ;;  %s790_s12 = scalar_lea.vmem %s18328_s3, %s9963_s19 }
  0x3d   : > { %v1163_v23 = vor.u32 %v1162_v20, %v1158_v17  ;;  %s949_s21 = sshrl.u32 %s946_s15, 16  ;;  %p948_p10 = scmp.ne.f32.partialorder %s946_s15, %s946_s15  ;;  %v942_v33 = vld [vmem:[%s790_s12] sm:$0xf]  ;;  %v943_v35 = vld [vmem:[%s790_s12 + $0x4] sm:$0xf] }
  0x3e   : > { %v1165_v24 = vshll.u32 %v14362_v21, 16  ;;  %v1169_v27 = vshrl.u32 %v14362_v21, 16  ;;  %v1173_v28 = vshll.u32 %v14366_v22, 16  ;;  %s950_s30 = sand.u32 1, %s949_s21  ;;  %s14388_s16 = scalar_lea.vmem %s18325_s0, %s9941_s1  ;;  %v944_v36 = vld [vmem:[%s790_s12 + $0x8] sm:$0xf] }
  0x3f   : > { %s951_s13 = sadd.s32 32767, %s950_s30  ;;  %v14392_v38 = vld [vmem:[%s14388_s16] sm:$0xf]  ;;  %v1177_v41 = vshrl.u32 %v14366_v22, 16  ;;  %v14416_v50 = vld [vmem:[%s14388_s16 + $0x4] sm:$0xf] }
  0x40   : > { %v1167_v26 = vrot.slane %v1165_v24, 1  ;;  %s952_s14 = sadd.s32 %s951_s13, %s946_s15  ;;  %v1175_v32 = vrot.slane %v1173_v28, 1  ;;  %v14419_v51 = vld [vmem:[%s14388_s16 + $0x8] sm:$0xf]  ;;  %v14435_v59 = vld [vmem:[%s14388_s16 + $0xc] sm:$0xf] }
  0x41   : > { %s953_s27 = sand.u32 4294901760, %s952_s14  ;;  %v14427_v55 = vcombine.low %v14416_v50, %v14419_v51  ;;  %v14438_v60 = vld [vmem:[%s14388_s16 + $0x10] sm:$0xf]  ;;  %v14454_v4 = vld [vmem:[%s14388_s16 + $0x14] sm:$0xf]  ;;  %s14506_s21 = sadd.s32 8, %s14277_s17 }
  0x42   : > { %v1168_v30 = vsel %vm1156_vm2, %v1163_v23, %v1167_v26  ;;  %v1171_v31 = vor.u32 %v1169_v27, %v1167_v26  ;;  %s18690_s27 = smov (%p948_p10, %s953_s27), 2143289344  ;;  %v1179_v45 = vor.u32 %v1177_v41, %v1175_v32  ;;  %v14446_v63 = vcombine.low %v14435_v59, %v14438_v60  ;;  %v14457_v5 = vld [vmem:[%s14388_s16 + $0x18] sm:$0xf]  ;;  %v14473_v13 = vld [vmem:[%s14388_s16 + $0x1c] sm:$0xf]  ;;  %p965_p11 = scmp.ge.s32.totalorder %s14506_s21, 0 }
  0x43   : > { %11075 = vmatmul.mubr.msk.bf16.vlgmr.msra.gmra.mrb[0].mxu0 %vm18384_vm3, %v1168_v30  ;;  %s956_s15 = sshrl.u32 %s18690_s27, 16  ;;  %v1197_v58 = vshll.u32 %v14427_v55, 16  ;;  %v1201_v2 = vshrl.u32 %v14427_v55, 16  ;;  %v14465_v8 = vcombine.low %v14454_v4, %v14457_v5  ;;  %v14476_v14 = vld [vmem:[%s14388_s16 + $0x20] sm:$0xf]  ;;  %p966_p12 = scmp.lt.s32.totalorder %s14506_s21, 16 }
  0x44   : > { %11159 = vmatpush3.bf16.msra.mxu0 %v1639_v29  ;;  %11078 = vmatprep.mubr.msk.bf16.mxu0 %vm14169_vm1, %v18344_v1  ;;  %v1176_v34 = vsel %vm1156_vm2, %v1171_v31, %v1175_v32  ;;  %s957_s24 = sshll.u32 %s956_s15, 16  ;;  %v1205_v3 = vshll.u32 %v14446_v63, 16  ;;  %v1209_v11 = vshrl.u32 %v14446_v63, 16  ;;  %v14484_v20 = vcombine.low %v14473_v13, %v14476_v14  ;;  %v14492_v26 = vld [vmem:[%s14388_s16 + $0x24] sm:$0xf]  ;;  %s14551_s30 = sadd.s32 9, %s14277_s17 }
  0x45   : > { %11244 = vmatprep.subr.bf16.mxu0 %v18344_v1  ;;  %s958_s10 = sor.u32 %s957_s24, %s956_s15  ;;  %v1199_v62 = vrot.slane %v1197_v58, 1  ;;  %v1213_v12 = vshll.u32 %v14465_v8, 16  ;;  %v1217_v24 = vshrl.u32 %v14465_v8, 16  ;;  %v14495_v27 = vld [vmem:[%s14388_s16 + $0x28] sm:$0xf]  ;;  %p967_p13 = pnand %p966_p12, %p965_p11 }
  0x46   : > { %v959_v37 = vstv %s958_s10  ;;  %v1207_v7 = vrot.slane %v1205_v3, 1  ;;  %v1221_v25 = vshll.u32 %v14484_v20, 16  ;;  %v14503_v30 = vcombine.low %v14492_v26, %v14495_v27  ;;  %p992_p0 = scmp.ge.s32.totalorder %s14551_s30, 0  ;;  %p993_p1 = scmp.lt.s32.totalorder %s14551_s30, 16 }
  0x47   : > { %v14395_v39 = vmul.bf16 %v959_v37, %v942_v33  ;;  %v14397_v40 = vmul.bf16 %v959_v37, %v943_v35  ;;  %v14400_v42 = vmul.bf16 %v959_v37, %v944_v36  ;;  %v1203_v6 = vor.u32 %v1201_v2, %v1199_v62  ;;  %v14519_v35 = vld [vmem:[%s14388_s16 + $0x30] sm:$0xf]  ;;  %s9990_s23 = scalar_select %p967_p13, 0, 1  ;;  %v14565_v2 = vld [vmem:[%s14388_s16 + $0x40] sm:$0xf] }
  0x48   : > { %v1211_v15 = vor.u32 %v1209_v11, %v1207_v7  ;;  %v1215_v17 = vrot.slane %v1213_v12, 1  ;;  %v1223_v29 = vrot.slane %v1221_v25, 1  ;;  %v1225_v32 = vshrl.u32 %v14484_v20, 16  ;;  %p797_p2 = scmp.lt.s32.totalorder %s14506_s21, 15  ;;  %p14578_p3 = pnand %p993_p1, %p992_p0 }
  0x49   : > { %v14406_v43 = vcombine.low %v14395_v39, %v14397_v40  ;;  %v14410_v44 = vcombine.low %v14400_v42, %v14392_v38  ;;  %v14468_v9 = vsel %vm1156_vm2, %v1203_v6, %v1207_v7  ;;  %v1229_v33 = vshll.u32 %v14503_v30, 16  ;;  %s14548_s19 = scvt.s32.f32 %s9990_s23  ;;  %s14583_s28 = sadd.s32 10, %s14277_s17 }
  0x4a   : > { %18418 = vst [vmem:[#allocation10_spill] sm:$0xff] %v14468_v9  ;;  %v14487_v23 = vsel %vm1156_vm2, %v1211_v15, %v1215_v17  ;;  %v1219_v28 = vor.u32 %v1217_v24, %v1215_v17  ;;  %v1227_v36 = vor.u32 %v1225_v32, %v1223_v29  ;;  %s798_s29 = scalar_select %p797_p2, %s14506_s21, 15  ;;  %v14597_v17 = vld [vmem:[%s14388_s16 + $0x44] sm:$0xf]  ;;  %v14600_v24 = vld [vmem:[%s14388_s16 + $0x48] sm:$0xf] }
  0x4b   : > { %11079 = vmatmul.mubr.msk.bf16.gmra.mrb[4].mxu0 %vm18384_vm3, %v1176_v34  ;;  %v1181_v46 = vshll.u32 %v14406_v43, 16  ;;  %v1185_v48 = vshrl.u32 %v14406_v43, 16  ;;  %v1189_v49 = vshll.u32 %v14410_v44, 16  ;;  %v1193_v57 = vshrl.u32 %v14410_v44, 16  ;;  %18419 = vst [vmem:[#allocation11_spill] sm:$0xff] %v14487_v23  ;;  %s976_s13 = sshrl.u32 %s14548_s19, 16  ;;  %p975_p6 = scmp.ne.f32.partialorder %s14548_s19, %s14548_s19 }
  0x4c   : > { %11082 = vmatprep.mubr.msk.bf16.mxu0 %vm14169_vm1, %v18344_v1  ;;  %v14509_v31 = vsel %vm1156_vm2, %v1219_v28, %v1223_v29  ;;  %v14516_v34 = vld [vmem:[%s14388_s16 + $0x2c] sm:$0xf]  ;;  %v1231_v37 = vrot.slane %v1229_v33, 1  ;;  %s977_s1 = sand.u32 1, %s976_s13  ;;  %p1019_p4 = scmp.ge.s32.totalorder %s14583_s28, 0  ;;  %v14614_v29 = vcombine.low %v14597_v17, %v14600_v24 }
  0x4d   : > { %v1183_v47 = vrot.slane %v1181_v46, 1  ;;  %v1191_v54 = vrot.slane %v1189_v49, 1  ;;  %18420 = vst [vmem:[#allocation12_spill] sm:$0xff] %v14509_v31  ;;  %v14527_v41 = vcombine.low %v14516_v34, %v14519_v35  ;;  %v1233_v46 = vshrl.u32 %v14503_v30, 16  ;;  %v14538_v49 = vld [vmem:[%s14388_s16 + $0x38] sm:$0xf] }
  0x4e   : > { %s978_s12 = sadd.s32 32767, %s977_s1  ;;  %p1020_p5 = scmp.lt.s32.totalorder %s14583_s28, 16 }
  0x4f   : > { %v1184_v52 = vsel %vm1156_vm2, %v1179_v45, %v1183_v47  ;;  %v1187_v53 = vor.u32 %v1185_v48, %v1183_v47  ;;  %v1195_v61 = vor.u32 %v1193_v57, %v1191_v54  ;;  %v14530_v45 = vsel %vm1156_vm2, %v1227_v36, %v1231_v37  ;;  %v14535_v48 = vld [vmem:[%s14388_s16 + $0x34] sm:$0xf]  ;;  %s9991_s27 = scalar_select %p14578_p3, 0, 1 }
  0x50   : > { %18421 = vst [vmem:[#allocation13_spill] sm:$0xff] %v14530_v45  ;;  %v1237_v47 = vshll.u32 %v14527_v41, 16  ;;  %v1241_v58 = vshrl.u32 %v14527_v41, 16  ;;  %s979_s17 = sadd.s32 %s978_s12, %s14548_s19  ;;  %s18692_s29 = smov (!%p797_p2, %s798_s29), 15  ;;  %v1261_v36 = vshll.u32 %v14614_v29, 16 }
  0x51   : > { %v14430_v56 = vsel %vm1156_vm2, %v1187_v53, %v1191_v54  ;;  %v14449_v0 = vsel %vm1156_vm2, %v1195_v61, %v1199_v62  ;;  %v14546_v54 = vcombine.low %v14535_v48, %v14538_v49  ;;  %v14562_v62 = vld [vmem:[%s14388_s16 + $0x3c] sm:$0xf]  ;;  %s980_s25 = sand.u32 4294901760, %s979_s17  ;;  %s14616_s18 = scvt.s32.f32 %s9991_s27 }
  0x52   : > { %18416 = vst [vmem:[#allocation8_spill] sm:$0xff] %v14430_v56  ;;  %18417 = vst [vmem:[#allocation9_spill] sm:$0xff] %v14449_v0  ;;  %v1239_v53 = vrot.slane %v1237_v47, 1  ;;  %v14574_v7 = vcombine.low %v14562_v62, %v14565_v2  ;;  %p14620_p7 = pnand %p1020_p5, %p1019_p4  ;;  %s14052_s24 = smul.u32 3, %s18692_s29 }
  0x53   : > { %11083 = vmatmul.mubr.msk.bf16.gmra.mrb[8].mxu0 %vm18384_vm3, %v1184_v52  ;;  %v1235_v52 = vor.u32 %v1233_v46, %v1231_v37  ;;  %v1245_v61 = vshll.u32 %v14546_v54, 16  ;;  %v1249_v12 = vshrl.u32 %v14546_v54, 16  ;;  %p814_p8 = scmp.lt.s32.totalorder %s14551_s30, 15  ;;  %s18694_s25 = smov (%p975_p6, %s980_s25), 2143289344  ;;  %v14634_v37 = vld [vmem:[%s14388_s16 + $0x4c] sm:$0xf] }
  0x54   : > { %11086 = vmatprep.mubr.msk.bf16.mxu0 %vm14169_vm1, %v18344_v1  ;;  %v1243_v3 = vor.u32 %v1241_v58, %v1239_v53  ;;  %v1253_v15 = vshll.u32 %v14574_v7, 16  ;;  %v1257_v33 = vshrl.u32 %v14574_v7, 16  ;;  %s1003_s10 = sshrl.u32 %s14616_s18, 16  ;;  %v14637_v46 = vld [vmem:[%s14388_s16 + $0x50] sm:$0xf]  ;;  %s805_s23 = sadd.s32 %s14052_s24, %s14301_s22  ;;  %v1265_v58 = vshrl.u32 %v14614_v29, 16 }
  0x55   : > { %v14555_v57 = vsel %vm1156_vm2, %v1235_v52, %v1239_v53  ;;  %v1247_v6 = vrot.slane %v1245_v61, 1  ;;  %s9992_s21 = scalar_select %p14620_p7, 0, 1  ;;  %v1263_v52 = vrot.slane %v1261_v36, 1  ;;  %v14651_v53 = vcombine.low %v14634_v37, %v14637_v46 }
  0x56   : > { %18422 = vst [vmem:[#allocation14_spill] sm:$0xff] %v14555_v57  ;;  %v1255_v28 = vrot.slane %v1253_v15, 1  ;;  %s815_s19 = scalar_select %p814_p8, %s14551_s30, 15 }
  0x57   : > { %v14590_v11 = vsel %vm1156_vm2, %v1243_v3, %v1247_v6  ;;  %v1251_v25 = vor.u32 %v1249_v12, %v1247_v6  ;;  %s983_s13 = sshrl.u32 %s18694_s25, 16  ;;  %s1004_s1 = sand.u32 1, %s1003_s10  ;;  %v1269_v3 = vshll.u32 %v14651_v53, 16  ;;  %v14663_v6 = vld [vmem:[%s14388_s16 + $0x54] sm:$0xf] }
  0x58   : > { %18424 = vst [vmem:[#allocation15_spill] sm:$0xff] %v14590_v11  ;;  %v1259_v47 = vor.u32 %v1257_v33, %v1255_v28  ;;  %s14654_s14 = scvt.s32.f32 %s9992_s21  ;;  %s9968_s29 = sshll.u32 %s805_s23, 2  ;;  %v14666_v12 = vld [vmem:[%s14388_s16 + $0x58] sm:$0xf] }
  0x59   : > { %v14628_v32 = vsel %vm1156_vm2, %v1251_v25, %v1255_v28  ;;  %p831_p9 = scmp.lt.s32.totalorder %s14583_s28, 15  ;;  %s984_s12 = sshll.u32 %s983_s13, 16  ;;  %18428 = vst [vmem:[#allocation18_spill] sm:$0xff] %v14666_v12  ;;  %v14681_v15 = vcombine.low %v14663_v6, %v14666_v12  ;;  %v1267_v25 = vor.u32 %v1265_v58, %v1263_v52  ;;  %v1271_v28 = vrot.slane %v1269_v3, 1  ;;  %v14699_v3 = vld [vmem:[%s14388_s16 + $0x5c] sm:$0xf] }
  0x5a   : > { %18426 = vst [vmem:[#allocation16_spill] sm:$0xff] %v14628_v32  ;;  %s1005_s27 = sadd.s32 32767, %s1004_s1  ;;  %v14659_v61 = vsel %vm1156_vm2, %v1259_v47, %v1263_v52  ;;  %s18696_s19 = smov (!%p814_p8, %s815_s19), 15  ;;  %v1273_v47 = vshrl.u32 %v14651_v53, 16  ;;  %18431 = vst [vmem:[#allocation21_spill] sm:$0xff] %v14699_v3 }
  0x5b   : > { %11087 = vmatmul.mubr.msk.bf16.gmra.mrb[12].mxu0 %vm18384_vm3, %v14430_v56  ;;  %18427 = vst [vmem:[#allocation17_spill] sm:$0xff] %v14659_v61  ;;  %s14673_s15 = scalar_lea.vmem %s18329_s4, %s9968_s29  ;;  %s1030_s24 = sshrl.u32 %s14654_s14, 16  ;;  %v14694_v52 = vsel %vm1156_vm2, %v1267_v25, %v1271_v28 }
  0x5c   : > { %11090 = vmatprep.mubr.msk.bf16.mxu0 %vm14169_vm1, %v18344_v1  ;;  %s985_s10 = sor.u32 %s984_s12, %s983_s13  ;;  %s1006_s21 = sadd.s32 %s1005_s27, %s14616_s18  ;;  %v969_v33 = vld [vmem:[%s14673_s15] sm:$0xf]  ;;  %18429 = vst [vmem:[#allocation19_spill] sm:$0xff] %v14694_v52 }
  0x5d   : > { %p1002_p10 = scmp.ne.f32.partialorder %s14616_s18, %s14616_s18  ;;  %s1031_s30 = sand.u32 1, %s1030_s24  ;;  %v986_v36 = vstv %s985_s10 }
  0x5e   : > { %s14053_s23 = smul.u32 3, %s18696_s19  ;;  %s1007_s13 = sand.u32 4294901760, %s1006_s21  ;;  %v14696_v58 = vmul.bf16 %v986_v36, %v969_v33  ;;  %v970_v33 = vld [vmem:[%s14673_s15 + $0x4] sm:$0xf] }
  0x5f   : > { %s832_s1 = scalar_select %p831_p9, %s14583_s28, 15 }
  0x60   : > { %s1032_s29 = sadd.s32 32767, %s1031_s30  ;;  %18430 = vst [vmem:[#allocation20_spill] sm:$0xff] %v14696_v58  ;;  %s18698_s13 = smov (%p1002_p10, %s1007_s13), 2143289344  ;;  %v14711_v25 = vcombine.low %v14699_v3, %v14696_v58 }
  0x61   : > { %s822_s18 = sadd.s32 %s14053_s23, %s14301_s22  ;;  %s1033_s19 = sadd.s32 %s1032_s29, %s14654_s14 }
  0x62   : > { %s18700_s1 = smov (!%p831_p9, %s832_s1), 15  ;;  %s1010_s12 = sshrl.u32 %s18698_s13, 16 }
  0x63   : > { %11091 = vmatmul.mubr.msk.bf16.gmra.mrb[16].mxu0 %vm18384_vm3, %v14449_v0  ;;  %p1029_p11 = scmp.ne.f32.partialorder %s14654_s14, %s14654_s14  ;;  %s1034_s16 = sand.u32 4294901760, %s1033_s19 }
  0x64   : > { %11094 = vmatprep.mubr.msk.bf16.mxu0 %vm14169_vm1, %v18344_v1  ;;  %s9973_s27 = sshll.u32 %s822_s18, 2  ;;  %s1011_s28 = sshll.u32 %s1010_s12, 16 }
  0x65   : > { %s14054_s17 = smul.u32 3, %s18700_s1  ;;  %s18702_s16 = smov (%p1029_p11, %s1034_s16), 2143289344 }
  0x66   : > { %s1012_s24 = sor.u32 %s1011_s28, %s1010_s12  ;;  %s1037_s21 = sshrl.u32 %s18702_s16, 16 }
  0x67   : > { %s839_s10 = sadd.s32 %s14054_s17, %s14301_s22  ;;  %s1038_s23 = sshll.u32 %s1037_s21, 16 }
  0x68   : > { %s9978_s30 = sshll.u32 %s839_s10, 2  ;;  %s1039_s29 = sor.u32 %s1038_s23, %s1037_s21 }
  0x69   : > { %s841_s22 = scalar_lea.vmem %s18331_s6, %s9978_s30  ;;  %s18567_s14 = sld [smem:[#allocation46_spill]] }
  0x6a   : > { %s14173_s30 = smov 12   ;;  %s18641_s23 = sld [smem:[#allocation7_spill]] }
  0x6b   : > { %11095 = vmatmul.mubr.msk.bf16.gmra.mrb[20].mxu0 %vm18384_vm3, %v14468_v9  ;;  %v1289_v9 = vshrl.u32 %v14711_v25, 16 }
  0x6c   : > { %11098 = vmatprep.mubr.msk.bf16.mxu0 %vm14169_vm1, %v18344_v1 }
  0x70   : > { %s9982_s13 = sshll.u32 %s18641_s23, 3 }
  0x73   : > { %11099 = vmatmul.mubr.msk.bf16.gmra.mrb[24].mxu0 %vm18384_vm3, %v14487_v23  ;;  %v1013_v23 = vstv %s1012_s24  ;;  %s18640_s24 = sld [smem:[#allocation47_spill]] }
  0x74   : > { %11102 = vmatprep.mubr.msk.bf16.mxu0 %vm14169_vm1, %v18344_v1 }
  0x7b   : > { %11103 = vmatmul.mubr.msk.bf16.gmra.mrb[28].mxu0 %vm18384_vm3, %v14509_v31 }
  0x7c   : > { %11106 = vmatprep.mubr.msk.bf16.mxu0 %vm14169_vm1, %v18344_v1 }
  0x83   : > { %11107 = vmatmul.mubr.msk.bf16.gmra.mrb[32].mxu0 %vm18384_vm3, %v14530_v45 }
  0x84   : > { %11110 = vmatprep.mubr.msk.bf16.mxu0 %vm14169_vm1, %v18344_v1 }
  0x8b   : > { %11111 = vmatmul.mubr.msk.bf16.gmra.mrb[36].mxu0 %vm18384_vm3, %v14555_v57  ;;  %v971_v57 = vld [vmem:[%s14673_s15 + $0x8] sm:$0xf]  ;;  %s824_s15 = scalar_lea.vmem %s18330_s5, %s9973_s27 }
  0x8c   : > { %11114 = vmatprep.mubr.msk.bf16.mxu0 %vm14169_vm1, %v18344_v1  ;;  %v14724_v45 = vmul.bf16 %v986_v36, %v971_v57  ;;  %v996_v57 = vld [vmem:[%s824_s15] sm:$0xf] }
  0x8e   : > { %18435 = vst [vmem:[#allocation24_spill] sm:$0xff] %v14724_v45 }
  0x93   : > { %11115 = vmatmul.mubr.msk.bf16.gmra.mrb[40].mxu0 %vm18384_vm3, %v14590_v11  ;;  %v18432_v11 = vmov 0.0  }
  0x94   : > { %11118 = vmatprep.mubr.msk.bf16.mxu0 %vm14169_vm1, %v18344_v1 }
  0x9b   : > { %11119 = vmatmul.mubr.msk.bf16.gmra.mrb[44].mxu0 %vm18384_vm3, %v14628_v32 }
  0x9c   : > { %11122 = vmatprep.mubr.msk.bf16.mxu0 %vm14169_vm1, %v18344_v1 }
  0xa3   : > { %11123 = vmatmul.mubr.msk.bf16.gmra.mrb[48].mxu0 %vm18384_vm3, %v14659_v61  ;;  %v1275_v61 = vor.u32 %v1273_v47, %v1271_v28  ;;  %v1285_v47 = vshll.u32 %v14711_v25, 16 }
  0xa4   : > { %11126 = vmatprep.mubr.msk.bf16.mxu0 %vm14169_vm1, %v18344_v1  ;;  %v1277_v1 = vshll.u32 %v14681_v15, 16 }
  0xa5   : > { %v1287_v31 = vrot.slane %v1285_v47, 1 }
  0xa6   : > { %v1279_v32 = vrot.slane %v1277_v1, 1  ;;  %v1281_v1 = vshrl.u32 %v14681_v15, 16 }
  0xa7   : > { %v1291_v47 = vor.u32 %v1289_v9, %v1287_v31 }
  0xa8   : > { %v14718_v28 = vsel %vm1156_vm2, %v1275_v61, %v1279_v32  ;;  %v1283_v61 = vor.u32 %v1281_v1, %v1279_v32  ;;  %v14743_v32 = vmul.bf16 %v1013_v23, %v996_v57  ;;  %v998_v57 = vld [vmem:[%s824_s15 + $0x8] sm:$0xf] }
  0xa9   : > { %18433 = vst [vmem:[#allocation22_spill] sm:$0xff] %v14718_v28 }
  0xaa   : > { %18437 = vst [vmem:[#allocation26_spill] sm:$0xff] %v14743_v32 }
  0xab   : > { %11127 = vmatmul.mubr.msk.bf16.gmra.mrb[52].mxu0 %vm18384_vm3, %v14694_v52  ;;  %v14722_v52 = vmul.bf16 %v986_v36, %v970_v33  ;;  %v997_v36 = vld [vmem:[%s824_s15 + $0x4] sm:$0xf] }
  0xac   : > { %11130 = vmatprep.mubr.msk.bf16.mxu0 %vm14169_vm1, %v18432_v11  ;;  %v14745_v1 = vmul.bf16 %v1013_v23, %v997_v36  ;;  %v1023_v36 = vld [vmem:[%s841_s22] sm:$0xf] }
  0xad   : > { %18434 = vst [vmem:[#allocation23_spill] sm:$0xff] %v14722_v52  ;;  %v14735_v33 = vcombine.low %v14722_v52, %v14724_v45  ;;  %v1040_v45 = vstv %s1039_s29  ;;  %s18643_s29 = sld [smem:[#allocation48_spill]] }
  0xae   : > { %18438 = vst [vmem:[#allocation27_spill] sm:$0xff] %v14745_v1  ;;  %v14756_v56 = vcombine.low %v14743_v32, %v14745_v1  ;;  %v14765_v3 = vmul.bf16 %v1040_v45, %v1023_v36  ;;  %v1025_v1 = vld [vmem:[%s841_s22 + $0x8] sm:$0xf] }
  0xaf   : > { %v1293_v0 = vshll.u32 %v14735_v33, 16  ;;  %v1297_v58 = vshrl.u32 %v14735_v33, 16 }
  0xb0   : > { %v1301_v12 = vshll.u32 %v14756_v56, 16  ;;  %v1305_v32 = vshrl.u32 %v14756_v56, 16 }
  0xb2   : > { %v1303_v9 = vrot.slane %v1301_v12, 1 }
  0xb3   : > { %11131 = vmatmul.mubr.msk.bf16.gmra.mrb[56].mxu0 %vm18384_vm3, %v14718_v28  ;;  %v14740_v28 = vsel %vm1156_vm2, %v1283_v61, %v1287_v31  ;;  %v1295_v61 = vrot.slane %v1293_v0, 1  ;;  %s18176_s18 = scalar_lea.vmem %s18643_s29, %s9982_s13 }
  0xb4   : > { %11134 = vmatprep.mubr.msk.bf16.mxu0 %vm14169_vm1, %v18432_v11  ;;  %18436 = vst [vmem:[#allocation25_spill] sm:$0xff] %v14740_v28  ;;  %v1307_v12 = vor.u32 %v1305_v32, %v1303_v9 }
  0xb5   : > { %v14760_v52 = vsel %vm1156_vm2, %v1291_v47, %v1295_v61  ;;  %v1299_v0 = vor.u32 %v1297_v58, %v1295_v61  ;;  %v1024_v47 = vld [vmem:[%s841_s22 + $0x4] sm:$0xf] }
  0xb6   : > { %18439 = vst [vmem:[#allocation28_spill] sm:$0xff] %v14760_v52  ;;  %v14780_v36 = vmul.bf16 %v1040_v45, %v1024_v47 }
  0xbb   : > { %11135 = vmatmul.mubr.msk.bf16.gmra.mrb[60].mxu0 %vm18384_vm3, %v14740_v28  ;;  %v14763_v28 = vmul.bf16 %v1013_v23, %v998_v57  ;;  %v14777_v23 = vsel %vm1156_vm2, %v1299_v0, %v1303_v9  ;;  %v18369_v9 = vmov 0  }
  0xbc   : > { %11138 = vmatprep.mubr.msk.bf16.mxu0 %vm14169_vm1, %v18432_v11  ;;  %18440 = vst [vmem:[#allocation29_spill] sm:$0xff] %v14777_v23 }
  0xbd   : > { %v14773_v31 = vcombine.low %v14763_v28, %v14765_v3 }
  0xbf   : > { %v1309_v57 = vshll.u32 %v14773_v31, 16  ;;  %v1313_v47 = vshrl.u32 %v14773_v31, 16 }
  0xc1   : > { %v1311_v58 = vrot.slane %v1309_v57, 1  ;;  %v14803_v57 = vcombine.low %v18369_v9, %v18369_v9 }
  0xc3   : > { %11139 = vmatmul.mubr.msk.bf16.gmra.mrb[64].mxu0 %vm18384_vm3, %v14760_v52  ;;  %v14782_v52 = vmul.bf16 %v1040_v45, %v1025_v1  ;;  %v14793_v0 = vsel %vm1156_vm2, %v1307_v12, %v1311_v58  ;;  %v1315_v1 = vor.u32 %v1313_v47, %v1311_v58 }
  0xc4   : > { %11142 = vmatprep.mubr.msk.bf16.mxu0 %vm14169_vm1, %v18432_v11 }
  0xc5   : > { %18441 = vst [vmem:[#allocation30_spill] sm:$0xff] %v14782_v52  ;;  %v14790_v61 = vcombine.low %v14780_v36, %v14782_v52  ;;  %v1325_v52 = vshll.u32 %v14803_v57, 16 }
  0xc7   : > { %v1317_v45 = vshll.u32 %v14790_v61, 16  ;;  %v14814_v47 = vrot.slane %v1325_v52, 1  ;;  %v1843_v52 = vrot.slane %v14344_v10, 1 }
  0xc9   : > { %v1319_v32 = vrot.slane %v1317_v45, 1 }
  0xcb   : > { %11143 = vmatmul.mubr.msk.bf16.gmra.mrb[68].mxu0 %vm18384_vm3, %v14777_v23  ;;  %v14806_v12 = vsel %vm1156_vm2, %v1315_v1, %v1319_v32  ;;  %v1321_v23 = vshrl.u32 %v14790_v61, 16  ;;  %v10058_v1 = vld [vmem:[%s18332_s7 + $0x8] sm:$0xf] }
  0xcc   : > { %11146 = vmatprep.mubr.msk.bf16.mxu0 %vm14169_vm1, %v18432_v11  ;;  %v1950_v9 = vsel %vm1393_vm0, %v10058_v1, 0  ;;  %v1846_v1 = vrot.slane %v14366_v22, 1 }
  0xcd   : > { %v1323_v58 = vor.u32 %v1321_v23, %v1319_v32  ;;  %v1844_v23 = vrot.slane %v14362_v21, 1  ;;  %v10080_v32 = vld [vmem:[%s18332_s7 + $0xc] sm:$0xf] }
  0xcf   : > { %v14818_v45 = vsel %vm1156_vm2, %v1323_v58, %v14814_v47  ;;  %v2276_v58 = vsel %vm1393_vm0, %v10080_v32, 0 }
  0xd3   : > { %11147 = vmatmul.mubr.msk.bf16.gmra.mrb[72].mxu0 %vm18384_vm3, %v14793_v0 }
  0xd4   : > { %11150 = vmatprep.mubr.msk.bf16.mxu0 %vm14169_vm1, %v18432_v11 }
  0xdb   : > { %11151 = vmatmul.mubr.msk.bf16.gmra.mrb[76].mxu0 %vm18384_vm3, %v14806_v12 }
  0xdc   : > { %11154 = vmatprep.mubr.msk.bf16.mxu0 %vm14169_vm1, %v18432_v11 }
  0xe3   : > { %11155 = vmatmul.mubr.msk.bf16.gmra.mrb[80].mxu0 %vm18384_vm3, %v14818_v45 }
  0xe4   : > { %11160 = vmatprep.mubr.msk.bf16.mxu0 %vm14169_vm1, %v18432_v11 }
  0xeb   : > { %11161 = vmatmul.mubr.msk.bf16.vlgmr.msra.gmra.mrb[0].mxu0 %vm18384_vm3, %v14344_v10  ;;  %v1847_v10 = vsel %vm1842_vm4, %v1844_v23, %v1846_v1 }
  0xec   : > { %11245 = vmatpush3.bf16.msra.mxu0 %v1950_v9  ;;  %11164 = vmatprep.mubr.msk.bf16.mxu0 %vm14169_vm1, %v18432_v11  ;;  %v1845_v9 = vsel %vm1842_vm4, %v1843_v52, %v1844_v23  ;;  %v1852_v23 = vrot.slane %v14427_v55, 1 }
  0xed   : > { %11330 = vmatprep.subr.bf16.mxu0 %v18432_v11 }
  0xf3   : > { %11165 = vmatmul.mubr.msk.bf16.gmra.mrb[4].mxu0 %vm18384_vm3, %v14362_v21  ;;  %v1848_v21 = vrot.slane %v14406_v43, 1 }
  0xf4   : > { %11168 = vmatprep.mubr.msk.bf16.mxu0 %vm14169_vm1, %v18432_v11 }
  0xf5   : > { %v1849_v52 = vsel %vm1842_vm4, %v1846_v1, %v1848_v21 }
  0xfb   : > { %11169 = vmatmul.mubr.msk.bf16.gmra.mrb[8].mxu0 %vm18384_vm3, %v14366_v22  ;;  %v1850_v22 = vrot.slane %v14410_v44, 1 }
  0xfc   : > { %11172 = vmatprep.mubr.msk.bf16.mxu0 %vm14169_vm1, %v18432_v11 }
  0xfd   : > { %v14936_v32 = vsel %vm1842_vm4, %v1848_v21, %v1850_v22 }
  0xfe   : > { %18442 = vst [vmem:[#allocation31_spill] sm:$0xff] %v14936_v32 }
 0x103   : > { %11173 = vmatmul.mubr.msk.bf16.gmra.mrb[12].mxu0 %vm18384_vm3, %v14406_v43 }
 0x104   : > { %11176 = vmatprep.mubr.msk.bf16.mxu0 %vm14169_vm1, %v18432_v11 }
 0x10b   : > { %11177 = vmatmul.mubr.msk.bf16.gmra.mrb[16].mxu0 %vm18384_vm3, %v14410_v44 }
 0x10c   : > { %11180 = vmatprep.mubr.msk.bf16.mxu0 %vm14169_vm1, %v18432_v11 }
 0x113   : > { %11181 = vmatmul.mubr.msk.bf16.gmra.mrb[20].mxu0 %vm18384_vm3, %v14427_v55 }
 0x114   : > { %11184 = vmatprep.mubr.msk.bf16.mxu0 %vm14169_vm1, %v18432_v11 }
 0x11b   : > { %11185 = vmatmul.mubr.msk.bf16.gmra.mrb[24].mxu0 %vm18384_vm3, %v14446_v63 }
 0x11c   : > { %11188 = vmatprep.mubr.msk.bf16.mxu0 %vm14169_vm1, %v18432_v11 }
 0x123   : > { %11189 = vmatmul.mubr.msk.bf16.gmra.mrb[28].mxu0 %vm18384_vm3, %v14465_v8 }
 0x124   : > { %11192 = vmatprep.mubr.msk.bf16.mxu0 %vm14169_vm1, %v18432_v11 }
 0x12b   : > { %11193 = vmatmul.mubr.msk.bf16.gmra.mrb[32].mxu0 %vm18384_vm3, %v14484_v20 }
 0x12c   : > { %11196 = vmatprep.mubr.msk.bf16.mxu0 %vm14169_vm1, %v18432_v11 }
 0x133   : > { %11197 = vmatmul.mubr.msk.bf16.gmra.mrb[36].mxu0 %vm18384_vm3, %v14503_v30 }
 0x134   : > { %11200 = vmatprep.mubr.msk.bf16.mxu0 %vm14169_vm1, %v18432_v11 }
 0x13b   : > { %11201 = vmatmul.mubr.msk.bf16.gmra.mrb[40].mxu0 %vm18384_vm3, %v14527_v41 }
 0x13c   : > { %11204 = vmatprep.mubr.msk.bf16.mxu0 %vm14169_vm1, %v18432_v11 }
 0x143   : > { %11205 = vmatmul.mubr.msk.bf16.gmra.mrb[44].mxu0 %vm18384_vm3, %v14546_v54 }
 0x144   : > { %11208 = vmatprep.mubr.msk.bf16.mxu0 %vm14169_vm1, %v18432_v11 }
 0x14b   : > { %11209 = vmatmul.mubr.msk.bf16.gmra.mrb[48].mxu0 %vm18384_vm3, %v14574_v7 }
 0x14c   : > { %11212 = vmatprep.mubr.msk.bf16.mxu0 %vm14169_vm1, %v18432_v11 }
 0x153   : > { %11213 = vmatmul.mubr.msk.bf16.gmra.mrb[52].mxu0 %vm18384_vm3, %v14614_v29 }
 0x154   : > { %11216 = vmatprep.mubr.msk.bf16.mxu0 %vm14169_vm1, %v18432_v11 }
 0x15b   : > { %11217 = vmatmul.mubr.msk.bf16.gmra.mrb[56].mxu0 %vm18384_vm3, %v14651_v53 }
 0x15c   : > { %11220 = vmatprep.mubr.msk.bf16.mxu0 %vm14169_vm1, %v18432_v11 }
 0x163   : > { %11221 = vmatmul.mubr.msk.bf16.gmra.mrb[60].mxu0 %vm18384_vm3, %v14681_v15 }
 0x164   : > { %11224 = vmatprep.mubr.msk.bf16.mxu0 %vm14169_vm1, %v18432_v11 }
 0x16b   : > { %11225 = vmatmul.mubr.msk.bf16.gmra.mrb[64].mxu0 %vm18384_vm3, %v14711_v25 }
 0x16c   : > { %11228 = vmatprep.mubr.msk.bf16.mxu0 %vm14169_vm1, %v18432_v11 }
 0x173   : > { %11229 = vmatmul.mubr.msk.bf16.gmra.mrb[68].mxu0 %vm18384_vm3, %v14735_v33 }
 0x174   : > { %11232 = vmatprep.mubr.msk.bf16.mxu0 %vm14169_vm1, %v18432_v11 }
 0x17b   : > { %11233 = vmatmul.mubr.msk.bf16.gmra.mrb[72].mxu0 %vm18384_vm3, %v14756_v56 }
 0x17c   : > { %11236 = vmatprep.mubr.msk.bf16.mxu0 %vm14169_vm1, %v18432_v11 }
 0x183   : > { %11237 = vmatmul.mubr.msk.bf16.gmra.mrb[76].mxu0 %vm18384_vm3, %v14773_v31 }
 0x184   : > { %11240 = vmatprep.mubr.msk.bf16.mxu0 %vm14169_vm1, %v18432_v11 }
 0x18b   : > { %11241 = vmatmul.mubr.msk.bf16.gmra.mrb[84].mxu0 %vm18384_vm3, %v14790_v61 }
 0x18c   : > { %11246 = vmatprep.mubr.msk.bf16.mxu0 %vm14169_vm1, %v18432_v11 }
 0x193   : > { %11247 = vmatmul.mubr.msk.bf16.vlgmr.msra.gmra.mrb[0].mxu0 %vm18384_vm3, %v1845_v9  ;;  %v14944_v9 = vsel %vm1842_vm4, %v1850_v22, %v1852_v23  ;;  %v1856_v22 = vrot.slane %v14465_v8, 1 }
 0x194   : > { %11331 = vmatpush3.bf16.msra.mxu0 %v2276_v58  ;;  %11250 = vmatprep.mubr.msk.bf16.mxu0 %vm14169_vm1, %v18432_v11  ;;  %18443 = vst [vmem:[#allocation32_spill] sm:$0xff] %v14944_v9  ;;  %v1854_v58 = vrot.slane %v14446_v63, 1 }
 0x195   : > { %11416 = vmatprep.subr.bf16.mxu0 %v18432_v11 }
 0x19b   : > { %11251 = vmatmul.mubr.msk.bf16.gmra.mrb[4].mxu0 %vm18384_vm3, %v1847_v10 }
 0x19c   : > { %11254 = vmatprep.mubr.msk.bf16.mxu0 %vm14169_vm1, %v18432_v11 }
 0x1a3   : > { %11255 = vmatmul.mubr.msk.bf16.gmra.mrb[8].mxu0 %vm18384_vm3, %v1849_v52  ;;  %v14952_v52 = vsel %vm1842_vm4, %v1852_v23, %v1854_v58  ;;  %v1858_v23 = vrot.slane %v14484_v20, 1 }
 0x1a4   : > { %11258 = vmatprep.mubr.msk.bf16.mxu0 %vm14169_vm1, %v18432_v11 }
 0x1ab   : > { %11259 = vmatmul.mubr.msk.bf16.gmra.mrb[12].mxu0 %vm18384_vm3, %v14936_v32 }
 0x1ac   : > { %11262 = vmatprep.mubr.msk.bf16.mxu0 %vm14169_vm1, %v18432_v11 }
 0x1b3   : > { %11263 = vmatmul.mubr.msk.bf16.gmra.mrb[16].mxu0 %vm18384_vm3, %v14944_v9  ;;  %v14960_v9 = vsel %vm1842_vm4, %v1854_v58, %v1856_v22  ;;  %v1860_v58 = vrot.slane %v14503_v30, 1 }
 0x1b4   : > { %11266 = vmatprep.mubr.msk.bf16.mxu0 %vm14169_vm1, %v18432_v11 }
 0x1b6   : > { %v1591_v1 = vpop.f32.mrb[80].mxu0 }
 0x1b7   : > { %v11156_v10 = vpop.f32.mrb[81].mxu0  ;;  %v14976_v1 = vsel %vm1842_vm4, %v1858_v23, %v1860_v58 }
 0x1b8   : > { %v1593_v21 = vpop.f32.mrb[82].mxu0  ;;  %18444 = vst [vmem:[#allocation33_spill] sm:$0xff] %v14976_v1  ;;  %v1862_v10 = vrot.slane %v14527_v41, 1 }
 0x1b9   : > { %v11157_v32 = vpop.f32.mrb[83].mxu0 }
 0x1ba   : > { %v14968_v32 = vsel %vm1842_vm4, %v1856_v22, %v1858_v23  ;;  %v14984_v21 = vsel %vm1842_vm4, %v1860_v58, %v1862_v10  ;;  %v1864_v22 = vrot.slane %v14546_v54, 1  ;;  %v1866_v58 = vrot.slane %v14574_v7, 1 }
 0x1bb   : > { %11267 = vmatmul.mubr.msk.bf16.gmra.mrb[20].mxu0 %vm18384_vm3, %v14952_v52  ;;  %18445 = vst [vmem:[#allocation34_spill] sm:$0xff] %v14984_v21 }
 0x1bc   : > { %11270 = vmatprep.mubr.msk.bf16.mxu0 %vm14169_vm1, %v18432_v11  ;;  %v14992_v23 = vsel %vm1842_vm4, %v1862_v10, %v1864_v22  ;;  %v1868_v10 = vrot.slane %v14614_v29, 1 }
 0x1bd   : > { %18446 = vst [vmem:[#allocation35_spill] sm:$0xff] %v14992_v23 }
 0x1c3   : > { %11271 = vmatmul.mubr.msk.bf16.gmra.mrb[24].mxu0 %vm18384_vm3, %v14960_v9 }
 0x1c4   : > { %11274 = vmatprep.mubr.msk.bf16.mxu0 %vm14169_vm1, %v18432_v11 }
 0x1cb   : > { %11275 = vmatmul.mubr.msk.bf16.gmra.mrb[28].mxu0 %vm18384_vm3, %v14968_v32 }
 0x1cc   : > { %11278 = vmatprep.mubr.msk.bf16.mxu0 %vm14169_vm1, %v18432_v11 }
 0x1d3   : > { %11279 = vmatmul.mubr.msk.bf16.gmra.mrb[32].mxu0 %vm18384_vm3, %v14976_v1  ;;  %v15000_v1 = vsel %vm1842_vm4, %v1864_v22, %v1866_v58  ;;  %v1870_v22 = vrot.slane %v14651_v53, 1 }
 0x1d4   : > { %11282 = vmatprep.mubr.msk.bf16.mxu0 %vm14169_vm1, %v18432_v11  ;;  %18447 = vst [vmem:[#allocation36_spill] sm:$0xff] %v15000_v1 }
 0x1db   : > { %11283 = vmatmul.mubr.msk.bf16.gmra.mrb[36].mxu0 %vm18384_vm3, %v14984_v21  ;;  %v15008_v21 = vsel %vm1842_vm4, %v1866_v58, %v1868_v10  ;;  %v1872_v58 = vrot.slane %v14681_v15, 1 }
 0x1dc   : > { %11286 = vmatprep.mubr.msk.bf16.mxu0 %vm14169_vm1, %v18432_v11  ;;  %18448 = vst [vmem:[#allocation37_spill] sm:$0xff] %v15008_v21 }
 0x1e3   : > { %11287 = vmatmul.mubr.msk.bf16.gmra.mrb[40].mxu0 %vm18384_vm3, %v14992_v23  ;;  %v15016_v23 = vsel %vm1842_vm4, %v1868_v10, %v1870_v22  ;;  %v1874_v10 = vrot.slane %v14711_v25, 1 }
 0x1e4   : > { %11290 = vmatprep.mubr.msk.bf16.mxu0 %vm14169_vm1, %v18432_v11  ;;  %18449 = vst [vmem:[#allocation38_spill] sm:$0xff] %v15016_v23 }
 0x1eb   : > { %11291 = vmatmul.mubr.msk.bf16.gmra.mrb[44].mxu0 %vm18384_vm3, %v15000_v1  ;;  %v15024_v1 = vsel %vm1842_vm4, %v1870_v22, %v1872_v58  ;;  %v1876_v22 = vrot.slane %v14735_v33, 1 }
 0x1ec   : > { %11294 = vmatprep.mubr.msk.bf16.mxu0 %vm14169_vm1, %v18432_v11  ;;  %18450 = vst [vmem:[#allocation39_spill] sm:$0xff] %v15024_v1 }
 0x1f3   : > { %11295 = vmatmul.mubr.msk.bf16.gmra.mrb[48].mxu0 %vm18384_vm3, %v15008_v21  ;;  %v15032_v21 = vsel %vm1842_vm4, %v1872_v58, %v1874_v10  ;;  %v1878_v58 = vrot.slane %v14756_v56, 1 }
 0x1f4   : > { %11298 = vmatprep.mubr.msk.bf16.mxu0 %vm14169_vm1, %v18432_v11  ;;  %18451 = vst [vmem:[#allocation40_spill] sm:$0xff] %v15032_v21 }
 0x1fb   : > { %11299 = vmatmul.mubr.msk.bf16.gmra.mrb[52].mxu0 %vm18384_vm3, %v15016_v23  ;;  %v15040_v23 = vsel %vm1842_vm4, %v1874_v10, %v1876_v22  ;;  %v1880_v10 = vrot.slane %v14773_v31, 1 }
 0x1fc   : > { %11302 = vmatprep.mubr.msk.bf16.mxu0 %vm14169_vm1, %v18432_v11  ;;  %18452 = vst [vmem:[#allocation41_spill] sm:$0xff] %v15040_v23 }
 0x203   : > { %11303 = vmatmul.mubr.msk.bf16.gmra.mrb[56].mxu0 %vm18384_vm3, %v15024_v1  ;;  %v15048_v1 = vsel %vm1842_vm4, %v1876_v22, %v1878_v58  ;;  %v1882_v22 = vrot.slane %v14790_v61, 1 }
 0x204   : > { %11306 = vmatprep.mubr.msk.bf16.mxu0 %vm14169_vm1, %v18432_v11  ;;  %18453 = vst [vmem:[#allocation42_spill] sm:$0xff] %v15048_v1 }
 0x20b   : > { %11307 = vmatmul.mubr.msk.bf16.gmra.mrb[60].mxu0 %vm18384_vm3, %v15032_v21  ;;  %v15056_v21 = vsel %vm1842_vm4, %v1878_v58, %v1880_v10  ;;  %v15071_v58 = vrot.slane %v14803_v57, 1 }
 0x20c   : > { %11310 = vmatprep.mubr.msk.bf16.mxu0 %vm14169_vm1, %v18432_v11  ;;  %18454 = vst [vmem:[#allocation43_spill] sm:$0xff] %v15056_v21 }
 0x213   : > { %11311 = vmatmul.mubr.msk.bf16.gmra.mrb[64].mxu0 %vm18384_vm3, %v15040_v23  ;;  %v15064_v23 = vsel %vm1842_vm4, %v1880_v10, %v1882_v22  ;;  %v10122_v10 = vld [vmem:[%s18332_s7 + $0x10] sm:$0xf] }
 0x214   : > { %11314 = vmatprep.mubr.msk.bf16.mxu0 %vm14169_vm1, %v18432_v11  ;;  %18455 = vst [vmem:[#allocation44_spill] sm:$0xff] %v15064_v23 }
 0x21b   : > { %11315 = vmatmul.mubr.msk.bf16.gmra.mrb[68].mxu0 %vm18384_vm3, %v15048_v1  ;;  %v2727_v1 = vsel %vm1393_vm0, %v10122_v10, 0  ;;  %v18464_v10 = vld [vmem:[#allocation30_spill] sm:$0xff] }
 0x21c   : > { %11318 = vmatprep.mubr.msk.bf16.mxu0 %vm14169_vm1, %v18432_v11 }
 0x223   : > { %11319 = vmatmul.mubr.msk.bf16.gmra.mrb[72].mxu0 %vm18384_vm3, %v15056_v21  ;;  %v15075_v21 = vsel %vm1842_vm4, %v1882_v22, %v15071_v58  ;;  %v15096_v22 = vcombine.low %v14356_v19, %v14395_v39  ;;  %v15120_v19 = vcombine.low %v14419_v51, %v14435_v59  ;;  %v15136_v51 = vcombine.low %v14457_v5, %v14473_v13 }
 0x224   : > { %11322 = vmatprep.mubr.msk.bf16.mxu0 %vm14169_vm1, %v18432_v11  ;;  %v15144_v59 = vcombine.low %v14476_v14, %v14492_v26  ;;  %v15168_v5 = vcombine.low %v14538_v49, %v14562_v62  ;;  %v15176_v13 = vcombine.low %v14565_v2, %v14597_v17  ;;  %v15184_v14 = vcombine.low %v14600_v24, %v14634_v37  ;;  %v18459_v49 = vld [vmem:[#allocation20_spill] sm:$0xff]  ;;  %v18460_v2 = vld [vmem:[#allocation26_spill] sm:$0xff]  ;;  %v18462_v37 = vld [vmem:[#allocation27_spill] sm:$0xff] }
 0x225   : > { %v15192_v26 = vcombine.low %v14637_v46, %v14663_v6  ;;  %v18461_v17 = vld [vmem:[#allocation24_spill] sm:$0xff]  ;;  %v15224_v46 = vcombine.low %v18462_v37, %v14763_v28  ;;  %v15232_v6 = vcombine.low %v14765_v3, %v14780_v36 }
 0x226   : > { %v15216_v24 = vcombine.low %v18461_v17, %v18460_v2 }
 0x22b   : > { %11323 = vmatmul.mubr.msk.bf16.gmra.mrb[76].mxu0 %vm18384_vm3, %v15064_v23  ;;  %v15086_v23 = vcombine.low %v14351_v16, %v14354_v18  ;;  %v15104_v16 = vcombine.low %v14397_v40, %v14400_v42  ;;  %v15112_v18 = vcombine.low %v14392_v38, %v14416_v50  ;;  %v15128_v38 = vcombine.low %v14438_v60, %v14454_v4 }
 0x22c   : > { %11326 = vmatprep.mubr.msk.bf16.mxu0 %vm14169_vm1, %v18432_v11  ;;  %v15152_v60 = vcombine.low %v14495_v27, %v14516_v34  ;;  %v15160_v4 = vcombine.low %v14519_v35, %v14535_v48  ;;  %v18456_v27 = vld [vmem:[#allocation21_spill] sm:$0xff]  ;;  %v18457_v34 = vld [vmem:[#allocation18_spill] sm:$0xff]  ;;  %v18458_v48 = vld [vmem:[#allocation23_spill] sm:$0xff] }
 0x22d   : > { %v15200_v35 = vcombine.low %v18457_v34, %v18456_v27  ;;  %v15208_v62 = vcombine.low %v18459_v49, %v18458_v48  ;;  %v2519_v3 = vshrl.u32 %v15086_v23, 16  ;;  %v10144_v27 = vld [vmem:[%s18332_s7 + $0x14] sm:$0xf]  ;;  %v2529_v48 = vshrl.u32 %v15096_v22, 16 }
 0x22e   : > { %v2532_v49 = vshll.u32 %v15104_v16, 16  ;;  %v3075_v2 = vsel %vm1393_vm0, %v10144_v27, 0 }
 0x230   : > { %v2534_v37 = vrot.slane %v2532_v49, 1  ;;  %v2550_v49 = vshrl.u32 %v15120_v19, 16 }
 0x233   : > { %11327 = vmatmul.mubr.msk.bf16.gmra.mrb[88].mxu0 %vm18384_vm3, %v15075_v21 }
 0x234   : > { %11332 = vmatprep.mubr.msk.bf16.mxu0 %vm14169_vm1, %v18432_v11 }
 0x23b   : > { %11333 = vmatmul.mubr.msk.bf16.vlgmr.msra.gmra.mrb[0].mxu0 %vm18384_vm3, %v15086_v23 }
 0x23c   : > { %11417 = vmatpush3.bf16.msra.mxu0 %v2727_v1  ;;  %11336 = vmatprep.mubr.msk.bf16.mxu0 %vm14169_vm1, %v18432_v11  ;;  %v18463_v1 = vmov 0  }
 0x23d   : > { %11502 = vmatprep.subr.bf16.mxu0 %v18432_v11  ;;  %v15240_v28 = vcombine.low %v18464_v10, %v18463_v1  ;;  %v2536_v10 = vshrl.u32 %v15104_v16, 16 }
 0x243   : > { %11337 = vmatmul.mubr.msk.bf16.gmra.mrb[4].mxu0 %vm18384_vm3, %v15096_v22 }
 0x244   : > { %11340 = vmatprep.mubr.msk.bf16.mxu0 %vm14169_vm1, %v18432_v11 }
 0x24b   : > { %11341 = vmatmul.mubr.msk.bf16.gmra.mrb[8].mxu0 %vm18384_vm3, %v15104_v16 }
 0x24c   : > { %11344 = vmatprep.mubr.msk.bf16.mxu0 %vm14169_vm1, %v18432_v11 }
 0x253   : > { %11345 = vmatmul.mubr.msk.bf16.gmra.mrb[12].mxu0 %vm18384_vm3, %v15112_v18 }
 0x254   : > { %11348 = vmatprep.mubr.msk.bf16.mxu0 %vm14169_vm1, %v18432_v11 }
 0x25b   : > { %11349 = vmatmul.mubr.msk.bf16.gmra.mrb[16].mxu0 %vm18384_vm3, %v15120_v19 }
 0x25c   : > { %11352 = vmatprep.mubr.msk.bf16.mxu0 %vm14169_vm1, %v18432_v11 }
 0x25e   : > { %v1835_v39 = vpop.f32.mrb[84].mxu0 }
 0x25f   : > { %v11242_v40 = vpop.f32.mrb[85].mxu0  ;;  %v2521_v39 = vshll.u32 %v15086_v23, 16 }
 0x260   : > { %v1837_v42 = vpop.f32.mrb[86].mxu0  ;;  %v2525_v40 = vshll.u32 %v15096_v22, 16 }
 0x261   : > { %v11243_v50 = vpop.f32.mrb[87].mxu0  ;;  %v2523_v36 = vrot.slane %v2521_v39, 1  ;;  %v2539_v39 = vshll.u32 %v15112_v18, 16 }
 0x262   : > { %v2527_v50 = vrot.slane %v2525_v40, 1 }
 0x263   : > { %11353 = vmatmul.mubr.msk.bf16.gmra.mrb[20].mxu0 %vm18384_vm3, %v15128_v38  ;;  %v2524_v42 = vor.u32 %v2523_v36, %v2519_v3  ;;  %v2538_v3 = vor.u32 %v2536_v10, %v2534_v37  ;;  %v2541_v36 = vrot.slane %v2539_v39, 1  ;;  %v2557_v10 = vshrl.u32 %v15128_v38, 16 }
 0x264   : > { %11356 = vmatprep.mubr.msk.bf16.mxu0 %vm14169_vm1, %v18432_v11  ;;  %v2531_v17 = vor.u32 %v2529_v48, %v2527_v50  ;;  %v2560_v39 = vshll.u32 %v15136_v51, 16 }
 0x265   : > { %v2528_v34 = vsel %vm1156_vm2, %v2524_v42, %v2527_v50  ;;  %v2542_v40 = vsel %vm1156_vm2, %v2538_v3, %v2541_v36  ;;  %v2543_v42 = vshrl.u32 %v15112_v18, 16  ;;  %v2546_v50 = vshll.u32 %v15120_v19, 16 }
 0x266   : > { %v2535_v1 = vsel %vm1156_vm2, %v2531_v17, %v2534_v37 }
 0x267   : > { %v2545_v27 = vor.u32 %v2543_v42, %v2541_v36  ;;  %v2562_v36 = vrot.slane %v2560_v39, 1 }
 0x26b   : > { %11357 = vmatmul.mubr.msk.bf16.gmra.mrb[24].mxu0 %vm18384_vm3, %v15136_v51 }
 0x26c   : > { %11360 = vmatprep.mubr.msk.bf16.mxu0 %vm14169_vm1, %v18432_v11 }
 0x273   : > { %11361 = vmatmul.mubr.msk.bf16.gmra.mrb[28].mxu0 %vm18384_vm3, %v15144_v59 }
 0x274   : > { %11364 = vmatprep.mubr.msk.bf16.mxu0 %vm14169_vm1, %v18432_v11 }
 0x27b   : > { %11365 = vmatmul.mubr.msk.bf16.gmra.mrb[32].mxu0 %vm18384_vm3, %v15152_v60 }
 0x27c   : > { %11368 = vmatprep.mubr.msk.bf16.mxu0 %vm14169_vm1, %v18432_v11 }
 0x283   : > { %11369 = vmatmul.mubr.msk.bf16.gmra.mrb[36].mxu0 %vm18384_vm3, %v15160_v4 }
 0x284   : > { %11372 = vmatprep.mubr.msk.bf16.mxu0 %vm14169_vm1, %v18432_v11 }
 0x28b   : > { %11373 = vmatmul.mubr.msk.bf16.gmra.mrb[40].mxu0 %vm18384_vm3, %v15168_v5 }
 0x28c   : > { %11376 = vmatprep.mubr.msk.bf16.mxu0 %vm14169_vm1, %v18432_v11 }
 0x293   : > { %11377 = vmatmul.mubr.msk.bf16.gmra.mrb[44].mxu0 %vm18384_vm3, %v15176_v13 }
 0x294   : > { %11380 = vmatprep.mubr.msk.bf16.mxu0 %vm14169_vm1, %v18432_v11 }
 0x29b   : > { %11381 = vmatmul.mubr.msk.bf16.gmra.mrb[48].mxu0 %vm18384_vm3, %v15184_v14 }
 0x29c   : > { %11384 = vmatprep.mubr.msk.bf16.mxu0 %vm14169_vm1, %v18432_v11 }
 0x2a3   : > { %11385 = vmatmul.mubr.msk.bf16.gmra.mrb[52].mxu0 %vm18384_vm3, %v15192_v26 }
 0x2a4   : > { %11388 = vmatprep.mubr.msk.bf16.mxu0 %vm14169_vm1, %v18432_v11 }
 0x2ab   : > { %11389 = vmatmul.mubr.msk.bf16.gmra.mrb[56].mxu0 %vm18384_vm3, %v15200_v35 }
 0x2ac   : > { %11392 = vmatprep.mubr.msk.bf16.mxu0 %vm14169_vm1, %v18432_v11 }
 0x2b3   : > { %11393 = vmatmul.mubr.msk.bf16.gmra.mrb[60].mxu0 %vm18384_vm3, %v15208_v62 }
 0x2b4   : > { %11396 = vmatprep.mubr.msk.bf16.mxu0 %vm14169_vm1, %v18432_v11 }
 0x2bb   : > { %11397 = vmatmul.mubr.msk.bf16.gmra.mrb[64].mxu0 %vm18384_vm3, %v15216_v24 }
 0x2bc   : > { %11400 = vmatprep.mubr.msk.bf16.mxu0 %vm14169_vm1, %v18432_v11 }
 0x2c3   : > { %11401 = vmatmul.mubr.msk.bf16.gmra.mrb[68].mxu0 %vm18384_vm3, %v15224_v46 }
 0x2c4   : > { %11404 = vmatprep.mubr.msk.bf16.mxu0 %vm14169_vm1, %v18432_v11 }
 0x2cb   : > { %11405 = vmatmul.mubr.msk.bf16.gmra.mrb[72].mxu0 %vm18384_vm3, %v15232_v6 }
 0x2cc   : > { %11408 = vmatprep.mubr.msk.bf16.mxu0 %vm14169_vm1, %v18432_v11 }
 0x2d3   : > { %11409 = vmatmul.mubr.msk.bf16.gmra.mrb[76].mxu0 %vm18384_vm3, %v15240_v28 }
 0x2d4   : > { %11412 = vmatprep.mubr.msk.bf16.mxu0 %vm14169_vm1, %v18432_v11 }
 0x2db   : > { %11413 = vmatmul.mubr.msk.bf16.gmra.mrb[92].mxu0 %vm18384_vm3, %v14803_v57 }
 0x2dc   : > { %11418 = vmatprep.mubr.msk.bf16.mxu0 %vm14169_vm1, %v18432_v11 }
 0x2e3   : > { %11419 = vmatmul.mubr.msk.bf16.vlgmr.msra.gmra.mrb[0].mxu0 %vm18384_vm3, %v2528_v34  ;;  %v2548_v34 = vrot.slane %v2546_v50, 1 }
 0x2e4   : > { %11503 = vmatpush3.bf16.msra.mxu0 %v3075_v2  ;;  %11422 = vmatprep.mubr.msk.bf16.mxu0 %vm14169_vm1, %v18432_v11  ;;  %v2553_v2 = vshll.u32 %v15128_v38, 16 }
 0x2e5   : > { %11588 = vmatprep.subr.bf16.mxu0 %v18432_v11  ;;  %v2549_v48 = vsel %vm1156_vm2, %v2545_v27, %v2548_v34  ;;  %v2552_v17 = vor.u32 %v2550_v49, %v2548_v34  ;;  %v2564_v34 = vshrl.u32 %v15136_v51, 16 }
 0x2e6   : > { %v2555_v37 = vrot.slane %v2553_v2, 1 }
 0x2e7   : > { %v2566_v2 = vor.u32 %v2564_v34, %v2562_v36 }
 0x2e8   : > { %v2559_v3 = vor.u32 %v2557_v10, %v2555_v37  ;;  %v2574_v10 = vshll.u32 %v15152_v60, 16 }
 0x2ea   : > { %v2563_v27 = vsel %vm1156_vm2, %v2559_v3, %v2562_v36  ;;  %v2576_v3 = vrot.slane %v2574_v10, 1  ;;  %v2581_v36 = vshll.u32 %v15160_v4, 16  ;;  %v2595_v10 = vshll.u32 %v15176_v13, 16 }
 0x2eb   : > { %11423 = vmatmul.mubr.msk.bf16.gmra.mrb[4].mxu0 %vm18384_vm3, %v2535_v1  ;;  %v2556_v1 = vsel %vm1156_vm2, %v2552_v17, %v2555_v37 }
 0x2ec   : > { %11426 = vmatprep.mubr.msk.bf16.mxu0 %vm14169_vm1, %v18432_v11 }
 0x2f3   : > { %11427 = vmatmul.mubr.msk.bf16.gmra.mrb[8].mxu0 %vm18384_vm3, %v2542_v40 }
 0x2f4   : > { %11430 = vmatprep.mubr.msk.bf16.mxu0 %vm14169_vm1, %v18432_v11 }
 0x2fb   : > { %11431 = vmatmul.mubr.msk.bf16.gmra.mrb[12].mxu0 %vm18384_vm3, %v2549_v48  ;;  %v2567_v48 = vshll.u32 %v15144_v59, 16 }
 0x2fc   : > { %11434 = vmatprep.mubr.msk.bf16.mxu0 %vm14169_vm1, %v18432_v11 }
 0x2fd   : > { %v2569_v17 = vrot.slane %v2567_v48, 1  ;;  %v2585_v48 = vshrl.u32 %v15160_v4, 16 }
 0x2ff   : > { %v2570_v37 = vsel %vm1156_vm2, %v2566_v2, %v2569_v17 }
 0x303   : > { %11435 = vmatmul.mubr.msk.bf16.gmra.mrb[16].mxu0 %vm18384_vm3, %v2556_v1  ;;  %v2571_v1 = vshrl.u32 %v15144_v59, 16 }
 0x304   : > { %11438 = vmatprep.mubr.msk.bf16.mxu0 %vm14169_vm1, %v18432_v11 }
 0x305   : > { %v2573_v39 = vor.u32 %v2571_v1, %v2569_v17  ;;  %v2592_v1 = vshrl.u32 %v15168_v5, 16 }
 0x306   : > { %v2146_v40 = vpop.f32.mrb[88].mxu0 }
 0x307   : > { %v11328_v42 = vpop.f32.mrb[89].mxu0  ;;  %v2577_v40 = vsel %vm1156_vm2, %v2573_v39, %v2576_v3 }
 0x308   : > { %v2148_v50 = vpop.f32.mrb[90].mxu0  ;;  %v2578_v42 = vshrl.u32 %v15152_v60, 16 }
 0x309   : > { %v11329_v49 = vpop.f32.mrb[91].mxu0 }
 0x30a   : > { %v2580_v50 = vor.u32 %v2578_v42, %v2576_v3  ;;  %v2588_v49 = vshll.u32 %v15168_v5, 16  ;;  %v2597_v3 = vrot.slane %v2595_v10, 1  ;;  %v2599_v42 = vshrl.u32 %v15176_v13, 16 }
 0x30b   : > { %11439 = vmatmul.mubr.msk.bf16.gmra.mrb[20].mxu0 %vm18384_vm3, %v2563_v27  ;;  %v2583_v27 = vrot.slane %v2581_v36, 1  ;;  %v2602_v36 = vshll.u32 %v15184_v14, 16  ;;  %v2616_v10 = vshll.u32 %v15200_v35, 16 }
 0x30c   : > { %11442 = vmatprep.mubr.msk.bf16.mxu0 %vm14169_vm1, %v18432_v11  ;;  %v2590_v17 = vrot.slane %v2588_v49, 1  ;;  %v2609_v49 = vshll.u32 %v15192_v26, 16 }
 0x30d   : > { %v2584_v34 = vsel %vm1156_vm2, %v2580_v50, %v2583_v27  ;;  %v2587_v2 = vor.u32 %v2585_v48, %v2583_v27  ;;  %v2601_v50 = vor.u32 %v2599_v42, %v2597_v3  ;;  %v2604_v27 = vrot.slane %v2602_v36, 1 }
 0x30e   : > { %v2594_v39 = vor.u32 %v2592_v1, %v2590_v17  ;;  %v2606_v48 = vshrl.u32 %v15184_v14, 16  ;;  %v2613_v1 = vshrl.u32 %v15192_v26, 16  ;;  %v2620_v42 = vshrl.u32 %v15200_v35, 16 }
 0x30f   : > { %v2623_v36 = vshll.u32 %v15208_v62, 16 }
 0x313   : > { %11443 = vmatmul.mubr.msk.bf16.gmra.mrb[24].mxu0 %vm18384_vm3, %v2570_v37  ;;  %v2591_v37 = vsel %vm1156_vm2, %v2587_v2, %v2590_v17  ;;  %v2608_v2 = vor.u32 %v2606_v48, %v2604_v27  ;;  %v2611_v17 = vrot.slane %v2609_v49, 1  ;;  %v2627_v48 = vshrl.u32 %v15208_v62, 16 }
 0x314   : > { %11446 = vmatprep.mubr.msk.bf16.mxu0 %vm14169_vm1, %v18432_v11  ;;  %v2630_v49 = vshll.u32 %v15216_v24, 16 }
 0x31b   : > { %11447 = vmatmul.mubr.msk.bf16.gmra.mrb[28].mxu0 %vm18384_vm3, %v2577_v40  ;;  %v2598_v40 = vsel %vm1156_vm2, %v2594_v39, %v2597_v3  ;;  %v2615_v39 = vor.u32 %v2613_v1, %v2611_v17  ;;  %v2618_v3 = vrot.slane %v2616_v10, 1  ;;  %v2634_v1 = vshrl.u32 %v15216_v24, 16 }
 0x31c   : > { %11450 = vmatprep.mubr.msk.bf16.mxu0 %vm14169_vm1, %v18432_v11  ;;  %v2637_v10 = vshll.u32 %v15224_v46, 16 }
 0x323   : > { %11451 = vmatmul.mubr.msk.bf16.gmra.mrb[32].mxu0 %vm18384_vm3, %v2584_v34  ;;  %v2605_v34 = vsel %vm1156_vm2, %v2601_v50, %v2604_v27  ;;  %v2622_v50 = vor.u32 %v2620_v42, %v2618_v3  ;;  %v2625_v27 = vrot.slane %v2623_v36, 1  ;;  %v2641_v42 = vshrl.u32 %v15224_v46, 16 }
 0x324   : > { %11454 = vmatprep.mubr.msk.bf16.mxu0 %vm14169_vm1, %v18432_v11  ;;  %v2644_v36 = vshll.u32 %v15232_v6, 16 }
 0x32b   : > { %11455 = vmatmul.mubr.msk.bf16.gmra.mrb[36].mxu0 %vm18384_vm3, %v2591_v37  ;;  %v2612_v37 = vsel %vm1156_vm2, %v2608_v2, %v2611_v17  ;;  %v2629_v2 = vor.u32 %v2627_v48, %v2625_v27  ;;  %v2632_v17 = vrot.slane %v2630_v49, 1  ;;  %v2648_v48 = vshrl.u32 %v15232_v6, 16 }
 0x32c   : > { %11458 = vmatprep.mubr.msk.bf16.mxu0 %vm14169_vm1, %v18432_v11  ;;  %v2651_v49 = vshll.u32 %v15240_v28, 16 }
 0x333   : > { %11459 = vmatmul.mubr.msk.bf16.gmra.mrb[40].mxu0 %vm18384_vm3, %v2598_v40  ;;  %v2619_v40 = vsel %vm1156_vm2, %v2615_v39, %v2618_v3  ;;  %v2636_v39 = vor.u32 %v2634_v1, %v2632_v17  ;;  %v2639_v3 = vrot.slane %v2637_v10, 1  ;;  %v2655_v1 = vshrl.u32 %v15240_v28, 16 }
 0x334   : > { %11462 = vmatprep.mubr.msk.bf16.mxu0 %vm14169_vm1, %v18432_v11 }
 0x33b   : > { %11463 = vmatmul.mubr.msk.bf16.gmra.mrb[44].mxu0 %vm18384_vm3, %v2605_v34  ;;  %v2626_v34 = vsel %vm1156_vm2, %v2622_v50, %v2625_v27  ;;  %v2643_v50 = vor.u32 %v2641_v42, %v2639_v3  ;;  %v2646_v27 = vrot.slane %v2644_v36, 1  ;;  %v2970_v36 = vrot.slane %v15086_v23, 1 }
 0x33c   : > { %11466 = vmatprep.mubr.msk.bf16.mxu0 %vm14169_vm1, %v18432_v11 }
 0x343   : > { %11467 = vmatmul.mubr.msk.bf16.gmra.mrb[48].mxu0 %vm18384_vm3, %v2612_v37  ;;  %v2633_v37 = vsel %vm1156_vm2, %v2629_v2, %v2632_v17  ;;  %v2650_v2 = vor.u32 %v2648_v48, %v2646_v27  ;;  %v2653_v17 = vrot.slane %v2651_v49, 1 }
 0x344   : > { %11470 = vmatprep.mubr.msk.bf16.mxu0 %vm14169_vm1, %v18432_v11 }
 0x345   : > { %v2657_v10 = vor.u32 %v2655_v1, %v2653_v17 }
 0x34b   : > { %11471 = vmatmul.mubr.msk.bf16.gmra.mrb[52].mxu0 %vm18384_vm3, %v2619_v40  ;;  %v2640_v40 = vsel %vm1156_vm2, %v2636_v39, %v2639_v3  ;;  %v2658_v39 = vsel %vm1156_vm2, %v2657_v10, %v14814_v47  ;;  %v2659_v3 = vshrl.u32 %v14803_v57, 16 }
 0x34c   : > { %11474 = vmatprep.mubr.msk.bf16.mxu0 %vm14169_vm1, %v18432_v11 }
 0x353   : > { %11475 = vmatmul.mubr.msk.bf16.gmra.mrb[56].mxu0 %vm18384_vm3, %v2626_v34  ;;  %v2647_v34 = vsel %vm1156_vm2, %v2643_v50, %v2646_v27  ;;  %v2971_v50 = vrot.slane %v15096_v22, 1  ;;  %v10166_v27 = vld [vmem:[%s18332_s7 + $0x18] sm:$0xf]  ;;  %v2975_v22 = vrot.slane %v15112_v18, 1 }
 0x354   : > { %11478 = vmatprep.mubr.msk.bf16.mxu0 %vm14169_vm1, %v18432_v11  ;;  %v3319_v48 = vsel %vm1393_vm0, %v10166_v27, 0  ;;  %v2989_v27 = vrot.slane %v15168_v5, 1 }
 0x35b   : > { %11479 = vmatmul.mubr.msk.bf16.gmra.mrb[60].mxu0 %vm18384_vm3, %v2633_v37  ;;  %v2654_v37 = vsel %vm1156_vm2, %v2650_v2, %v2653_v17  ;;  %v2979_v17 = vrot.slane %v15128_v38, 1  ;;  %v2983_v38 = vrot.slane %v15144_v59, 1 }
 0x35c   : > { %11482 = vmatprep.mubr.msk.bf16.mxu0 %vm14169_vm1, %v18432_v11 }
 0x363   : > { %11483 = vmatmul.mubr.msk.bf16.gmra.mrb[64].mxu0 %vm18384_vm3, %v2640_v40  ;;  %v2661_v40 = vor.u32 %v2659_v3, %v14814_v47 }
 0x364   : > { %11486 = vmatprep.mubr.msk.bf16.mxu0 %vm14169_vm1, %v18432_v11 }
 0x365   : > { %v15380_v42 = vsel %vm1156_vm2, %v2661_v40, %v14814_v47  ;;  %v2973_v47 = vrot.slane %v15104_v16, 1  ;;  %v2977_v16 = vrot.slane %v15120_v19, 1 }
 0x367   : > { %v2974_v23 = vsel %vm1842_vm4, %v2971_v50, %v2973_v47  ;;  %v2976_v49 = vsel %vm1842_vm4, %v2973_v47, %v2975_v22  ;;  %v2978_v2 = vsel %vm1842_vm4, %v2975_v22, %v2977_v16  ;;  %v2980_v18 = vsel %vm1842_vm4, %v2977_v16, %v2979_v17 }
 0x368   : > { %v2995_v47 = vrot.slane %v15192_v26, 1  ;;  %v2999_v22 = vrot.slane %v15208_v62, 1  ;;  %v3003_v16 = vrot.slane %v15224_v46, 1 }
 0x36b   : > { %11487 = vmatmul.mubr.msk.bf16.gmra.mrb[68].mxu0 %vm18384_vm3, %v2647_v34  ;;  %v2972_v34 = vsel %vm1842_vm4, %v2970_v36, %v2971_v50  ;;  %v2987_v50 = vrot.slane %v15160_v4, 1 }
 0x36c   : > { %11490 = vmatprep.mubr.msk.bf16.mxu0 %vm14169_vm1, %v18432_v11 }
 0x373   : > { %11491 = vmatmul.mubr.msk.bf16.gmra.mrb[72].mxu0 %vm18384_vm3, %v2654_v37  ;;  %v2981_v37 = vrot.slane %v15136_v51, 1  ;;  %v2985_v51 = vrot.slane %v15152_v60, 1  ;;  %v2990_v60 = vsel %vm1842_vm4, %v2987_v50, %v2989_v27 }
 0x374   : > { %11494 = vmatprep.mubr.msk.bf16.mxu0 %vm14169_vm1, %v18432_v11 }
 0x375   : > { %v2984_v40 = vsel %vm1842_vm4, %v2981_v37, %v2983_v38  ;;  %v2986_v36 = vsel %vm1842_vm4, %v2983_v38, %v2985_v51  ;;  %v2988_v59 = vsel %vm1842_vm4, %v2985_v51, %v2987_v50  ;;  %v18485_v51 = vld [vmem:[#allocation36_spill] sm:$0xff]  ;;  %v18487_v50 = vld [vmem:[#allocation38_spill] sm:$0xff] }
 0x37b   : > { %11495 = vmatmul.mubr.msk.bf16.gmra.mrb[76].mxu0 %vm18384_vm3, %v2658_v39  ;;  %v2982_v39 = vsel %vm1842_vm4, %v2979_v17, %v2981_v37  ;;  %v3007_v17 = vrot.slane %v15240_v28, 1 }
 0x37c   : > { %11498 = vmatprep.mubr.msk.bf16.mxu0 %vm14169_vm1, %v18432_v11 }
 0x383   : > { %11499 = vmatmul.mubr.msk.bf16.gmra.mrb[96].mxu0 %vm18384_vm3, %v15380_v42 }
 0x384   : > { %11504 = vmatprep.mubr.msk.bf16.mxu0 %vm14169_vm1, %v18432_v11 }
 0x38b   : > { %11505 = vmatmul.mubr.msk.bf16.vlgmr.msra.gmra.mrb[0].mxu0 %vm18384_vm3, %v2972_v34  ;;  %v2991_v34 = vrot.slane %v15176_v13, 1 }
 0x38c   : > { %11589 = vmatpush3.bf16.msra.mxu0 %v3319_v48  ;;  %11508 = vmatprep.mubr.msk.bf16.mxu0 %vm14169_vm1, %v18432_v11  ;;  %v2993_v48 = vrot.slane %v15184_v14, 1 }
 0x38d   : > { %11674 = vmatprep.subr.bf16.mxu0 %v18432_v11  ;;  %v2992_v4 = vsel %vm1842_vm4, %v2989_v27, %v2991_v34  ;;  %v18489_v27 = vld [vmem:[#allocation40_spill] sm:$0xff] }
 0x38e   : > { %v2994_v5 = vsel %vm1842_vm4, %v2991_v34, %v2993_v48  ;;  %v2996_v13 = vsel %vm1842_vm4, %v2993_v48, %v2995_v47  ;;  %v10274_v34 = vld [vmem:[%s18334_s9 + $0x2] sm:$0x3]  ;;  %v18491_v48 = vld [vmem:[#allocation42_spill] sm:$0xff] }
 0x393   : > { %11509 = vmatmul.mubr.msk.bf16.gmra.mrb[4].mxu0 %vm18384_vm3, %v2974_v23  ;;  %v2997_v23 = vrot.slane %v15200_v35, 1 }
 0x394   : > { %11512 = vmatprep.mubr.msk.bf16.mxu0 %vm14169_vm1, %v18432_v11 }
 0x395   : > { %v2998_v14 = vsel %vm1842_vm4, %v2995_v47, %v2997_v23  ;;  %v3000_v26 = vsel %vm1842_vm4, %v2997_v23, %v2999_v22  ;;  %v18493_v47 = vld [vmem:[#allocation44_spill] sm:$0xff] }
 0x39b   : > { %11513 = vmatmul.mubr.msk.bf16.gmra.mrb[8].mxu0 %vm18384_vm3, %v2976_v49  ;;  %v3001_v49 = vrot.slane %v15216_v24, 1 }
 0x39c   : > { %11516 = vmatprep.mubr.msk.bf16.mxu0 %vm14169_vm1, %v18432_v11 }
 0x39d   : > { %v3002_v35 = vsel %vm1842_vm4, %v2999_v22, %v3001_v49  ;;  %v3004_v62 = vsel %vm1842_vm4, %v3001_v49, %v3003_v16 }
 0x3a3   : > { %11517 = vmatmul.mubr.msk.bf16.gmra.mrb[12].mxu0 %vm18384_vm3, %v2978_v2  ;;  %v3005_v2 = vrot.slane %v15232_v6, 1  ;;  %v10188_v6 = vld [vmem:[%s18332_s7 + $0x1c] sm:$0xf] }
 0x3a4   : > { %11520 = vmatprep.mubr.msk.bf16.mxu0 %vm14169_vm1, %v18432_v11  ;;  %v3563_v28 = vsel %vm1393_vm0, %v10188_v6, 0 }
 0x3a5   : > { %v3006_v24 = vsel %vm1842_vm4, %v3003_v16, %v3005_v2  ;;  %v3008_v46 = vsel %vm1842_vm4, %v3005_v2, %v3007_v17  ;;  %v15778_v16 = vld [vmem:[%s18333_s8 + $0x1] ss:$0 sm:$0xff] }
 0x3ab   : > { %11521 = vmatmul.mubr.msk.bf16.gmra.mrb[16].mxu0 %vm18384_vm3, %v2980_v18  ;;  %v3009_v18 = vsel %vm1842_vm4, %v3007_v17, %v15071_v58 }
 0x3ac   : > { %11524 = vmatprep.mubr.msk.bf16.mxu0 %vm14169_vm1, %v18432_v11 }
 0x3ae   : > { %v2472_v1 = vpop.f32.mrb[92].mxu0 }
 0x3af   : > { %v11414_v19 = vpop.f32.mrb[93].mxu0 }
 0x3b0   : > { %v2474_v10 = vpop.f32.mrb[94].mxu0  ;;  %v18476_v19 = vld [vmem:[#allocation22_spill] sm:$0xff] }
 0x3b1   : > { %v11415_v3 = vpop.f32.mrb[95].mxu0  ;;  %v18477_v10 = vld [vmem:[#allocation25_spill] sm:$0xff] }
 0x3b2   : > { %v18479_v3 = vld [vmem:[#allocation29_spill] sm:$0xff] }
 0x3b3   : > { %11525 = vmatmul.mubr.msk.bf16.gmra.mrb[20].mxu0 %vm18384_vm3, %v2982_v39  ;;  %v18478_v39 = vld [vmem:[#allocation28_spill] sm:$0xff] }
 0x3b4   : > { %11528 = vmatprep.mubr.msk.bf16.mxu0 %vm14169_vm1, %v18432_v11 }
 0x3bb   : > { %11529 = vmatmul.mubr.msk.bf16.gmra.mrb[24].mxu0 %vm18384_vm3, %v2984_v40 }
 0x3bc   : > { %11532 = vmatprep.mubr.msk.bf16.mxu0 %vm14169_vm1, %v18432_v11 }
 0x3c3   : > { %11533 = vmatmul.mubr.msk.bf16.gmra.mrb[28].mxu0 %vm18384_vm3, %v2986_v36  ;;  %v18486_v36 = vld [vmem:[#allocation37_spill] sm:$0xff] }
 0x3c4   : > { %11536 = vmatprep.mubr.msk.bf16.mxu0 %vm14169_vm1, %v18432_v11 }
 0x3cb   : > { %11537 = vmatmul.mubr.msk.bf16.gmra.mrb[32].mxu0 %vm18384_vm3, %v2988_v59  ;;  %v18488_v59 = vld [vmem:[#allocation39_spill] sm:$0xff] }
 0x3cc   : > { %11540 = vmatprep.mubr.msk.bf16.mxu0 %vm14169_vm1, %v18432_v11 }
 0x3d3   : > { %11541 = vmatmul.mubr.msk.bf16.gmra.mrb[36].mxu0 %vm18384_vm3, %v2990_v60  ;;  %v18490_v60 = vld [vmem:[#allocation41_spill] sm:$0xff] }
 0x3d4   : > { %11544 = vmatprep.mubr.msk.bf16.mxu0 %vm14169_vm1, %v18432_v11 }
 0x3db   : > { %11545 = vmatmul.mubr.msk.bf16.gmra.mrb[40].mxu0 %vm18384_vm3, %v2992_v4  ;;  %v4776_v4 = vsel %vm4774_vm5, %v10274_v34, 0 }
 0x3dc   : > { %11548 = vmatprep.mubr.msk.bf16.mxu0 %vm14169_vm1, %v18432_v11  ;;  %12711 = vmatpush3.bf16.msra.mxu1 %v4776_v4 }
 0x3dd   : > { %11916 = vmatprep.subr.bf16.mxu1 %v18432_v11 }
 0x3e3   : > { %11549 = vmatmul.mubr.msk.bf16.gmra.mrb[44].mxu0 %vm18384_vm3, %v2994_v5  ;;  %v18492_v5 = vld [vmem:[#allocation43_spill] sm:$0xff] }
 0x3e4   : > { %11552 = vmatprep.mubr.msk.bf16.mxu0 %vm14169_vm1, %v18432_v11 }
 0x3eb   : > { %11553 = vmatmul.mubr.msk.bf16.gmra.mrb[48].mxu0 %vm18384_vm3, %v2996_v13  ;;  %v4272_v13 = vlaneseq }
 0x3ec   : > { %11556 = vmatprep.mubr.msk.bf16.mxu0 %vm14169_vm1, %v18432_v11 }
 0x3ed   : > { %v15766_v49 = vshrl.u32 %v4272_v13, 7 }
 0x3ef   : > { %18494 = vst [vmem:[#allocation21_spill] sm:$0xff] %v15766_v49  ;;  %vm4318_vm9 = vcmp.ge.s32.totalorder %v15766_v49, 2 }
 0x3f3   : > { %11557 = vmatmul.mubr.msk.bf16.gmra.mrb[52].mxu0 %vm18384_vm3, %v2998_v14  ;;  %v15764_v14 = vstv %s14297_s20  ;;  %s14171_s20 = smov 124  }
 0x3f4   : > { %11560 = vmatprep.mubr.msk.bf16.mxu0 %vm14169_vm1, %v18432_v11  ;;  %vm4276_vm6 = vcmp.ge.s32.totalorder %v15764_v14, 0  ;;  %vm4290_vm7 = vcmp.lt.s32.totalorder %v15764_v14, 16 }
 0x3f5   : > { %vm15780_vm8 = vmand %vm4276_vm6, %vm4290_vm7 }
 0x3f6   : > { %vm4355_vm10 = vmand %vm15780_vm8, %vm4318_vm9 }
 0x3fb   : > { %11561 = vmatmul.mubr.msk.bf16.gmra.mrb[56].mxu0 %vm18384_vm3, %v3000_v26 }
 0x3fc   : > { %11564 = vmatprep.mubr.msk.bf16.mxu0 %vm14169_vm1, %v18432_v11 }
 0x403   : > { %11565 = vmatmul.mubr.msk.bf16.gmra.mrb[60].mxu0 %vm18384_vm3, %v3002_v35 }
 0x404   : > { %11568 = vmatprep.mubr.msk.bf16.mxu0 %vm14169_vm1, %v18432_v11 }
 0x40b   : > { %11569 = vmatmul.mubr.msk.bf16.gmra.mrb[64].mxu0 %vm18384_vm3, %v3004_v62 }
 0x40c   : > { %11572 = vmatprep.mubr.msk.bf16.mxu0 %vm14169_vm1, %v18432_v11 }
 0x413   : > { %11573 = vmatmul.mubr.msk.bf16.gmra.mrb[68].mxu0 %vm18384_vm3, %v3006_v24 }
 0x414   : > { %11576 = vmatprep.mubr.msk.bf16.mxu0 %vm14169_vm1, %v18432_v11 }
 0x41b   : > { %11577 = vmatmul.mubr.msk.bf16.gmra.mrb[72].mxu0 %vm18384_vm3, %v3008_v46  ;;  %v4259_v46 = vadd.s32 1, %v15764_v14 }
 0x41c   : > { %11580 = vmatprep.mubr.msk.bf16.mxu0 %vm14169_vm1, %v18432_v11 }
 0x41d   : > { %vm4277_vm12 = vcmp.ge.s32.totalorder %v4259_v46, 0  ;;  %vm4291_vm13 = vcmp.lt.s32.totalorder %v4259_v46, 16 }
 0x41e   : > { %vm15803_vm6 = vmand %vm4277_vm12, %vm4291_vm13 }
 0x423   : > { %11581 = vmatmul.mubr.msk.bf16.gmra.mrb[76].mxu0 %vm18384_vm3, %v3009_v18 }
 0x424   : > { %11584 = vmatprep.mubr.msk.bf16.mxu0 %vm14169_vm1, %v18432_v11 }
 0x42b   : > { %11585 = vmatmul.mubr.msk.bf16.gmra.mrb[100].mxu0 %vm18384_vm3, %v15071_v58 }
 0x42c   : > { %11590 = vmatprep.mubr.msk.bf16.mxu0 %vm14169_vm1, %v18432_v11 }
 0x433   : > { %11591 = vmatmul.mubr.msk.bf16.vlgmr.msra.gmra.mrb[0].mxu0 %vm18384_vm3, %v14406_v43 }
 0x434   : > { %11675 = vmatpush3.bf16.msra.mxu0 %v3563_v28  ;;  %11594 = vmatprep.mubr.msk.bf16.mxu0 %vm14169_vm1, %v18432_v11 }
 0x435   : > { %11760 = vmatprep.subr.bf16.mxu0 %v18432_v11 }
 0x43b   : > { %11595 = vmatmul.mubr.msk.bf16.gmra.mrb[4].mxu0 %vm18384_vm3, %v14410_v44 }
 0x43c   : > { %11598 = vmatprep.mubr.msk.bf16.mxu0 %vm14169_vm1, %v18432_v11 }
 0x443   : > { %11599 = vmatmul.mubr.msk.bf16.gmra.mrb[8].mxu0 %vm18384_vm3, %v14427_v55  ;;  %v10210_v55 = vld [vmem:[%s18332_s7 + $0x20] sm:$0xf] }
 0x444   : > { %11602 = vmatprep.mubr.msk.bf16.mxu0 %vm14169_vm1, %v18432_v11 }
 0x44b   : > { %11603 = vmatmul.mubr.msk.bf16.gmra.mrb[12].mxu0 %vm18384_vm3, %v14446_v63  ;;  %v18465_v63 = vld [vmem:[#allocation8_spill] sm:$0xff] }
 0x44c   : > { %11606 = vmatprep.mubr.msk.bf16.mxu0 %vm14169_vm1, %v18432_v11 }
 0x453   : > { %11607 = vmatmul.mubr.msk.bf16.gmra.mrb[16].mxu0 %vm18384_vm3, %v14465_v8  ;;  %v18466_v8 = vld [vmem:[#allocation9_spill] sm:$0xff] }
 0x454   : > { %11610 = vmatprep.mubr.msk.bf16.mxu0 %vm14169_vm1, %v18432_v11 }
 0x456   : > { %v2923_v43 = vpop.f32.mrb[96].mxu0 }
 0x457   : > { %v11500_v44 = vpop.f32.mrb[97].mxu0  ;;  %v15794_v43 = vadd.s32 16, %v15766_v49 }
 0x458   : > { %v2925_v37 = vpop.f32.mrb[98].mxu0 }
 0x459   : > { %v11501_v1 = vpop.f32.mrb[99].mxu0  ;;  %18497 = vst [vmem:[#allocation18_spill] sm:$0xff] %v15794_v43  ;;  %vm4397_vm15 = vcmp.lt.s32.totalorder %v15794_v43, 18 }
 0x45a   : > { %v10234_v1 = vsel %vm4355_vm10, 1.0, %v18432_v11  ;;  %vm4406_vm7 = vmand %vm15780_vm8, %vm4397_vm15 }
 0x45b   : > { %11611 = vmatmul.mubr.msk.bf16.gmra.mrb[20].mxu0 %vm18384_vm3, %v14484_v20  ;;  %v18467_v20 = vld [vmem:[#allocation10_spill] sm:$0xff]  ;;  %vm4358_vm10 = vmand %vm15803_vm6, %vm4318_vm9 }
 0x45c   : > { %11614 = vmatprep.mubr.msk.bf16.mxu0 %vm14169_vm1, %v18432_v11 }
 0x463   : > { %11615 = vmatmul.mubr.msk.bf16.gmra.mrb[24].mxu0 %vm18384_vm3, %v14503_v30  ;;  %v18468_v30 = vld [vmem:[#allocation11_spill] sm:$0xff] }
 0x464   : > { %11618 = vmatprep.mubr.msk.bf16.mxu0 %vm14169_vm1, %v18432_v11 }
 0x46b   : > { %11619 = vmatmul.mubr.msk.bf16.gmra.mrb[28].mxu0 %vm18384_vm3, %v14527_v41  ;;  %v18469_v41 = vld [vmem:[#allocation12_spill] sm:$0xff] }
 0x46c   : > { %11622 = vmatprep.mubr.msk.bf16.mxu0 %vm14169_vm1, %v18432_v11 }
 0x473   : > { %11623 = vmatmul.mubr.msk.bf16.gmra.mrb[32].mxu0 %vm18384_vm3, %v14546_v54 }
 0x474   : > { %11626 = vmatprep.mubr.msk.bf16.mxu0 %vm14169_vm1, %v18432_v11 }
 0x47b   : > { %11627 = vmatmul.mubr.msk.bf16.gmra.mrb[36].mxu0 %vm18384_vm3, %v14574_v7 }
 0x47c   : > { %11630 = vmatprep.mubr.msk.bf16.mxu0 %vm14169_vm1, %v18432_v11 }
 0x483   : > { %11631 = vmatmul.mubr.msk.bf16.gmra.mrb[40].mxu0 %vm18384_vm3, %v14614_v29 }
 0x484   : > { %11634 = vmatprep.mubr.msk.bf16.mxu0 %vm14169_vm1, %v18432_v11 }
 0x48b   : > { %11635 = vmatmul.mubr.msk.bf16.gmra.mrb[44].mxu0 %vm18384_vm3, %v14651_v53 }
 0x48c   : > { %11638 = vmatprep.mubr.msk.bf16.mxu0 %vm14169_vm1, %v18432_v11 }
 0x493   : > { %11639 = vmatmul.mubr.msk.bf16.gmra.mrb[48].mxu0 %vm18384_vm3, %v14681_v15  ;;  %v18470_v15 = vld [vmem:[#allocation13_spill] sm:$0xff] }
 0x494   : > { %11642 = vmatprep.mubr.msk.bf16.mxu0 %vm14169_vm1, %v18432_v11 }
 0x49b   : > { %11643 = vmatmul.mubr.msk.bf16.gmra.mrb[52].mxu0 %vm18384_vm3, %v14711_v25  ;;  %v18471_v25 = vld [vmem:[#allocation14_spill] sm:$0xff] }
 0x49c   : > { %11646 = vmatprep.mubr.msk.bf16.mxu0 %vm14169_vm1, %v18432_v11 }
 0x4a3   : > { %11647 = vmatmul.mubr.msk.bf16.gmra.mrb[56].mxu0 %vm18384_vm3, %v14735_v33  ;;  %v18472_v33 = vld [vmem:[#allocation15_spill] sm:$0xff] }
 0x4a4   : > { %11650 = vmatprep.mubr.msk.bf16.mxu0 %vm14169_vm1, %v18432_v11 }
 0x4ab   : > { %11651 = vmatmul.mubr.msk.bf16.gmra.mrb[60].mxu0 %vm18384_vm3, %v14756_v56  ;;  %v3807_v56 = vsel %vm1393_vm0, %v10210_v55, 0 }
 0x4ac   : > { %11654 = vmatprep.mubr.msk.bf16.mxu0 %vm14169_vm1, %v18432_v11 }
 0x4b3   : > { %11655 = vmatmul.mubr.msk.bf16.gmra.mrb[64].mxu0 %vm18384_vm3, %v14773_v31  ;;  %v18473_v31 = vld [vmem:[#allocation16_spill] sm:$0xff] }
 0x4b4   : > { %11658 = vmatprep.mubr.msk.bf16.mxu0 %vm14169_vm1, %v18432_v11 }
 0x4bb   : > { %11659 = vmatmul.mubr.msk.bf16.gmra.mrb[68].mxu0 %vm18384_vm3, %v14790_v61  ;;  %v18474_v61 = vld [vmem:[#allocation17_spill] sm:$0xff] }
 0x4bc   : > { %11662 = vmatprep.mubr.msk.bf16.mxu0 %vm14169_vm1, %v18432_v11 }
 0x4c3   : > { %11663 = vmatmul.mubr.msk.bf16.gmra.mrb[72].mxu0 %vm18384_vm3, %v14803_v57 }
 0x4c4   : > { %11666 = vmatprep.mubr.msk.bf16.mxu0 %vm14169_vm1, %v18432_v11 }
 0x4cb   : > { %11667 = vmatmul.mubr.msk.bf16.gmra.mrb[76].mxu0 %vm18384_vm3, %v14803_v57 }
 0x4cc   : > { %11670 = vmatprep.mubr.msk.bf16.mxu0 %vm14169_vm1, %v18432_v11 }
 0x4d3   : > { %11671 = vmatmul.mubr.msk.bf16.gmra.mrb[104].mxu0 %vm18384_vm3, %v14803_v57  ;;  %v18475_v57 = vld [vmem:[#allocation19_spill] sm:$0xff] }
 0x4d4   : > { %11676 = vmatprep.mubr.msk.bf16.mxu0 %vm14169_vm1, %v18432_v11 }
 0x4db   : > { %11677 = vmatmul.mubr.msk.bf16.vlgmr.msra.gmra.mrb[0].mxu0 %vm18384_vm3, %v18465_v63  ;;  %v10235_v63 = vsel %vm15780_vm8, 1.0, %v18432_v11  ;;  %vm4409_vm8 = vmand %vm15803_vm6, %vm4397_vm15 }
 0x4dc   : > { %11761 = vmatpush3.bf16.msra.mxu0 %v3807_v56  ;;  %11680 = vmatprep.mubr.msk.bf16.mxu0 %vm14169_vm1, %v18432_v11 }
 0x4dd   : > { %11846 = vmatprep.subr.bf16.mxu0 %v18432_v11 }
 0x4e3   : > { %11681 = vmatmul.mubr.msk.bf16.gmra.mrb[4].mxu0 %vm18384_vm3, %v18466_v8 }
 0x4e4   : > { %11684 = vmatprep.mubr.msk.bf16.mxu0 %vm14169_vm1, %v18432_v11 }
 0x4eb   : > { %11685 = vmatmul.mubr.msk.bf16.gmra.mrb[8].mxu0 %vm18384_vm3, %v18467_v20 }
 0x4ec   : > { %11688 = vmatprep.mubr.msk.bf16.mxu0 %vm14169_vm1, %v18432_v11 }
 0x4f3   : > { %11689 = vmatmul.mubr.msk.bf16.gmra.mrb[12].mxu0 %vm18384_vm3, %v18468_v30 }
 0x4f4   : > { %11692 = vmatprep.mubr.msk.bf16.mxu0 %vm14169_vm1, %v18432_v11 }
 0x4fb   : > { %11693 = vmatmul.mubr.msk.bf16.gmra.mrb[16].mxu0 %vm18384_vm3, %v18469_v41 }
 0x4fc   : > { %11696 = vmatprep.mubr.msk.bf16.mxu0 %vm14169_vm1, %v18432_v11 }
 0x4fe   : > { %v3271_v54 = vpop.f32.mrb[100].mxu0 }
 0x4ff   : > { %v11586_v7 = vpop.f32.mrb[101].mxu0 }
 0x500   : > { %v3273_v29 = vpop.f32.mrb[102].mxu0 }
 0x501   : > { %v11587_v53 = vpop.f32.mrb[103].mxu0 }
 0x503   : > { %11697 = vmatmul.mubr.msk.bf16.gmra.mrb[20].mxu0 %vm18384_vm3, %v18470_v15 }
 0x504   : > { %11700 = vmatprep.mubr.msk.bf16.mxu0 %vm14169_vm1, %v18432_v11 }
 0x50b   : > { %11701 = vmatmul.mubr.msk.bf16.gmra.mrb[24].mxu0 %vm18384_vm3, %v18471_v25 }
 0x50c   : > { %11704 = vmatprep.mubr.msk.bf16.mxu0 %vm14169_vm1, %v18432_v11 }
 0x513   : > { %11705 = vmatmul.mubr.msk.bf16.gmra.mrb[28].mxu0 %vm18384_vm3, %v18472_v33 }
 0x514   : > { %11708 = vmatprep.mubr.msk.bf16.mxu0 %vm14169_vm1, %v18432_v11 }
 0x51b   : > { %11709 = vmatmul.mubr.msk.bf16.gmra.mrb[32].mxu0 %vm18384_vm3, %v18473_v31 }
 0x51c   : > { %11712 = vmatprep.mubr.msk.bf16.mxu0 %vm14169_vm1, %v18432_v11 }
 0x523   : > { %11713 = vmatmul.mubr.msk.bf16.gmra.mrb[36].mxu0 %vm18384_vm3, %v18474_v61 }
 0x524   : > { %11716 = vmatprep.mubr.msk.bf16.mxu0 %vm14169_vm1, %v18432_v11 }
 0x52b   : > { %11717 = vmatmul.mubr.msk.bf16.gmra.mrb[40].mxu0 %vm18384_vm3, %v18475_v57 }
 0x52c   : > { %11720 = vmatprep.mubr.msk.bf16.mxu0 %vm14169_vm1, %v18432_v11 }
 0x533   : > { %11721 = vmatmul.mubr.msk.bf16.gmra.mrb[44].mxu0 %vm18384_vm3, %v18476_v19  ;;  %v10236_v19 = vsel %vm4406_vm7, 1.0, %v18432_v11 }
 0x534   : > { %11724 = vmatprep.mubr.msk.bf16.mxu0 %vm14169_vm1, %v18432_v11 }
 0x53b   : > { %11725 = vmatmul.mubr.msk.bf16.gmra.mrb[48].mxu0 %vm18384_vm3, %v18477_v10 }
 0x53c   : > { %11728 = vmatprep.mubr.msk.bf16.mxu0 %vm14169_vm1, %v18432_v11 }
 0x543   : > { %11729 = vmatmul.mubr.msk.bf16.gmra.mrb[52].mxu0 %vm18384_vm3, %v18478_v39 }
 0x544   : > { %11732 = vmatprep.mubr.msk.bf16.mxu0 %vm14169_vm1, %v18432_v11 }
 0x54b   : > { %11733 = vmatmul.mubr.msk.bf16.gmra.mrb[56].mxu0 %vm18384_vm3, %v18479_v3  ;;  %v10237_v3 = vsel %vm4358_vm10, 1.0, %v18432_v11 }
 0x54c   : > { %11736 = vmatprep.mubr.msk.bf16.mxu0 %vm14169_vm1, %v18432_v11 }
 0x553   : > { %11737 = vmatmul.mubr.msk.bf16.gmra.mrb[60].mxu0 %vm18384_vm3, %v14793_v0  ;;  %v18480_v0 = vld [vmem:[#allocation31_spill] sm:$0xff] }
 0x554   : > { %11740 = vmatprep.mubr.msk.bf16.mxu0 %vm14169_vm1, %v18432_v11 }
 0x55b   : > { %11741 = vmatmul.mubr.msk.bf16.gmra.mrb[64].mxu0 %vm18384_vm3, %v14806_v12  ;;  %v18481_v12 = vld [vmem:[#allocation32_spill] sm:$0xff] }
 0x55c   : > { %11744 = vmatprep.mubr.msk.bf16.mxu0 %vm14169_vm1, %v18432_v11 }
 0x563   : > { %11745 = vmatmul.mubr.msk.bf16.gmra.mrb[68].mxu0 %vm18384_vm3, %v14818_v45 }
 0x564   : > { %11748 = vmatprep.mubr.msk.bf16.mxu0 %vm14169_vm1, %v18432_v11 }
 0x56b   : > { %11749 = vmatmul.mubr.msk.bf16.gmra.mrb[72].mxu0 %vm18384_vm3, %v15380_v42 }
 0x56c   : > { %11752 = vmatprep.mubr.msk.bf16.mxu0 %vm14169_vm1, %v18432_v11 }
 0x573   : > { %11753 = vmatmul.mubr.msk.bf16.gmra.mrb[76].mxu0 %vm18384_vm3, %v15380_v42 }
 0x574   : > { %11756 = vmatprep.mubr.msk.bf16.mxu0 %vm14169_vm1, %v18432_v11 }
 0x57b   : > { %11757 = vmatmul.mubr.msk.bf16.gmra.mrb[108].mxu0 %vm18384_vm3, %v15380_v42 }
 0x57c   : > { %11762 = vmatprep.mubr.msk.bf16.mxu0 %vm14169_vm1, %v18432_v11 }
 0x583   : > { %11763 = vmatmul.mubr.msk.bf16.vlgmr.msra.gmra.mrb[0].mxu0 %vm18384_vm3, %v18480_v0 }
 0x584   : > { %11766 = vmatprep.mubr.msk.bf16.mxu0 %vm14169_vm1, %v18432_v11  ;;  %11847 = vmatpush3.bf16.msra.mxu0 %v4776_v4  ;;  %v10238_v4 = vsel %vm15803_vm6, 1.0, %v18432_v11 }
 0x58b   : > { %11767 = vmatmul.mubr.msk.bf16.gmra.mrb[4].mxu0 %vm18384_vm3, %v18481_v12  ;;  %v4260_v12 = vadd.s32 2, %v15764_v14 }
 0x58c   : > { %11770 = vmatprep.mubr.msk.bf16.mxu0 %vm14169_vm1, %v18432_v11 }
 0x58d   : > { %vm4278_vm13 = vcmp.ge.s32.totalorder %v4260_v12, 0 }
 0x593   : > { %11771 = vmatmul.mubr.msk.bf16.gmra.mrb[8].mxu0 %vm18384_vm3, %v14952_v52  ;;  %v18482_v52 = vld [vmem:[#allocation33_spill] sm:$0xff] }
 0x594   : > { %11774 = vmatprep.mubr.msk.bf16.mxu0 %vm14169_vm1, %v18432_v11 }
 0x59b   : > { %11775 = vmatmul.mubr.msk.bf16.gmra.mrb[12].mxu0 %vm18384_vm3, %v14960_v9  ;;  %v18483_v9 = vld [vmem:[#allocation34_spill] sm:$0xff] }
 0x59c   : > { %11778 = vmatprep.mubr.msk.bf16.mxu0 %vm14169_vm1, %v18432_v11 }
 0x5a3   : > { %11779 = vmatmul.mubr.msk.bf16.gmra.mrb[16].mxu0 %vm18384_vm3, %v14968_v32  ;;  %v18484_v32 = vld [vmem:[#allocation35_spill] sm:$0xff] }
 0x5a4   : > { %11782 = vmatprep.mubr.msk.bf16.mxu0 %vm14169_vm1, %v18432_v11 }
 0x5a6   : > { %v3515_v45 = vpop.f32.mrb[104].mxu0 }
 0x5a7   : > { %v11672_v42 = vpop.f32.mrb[105].mxu0 }
 0x5a8   : > { %v3517_v38 = vpop.f32.mrb[106].mxu0 }
 0x5a9   : > { %v11673_v40 = vpop.f32.mrb[107].mxu0 }
 0x5ab   : > { %11783 = vmatmul.mubr.msk.bf16.gmra.mrb[20].mxu0 %vm18384_vm3, %v18482_v52 }
 0x5ac   : > { %11786 = vmatprep.mubr.msk.bf16.mxu0 %vm14169_vm1, %v18432_v11 }
 0x5b3   : > { %11787 = vmatmul.mubr.msk.bf16.gmra.mrb[24].mxu0 %vm18384_vm3, %v18483_v9 }
 0x5b4   : > { %11790 = vmatprep.mubr.msk.bf16.mxu0 %vm14169_vm1, %v18432_v11 }
 0x5bb   : > { %11791 = vmatmul.mubr.msk.bf16.gmra.mrb[28].mxu0 %vm18384_vm3, %v18484_v32 }
 0x5bc   : > { %11794 = vmatprep.mubr.msk.bf16.mxu0 %vm14169_vm1, %v18432_v11 }
 0x5c3   : > { %11795 = vmatmul.mubr.msk.bf16.gmra.mrb[32].mxu0 %vm18384_vm3, %v18485_v51 }
 0x5c4   : > { %11798 = vmatprep.mubr.msk.bf16.mxu0 %vm14169_vm1, %v18432_v11 }
 0x5cb   : > { %11799 = vmatmul.mubr.msk.bf16.gmra.mrb[36].mxu0 %vm18384_vm3, %v18486_v36 }
 0x5cc   : > { %11802 = vmatprep.mubr.msk.bf16.mxu0 %vm14169_vm1, %v18432_v11 }
 0x5d3   : > { %11803 = vmatmul.mubr.msk.bf16.gmra.mrb[40].mxu0 %vm18384_vm3, %v18487_v50 }
 0x5d4   : > { %11806 = vmatprep.mubr.msk.bf16.mxu0 %vm14169_vm1, %v18432_v11 }
 0x5db   : > { %11807 = vmatmul.mubr.msk.bf16.gmra.mrb[44].mxu0 %vm18384_vm3, %v18488_v59 }
 0x5dc   : > { %11810 = vmatprep.mubr.msk.bf16.mxu0 %vm14169_vm1, %v18432_v11 }
 0x5e3   : > { %11811 = vmatmul.mubr.msk.bf16.gmra.mrb[48].mxu0 %vm18384_vm3, %v18489_v27 }
 0x5e4   : > { %11814 = vmatprep.mubr.msk.bf16.mxu0 %vm14169_vm1, %v18432_v11 }
 0x5eb   : > { %11815 = vmatmul.mubr.msk.bf16.gmra.mrb[52].mxu0 %vm18384_vm3, %v18490_v60 }
 0x5ec   : > { %11818 = vmatprep.mubr.msk.bf16.mxu0 %vm14169_vm1, %v18432_v11 }
 0x5f3   : > { %11819 = vmatmul.mubr.msk.bf16.gmra.mrb[56].mxu0 %vm18384_vm3, %v18491_v48 }
 0x5f4   : > { %11822 = vmatprep.mubr.msk.bf16.mxu0 %vm14169_vm1, %v18432_v11 }
 0x5fb   : > { %11823 = vmatmul.mubr.msk.bf16.gmra.mrb[60].mxu0 %vm18384_vm3, %v18492_v5 }
 0x5fc   : > { %11826 = vmatprep.mubr.msk.bf16.mxu0 %vm14169_vm1, %v18432_v11 }
 0x603   : > { %11827 = vmatmul.mubr.msk.bf16.gmra.mrb[64].mxu0 %vm18384_vm3, %v18493_v47 }
 0x604   : > { %11830 = vmatprep.mubr.msk.bf16.mxu0 %vm14169_vm1, %v18432_v11 }
 0x60b   : > { %11831 = vmatmul.mubr.msk.bf16.gmra.mrb[68].mxu0 %vm18384_vm3, %v15075_v21 }
 0x60c   : > { %11834 = vmatprep.mubr.msk.bf16.mxu0 %vm14169_vm1, %v18432_v11 }
 0x613   : > { %11835 = vmatmul.mubr.msk.bf16.gmra.mrb[72].mxu0 %vm18384_vm3, %v15071_v58 }
 0x614   : > { %11838 = vmatprep.mubr.msk.bf16.mxu0 %vm14169_vm1, %v18432_v11 }
 0x61b   : > { %11839 = vmatmul.mubr.msk.bf16.gmra.mrb[76].mxu0 %vm18384_vm3, %v15071_v58 }
 0x61c   : > { %11842 = vmatprep.mubr.msk.bf16.mxu0 %vm14169_vm1, %v18432_v11 }
 0x623   : > { %11843 = vmatmul.mubr.msk.bf16.gmra.mrb[112].mxu0 %vm18384_vm3, %v15071_v58  ;;  %v15773_v58 = vld [vmem:[%s18333_s8] ss:$0 sm:$0xff] }
 0x624   : > { %11848 = vmatprep.mubr.msk.bf16.mxu0 %vm14169_vm1, %v18432_v11 }
 0x64e   : > { %v3759_v21 = vpop.f32.mrb[108].mxu0 }
 0x64f   : > { %v11758_v23 = vpop.f32.mrb[109].mxu0 }
 0x650   : > { %v3761_v22 = vpop.f32.mrb[110].mxu0  ;;  %v10239_v23 = vsel %vm4409_vm8, 1.0, %v18432_v11 }
 0x651   : > { %v11759_v26 = vpop.f32.mrb[111].mxu0 }
 0x656   : > { %v3843_v35 = vpop.f32.mrb[0].mxu0 }
 0x657   : > { %v4053_v2 = vmul.f32 %v15773_v58, %v3843_v35  ;;  %v11764_v24 = vpop.f32.mrb[1].mxu0 }
 0x658   : > { %v3846_v17 = vpop.f32.mrb[2].mxu0 }
 0x659   : > { %v4098_v18 = vadd.f32 %v15778_v16, %v4053_v2  ;;  %v4054_v6 = vmul.f32 %v15773_v58, %v3846_v17  ;;  %v11765_v28 = vpop.f32.mrb[3].mxu0 }
 0x65b   : > { %vm4138_vm11 = vcmp.ge.f32.partialorder %v4098_v18, 0.0  ;;  %v4178_v44 = vmul.f32 0.1, %v4098_v18  ;;  %v4099_v37 = vadd.f32 %v15778_v16, %v4054_v6 }
 0x65d   : > { %v4218_v55 = vsel %vm4138_vm11, %v4098_v18, %v4178_v44  ;;  %vm4139_vm14 = vcmp.ge.f32.partialorder %v4099_v37, 0.0  ;;  %v4179_v56 = vmul.f32 0.1, %v4099_v37 }
 0x65e   : > { %v3851_v8 = vpop.f32.mrb[4].mxu0  ;;  %v4524_v7 = vmul.f32 %v10234_v1, %v4218_v55  ;;  %v4261_v1 = vadd.s32 3, %v15764_v14 }
 0x65f   : > { %v4219_v20 = vsel %vm4139_vm14, %v4099_v37, %v4179_v56  ;;  %v4055_v30 = vmul.f32 %v15773_v58, %v3851_v8  ;;  %v11768_v41 = vpop.f32.mrb[5].mxu0  ;;  %vm4292_vm14 = vcmp.lt.s32.totalorder %v4260_v12, 16 }
 0x660   : > { %v4525_v29 = vmul.f32 %v10235_v63, %v4219_v20  ;;  %v3854_v53 = vpop.f32.mrb[6].mxu0 }
 0x661   : > { %v4100_v15 = vadd.f32 %v15778_v16, %v4055_v30  ;;  %v4056_v25 = vmul.f32 %v15773_v58, %v3854_v53  ;;  %v11769_v33 = vpop.f32.mrb[7].mxu0 }
 0x662   : > { %v15813_v31 = vpack.c.bf16 %v4525_v29, %v4524_v7 }
 0x663   : > { %vm4140_vm11 = vcmp.ge.f32.partialorder %v4100_v15, 0.0  ;;  %v4180_v61 = vmul.f32 0.1, %v4100_v15  ;;  %v4101_v57 = vadd.f32 %v15778_v16, %v4056_v25 }
 0x664   : > { %v4590_v45 = vshll.u32 %v15813_v31, 16  ;;  %v4588_v48 = vshrl.u32 %v15813_v31, 16 }
 0x665   : > { %v4220_v10 = vsel %vm4140_vm11, %v4100_v15, %v4180_v61  ;;  %vm4141_vm12 = vcmp.ge.f32.partialorder %v4101_v57, 0.0  ;;  %v4181_v39 = vmul.f32 0.1, %v4101_v57  ;;  %vm15841_vm11 = vmand %vm4278_vm13, %vm4292_vm14  ;;  %vm4279_vm13 = vcmp.ge.s32.totalorder %v4261_v1, 0 }
 0x666   : > { %v3859_v0 = vpop.f32.mrb[8].mxu0  ;;  %v4526_v52 = vmul.f32 %v10236_v19, %v4220_v10  ;;  %v4592_v27 = vrot.slane %v4590_v45, 1  ;;  %vm4361_vm6 = vmand %vm15841_vm11, %vm4318_vm9  ;;  %vm4293_vm14 = vcmp.lt.s32.totalorder %v4261_v1, 16  ;;  %v10241_v25 = vsel %vm15841_vm11, 1.0, %v18432_v11 }
 0x667   : > { %v4221_v42 = vsel %vm4141_vm12, %v4101_v57, %v4181_v39  ;;  %v4057_v38 = vmul.f32 %v15773_v58, %v3859_v0  ;;  %v11772_v40 = vpop.f32.mrb[9].mxu0  ;;  %vm4722_vm12 = vcmask 31744   ;;  %v10240_v41 = vsel %vm4361_vm6, 1.0, %v18432_v11 }
 0x668   : > { %v4527_v9 = vmul.f32 %v10237_v3, %v4221_v42  ;;  %v3862_v32 = vpop.f32.mrb[10].mxu0  ;;  %v4593_v35 = vor.u32 %v4592_v27, %v4588_v48  ;;  %vm5746_vm6 = vsmask.f32 3328  ;;  %v4262_v48 = vadd.s32 4, %v15764_v14 }
 0x669   : > { %v4102_v51 = vadd.f32 %v15778_v16, %v4057_v38  ;;  %v4058_v36 = vmul.f32 %v15773_v58, %v3862_v32  ;;  %v11773_v50 = vpop.f32.mrb[11].mxu0 }
 0x66a   : > { %v15827_v59 = vpack.c.bf16 %v4527_v9, %v4526_v52 }
 0x66b   : > { %vm4142_vm7 = vcmp.ge.f32.partialorder %v4102_v51, 0.0  ;;  %v4182_v60 = vmul.f32 0.1, %v4102_v51  ;;  %v4103_v34 = vadd.f32 %v15778_v16, %v4058_v36 }
 0x66c   : > { %v4595_v5 = vshll.u32 %v15827_v59, 16  ;;  %v4599_v47 = vshrl.u32 %v15827_v59, 16 }
 0x66d   : > { %v4222_v21 = vsel %vm4142_vm7, %v4102_v51, %v4182_v60  ;;  %vm4143_vm10 = vcmp.ge.f32.partialorder %v4103_v34, 0.0  ;;  %v4183_v13 = vmul.f32 0.1, %v4103_v34 }
 0x66e   : > { %v3867_v26 = vpop.f32.mrb[12].mxu0  ;;  %v4597_v62 = vrot.slane %v4595_v5, 1  ;;  %v5747_v2 = vrot.slane %v4599_v47, 4  ;;  %v5748_v18 = vrot.slane %v4595_v5, 5  ;;  %v4528_v6 = vmul.f32 %v10238_v4, %v4222_v21 }
 0x66f   : > { %v4223_v24 = vsel %vm4143_vm10, %v4103_v34, %v4183_v13  ;;  %v4059_v17 = vmul.f32 %v15773_v58, %v3867_v26  ;;  %v11776_v46 = vpop.f32.mrb[13].mxu0  ;;  %vm15871_vm10 = vmand %vm4279_vm13, %vm4293_vm14 }
 0x670   : > { %v4529_v28 = vmul.f32 %v10239_v23, %v4223_v24  ;;  %v3870_v44 = vpop.f32.mrb[14].mxu0  ;;  %v4598_v37 = vsel %vm1156_vm2, %v4593_v35, %v4597_v62  ;;  %v5749_v8 = vor.u32 %v5748_v18, %v5747_v2  ;;  %v4601_v61 = vor.u32 %v4599_v47, %v4597_v62  ;;  %vm4364_vm13 = vmand %vm15871_vm10, %vm4318_vm9 }
 0x671   : > { %v4104_v55 = vadd.f32 %v15778_v16, %v4059_v17  ;;  %v4060_v56 = vmul.f32 %v15773_v58, %v3870_v44  ;;  %v11777_v63 = vpop.f32.mrb[15].mxu0  ;;  %11849 = vmatmul.mubr.msk.bf16.vlgmr.msra.gmra.mrb[116].mxu0 %vm4722_vm12, %v4598_v37  ;;  %v10243_v13 = vsel %vm4364_vm13, 1.0, %v18432_v11  ;;  %vm4415_vm13 = vmand %vm15871_vm10, %vm4397_vm15 }
 0x672   : > { %v15855_v20 = vpack.c.bf16 %v4529_v28, %v4528_v6  ;;  %11852 = vmatprep.mubr.msk.bf16.mxu0 %vm14169_vm1, %v18432_v11 }
 0x673   : > { %vm4144_vm8 = vcmp.ge.f32.partialorder %v4104_v55, 0.0  ;;  %v4184_v30 = vmul.f32 0.1, %v4104_v55  ;;  %v4105_v54 = vadd.f32 %v15778_v16, %v4060_v56  ;;  %9275 = vrot.lane.b32.xlu0 %v4104_v55, %s14171_s20 }
 0x674   : > { %v4603_v7 = vshll.u32 %v15855_v20, 16  ;;  %v4607_v29 = vshrl.u32 %v15855_v20, 16 }
 0x675   : > { %v4224_v53 = vsel %vm4144_vm8, %v4104_v55, %v4184_v30  ;;  %vm4145_vm7 = vcmp.ge.f32.partialorder %v4105_v54, 0.0  ;;  %v4185_v15 = vmul.f32 0.1, %v4105_v54  ;;  %vm4412_vm8 = vmand %vm15841_vm11, %vm4397_vm15 }
 0x676   : > { %v3875_v33 = vpop.f32.mrb[16].mxu0  ;;  %v4605_v57 = vrot.slane %v4603_v7, 1  ;;  %v5751_v19 = vrot.slane %v4603_v7, 5  ;;  %v5750_v10 = vrot.slane %v4607_v29, 4  ;;  %v4530_v45 = vmul.f32 %v10240_v41, %v4224_v53 }
 0x677   : > { %v4225_v39 = vsel %vm4145_vm7, %v4105_v54, %v4185_v15  ;;  %v4061_v3 = vmul.f32 %v15773_v58, %v3875_v33  ;;  %9277 = vrot.lane.b32.xlu0 %v4105_v54, %s14171_s20  ;;  %v11780_v0 = vpop.f32.mrb[17].mxu0  ;;  %v10242_v34 = vsel %vm4412_vm8, 1.0, %v18432_v11  ;;  %vm4280_vm7 = vcmp.ge.s32.totalorder %v4262_v48, 0 }
 0x678   : > { %v4531_v42 = vmul.f32 %v10241_v25, %v4225_v39  ;;  %v3878_v38 = vpop.f32.mrb[18].mxu0  ;;  %v4606_v40 = vsel %vm1156_vm2, %v4601_v61, %v4605_v57  ;;  %v5752_v51 = vor.u32 %v5751_v19, %v5750_v10  ;;  %v4609_v22 = vor.u32 %v4607_v29, %v4605_v57 }
 0x679   : > { %v4106_v52 = vadd.f32 %v15778_v16, %v4061_v3  ;;  %v4062_v9 = vmul.f32 %v15773_v58, %v3878_v38  ;;  %v11781_v32 = vpop.f32.mrb[19].mxu0  ;;  %11853 = vmatmul.mubr.msk.bf16.gmra.mrb[120].mxu0 %vm4722_vm12, %v4606_v40  ;;  %vm4294_vm8 = vcmp.lt.s32.totalorder %v4262_v48, 16  ;;  %v10244_v41 = vsel %vm15871_vm10, 1.0, %v18432_v11 }
 0x67a   : > { %v15883_v36 = vpack.c.bf16 %v4531_v42, %v4530_v45  ;;  %11856 = vmatprep.mubr.msk.bf16.mxu0 %vm14169_vm1, %v18432_v11  ;;  %v15894_v60 = vsel %vm5746_vm6, %v5749_v8, %v5752_v51  ;;  %v10245_v25 = vsel %vm4415_vm13, 1.0, %v18432_v11  ;;  %v4263_v40 = vadd.s32 5, %v15764_v14 }
 0x67b   : > { %vm4146_vm14 = vcmp.ge.f32.partialorder %v4106_v52, 0.0  ;;  %v4186_v50 = vmul.f32 0.1, %v4106_v52  ;;  %v4107_v27 = vadd.f32 %v15778_v16, %v4062_v9  ;;  %9279 = vrot.lane.b32.xlu1 %v4106_v52, %s14171_s20 }
 0x67c   : > { %v4611_v4 = vshll.u32 %v15883_v36, 16  ;;  %v4615_v5 = vshrl.u32 %v15883_v36, 16  ;;  %v5461_v49 = vrot.slane %v15883_v36, 4 }
 0x67d   : > { %v4226_v47 = vsel %vm4146_vm14, %v4106_v52, %v4186_v50  ;;  %vm4147_vm11 = vcmp.ge.f32.partialorder %v4107_v27, 0.0  ;;  %v4187_v21 = vmul.f32 0.1, %v4107_v27 }
 0x67e   : > { %v3883_v23 = vpop.f32.mrb[20].mxu0  ;;  %v4613_v26 = vrot.slane %v4611_v4, 1  ;;  %v5754_v24 = vrot.slane %v4615_v5, 4  ;;  %v5755_v17 = vrot.slane %v4611_v4, 5  ;;  %v4532_v46 = vmul.f32 %v10242_v34, %v4226_v47 }
 0x67f   : > { %v4227_v35 = vsel %vm4147_vm11, %v4107_v27, %v4187_v21  ;;  %v4063_v62 = vmul.f32 %v15773_v58, %v3883_v23  ;;  %9281 = vrot.lane.b32.xlu1 %v4107_v27, %s14171_s20  ;;  %v11784_v2 = vpop.f32.mrb[21].mxu0  ;;  %vm15924_vm11 = vmand %vm4280_vm7, %vm4294_vm8  ;;  %vm4281_vm7 = vcmp.ge.s32.totalorder %v4263_v40, 0  ;;  %vm4295_vm8 = vcmp.lt.s32.totalorder %v4263_v40, 16 }
 0x680   : > { %v4533_v18 = vmul.f32 %v10243_v13, %v4227_v35  ;;  %v3886_v6 = vpop.f32.mrb[22].mxu0  ;;  %v4614_v28 = vsel %vm1156_vm2, %v4609_v22, %v4613_v26  ;;  %v5756_v55 = vor.u32 %v5755_v17, %v5754_v24  ;;  %v4617_v61 = vor.u32 %v4615_v5, %v4613_v26  ;;  %vm4367_vm10 = vmand %vm15924_vm11, %vm4318_vm9 }
 0x681   : > { %v4108_v44 = vadd.f32 %v15778_v16, %v4063_v62  ;;  %v4064_v37 = vmul.f32 %v15773_v58, %v3886_v6  ;;  %v11785_v1 = vpop.f32.mrb[23].mxu0  ;;  %11857 = vmatmul.mubr.msk.bf16.gmra.mrb[124].mxu0 %vm4722_vm12, %v4614_v28  ;;  %v10246_v27 = vsel %vm4367_vm10, 1.0, %v18432_v11  ;;  %v10247_v23 = vsel %vm15924_vm11, 1.0, %v18432_v11  ;;  %vm4418_vm10 = vmand %vm15924_vm11, %vm4397_vm15 }
 0x682   : > { %v15907_v56 = vpack.c.bf16 %v4533_v18, %v4532_v46  ;;  %11860 = vmatprep.mubr.msk.bf16.mxu0 %vm14169_vm1, %v18432_v11  ;;  %v15918_v30 = vsel %vm5746_vm6, %v5752_v51, %v5756_v55 }
 0x683   : > { %vm4148_vm14 = vcmp.ge.f32.partialorder %v4108_v44, 0.0  ;;  %v4188_v63 = vmul.f32 0.1, %v4108_v44  ;;  %v4109_v8 = vadd.f32 %v15778_v16, %v4064_v37  ;;  %9283 = vrot.lane.b32.xlu0 %v4108_v44, %s14171_s20 }
 0x684   : > { %v4619_v7 = vshll.u32 %v15907_v56, 16  ;;  %v4623_v29 = vshrl.u32 %v15907_v56, 16 }
 0x685   : > { %v4228_v53 = vsel %vm4148_vm14, %v4108_v44, %v4188_v63  ;;  %vm4149_vm3 = vcmp.ge.f32.partialorder %v4109_v8, 0.0  ;;  %v4189_v15 = vmul.f32 0.1, %v4109_v8  ;;  %9285 = vrot.lane.b32.xlu1 %v4109_v8, %s14171_s20  ;;  %vm15963_vm14 = vmand %vm4281_vm7, %vm4295_vm8 }
 0x686   : > { %v3891_v33 = vpop.f32.mrb[24].mxu0  ;;  %v4621_v57 = vrot.slane %v4619_v7, 1  ;;  %v5758_v3 = vrot.slane %v4623_v29, 4  ;;  %v5759_v0 = vrot.slane %v4619_v7, 5  ;;  %v4534_v12 = vmul.f32 %v10244_v41, %v4228_v53 }
 0x687   : > { %v4229_v19 = vsel %vm4149_vm3, %v4109_v8, %v4189_v15  ;;  %v4065_v10 = vmul.f32 %v15773_v58, %v3891_v33  ;;  %v11788_v39 = vpop.f32.mrb[25].mxu0  ;;  %v10248_v53 = vsel %vm4418_vm10, 1.0, %v18432_v11  ;;  %vm4421_vm10 = vmand %vm15963_vm14, %vm4397_vm15 }
 0x688   : > { %v4535_v45 = vmul.f32 %v10245_v25, %v4229_v19  ;;  %v3894_v42 = vpop.f32.mrb[26].mxu0  ;;  %v15938_v38 = vsel %vm1156_vm2, %v4617_v61, %v4621_v57  ;;  %v5760_v51 = vor.u32 %v5759_v0, %v5758_v3  ;;  %v4625_v26 = vor.u32 %v4623_v29, %v4621_v57 }
 0x689   : > { %v4110_v52 = vadd.f32 %v15778_v16, %v4065_v10  ;;  %v4066_v9 = vmul.f32 %v15773_v58, %v3894_v42  ;;  %v11789_v32 = vpop.f32.mrb[27].mxu0  ;;  %11861 = vmatmul.mubr.msk.bf16.gmra.mrb[128].mxu0 %vm4722_vm12, %v15938_v38  ;;  %v4264_v25 = vadd.s32 6, %v15764_v14 }
 0x68a   : > { %v15945_v50 = vpack.c.bf16 %v4535_v45, %v4534_v12  ;;  %11864 = vmatprep.mubr.msk.bf16.mxu0 %vm14169_vm1, %v18432_v11  ;;  %v15953_v48 = vsel %vm5746_vm6, %v5756_v55, %v5760_v51 }
 0x68b   : > { %vm4150_vm3 = vcmp.ge.f32.partialorder %v4110_v52, 0.0  ;;  %v4190_v34 = vmul.f32 0.1, %v4110_v52  ;;  %v4111_v4 = vadd.f32 %v15778_v16, %v4066_v9  ;;  %9287 = vrot.lane.b32.xlu0 %v4110_v52, %s14171_s20  ;;  %vm4282_vm8 = vcmp.ge.s32.totalorder %v4264_v25, 0 }
 0x68c   : > { %v4627_v5 = vshll.u32 %v15945_v50, 16  ;;  %v4631_v47 = vshrl.u32 %v15945_v50, 16 }
 0x68d   : > { %v4230_v21 = vsel %vm4150_vm3, %v4110_v52, %v4190_v34  ;;  %vm4151_vm13 = vcmp.ge.f32.partialorder %v4111_v4, 0.0  ;;  %v4191_v13 = vmul.f32 0.1, %v4111_v4  ;;  %9289 = vrot.lane.b32.xlu1 %v4111_v4, %s14171_s20  ;;  %vm4370_vm3 = vmand %vm15963_vm14, %vm4318_vm9 }
 0x68e   : > { %v3899_v22 = vpop.f32.mrb[28].mxu0  ;;  %v4629_v35 = vrot.slane %v4627_v5, 1  ;;  %v5762_v46 = vrot.slane %v4631_v47, 4  ;;  %v5763_v18 = vrot.slane %v4627_v5, 5  ;;  %v4536_v6 = vmul.f32 %v10246_v27, %v4230_v21 }
 0x68f   : > { %v4231_v62 = vsel %vm4151_vm13, %v4111_v4, %v4191_v13  ;;  %v4067_v2 = vmul.f32 %v15773_v58, %v3899_v22  ;;  %v11792_v24 = vpop.f32.mrb[29].mxu0  ;;  %v10249_v19 = vsel %vm4370_vm3, 1.0, %v18432_v11  ;;  %vm4296_vm13 = vcmp.lt.s32.totalorder %v4264_v25, 16 }
 0x690   : > { %v4537_v28 = vmul.f32 %v10247_v23, %v4231_v62  ;;  %v3902_v44 = vpop.f32.mrb[30].mxu0  ;;  %v15968_v37 = vsel %vm1156_vm2, %v4625_v26, %v4629_v35  ;;  %v5764_v8 = vor.u32 %v5763_v18, %v5762_v46  ;;  %v4633_v39 = vor.u32 %v4631_v47, %v4629_v35 }
 0x691   : > { %v4112_v1 = vadd.f32 %v15778_v16, %v4067_v2  ;;  %v4068_v55 = vmul.f32 %v15773_v58, %v3902_v44  ;;  %v11793_v63 = vpop.f32.mrb[31].mxu0  ;;  %11865 = vmatmul.mubr.msk.bf16.gmra.mrb[132].mxu0 %vm4722_vm12, %v15968_v37  ;;  %v10250_v22 = vsel %vm15963_vm14, 1.0, %v18432_v11  ;;  %v10251_v46 = vsel %vm4421_vm10, 1.0, %v18432_v11 }
 0x692   : > { %v15978_v41 = vpack.c.bf16 %v4537_v28, %v4536_v6  ;;  %11868 = vmatprep.mubr.msk.bf16.mxu0 %vm14169_vm1, %v18432_v11  ;;  %v15989_v29 = vsel %vm5746_vm6, %v5760_v51, %v5764_v8 }
 0x693   : > { %vm4152_vm7 = vcmp.ge.f32.partialorder %v4112_v1, 0.0  ;;  %v4192_v54 = vmul.f32 0.1, %v4112_v1  ;;  %v4113_v7 = vadd.f32 %v15778_v16, %v4068_v55  ;;  %9291 = vrot.lane.b32.xlu0 %v4112_v1, %s14171_s20 }
 0x694   : > { %v4635_v15 = vshll.u32 %v15978_v41, 16  ;;  %v4639_v33 = vshrl.u32 %v15978_v41, 16 }
 0x695   : > { %v4232_v61 = vsel %vm4152_vm7, %v4112_v1, %v4192_v54  ;;  %vm4153_vm11 = vcmp.ge.f32.partialorder %v4113_v7, 0.0  ;;  %v4193_v57 = vmul.f32 0.1, %v4113_v7  ;;  %9293 = vrot.lane.b32.xlu1 %v4113_v7, %s14171_s20  ;;  %vm16022_vm7 = vmand %vm4282_vm8, %vm4296_vm13 }
 0x696   : > { %v3907_v10 = vpop.f32.mrb[32].mxu0  ;;  %v4637_v3 = vrot.slane %v4635_v15, 1  ;;  %v5766_v42 = vrot.slane %v4639_v33, 4  ;;  %v5767_v40 = vrot.slane %v4635_v15, 5  ;;  %v4538_v52 = vmul.f32 %v10248_v53, %v4232_v61  ;;  %vm4373_vm14 = vmand %vm16022_vm7, %vm4318_vm9 }
 0x697   : > { %v4233_v0 = vsel %vm4153_vm11, %v4113_v7, %v4193_v57  ;;  %v4069_v12 = vmul.f32 %v15773_v58, %v3907_v10  ;;  %v11796_v45 = vpop.f32.mrb[33].mxu0  ;;  %v4265_v15 = vadd.s32 7, %v15764_v14  ;;  %v10252_v10 = vsel %vm4373_vm14, 1.0, %v18432_v11  ;;  %vm4424_vm14 = vmand %vm16022_vm7, %vm4397_vm15 }
 0x698   : > { %v4539_v9 = vmul.f32 %v10249_v19, %v4233_v0  ;;  %v3910_v32 = vpop.f32.mrb[34].mxu0  ;;  %v15999_v51 = vsel %vm1156_vm2, %v4633_v39, %v4637_v3  ;;  %v5768_v5 = vor.u32 %v5767_v40, %v5766_v42  ;;  %v4641_v6 = vor.u32 %v4639_v33, %v4637_v3 }
 0x699   : > { %v4114_v27 = vadd.f32 %v15778_v16, %v4069_v12  ;;  %v4070_v34 = vmul.f32 %v15773_v58, %v3910_v32  ;;  %v11797_v4 = vpop.f32.mrb[35].mxu0  ;;  %11869 = vmatmul.mubr.msk.bf16.gmra.mrb[136].mxu0 %vm4722_vm12, %v15999_v51  ;;  %vm4283_vm13 = vcmp.ge.s32.totalorder %v4265_v15, 0  ;;  %vm4297_vm10 = vcmp.lt.s32.totalorder %v4265_v15, 16 }
 0x69a   : > { %v16005_v47 = vpack.c.bf16 %v4539_v9, %v4538_v52  ;;  %11872 = vmatprep.mubr.msk.bf16.mxu0 %vm14169_vm1, %v18432_v11  ;;  %v16016_v23 = vsel %vm5746_vm6, %v5764_v8, %v5768_v5  ;;  %v10253_v52 = vsel %vm16022_vm7, 1.0, %v18432_v11 }
 0x69b   : > { %vm4154_vm3 = vcmp.ge.f32.partialorder %v4114_v27, 0.0  ;;  %v4194_v21 = vmul.f32 0.1, %v4114_v27  ;;  %v4115_v13 = vadd.f32 %v15778_v16, %v4070_v34  ;;  %9295 = vrot.lane.b32.xlu0 %v4114_v27, %s14171_s20 }
 0x69c   : > { %v4643_v35 = vshll.u32 %v16005_v47, 16  ;;  %v4647_v62 = vshrl.u32 %v16005_v47, 16 }
 0x69d   : > { %v4234_v2 = vsel %vm4154_vm3, %v4114_v27, %v4194_v21  ;;  %vm4155_vm11 = vcmp.ge.f32.partialorder %v4115_v13, 0.0  ;;  %v4195_v24 = vmul.f32 0.1, %v4115_v13  ;;  %9297 = vrot.lane.b32.xlu1 %v4115_v13, %s14171_s20 }
 0x69e   : > { %v3915_v18 = vpop.f32.mrb[36].mxu0  ;;  %v4645_v17 = vrot.slane %v4643_v35, 1  ;;  %v5770_v55 = vrot.slane %v4647_v62, 4  ;;  %v5771_v63 = vrot.slane %v4643_v35, 5  ;;  %v4540_v8 = vmul.f32 %v10250_v22, %v4234_v2 }
 0x69f   : > { %v4235_v28 = vsel %vm4155_vm11, %v4115_v13, %v4195_v24  ;;  %v4071_v44 = vmul.f32 %v15773_v58, %v3915_v18  ;;  %v11800_v1 = vpop.f32.mrb[37].mxu0  ;;  %vm16061_vm11 = vmand %vm4283_vm13, %vm4297_vm10 }
 0x6a0   : > { %v4541_v54 = vmul.f32 %v10251_v46, %v4235_v28  ;;  %v3918_v7 = vpop.f32.mrb[38].mxu0  ;;  %v16036_v53 = vsel %vm1156_vm2, %v4641_v6, %v4645_v17  ;;  %v5772_v57 = vor.u32 %v5771_v63, %v5770_v55  ;;  %v4649_v32 = vor.u32 %v4647_v62, %v4645_v17 }
 0x6a1   : > { %18510 = vst [vmem:[#allocation23_spill] sm:$0xff] %v16036_v53  ;;  %v4116_v25 = vadd.f32 %v15778_v16, %v4071_v44  ;;  %v4072_v33 = vmul.f32 %v15773_v58, %v3918_v7  ;;  %v11801_v61 = vpop.f32.mrb[39].mxu0  ;;  %11873 = vmatmul.mubr.msk.bf16.gmra.mrb[140].mxu0 %vm4722_vm12, %v16036_v53  ;;  %v10254_v55 = vsel %vm4424_vm14, 1.0, %v18432_v11  ;;  %vm4427_vm14 = vmand %vm16061_vm11, %vm4397_vm15 }
 0x6a2   : > { %v16043_v19 = vpack.c.bf16 %v4541_v54, %v4540_v8  ;;  %11876 = vmatprep.mubr.msk.bf16.mxu0 %vm14169_vm1, %v18432_v11  ;;  %v16051_v0 = vsel %vm5746_vm6, %v5768_v5, %v5772_v57  ;;  %v4266_v8 = vadd.s32 8, %v15764_v14 }
 0x6a3   : > { %vm4156_vm8 = vcmp.ge.f32.partialorder %v4116_v25, 0.0  ;;  %v4196_v39 = vmul.f32 0.1, %v4116_v25  ;;  %v4117_v3 = vadd.f32 %v15778_v16, %v4072_v33  ;;  %9299 = vrot.lane.b32.xlu0 %v4116_v25, %s14171_s20 }
 0x6a4   : > { %v4651_v12 = vshll.u32 %v16043_v19, 16  ;;  %v4655_v45 = vshrl.u32 %v16043_v19, 16  ;;  %vm4284_vm10 = vcmp.ge.s32.totalorder %v4266_v8, 0 }
 0x6a5   : > { %v4236_v42 = vsel %vm4156_vm8, %v4116_v25, %v4196_v39  ;;  %vm4157_vm3 = vcmp.ge.f32.partialorder %v4117_v3, 0.0  ;;  %v4197_v40 = vmul.f32 0.1, %v4117_v3  ;;  %9301 = vrot.lane.b32.xlu1 %v4117_v3, %s14171_s20  ;;  %vm4376_vm8 = vmand %vm16061_vm11, %vm4318_vm9 }
 0x6a6   : > { %v3923_v9 = vpop.f32.mrb[40].mxu0  ;;  %v4653_v27 = vrot.slane %v4651_v12, 1  ;;  %v5774_v13 = vrot.slane %v4655_v45, 4  ;;  %v5775_v22 = vrot.slane %v4651_v12, 5  ;;  %v4542_v35 = vmul.f32 %v10252_v10, %v4236_v42 }
 0x6a7   : > { %v4237_v34 = vsel %vm4157_vm3, %v4117_v3, %v4197_v40  ;;  %v4073_v4 = vmul.f32 %v15773_v58, %v3923_v9  ;;  %v11804_v5 = vpop.f32.mrb[41].mxu0  ;;  %v10255_v25 = vsel %vm4376_vm8, 1.0, %v18432_v11  ;;  %vm4298_vm3 = vcmp.lt.s32.totalorder %v4266_v8, 16 }
 0x6a8   : > { %v4543_v2 = vmul.f32 %v10253_v52, %v4237_v34  ;;  %v3926_v24 = vpop.f32.mrb[42].mxu0  ;;  %v16066_v46 = vsel %vm1156_vm2, %v4649_v32, %v4653_v27  ;;  %v5776_v17 = vor.u32 %v5775_v22, %v5774_v13  ;;  %v4657_v61 = vor.u32 %v4655_v45, %v4653_v27 }
 0x6a9   : > { %18513 = vst [vmem:[#allocation20_spill] sm:$0xff] %v16066_v46  ;;  %v4118_v62 = vadd.f32 %v15778_v16, %v4073_v4  ;;  %v4074_v18 = vmul.f32 %v15773_v58, %v3926_v24  ;;  %v11805_v6 = vpop.f32.mrb[43].mxu0  ;;  %11877 = vmatmul.mubr.msk.bf16.gmra.mrb[144].mxu0 %vm4722_vm12, %v16066_v46  ;;  %v10256_v24 = vsel %vm16061_vm11, 1.0, %v18432_v11 }
 0x6aa   : > { %v16076_v28 = vpack.c.bf16 %v4543_v2, %v4542_v35  ;;  %11880 = vmatprep.mubr.msk.bf16.mxu0 %vm14169_vm1, %v18432_v11  ;;  %v16087_v1 = vsel %vm5746_vm6, %v5772_v57, %v5776_v17  ;;  %v4584_v35 = vld [vmem:[%s18334_s9] sm:$0x3] }
 0x6ab   : > { %vm4158_vm13 = vcmp.ge.f32.partialorder %v4118_v62, 0.0  ;;  %v4198_v26 = vmul.f32 0.1, %v4118_v62  ;;  %v4119_v44 = vadd.f32 %v15778_v16, %v4074_v18  ;;  %9303 = vrot.lane.b32.xlu0 %v4118_v62, %s14171_s20  ;;  %v4980_v8 = vsel %vm4774_vm5, %v4584_v35, 0 }
 0x6ac   : > { %v4659_v63 = vshll.u32 %v16076_v28, 16  ;;  %v4663_v54 = vshrl.u32 %v16076_v28, 16 }
 0x6ad   : > { %v4238_v7 = vsel %vm4158_vm13, %v4118_v62, %v4198_v26  ;;  %vm4159_vm7 = vcmp.ge.f32.partialorder %v4119_v44, 0.0  ;;  %v4199_v15 = vmul.f32 0.1, %v4119_v44  ;;  %9305 = vrot.lane.b32.xlu1 %v4119_v44, %s14171_s20  ;;  %vm16121_vm13 = vmand %vm4284_vm10, %vm4298_vm3 }
 0x6ae   : > { %v3931_v33 = vpop.f32.mrb[44].mxu0  ;;  %v4661_v10 = vrot.slane %v4659_v63, 1  ;;  %v5778_v12 = vrot.slane %v4663_v54, 4  ;;  %v5779_v42 = vrot.slane %v4659_v63, 5  ;;  %v4544_v40 = vmul.f32 %v10254_v55, %v4238_v7  ;;  %vm4379_vm11 = vmand %vm16121_vm13, %vm4318_vm9 }
 0x6af   : > { %v4239_v57 = vsel %vm4159_vm7, %v4119_v44, %v4199_v15  ;;  %v4075_v39 = vmul.f32 %v15773_v58, %v3931_v33  ;;  %v11808_v3 = vpop.f32.mrb[45].mxu0  ;;  %v10257_v55 = vsel %vm4427_vm14, 1.0, %v18432_v11 }
 0x6b0   : > { %v4545_v52 = vmul.f32 %v10255_v25, %v4239_v57  ;;  %v3934_v9 = vpop.f32.mrb[46].mxu0  ;;  %v16097_v32 = vsel %vm1156_vm2, %v4657_v61, %v4661_v10  ;;  %v5780_v45 = vor.u32 %v5779_v42, %v5778_v12  ;;  %v4665_v63 = vor.u32 %v4663_v54, %v4661_v10 }
 0x6b1   : > { %18514 = vst [vmem:[#allocation26_spill] sm:$0xff] %v16097_v32  ;;  %v4120_v34 = vadd.f32 %v15778_v16, %v4075_v39  ;;  %v4076_v4 = vmul.f32 %v15773_v58, %v3934_v9  ;;  %v11809_v5 = vpop.f32.mrb[47].mxu0  ;;  %11881 = vmatmul.mubr.msk.bf16.gmra.mrb[148].mxu0 %vm4722_vm12, %v16097_v32  ;;  %v4267_v54 = vadd.s32 9, %v15764_v14 }
 0x6b2   : > { %v16103_v27 = vpack.c.bf16 %v4545_v52, %v4544_v40  ;;  %v16115_v2 = vsel %vm5746_vm6, %v5776_v17, %v5780_v45 }
 0x6b3   : > { %vm4160_vm8 = vcmp.ge.f32.partialorder %v4120_v34, 0.0  ;;  %v4200_v13 = vmul.f32 0.1, %v4120_v34  ;;  %v4121_v22 = vadd.f32 %v15778_v16, %v4076_v4  ;;  %9307 = vrot.lane.b32.xlu0 %v4120_v34, %s14171_s20  ;;  %vm4285_vm3 = vcmp.ge.s32.totalorder %v4267_v54, 0 }
 0x6b4   : > { %v4667_v18 = vshll.u32 %v16103_v27, 16  ;;  %v4671_v6 = vshrl.u32 %v16103_v27, 16  ;;  %vm4299_vm14 = vcmp.lt.s32.totalorder %v4267_v54, 16 }
 0x6b5   : > { %v4240_v26 = vsel %vm4160_vm8, %v4120_v34, %v4200_v13  ;;  %vm4161_vm7 = vcmp.ge.f32.partialorder %v4121_v22, 0.0  ;;  %v4201_v44 = vmul.f32 0.1, %v4121_v22  ;;  %9309 = vrot.lane.b32.xlu1 %v4121_v22, %s14171_s20  ;;  %v10258_v34 = vsel %vm4379_vm11, 1.0, %v18432_v11  ;;  %vm4430_vm11 = vmand %vm16121_vm13, %vm4397_vm15 }
 0x6b6   : > { %v3939_v17 = vpop.f32.mrb[48].mxu0  ;;  %v4669_v21 = vrot.slane %v4667_v18, 1  ;;  %v5782_v33 = vrot.slane %v4671_v6, 4  ;;  %v5783_v61 = vrot.slane %v4667_v18, 5  ;;  %v4546_v57 = vmul.f32 %v10256_v24, %v4240_v26 }
 0x6b7   : > { %v4241_v7 = vsel %vm4161_vm7, %v4121_v22, %v4201_v44  ;;  %v4077_v15 = vmul.f32 %v15773_v58, %v3939_v17  ;;  %v11812_v25 = vpop.f32.mrb[49].mxu0  ;;  %v10259_v26 = vsel %vm16121_vm13, 1.0, %v18432_v11  ;;  %vm16162_vm7 = vmand %vm4285_vm3, %vm4299_vm14 }
 0x6b8   : > { %v4547_v39 = vmul.f32 %v10257_v55, %v4241_v7  ;;  %v3942_v3 = vpop.f32.mrb[50].mxu0  ;;  %v16136_v12 = vsel %vm1156_vm2, %v4665_v63, %v4669_v21  ;;  %v5784_v52 = vor.u32 %v5783_v61, %v5782_v33  ;;  %v4673_v55 = vor.u32 %v4671_v6, %v4669_v21 }
 0x6b9   : > { %18517 = vst [vmem:[#allocation24_spill] sm:$0xff] %v16136_v12  ;;  %v4122_v10 = vadd.f32 %v15778_v16, %v4077_v15  ;;  %v4078_v42 = vmul.f32 %v15773_v58, %v3942_v3  ;;  %v11813_v40 = vpop.f32.mrb[51].mxu0  ;;  %11885 = vmatmul.mubr.msk.bf16.vlgmr.msra.gmra.mrb[0].mxu1 %vm4722_vm12, %v16136_v12 }
 0x6ba   : > { %v16143_v9 = vpack.c.bf16 %v4547_v39, %v4546_v57  ;;  %11917 = vmatpush3.bf16.msra.mxu1 %v4980_v8  ;;  %11888 = vmatprep.mubr.msk.bf16.mxu1 %vm14169_vm1, %v18432_v11  ;;  %v16152_v13 = vsel %vm5746_vm6, %v5780_v45, %v5784_v52 }
 0x6bb   : > { %vm4162_vm10 = vcmp.ge.f32.partialorder %v4122_v10, 0.0  ;;  %v4202_v4 = vmul.f32 0.1, %v4122_v10  ;;  %v4123_v5 = vadd.f32 %v15778_v16, %v4078_v42  ;;  %9311 = vrot.lane.b32.xlu0 %v4122_v10, %s14171_s20  ;;  %11986 = vmatprep.subr.bf16.mxu1 %v18432_v11 }
 0x6bc   : > { %v4675_v22 = vshll.u32 %v16143_v9, 16  ;;  %v4679_v35 = vshrl.u32 %v16143_v9, 16 }
 0x6bd   : > { %v4242_v24 = vsel %vm4162_vm10, %v4122_v10, %v4202_v4  ;;  %vm4163_vm8 = vcmp.ge.f32.partialorder %v4123_v5, 0.0  ;;  %v4203_v18 = vmul.f32 0.1, %v4123_v5  ;;  %9313 = vrot.lane.b32.xlu1 %v4123_v5, %s14171_s20  ;;  %vm4382_vm10 = vmand %vm16162_vm7, %vm4318_vm9 }
 0x6be   : > { %v3947_v44 = vpop.f32.mrb[52].mxu0  ;;  %v4677_v17 = vrot.slane %v4675_v22, 1  ;;  %v5786_v15 = vrot.slane %v4679_v35, 4  ;;  %v5787_v25 = vrot.slane %v4675_v22, 5  ;;  %v4548_v33 = vmul.f32 %v10258_v34, %v4242_v24 }
 0x6bf   : > { %v4243_v45 = vsel %vm4163_vm8, %v4123_v5, %v4203_v18  ;;  %v4079_v63 = vmul.f32 %v15773_v58, %v3947_v44  ;;  %v11816_v8 = vpop.f32.mrb[53].mxu0  ;;  %v10260_v34 = vsel %vm4430_vm11, 1.0, %v18432_v11  ;;  %v4268_v5 = vadd.s32 10, %v15764_v14  ;;  %vm4433_vm11 = vmand %vm16162_vm7, %vm4397_vm15 }
 0x6c0   : > { %v4549_v61 = vmul.f32 %v10259_v26, %v4243_v45  ;;  %v3950_v57 = vpop.f32.mrb[54].mxu0  ;;  %v16167_v39 = vsel %vm1156_vm2, %v4673_v55, %v4677_v17  ;;  %v5788_v54 = vor.u32 %v5787_v25, %v5786_v15  ;;  %v10261_v26 = vsel %vm4382_vm10, 1.0, %v18432_v11 }
 0x6c1   : > { %18520 = vst [vmem:[#allocation27_spill] sm:$0xff] %v16167_v39  ;;  %v4124_v6 = vadd.f32 %v15778_v16, %v4079_v63  ;;  %v4080_v21 = vmul.f32 %v15773_v58, %v3950_v57  ;;  %v11817_v3 = vpop.f32.mrb[55].mxu0  ;;  %11889 = vmatmul.mubr.msk.bf16.gmra.mrb[4].mxu1 %vm4722_vm12, %v16167_v39  ;;  %v4681_v55 = vor.u32 %v4679_v35, %v4677_v17  ;;  %vm4286_vm14 = vcmp.ge.s32.totalorder %v4268_v5, 0 }
 0x6c2   : > { %v16177_v10 = vpack.c.bf16 %v4549_v61, %v4548_v33  ;;  %11892 = vmatprep.mubr.msk.bf16.mxu1 %vm14169_vm1, %v18432_v11  ;;  %v16188_v40 = vsel %vm5746_vm6, %v5784_v52, %v5788_v54  ;;  %vm4300_vm8 = vcmp.lt.s32.totalorder %v4268_v5, 16  ;;  %v16232_v5 = vld [vmem:[%s18333_s8] ss:$0 sm:$0xff] }
 0x6c3   : > { %vm4164_vm3 = vcmp.ge.f32.partialorder %v4124_v6, 0.0  ;;  %v4204_v62 = vmul.f32 0.1, %v4124_v6  ;;  %v4125_v42 = vadd.f32 %v15778_v16, %v4080_v21  ;;  %9315 = vrot.lane.b32.xlu0 %v4124_v6, %s14171_s20 }
 0x6c4   : > { %v4683_v4 = vshll.u32 %v16177_v10, 16  ;;  %v4687_v22 = vshrl.u32 %v16177_v10, 16 }
 0x6c5   : > { %v4244_v24 = vsel %vm4164_vm3, %v4124_v6, %v4204_v62  ;;  %vm4165_vm13 = vcmp.ge.f32.partialorder %v4125_v42, 0.0  ;;  %v4205_v18 = vmul.f32 0.1, %v4125_v42  ;;  %9317 = vrot.lane.b32.xlu1 %v4125_v42, %s14171_s20  ;;  %vm16221_vm3 = vmand %vm4286_vm14, %vm4300_vm8 }
 0x6c6   : > { %v3955_v44 = vpop.f32.mrb[56].mxu0  ;;  %v4685_v45 = vrot.slane %v4683_v4, 1  ;;  %v5790_v15 = vrot.slane %v4687_v22, 4  ;;  %v5791_v25 = vrot.slane %v4683_v4, 5  ;;  %v4550_v33 = vmul.f32 %v10260_v34, %v4244_v24 }
 0x6c7   : > { %v4245_v52 = vsel %vm4165_vm13, %v4125_v42, %v4205_v18  ;;  %v4081_v63 = vmul.f32 %v15773_v58, %v3955_v44  ;;  %v11820_v8 = vpop.f32.mrb[57].mxu0  ;;  %v10262_v4 = vsel %vm16162_vm7, 1.0, %v18432_v11  ;;  %vm16239_vm7 = vmand %vm16221_vm3, %vm4318_vm9 }
 0x6c8   : > { %v4551_v61 = vmul.f32 %v10261_v26, %v4245_v52  ;;  %v3958_v57 = vpop.f32.mrb[58].mxu0  ;;  %v16198_v6 = vsel %vm1156_vm2, %v4681_v55, %v4685_v45  ;;  %v5792_v35 = vor.u32 %v5791_v25, %v5790_v15  ;;  %v10263_v55 = vsel %vm4433_vm11, 1.0, %v18432_v11 }
 0x6c9   : > { %18521 = vst [vmem:[#allocation30_spill] sm:$0xff] %v16198_v6  ;;  %v4126_v21 = vadd.f32 %v15778_v16, %v4081_v63  ;;  %v4082_v3 = vmul.f32 %v15773_v58, %v3958_v57  ;;  %v11821_v62 = vpop.f32.mrb[59].mxu0  ;;  %11893 = vmatmul.mubr.msk.bf16.gmra.mrb[8].mxu1 %vm4722_vm12, %v16198_v6  ;;  %v4689_v52 = vor.u32 %v4687_v22, %v4685_v45 }
 0x6ca   : > { %v16204_v17 = vpack.c.bf16 %v4551_v61, %v4550_v33  ;;  %11896 = vmatprep.mubr.msk.bf16.mxu1 %vm14169_vm1, %v18432_v11  ;;  %v16215_v34 = vsel %vm5746_vm6, %v5788_v54, %v5792_v35  ;;  %v16250_v62 = vld [vmem:[%s18333_s8 + $0x1] ss:$0 sm:$0xff] }
 0x6cb   : > { %vm4166_vm10 = vcmp.ge.f32.partialorder %v4126_v21, 0.0  ;;  %v4206_v42 = vmul.f32 0.1, %v4126_v21  ;;  %v4127_v58 = vadd.f32 %v15778_v16, %v4082_v3  ;;  %9319 = vrot.lane.b32.xlu0 %v4126_v21, %s14171_s20  ;;  %v4269_v3 = vadd.s32 11, %v15764_v14 }
 0x6cc   : > { %v4691_v18 = vshll.u32 %v16204_v17, 16  ;;  %v4695_v26 = vshrl.u32 %v16204_v17, 16 }
 0x6cd   : > { %v4246_v44 = vsel %vm4166_vm10, %v4126_v21, %v4206_v42  ;;  %vm4167_vm13 = vcmp.ge.f32.partialorder %v4127_v58, 0.0  ;;  %v4207_v16 = vmul.f32 0.1, %v4127_v58  ;;  %9321 = vrot.lane.b32.xlu1 %v4127_v58, %s14171_s20  ;;  %vm4287_vm8 = vcmp.ge.s32.totalorder %v4269_v3, 0 }
 0x6ce   : > { %v3963_v54 = vpop.f32.mrb[60].mxu0  ;;  %v4693_v7 = vrot.slane %v4691_v18, 1  ;;  %v5794_v33 = vrot.slane %v4695_v26, 4  ;;  %v5795_v22 = vrot.slane %v4691_v18, 5  ;;  %v4552_v45 = vmul.f32 %v10262_v4, %v4246_v44 }
 0x6cf   : > { %v4247_v63 = vsel %vm4167_vm13, %v4127_v58, %v4207_v16  ;;  %v4083_v8 = vmul.f32 %v16232_v5, %v3963_v54  ;;  %v11824_v25 = vpop.f32.mrb[61].mxu0  ;;  %v10264_v44 = vsel %vm16239_vm7, 1.0, %v18432_v11  ;;  %vm4301_vm11 = vcmp.lt.s32.totalorder %v4269_v3, 16  ;;  %vm4436_vm7 = vmand %vm16221_vm3, %vm4397_vm15 }
 0x6d0   : > { %v4553_v61 = vmul.f32 %v10263_v55, %v4247_v63  ;;  %v3966_v57 = vpop.f32.mrb[62].mxu0  ;;  %v16244_v21 = vsel %vm1156_vm2, %v4689_v52, %v4693_v7  ;;  %v5796_v4 = vor.u32 %v5795_v22, %v5794_v33  ;;  %v10265_v33 = vsel %vm16221_vm3, 1.0, %v18432_v11  ;;  %vm16273_vm13 = vmand %vm4287_vm8, %vm4301_vm11 }
 0x6d1   : > { %18526 = vst [vmem:[#allocation8_spill] sm:$0xff] %v16244_v21  ;;  %v4128_v42 = vadd.f32 %v16250_v62, %v4083_v8  ;;  %v4084_v58 = vmul.f32 %v16232_v5, %v3966_v57  ;;  %v11825_v16 = vpop.f32.mrb[63].mxu0  ;;  %11897 = vmatmul.mubr.msk.bf16.gmra.mrb[12].mxu1 %vm4722_vm12, %v16244_v21  ;;  %vm4439_vm11 = vmand %vm16273_vm13, %vm4397_vm15 }
 0x6d2   : > { %v16256_v18 = vpack.c.bf16 %v4553_v61, %v4552_v45  ;;  %11900 = vmatprep.mubr.msk.bf16.mxu1 %vm14169_vm1, %v18432_v11  ;;  %v16265_v52 = vsel %vm5746_vm6, %v5792_v35, %v5796_v4  ;;  %v4697_v45 = vor.u32 %v4695_v26, %v4693_v7 }
 0x6d3   : > { %vm4168_vm14 = vcmp.ge.f32.partialorder %v4128_v42, 0.0  ;;  %v4208_v55 = vmul.f32 0.1, %v4128_v42  ;;  %v4129_v54 = vadd.f32 %v16250_v62, %v4084_v58 }
 0x6d4   : > { %v4699_v63 = vshll.u32 %v16256_v18, 16  ;;  %v4703_v8 = vshrl.u32 %v16256_v18, 16 }
 0x6d5   : > { %v4248_v25 = vsel %vm4168_vm14, %v4128_v42, %v4208_v55  ;;  %vm4169_vm10 = vcmp.ge.f32.partialorder %v4129_v54, 0.0  ;;  %v4209_v15 = vmul.f32 0.1, %v4129_v54  ;;  %vm4388_vm14 = vmand %vm16273_vm13, %vm4318_vm9 }
 0x6d6   : > { %v3971_v22 = vpop.f32.mrb[64].mxu0  ;;  %v4701_v61 = vrot.slane %v4699_v63, 1  ;;  %v5798_v16 = vrot.slane %v4703_v8, 4  ;;  %v5799_v21 = vrot.slane %v4699_v63, 5  ;;  %v4554_v42 = vmul.f32 %v10264_v44, %v4248_v25 }
 0x6d7   : > { %v4249_v57 = vsel %vm4169_vm10, %v4129_v54, %v4209_v15  ;;  %v4085_v35 = vmul.f32 %v16232_v5, %v3971_v22  ;;  %v11828_v58 = vpop.f32.mrb[65].mxu0  ;;  %v10266_v25 = vsel %vm4436_vm7, 1.0, %v18432_v11 }
 0x6d8   : > { %v4555_v55 = vmul.f32 %v10265_v33, %v4249_v57  ;;  %v3974_v6 = vpop.f32.mrb[66].mxu0  ;;  %v16278_v39 = vsel %vm1156_vm2, %v4697_v45, %v4701_v61  ;;  %v5800_v54 = vor.u32 %v5799_v21, %v5798_v16  ;;  %v10267_v45 = vsel %vm4388_vm14, 1.0, %v18432_v11 }
 0x6d9   : > { %18529 = vst [vmem:[#allocation9_spill] sm:$0xff] %v16278_v39  ;;  %v4130_v12 = vadd.f32 %v16250_v62, %v4085_v35  ;;  %v4086_v26 = vmul.f32 %v16232_v5, %v3974_v6  ;;  %v11829_v7 = vpop.f32.mrb[67].mxu0  ;;  %11901 = vmatmul.mubr.msk.bf16.gmra.mrb[16].mxu1 %vm4722_vm12, %v16278_v39  ;;  %v4705_v35 = vor.u32 %v4703_v8, %v4701_v61  ;;  %v4270_v16 = vadd.s32 12, %v15764_v14 }
 0x6da   : > { %v16288_v44 = vpack.c.bf16 %v4555_v55, %v4554_v42  ;;  %11904 = vmatprep.mubr.msk.bf16.mxu1 %vm14169_vm1, %v18432_v11  ;;  %v16298_v6 = vsel %vm5746_vm6, %v5796_v4, %v5800_v54 }
 0x6db   : > { %vm4170_vm8 = vcmp.ge.f32.partialorder %v4130_v12, 0.0  ;;  %v4210_v24 = vmul.f32 0.1, %v4130_v12  ;;  %v4131_v63 = vadd.f32 %v16250_v62, %v4086_v26  ;;  %vm4288_vm10 = vcmp.ge.s32.totalorder %v4270_v16, 0 }
 0x6dc   : > { %v4707_v21 = vshll.u32 %v16288_v44, 16  ;;  %v4711_v15 = vshrl.u32 %v16288_v44, 16  ;;  %vm4302_vm7 = vcmp.lt.s32.totalorder %v4270_v16, 16 }
 0x6dd   : > { %v4250_v33 = vsel %vm4170_vm8, %v4130_v12, %v4210_v24  ;;  %vm4171_vm3 = vcmp.ge.f32.partialorder %v4131_v63, 0.0  ;;  %v4211_v22 = vmul.f32 0.1, %v4131_v63 }
 0x6de   : > { %v3979_v57 = vpop.f32.mrb[68].mxu0  ;;  %v4709_v58 = vrot.slane %v4707_v21, 1  ;;  %v5802_v26 = vrot.slane %v4711_v15, 4  ;;  %v5803_v7 = vrot.slane %v4707_v21, 5  ;;  %v4556_v39 = vmul.f32 %v10266_v25, %v4250_v33 }
 0x6df   : > { %v4251_v42 = vsel %vm4171_vm3, %v4131_v63, %v4211_v22  ;;  %v4087_v4 = vmul.f32 %v16232_v5, %v3979_v57  ;;  %v11832_v55 = vpop.f32.mrb[69].mxu0  ;;  %v10268_v25 = vsel %vm16273_vm13, 1.0, %v18432_v11  ;;  %vm16332_vm13 = vmand %vm4288_vm10, %vm4302_vm7 }
 0x6e0   : > { %v4557_v32 = vmul.f32 %v10267_v45, %v4251_v42  ;;  %v3982_v46 = vpop.f32.mrb[70].mxu0  ;;  %v16307_v12 = vsel %vm1156_vm2, %v4705_v35, %v4709_v58  ;;  %v5804_v61 = vor.u32 %v5803_v7, %v5802_v26  ;;  %v10269_v45 = vsel %vm4439_vm11, 1.0, %v18432_v11  ;;  %vm4391_vm3 = vmand %vm16332_vm13, %vm4318_vm9 }
 0x6e1   : > { %18530 = vst [vmem:[#allocation10_spill] sm:$0xff] %v16307_v12  ;;  %v4132_v24 = vadd.f32 %v16250_v62, %v4087_v4  ;;  %v4088_v53 = vmul.f32 %v16232_v5, %v3982_v46  ;;  %v11833_v8 = vpop.f32.mrb[71].mxu0  ;;  %11905 = vmatmul.mubr.msk.bf16.gmra.mrb[20].mxu1 %vm4722_vm12, %v16307_v12 }
 0x6e2   : > { %v16313_v63 = vpack.c.bf16 %v4557_v32, %v4556_v39  ;;  %11908 = vmatprep.mubr.msk.bf16.mxu1 %vm14169_vm1, %v18432_v11  ;;  %v16326_v32 = vsel %vm5746_vm6, %v5800_v54, %v5804_v61 }
 0x6e3   : > { %vm4172_vm14 = vcmp.ge.f32.partialorder %v4132_v24, 0.0  ;;  %v4212_v46 = vmul.f32 0.1, %v4132_v24  ;;  %v4133_v21 = vadd.f32 %v16250_v62, %v4088_v53  ;;  %v4713_v53 = vor.u32 %v4711_v15, %v4709_v58 }
 0x6e4   : > { %v4715_v39 = vshll.u32 %v16313_v63, 16  ;;  %v4719_v33 = vshrl.u32 %v16313_v63, 16 }
 0x6e5   : > { %v4252_v22 = vsel %vm4172_vm14, %v4132_v24, %v4212_v46  ;;  %vm4173_vm8 = vcmp.ge.f32.partialorder %v4133_v21, 0.0  ;;  %v4213_v3 = vmul.f32 0.1, %v4133_v21 }
 0x6e6   : > { %v4558_v57 = vmul.f32 %v10268_v25, %v4252_v22  ;;  %v3987_v35 = vpop.f32.mrb[72].mxu0  ;;  %v4717_v4 = vrot.slane %v4715_v39, 1  ;;  %v5806_v7 = vrot.slane %v4719_v33, 4  ;;  %v5807_v8 = vrot.slane %v4715_v39, 5 }
 0x6e7   : > { %v4253_v54 = vsel %vm4173_vm8, %v4133_v21, %v4213_v3  ;;  %v4089_v55 = vmul.f32 %v16232_v5, %v3987_v35  ;;  %v11836_v26 = vpop.f32.mrb[73].mxu0  ;;  %v4271_v25 = vadd.s32 13, %v15764_v14 }
 0x6e8   : > { %v4559_v24 = vmul.f32 %v10269_v45, %v4253_v54  ;;  %v3990_v46 = vpop.f32.mrb[74].mxu0  ;;  %v16338_v12 = vsel %vm1156_vm2, %v4713_v53, %v4717_v4  ;;  %v16349_v21 = vor.u32 %v5807_v8, %v5806_v7  ;;  %v10270_v45 = vsel %vm4391_vm3, 1.0, %v18432_v11  ;;  %vm4442_vm3 = vmand %vm16332_vm13, %vm4397_vm15 }
 0x6e9   : > { %v4134_v16 = vadd.f32 %v16250_v62, %v4089_v55  ;;  %v4090_v15 = vmul.f32 %v16232_v5, %v3990_v46  ;;  %v11837_v58 = vpop.f32.mrb[75].mxu0  ;;  %11909 = vmatmul.mubr.msk.bf16.gmra.mrb[24].mxu1 %vm4722_vm12, %v16338_v12  ;;  %vm4289_vm10 = vcmp.ge.s32.totalorder %v4271_v25, 0  ;;  %vm4303_vm7 = vcmp.lt.s32.totalorder %v4271_v25, 16 }
 0x6ea   : > { %v16351_v39 = vpack.c.bf16 %v4559_v24, %v4558_v57  ;;  %11912 = vmatprep.mubr.msk.bf16.mxu1 %vm14169_vm1, %v18432_v11  ;;  %v16358_v3 = vsel %vm5746_vm6, %v5804_v61, %v16349_v21  ;;  %v10271_v54 = vsel %vm16332_vm13, 1.0, %v18432_v11  ;;  %v4721_v26 = vor.u32 %v4719_v33, %v4717_v4  ;;  %vm4317_vm8 = vmand %vm4289_vm10, %vm4303_vm7 }
 0x6eb   : > { %vm4174_vm11 = vcmp.ge.f32.partialorder %v4134_v16, 0.0  ;;  %v4214_v14 = vmul.f32 0.1, %v4134_v16  ;;  %v4135_v22 = vadd.f32 %v16250_v62, %v4090_v15 }
 0x6ec   : > { %v18395_v35 = vshll.u32 %v16351_v39, 16  ;;  %v18396_v24 = vshrl.u32 %v16351_v39, 16 }
 0x6ed   : > { %v4254_v53 = vsel %vm4174_vm11, %v4134_v16, %v4214_v14  ;;  %vm4175_vm14 = vcmp.ge.f32.partialorder %v4135_v22, 0.0  ;;  %v4215_v57 = vmul.f32 0.1, %v4135_v22  ;;  %vm4394_vm11 = vmand %vm4317_vm8, %vm4318_vm9  ;;  %vm18403_vm9 = vcmask 1042432  }
 0x6ee   : > { %v3995_v55 = vpop.f32.mrb[76].mxu0  ;;  %v6582_v46 = vrot.slane %v18395_v35, 1  ;;  %v4560_v25 = vmul.f32 %v10270_v45, %v4254_v53 }
 0x6ef   : > { %v4255_v7 = vsel %vm4175_vm14, %v4135_v22, %v4215_v57  ;;  %v4091_v8 = vmul.f32 %v16232_v5, %v3995_v55  ;;  %v11840_v61 = vpop.f32.mrb[77].mxu0  ;;  %v10309_v57 = vld [vmem:[%s18334_s9 + $0x4] sm:$0x3] }
 0x6f0   : > { %v4561_v16 = vmul.f32 %v10271_v54, %v4255_v7  ;;  %v3998_v15 = vpop.f32.mrb[78].mxu0  ;;  %v16377_v14 = vsel %vm1156_vm2, %v4721_v26, %v6582_v46  ;;  %v6584_v22 = vor.u32 %v6582_v46, %v18396_v24  ;;  %v10273_v7 = vsel %vm4394_vm11, 1.0, %v18432_v11 }
 0x6f1   : > { %v4136_v33 = vadd.f32 %v16250_v62, %v4091_v8  ;;  %v4092_v4 = vmul.f32 %v16232_v5, %v3998_v15  ;;  %v11841_v58 = vpop.f32.mrb[79].mxu0  ;;  %11913 = vmatmul.mubr.msk.bf16.gmra.mrb[28].mxu1 %vm4722_vm12, %v4721_v26  ;;  %v10272_v5 = vsel %vm4442_vm3, 1.0, %v18432_v11 }
 0x6f2   : > { %v16381_v45 = vpack.c.bf16 %v4561_v16, %v4560_v25  ;;  %11918 = vmatprep.mubr.msk.bf16.mxu1 %vm14169_vm1, %v18432_v11 }
 0x6f3   : > { %vm4176_vm15 = vcmp.ge.f32.partialorder %v4136_v33, 0.0  ;;  %v4216_v42 = vmul.f32 0.1, %v4136_v33  ;;  %v4137_v53 = vadd.f32 %v16250_v62, %v4092_v4  ;;  %v5253_v62 = vsel %vm4774_vm5, %v10309_v57, 0 }
 0x6f4   : > { %v18394_v54 = vshll.u32 %v16381_v45, 16 }
 0x6f5   : > { %v4256_v55 = vsel %vm4176_vm15, %v4136_v33, %v4216_v42  ;;  %vm4177_vm13 = vcmp.ge.f32.partialorder %v4137_v53, 0.0  ;;  %v4217_v26 = vmul.f32 0.1, %v4137_v53 }
 0x6f6   : > { %v4562_v8 = vmul.f32 %v10272_v5, %v4256_v55  ;;  %v4003_v61 = vpop.f32.mrb[112].mxu0  ;;  %v16396_v46 = vrot.slane %v18394_v54, 1 }
 0x6f7   : > { %v4257_v25 = vsel %vm4177_vm13, %v4137_v53, %v4217_v26  ;;  %v11844_v16 = vpop.f32.mrb[113].mxu0 }
 0x6f8   : > { %v4563_v15 = vmul.f32 %v10273_v7, %v4257_v25  ;;  %v4005_v4 = vpop.f32.mrb[114].mxu0  ;;  %v16401_v58 = vsel %vm1156_vm2, %v6584_v22, %v16396_v46 }
 0x6f9   : > { %11919 = vmatmul.mubr.msk.bf16.vlgmr.msra.gmra.mrb[32].mxu1 %vm4722_vm12, %v15813_v31  ;;  %v11845_v33 = vpop.f32.mrb[115].mxu0 }
 0x6fa   : > { %11987 = vmatpush3.bf16.msra.mxu1 %v5253_v62  ;;  %11922 = vmatprep.mubr.msk.bf16.mxu1 %vm14169_vm1, %v18432_v11  ;;  %v16407_v42 = vpack.c.bf16 %v4563_v15, %v4562_v8 }
 0x6fb   : > { %12056 = vmatprep.subr.bf16.mxu1 %v18432_v11 }
 0x701   : > { %11923 = vmatmul.mubr.msk.bf16.gmra.mrb[36].mxu1 %vm4722_vm12, %v15827_v59 }
 0x702   : > { %11926 = vmatprep.mubr.msk.bf16.mxu1 %vm14169_vm1, %v18432_v11 }
 0x709   : > { %11927 = vmatmul.mubr.msk.bf16.gmra.mrb[40].mxu1 %vm4722_vm12, %v15855_v20 }
 0x70a   : > { %11930 = vmatprep.mubr.msk.bf16.mxu1 %vm14169_vm1, %v18432_v11 }
 0x711   : > { %11931 = vmatmul.mubr.msk.bf16.gmra.mrb[44].mxu1 %vm4722_vm12, %v15883_v36 }
 0x712   : > { %11934 = vmatprep.mubr.msk.bf16.mxu1 %vm14169_vm1, %v18432_v11 }
 0x719   : > { %11935 = vmatmul.mubr.msk.bf16.gmra.mrb[48].mxu1 %vm4722_vm12, %v15907_v56 }
 0x71a   : > { %11938 = vmatprep.mubr.msk.bf16.mxu1 %vm14169_vm1, %v18432_v11 }
 0x721   : > { %11939 = vmatmul.mubr.msk.bf16.gmra.mrb[52].mxu1 %vm4722_vm12, %v15945_v50 }
 0x722   : > { %11942 = vmatprep.mubr.msk.bf16.mxu1 %vm14169_vm1, %v18432_v11 }
 0x729   : > { %11943 = vmatmul.mubr.msk.bf16.gmra.mrb[56].mxu1 %vm4722_vm12, %v15978_v41 }
 0x72a   : > { %11946 = vmatprep.mubr.msk.bf16.mxu1 %vm14169_vm1, %v18432_v11 }
 0x731   : > { %11947 = vmatmul.mubr.msk.bf16.gmra.mrb[60].mxu1 %vm4722_vm12, %v16005_v47 }
 0x732   : > { %11950 = vmatprep.mubr.msk.bf16.mxu1 %vm14169_vm1, %v18432_v11 }
 0x739   : > { %11951 = vmatmul.mubr.msk.bf16.gmra.mrb[64].mxu1 %vm4722_vm12, %v16043_v19 }
 0x73a   : > { %11954 = vmatprep.mubr.msk.bf16.mxu1 %vm14169_vm1, %v18432_v11 }
 0x741   : > { %11955 = vmatmul.mubr.msk.bf16.gmra.mrb[0].mxu1 %vm4722_vm12, %v16076_v28 }
 0x742   : > { %11958 = vmatprep.mubr.msk.bf16.mxu1 %vm14169_vm1, %v18432_v11 }
 0x744   : > { %v16446_v22 = vpop.f32.mrb[116].mxu0 }
 0x745   : > { %18533 = vst [vmem:[#allocation11_spill] sm:$0xff] %v16446_v22  ;;  %v11850_v5 = vpop.f32.mrb[117].mxu0 }
 0x746   : > { %v16448_v53 = vpop.f32.mrb[118].mxu0 }
 0x747   : > { %18534 = vst [vmem:[#allocation12_spill] sm:$0xff] %v16448_v53  ;;  %v11851_v57 = vpop.f32.mrb[119].mxu0 }
 0x749   : > { %11959 = vmatmul.mubr.msk.bf16.gmra.mrb[4].mxu1 %vm4722_vm12, %v16103_v27 }
 0x74a   : > { %11962 = vmatprep.mubr.msk.bf16.mxu1 %vm14169_vm1, %v18432_v11 }
 0x74c   : > { %v16454_v55 = vpop.f32.mrb[120].mxu0 }
 0x74d   : > { %18535 = vst [vmem:[#allocation13_spill] sm:$0xff] %v16454_v55  ;;  %v11854_v26 = vpop.f32.mrb[121].mxu0  ;;  %v10345_v55 = vld [vmem:[%s18334_s9 + $0x8] sm:$0x3] }
 0x74e   : > { %v16456_v7 = vpop.f32.mrb[122].mxu0  ;;  %v5876_v43 = vsel %vm4774_vm5, %v10345_v55, 0  ;;  %v5463_v55 = vrot.slane %v15907_v56, 4 }
 0x74f   : > { %18536 = vst [vmem:[#allocation14_spill] sm:$0xff] %v16456_v7  ;;  %v11855_v8 = vpop.f32.mrb[123].mxu0 }
 0x751   : > { %11963 = vmatmul.mubr.msk.bf16.gmra.mrb[8].mxu1 %vm4722_vm12, %v16143_v9 }
 0x752   : > { %11966 = vmatprep.mubr.msk.bf16.mxu1 %vm14169_vm1, %v18432_v11 }
 0x754   : > { %v16462_v61 = vpop.f32.mrb[124].mxu0 }
 0x755   : > { %18537 = vst [vmem:[#allocation15_spill] sm:$0xff] %v16462_v61  ;;  %v11858_v25 = vpop.f32.mrb[125].mxu0 }
 0x756   : > { %v16464_v62 = vpop.f32.mrb[126].mxu0 }
 0x757   : > { %18538 = vst [vmem:[#allocation16_spill] sm:$0xff] %v16464_v62  ;;  %v11859_v16 = vpop.f32.mrb[127].mxu0 }
 0x759   : > { %11967 = vmatmul.mubr.msk.bf16.gmra.mrb[12].mxu1 %vm4722_vm12, %v16177_v10 }
 0x75a   : > { %11970 = vmatprep.mubr.msk.bf16.mxu1 %vm14169_vm1, %v18432_v11 }
 0x75c   : > { %v16470_v15 = vpop.f32.mrb[128].mxu0 }
 0x75d   : > { %18539 = vst [vmem:[#allocation17_spill] sm:$0xff] %v16470_v15  ;;  %v11862_v4 = vpop.f32.mrb[129].mxu0 }
 0x75e   : > { %v16472_v33 = vpop.f32.mrb[130].mxu0 }
 0x75f   : > { %18540 = vst [vmem:[#allocation19_spill] sm:$0xff] %v16472_v33  ;;  %v11863_v5 = vpop.f32.mrb[131].mxu0 }
 0x761   : > { %11971 = vmatmul.mubr.msk.bf16.gmra.mrb[16].mxu1 %vm4722_vm12, %v16204_v17 }
 0x762   : > { %11974 = vmatprep.mubr.msk.bf16.mxu1 %vm14169_vm1, %v18432_v11 }
 0x764   : > { %v16478_v57 = vpop.f32.mrb[132].mxu0 }
 0x765   : > { %18541 = vst [vmem:[#allocation22_spill] sm:$0xff] %v16478_v57  ;;  %v11866_v26 = vpop.f32.mrb[133].mxu0 }
 0x766   : > { %v16480_v8 = vpop.f32.mrb[134].mxu0 }
 0x767   : > { %18542 = vst [vmem:[#allocation25_spill] sm:$0xff] %v16480_v8  ;;  %v11867_v25 = vpop.f32.mrb[135].mxu0 }
 0x769   : > { %11975 = vmatmul.mubr.msk.bf16.gmra.mrb[20].mxu1 %vm4722_vm12, %v16256_v18 }
 0x76a   : > { %11978 = vmatprep.mubr.msk.bf16.mxu1 %vm14169_vm1, %v18432_v11 }
 0x76c   : > { %v16486_v16 = vpop.f32.mrb[136].mxu0 }
 0x76d   : > { %18543 = vst [vmem:[#allocation28_spill] sm:$0xff] %v16486_v16  ;;  %v11870_v4 = vpop.f32.mrb[137].mxu0 }
 0x76e   : > { %v16488_v5 = vpop.f32.mrb[138].mxu0 }
 0x76f   : > { %18544 = vst [vmem:[#allocation29_spill] sm:$0xff] %v16488_v5  ;;  %v11871_v54 = vpop.f32.mrb[139].mxu0  ;;  %v10327_v5 = vld [vmem:[%s18334_s9 + $0x6] sm:$0x3] }
 0x770   : > { %v5169_v54 = vrot.slane %v15827_v59, 1 }
 0x771   : > { %11979 = vmatmul.mubr.msk.bf16.gmra.mrb[24].mxu1 %vm4722_vm12, %v16288_v44 }
 0x772   : > { %11982 = vmatprep.mubr.msk.bf16.mxu1 %vm14169_vm1, %v18432_v11 }
 0x774   : > { %v16494_v26 = vpop.f32.mrb[140].mxu0 }
 0x775   : > { %18545 = vst [vmem:[#allocation31_spill] sm:$0xff] %v16494_v26  ;;  %v11874_v25 = vpop.f32.mrb[141].mxu0 }
 0x776   : > { %v16496_v35 = vpop.f32.mrb[142].mxu0  ;;  %v5168_v25 = vrot.slane %v15813_v31, 1 }
 0x777   : > { %18546 = vst [vmem:[#allocation32_spill] sm:$0xff] %v16496_v35  ;;  %v11875_v24 = vpop.f32.mrb[143].mxu0  ;;  %v5543_v35 = vsel %vm4774_vm5, %v10327_v5, 0 }
 0x778   : > { %v5170_v8 = vsel %vm1842_vm4, %v5168_v25, %v5169_v54 }
 0x779   : > { %11983 = vmatmul.mubr.msk.bf16.gmra.mrb[68].mxu1 %vm4722_vm12, %v16313_v63 }
 0x77a   : > { %11988 = vmatprep.mubr.msk.bf16.mxu1 %vm14169_vm1, %v18432_v11 }
 0x77c   : > { %v16502_v4 = vpop.f32.mrb[144].mxu0 }
 0x77d   : > { %18547 = vst [vmem:[#allocation33_spill] sm:$0xff] %v16502_v4  ;;  %v11878_v16 = vpop.f32.mrb[145].mxu0 }
 0x77e   : > { %v16508_v26 = vpop.f32.mrb[146].mxu0  ;;  %v5171_v16 = vrot.slane %v15855_v20, 1 }
 0x77f   : > { %18548 = vst [vmem:[#allocation34_spill] sm:$0xff] %v16508_v26  ;;  %v11879_v24 = vpop.f32.mrb[147].mxu0 }
 0x780   : > { %v5172_v5 = vsel %vm1842_vm4, %v5169_v54, %v5171_v16  ;;  %v5177_v54 = vrot.slane %v15945_v50, 1 }
 0x781   : > { %11989 = vmatmul.mubr.msk.bf16.vlgmr.msra.gmra.mrb[32].mxu1 %vm4722_vm12, %v5170_v8 }
 0x782   : > { %12057 = vmatpush3.bf16.msra.mxu1 %v5543_v35  ;;  %11992 = vmatprep.mubr.msk.bf16.mxu1 %vm14169_vm1, %v18432_v11  ;;  %v5173_v35 = vrot.slane %v15883_v36, 1 }
 0x783   : > { %12126 = vmatprep.subr.bf16.mxu1 %v18432_v11 }
 0x784   : > { %v16517_v4 = vpop.f32.mrb[148].mxu0  ;;  %v5174_v8 = vsel %vm1842_vm4, %v5171_v16, %v5173_v35  ;;  %v5179_v16 = vrot.slane %v15978_v41, 1 }
 0x785   : > { %18549 = vst [vmem:[#allocation35_spill] sm:$0xff] %v16517_v4  ;;  %v11882_v26 = vpop.f32.mrb[149].mxu0 }
 0x786   : > { %v16520_v57 = vpop.f32.mrb[150].mxu0  ;;  %v5175_v26 = vrot.slane %v15907_v56, 1 }
 0x787   : > { %18550 = vst [vmem:[#allocation36_spill] sm:$0xff] %v16520_v57  ;;  %v11883_v31 = vpop.f32.mrb[151].mxu0 }
 0x788   : > { %v16533_v25 = vsel %vm1842_vm4, %v5173_v35, %v5175_v26  ;;  %v16541_v24 = vsel %vm1842_vm4, %v5175_v26, %v5177_v54  ;;  %v16549_v31 = vsel %vm1842_vm4, %v5177_v54, %v5179_v16  ;;  %v5185_v54 = vrot.slane %v16076_v28, 1 }
 0x789   : > { %11993 = vmatmul.mubr.msk.bf16.gmra.mrb[36].mxu1 %vm4722_vm12, %v5172_v5  ;;  %v5181_v5 = vrot.slane %v16005_v47, 1 }
 0x78a   : > { %11996 = vmatprep.mubr.msk.bf16.mxu1 %vm14169_vm1, %v18432_v11 }
 0x78b   : > { %v16557_v35 = vsel %vm1842_vm4, %v5179_v16, %v5181_v5 }
 0x791   : > { %11997 = vmatmul.mubr.msk.bf16.gmra.mrb[40].mxu1 %vm4722_vm12, %v5174_v8  ;;  %v5183_v8 = vrot.slane %v16043_v19, 1 }
 0x792   : > { %12000 = vmatprep.mubr.msk.bf16.mxu1 %vm14169_vm1, %v18432_v11 }
 0x793   : > { %v16565_v26 = vsel %vm1842_vm4, %v5181_v5, %v5183_v8  ;;  %v16573_v16 = vsel %vm1842_vm4, %v5183_v8, %v5185_v54  ;;  %v5187_v5 = vrot.slane %v16103_v27, 1  ;;  %v5189_v8 = vrot.slane %v16143_v9, 1 }
 0x795   : > { %v16581_v62 = vsel %vm1842_vm4, %v5185_v54, %v5187_v5  ;;  %v16589_v61 = vsel %vm1842_vm4, %v5187_v5, %v5189_v8  ;;  %v5195_v54 = vrot.slane %v16256_v18, 1 }
 0x799   : > { %12001 = vmatmul.mubr.msk.bf16.gmra.mrb[44].mxu1 %vm4722_vm12, %v16533_v25 }
 0x79a   : > { %12004 = vmatprep.mubr.msk.bf16.mxu1 %vm14169_vm1, %v18432_v11 }
 0x7a1   : > { %12005 = vmatmul.mubr.msk.bf16.gmra.mrb[48].mxu1 %vm4722_vm12, %v16541_v24 }
 0x7a2   : > { %12008 = vmatprep.mubr.msk.bf16.mxu1 %vm14169_vm1, %v18432_v11 }
 0x7a9   : > { %12009 = vmatmul.mubr.msk.bf16.gmra.mrb[52].mxu1 %vm4722_vm12, %v16549_v31 }
 0x7aa   : > { %12012 = vmatprep.mubr.msk.bf16.mxu1 %vm14169_vm1, %v18432_v11 }
 0x7b1   : > { %12013 = vmatmul.mubr.msk.bf16.gmra.mrb[56].mxu1 %vm4722_vm12, %v16557_v35 }
 0x7b2   : > { %12016 = vmatprep.mubr.msk.bf16.mxu1 %vm14169_vm1, %v18432_v11 }
 0x7b9   : > { %12017 = vmatmul.mubr.msk.bf16.gmra.mrb[60].mxu1 %vm4722_vm12, %v16565_v26 }
 0x7ba   : > { %12020 = vmatprep.mubr.msk.bf16.mxu1 %vm14169_vm1, %v18432_v11 }
 0x7c1   : > { %12021 = vmatmul.mubr.msk.bf16.gmra.mrb[64].mxu1 %vm4722_vm12, %v16573_v16 }
 0x7c2   : > { %12024 = vmatprep.mubr.msk.bf16.mxu1 %vm14169_vm1, %v18432_v11 }
 0x7c4   : > { %v4940_v57 = vpop.f32.mrb[28].mxu1 }
 0x7c5   : > { %v11914_v4 = vpop.f32.mrb[29].mxu1  ;;  %v5193_v57 = vrot.slane %v16204_v17, 1 }
 0x7c6   : > { %v4942_v33 = vpop.f32.mrb[30].mxu1 }
 0x7c7   : > { %v11915_v15 = vpop.f32.mrb[31].mxu1  ;;  %v16613_v5 = vsel %vm1842_vm4, %v5193_v57, %v5195_v54 }
 0x7c8   : > { %v5191_v15 = vrot.slane %v16177_v10, 1 }
 0x7c9   : > { %12025 = vmatmul.mubr.msk.bf16.gmra.mrb[0].mxu1 %vm4722_vm12, %v16581_v62 }
 0x7ca   : > { %12028 = vmatprep.mubr.msk.bf16.mxu1 %vm14169_vm1, %v18432_v11  ;;  %v16597_v33 = vsel %vm1842_vm4, %v5189_v8, %v5191_v15  ;;  %v16605_v4 = vsel %vm1842_vm4, %v5191_v15, %v5193_v57  ;;  %v5197_v8 = vrot.slane %v16288_v44, 1  ;;  %v16628_v57 = vrot.slane %v16313_v63, 1 }
 0x7cc   : > { %v16621_v15 = vsel %vm1842_vm4, %v5195_v54, %v5197_v8  ;;  %18551 = vst [vmem:[#allocation37_spill] sm:$0xff] %v16628_v57  ;;  %v16632_v7 = vsel %vm1842_vm4, %v5197_v8, %v16628_v57  ;;  %v5459_v54 = vrot.slane %v15855_v20, 4  ;;  %v5458_v8 = vrot.slane %v15827_v59, 4 }
 0x7cd   : > { %18552 = vst [vmem:[#allocation38_spill] sm:$0xff] %v16632_v7 }
 0x7ce   : > { %v5460_v53 = vsel %vm1393_vm0, %v5458_v8, %v5459_v54  ;;  %v5462_v22 = vsel %vm1393_vm0, %v5459_v54, %v5461_v49  ;;  %v5464_v8 = vsel %vm1393_vm0, %v5461_v49, %v5463_v55  ;;  %v5469_v49 = vrot.slane %v16005_v47, 4 }
 0x7d1   : > { %12029 = vmatmul.mubr.msk.bf16.gmra.mrb[4].mxu1 %vm4722_vm12, %v16589_v61 }
 0x7d2   : > { %12032 = vmatprep.mubr.msk.bf16.mxu1 %vm14169_vm1, %v18432_v11 }
 0x7d9   : > { %12033 = vmatmul.mubr.msk.bf16.gmra.mrb[8].mxu1 %vm4722_vm12, %v16597_v33 }
 0x7da   : > { %12036 = vmatprep.mubr.msk.bf16.mxu1 %vm14169_vm1, %v18432_v11 }
 0x7e1   : > { %12037 = vmatmul.mubr.msk.bf16.gmra.mrb[12].mxu1 %vm4722_vm12, %v16605_v4 }
 0x7e2   : > { %12040 = vmatprep.mubr.msk.bf16.mxu1 %vm14169_vm1, %v18432_v11 }
 0x7e9   : > { %12041 = vmatmul.mubr.msk.bf16.gmra.mrb[16].mxu1 %vm4722_vm12, %v16613_v5 }
 0x7ea   : > { %12044 = vmatprep.mubr.msk.bf16.mxu1 %vm14169_vm1, %v18432_v11 }
 0x7f1   : > { %12045 = vmatmul.mubr.msk.bf16.gmra.mrb[20].mxu1 %vm4722_vm12, %v16621_v15 }
 0x7f2   : > { %12048 = vmatprep.mubr.msk.bf16.mxu1 %vm14169_vm1, %v18432_v11 }
 0x7f9   : > { %12049 = vmatmul.mubr.msk.bf16.gmra.mrb[24].mxu1 %vm4722_vm12, %v16632_v7 }
 0x7fa   : > { %12052 = vmatprep.mubr.msk.bf16.mxu1 %vm14169_vm1, %v18432_v11 }
 0x801   : > { %12053 = vmatmul.mubr.msk.bf16.gmra.mrb[72].mxu1 %vm4722_vm12, %v16628_v57 }
 0x802   : > { %12058 = vmatprep.mubr.msk.bf16.mxu1 %vm14169_vm1, %v18432_v11 }
 0x809   : > { %12059 = vmatmul.mubr.msk.bf16.vlgmr.msra.gmra.mrb[32].mxu1 %vm4722_vm12, %v5460_v53 }
 0x80a   : > { %12127 = vmatpush3.bf16.msra.mxu1 %v5876_v43  ;;  %12062 = vmatprep.mubr.msk.bf16.mxu1 %vm14169_vm1, %v18432_v11  ;;  %v5465_v43 = vrot.slane %v15945_v50, 4 }
 0x80b   : > { %12196 = vmatprep.subr.bf16.mxu1 %v18432_v11 }
 0x80c   : > { %v5466_v53 = vsel %vm1393_vm0, %v5463_v55, %v5465_v43  ;;  %v5471_v55 = vrot.slane %v16043_v19, 4 }
 0x811   : > { %12063 = vmatmul.mubr.msk.bf16.gmra.mrb[36].mxu1 %vm4722_vm12, %v5462_v22  ;;  %v5467_v22 = vrot.slane %v15978_v41, 4 }
 0x812   : > { %12066 = vmatprep.mubr.msk.bf16.mxu1 %vm14169_vm1, %v18432_v11 }
 0x813   : > { %v5468_v54 = vsel %vm1393_vm0, %v5465_v43, %v5467_v22  ;;  %v5473_v43 = vrot.slane %v16076_v28, 4 }
 0x819   : > { %12067 = vmatmul.mubr.msk.bf16.gmra.mrb[40].mxu1 %vm4722_vm12, %v5464_v8  ;;  %v5470_v8 = vsel %vm1393_vm0, %v5467_v22, %v5469_v49  ;;  %v5475_v22 = vrot.slane %v16103_v27, 4 }
 0x81a   : > { %12070 = vmatprep.mubr.msk.bf16.mxu1 %vm14169_vm1, %v18432_v11 }
 0x821   : > { %12071 = vmatmul.mubr.msk.bf16.gmra.mrb[44].mxu1 %vm4722_vm12, %v5466_v53  ;;  %v5472_v53 = vsel %vm1393_vm0, %v5469_v49, %v5471_v55 }
 0x822   : > { %12074 = vmatprep.mubr.msk.bf16.mxu1 %vm14169_vm1, %v18432_v11 }
 0x829   : > { %12075 = vmatmul.mubr.msk.bf16.gmra.mrb[48].mxu1 %vm4722_vm12, %v5468_v54  ;;  %v5474_v54 = vsel %vm1393_vm0, %v5471_v55, %v5473_v43 }
 0x82a   : > { %12078 = vmatprep.mubr.msk.bf16.mxu1 %vm14169_vm1, %v18432_v11 }
 0x831   : > { %12079 = vmatmul.mubr.msk.bf16.gmra.mrb[52].mxu1 %vm4722_vm12, %v5470_v8  ;;  %v5476_v8 = vsel %vm1393_vm0, %v5473_v43, %v5475_v22  ;;  %v5479_v43 = vrot.slane %v16177_v10, 4 }
 0x832   : > { %12082 = vmatprep.mubr.msk.bf16.mxu1 %vm14169_vm1, %v18432_v11 }
 0x839   : > { %12083 = vmatmul.mubr.msk.bf16.gmra.mrb[56].mxu1 %vm4722_vm12, %v5472_v53  ;;  %v5477_v53 = vrot.slane %v16143_v9, 4 }
 0x83a   : > { %12086 = vmatprep.mubr.msk.bf16.mxu1 %vm14169_vm1, %v18432_v11 }
 0x841   : > { %12087 = vmatmul.mubr.msk.bf16.gmra.mrb[60].mxu1 %vm4722_vm12, %v5474_v54  ;;  %v5478_v54 = vsel %vm1393_vm0, %v5475_v22, %v5477_v53  ;;  %v5483_v22 = vrot.slane %v16256_v18, 4 }
 0x842   : > { %12090 = vmatprep.mubr.msk.bf16.mxu1 %vm14169_vm1, %v18432_v11 }
 0x849   : > { %12091 = vmatmul.mubr.msk.bf16.gmra.mrb[64].mxu1 %vm4722_vm12, %v5476_v8  ;;  %v5480_v8 = vsel %vm1393_vm0, %v5477_v53, %v5479_v43  ;;  %v5485_v53 = vrot.slane %v16288_v44, 4 }
 0x84a   : > { %12094 = vmatprep.mubr.msk.bf16.mxu1 %vm14169_vm1, %v18432_v11 }
 0x84c   : > { %v5144_v49 = vpop.f32.mrb[68].mxu1 }
 0x84d   : > { %v11984_v57 = vpop.f32.mrb[69].mxu1 }
 0x84e   : > { %v5146_v7 = vpop.f32.mrb[70].mxu1  ;;  %v5481_v57 = vrot.slane %v16204_v17, 4 }
 0x84f   : > { %v11985_v55 = vpop.f32.mrb[71].mxu1 }
 0x850   : > { %v5482_v7 = vsel %vm1393_vm0, %v5479_v43, %v5481_v57  ;;  %v5484_v49 = vsel %vm1393_vm0, %v5481_v57, %v5483_v22  ;;  %v5486_v55 = vsel %vm1393_vm0, %v5483_v22, %v5485_v53 }
 0x851   : > { %12095 = vmatmul.mubr.msk.bf16.gmra.mrb[0].mxu1 %vm4722_vm12, %v5478_v54  ;;  %v5487_v54 = vrot.slane %v16313_v63, 4 }
 0x852   : > { %12098 = vmatprep.mubr.msk.bf16.mxu1 %vm14169_vm1, %v18432_v11 }
 0x853   : > { %v5488_v43 = vsel %vm1393_vm0, %v5485_v53, %v5487_v54 }
 0x859   : > { %12099 = vmatmul.mubr.msk.bf16.gmra.mrb[4].mxu1 %vm4722_vm12, %v5480_v8  ;;  %v5489_v8 = vrot.slane %v16351_v39, 4 }
 0x85a   : > { %12102 = vmatprep.mubr.msk.bf16.mxu1 %vm14169_vm1, %v18432_v11 }
 0x85b   : > { %v5490_v57 = vsel %vm1393_vm0, %v5487_v54, %v5489_v8 }
 0x861   : > { %12103 = vmatmul.mubr.msk.bf16.gmra.mrb[8].mxu1 %vm4722_vm12, %v5482_v7  ;;  %v10363_v7 = vld [vmem:[%s18334_s9 + $0xa] sm:$0x3] }
 0x862   : > { %12106 = vmatprep.mubr.msk.bf16.mxu1 %vm14169_vm1, %v18432_v11  ;;  %v6168_v22 = vsel %vm4774_vm5, %v10363_v7, 0 }
 0x869   : > { %12107 = vmatmul.mubr.msk.bf16.gmra.mrb[12].mxu1 %vm4722_vm12, %v5484_v49 }
 0x86a   : > { %12110 = vmatprep.mubr.msk.bf16.mxu1 %vm14169_vm1, %v18432_v11 }
 0x871   : > { %12111 = vmatmul.mubr.msk.bf16.gmra.mrb[16].mxu1 %vm4722_vm12, %v5486_v55 }
 0x872   : > { %12114 = vmatprep.mubr.msk.bf16.mxu1 %vm14169_vm1, %v18432_v11 }
 0x879   : > { %12115 = vmatmul.mubr.msk.bf16.gmra.mrb[20].mxu1 %vm4722_vm12, %v5488_v43  ;;  %v6088_v43 = vrot.slane %v15945_v50, 5 }
 0x87a   : > { %12118 = vmatprep.mubr.msk.bf16.mxu1 %vm14169_vm1, %v18432_v11 }
 0x881   : > { %12119 = vmatmul.mubr.msk.bf16.gmra.mrb[24].mxu1 %vm4722_vm12, %v5490_v57  ;;  %v6090_v57 = vrot.slane %v15978_v41, 5 }
 0x882   : > { %12122 = vmatprep.mubr.msk.bf16.mxu1 %vm14169_vm1, %v18432_v11 }
 0x883   : > { %v6091_v7 = vsel %vm18403_vm9, %v6088_v43, %v6090_v57 }
 0x889   : > { %12123 = vmatmul.mubr.msk.bf16.gmra.mrb[76].mxu1 %vm4722_vm12, %v5489_v8 }
 0x88a   : > { %12128 = vmatprep.mubr.msk.bf16.mxu1 %vm14169_vm1, %v18432_v11 }
 0x891   : > { %12129 = vmatmul.mubr.msk.bf16.vlgmr.msra.gmra.mrb[32].mxu1 %vm4722_vm12, %v15894_v60 }
 0x892   : > { %12197 = vmatpush3.bf16.msra.mxu1 %v6168_v22  ;;  %12132 = vmatprep.mubr.msk.bf16.mxu1 %vm14169_vm1, %v18432_v11  ;;  %v6092_v22 = vrot.slane %v16005_v47, 5 }
 0x893   : > { %12266 = vmatprep.subr.bf16.mxu1 %v18432_v11 }
 0x899   : > { %12133 = vmatmul.mubr.msk.bf16.gmra.mrb[36].mxu1 %vm4722_vm12, %v15918_v30 }
 0x89a   : > { %12136 = vmatprep.mubr.msk.bf16.mxu1 %vm14169_vm1, %v18432_v11 }
 0x8a1   : > { %12137 = vmatmul.mubr.msk.bf16.gmra.mrb[40].mxu1 %vm4722_vm12, %v15953_v48 }
 0x8a2   : > { %12140 = vmatprep.mubr.msk.bf16.mxu1 %vm14169_vm1, %v18432_v11 }
 0x8a9   : > { %12141 = vmatmul.mubr.msk.bf16.gmra.mrb[44].mxu1 %vm4722_vm12, %v15989_v29 }
 0x8aa   : > { %12144 = vmatprep.mubr.msk.bf16.mxu1 %vm14169_vm1, %v18432_v11 }
 0x8b1   : > { %12145 = vmatmul.mubr.msk.bf16.gmra.mrb[48].mxu1 %vm4722_vm12, %v16016_v23  ;;  %v18553_v23 = vshrl.u32 %v16351_v39, 16 }
 0x8b2   : > { %12148 = vmatprep.mubr.msk.bf16.mxu1 %vm14169_vm1, %v18432_v11 }
 0x8b9   : > { %12149 = vmatmul.mubr.msk.bf16.gmra.mrb[52].mxu1 %vm4722_vm12, %v16051_v0  ;;  %v5813_v0 = vrot.slane %v18553_v23, 4 }
 0x8ba   : > { %12152 = vmatprep.mubr.msk.bf16.mxu1 %vm14169_vm1, %v18432_v11 }
 0x8c1   : > { %12153 = vmatmul.mubr.msk.bf16.gmra.mrb[56].mxu1 %vm4722_vm12, %v16087_v1  ;;  %v18554_v1 = vshll.u32 %v16351_v39, 16 }
 0x8c2   : > { %12156 = vmatprep.mubr.msk.bf16.mxu1 %vm14169_vm1, %v18432_v11 }
 0x8c9   : > { %12157 = vmatmul.mubr.msk.bf16.gmra.mrb[60].mxu1 %vm4722_vm12, %v16115_v2  ;;  %v5816_v2 = vrot.slane %v18554_v1, 5 }
 0x8ca   : > { %12160 = vmatprep.mubr.msk.bf16.mxu1 %vm14169_vm1, %v18432_v11 }
 0x8d1   : > { %12161 = vmatmul.mubr.msk.bf16.gmra.mrb[64].mxu1 %vm4722_vm12, %v16152_v13  ;;  %v5817_v13 = vor.u32 %v5816_v2, %v5813_v0  ;;  %v6098_v0 = vrot.slane %v16103_v27, 5 }
 0x8d2   : > { %12164 = vmatprep.mubr.msk.bf16.mxu1 %vm14169_vm1, %v18432_v11 }
 0x8d4   : > { %v5417_v60 = vpop.f32.mrb[72].mxu1 }
 0x8d5   : > { %v12054_v30 = vpop.f32.mrb[73].mxu1  ;;  %v6093_v60 = vsel %vm18403_vm9, %v6090_v57, %v6092_v22 }
 0x8d6   : > { %v5419_v48 = vpop.f32.mrb[74].mxu1  ;;  %v6094_v30 = vrot.slane %v16043_v19, 5 }
 0x8d7   : > { %v12055_v29 = vpop.f32.mrb[75].mxu1 }
 0x8d8   : > { %v6095_v48 = vsel %vm18403_vm9, %v6092_v22, %v6094_v30  ;;  %v6096_v29 = vrot.slane %v16076_v28, 5 }
 0x8d9   : > { %12165 = vmatmul.mubr.msk.bf16.gmra.mrb[0].mxu1 %vm4722_vm12, %v16188_v40  ;;  %v5818_v40 = vsel %vm5746_vm6, %v16349_v21, %v5817_v13  ;;  %v10381_v21 = vld [vmem:[%s18334_s9 + $0xc] sm:$0x3] }
 0x8da   : > { %12168 = vmatprep.mubr.msk.bf16.mxu1 %vm14169_vm1, %v18432_v11  ;;  %v6379_v49 = vsel %vm4774_vm5, %v10381_v21, 0  ;;  %v6097_v23 = vsel %vm18403_vm9, %v6094_v30, %v6096_v29  ;;  %v6099_v1 = vsel %vm18403_vm9, %v6096_v29, %v6098_v0  ;;  %v18564_v29 = vld [vmem:[#allocation10_spill] sm:$0xff] }
 0x8e1   : > { %12169 = vmatmul.mubr.msk.bf16.gmra.mrb[4].mxu1 %vm4722_vm12, %v16215_v34  ;;  %v18555_v34 = vshll.u32 %v16381_v45, 16 }
 0x8e2   : > { %12172 = vmatprep.mubr.msk.bf16.mxu1 %vm14169_vm1, %v18432_v11 }
 0x8e9   : > { %12173 = vmatmul.mubr.msk.bf16.gmra.mrb[8].mxu1 %vm4722_vm12, %v16265_v52  ;;  %v5822_v52 = vrot.slane %v18555_v34, 5 }
 0x8ea   : > { %12176 = vmatprep.mubr.msk.bf16.mxu1 %vm14169_vm1, %v18432_v11 }
 0x8f1   : > { %12177 = vmatmul.mubr.msk.bf16.gmra.mrb[12].mxu1 %vm4722_vm12, %v16298_v6  ;;  %v5823_v6 = vsel %vm5746_vm6, %v5817_v13, %v5822_v52  ;;  %v6100_v13 = vrot.slane %v16143_v9, 5 }
 0x8f2   : > { %12180 = vmatprep.mubr.msk.bf16.mxu1 %vm14169_vm1, %v18432_v11 }
 0x8f9   : > { %12181 = vmatmul.mubr.msk.bf16.gmra.mrb[16].mxu1 %vm4722_vm12, %v16326_v32  ;;  %v6082_v32 = vrot.slane %v15855_v20, 5  ;;  %v6084_v20 = vrot.slane %v15883_v36, 5 }
 0x8fa   : > { %12184 = vmatprep.mubr.msk.bf16.mxu1 %vm14169_vm1, %v18432_v11 }
 0x8fb   : > { %v6085_v55 = vsel %vm18403_vm9, %v6082_v32, %v6084_v20 }
 0x901   : > { %12185 = vmatmul.mubr.msk.bf16.gmra.mrb[20].mxu1 %vm4722_vm12, %v16358_v3  ;;  %v6081_v3 = vrot.slane %v15827_v59, 5  ;;  %v6086_v59 = vrot.slane %v15907_v56, 5 }
 0x902   : > { %12188 = vmatprep.mubr.msk.bf16.mxu1 %vm14169_vm1, %v18432_v11 }
 0x903   : > { %v6083_v53 = vsel %vm18403_vm9, %v6081_v3, %v6082_v32  ;;  %v6087_v54 = vsel %vm18403_vm9, %v6084_v20, %v6086_v59  ;;  %v6089_v8 = vsel %vm18403_vm9, %v6086_v59, %v6088_v43  ;;  %v6102_v32 = vrot.slane %v16177_v10, 5 }
 0x904   : > { %v6104_v3 = vrot.slane %v16204_v17, 5 }
 0x905   : > { %v6103_v21 = vsel %vm18403_vm9, %v6100_v13, %v6102_v32 }
 0x909   : > { %12189 = vmatmul.mubr.msk.bf16.gmra.mrb[24].mxu1 %vm4722_vm12, %v5818_v40 }
 0x90a   : > { %12192 = vmatprep.mubr.msk.bf16.mxu1 %vm14169_vm1, %v18432_v11 }
 0x911   : > { %12193 = vmatmul.mubr.msk.bf16.gmra.mrb[80].mxu1 %vm4722_vm12, %v5823_v6  ;;  %v6101_v6 = vsel %vm18403_vm9, %v6098_v0, %v6100_v13  ;;  %v6587_v0 = vshrl.u32 %v16381_v45, 16 }
 0x912   : > { %12198 = vmatprep.mubr.msk.bf16.mxu1 %vm14169_vm1, %v18432_v11 }
 0x919   : > { %12199 = vmatmul.mubr.msk.bf16.vlgmr.msra.gmra.mrb[32].mxu1 %vm4722_vm12, %v6083_v53  ;;  %v6106_v53 = vrot.slane %v16256_v18, 5 }
 0x91a   : > { %12267 = vmatpush3.bf16.msra.mxu1 %v6379_v49  ;;  %12202 = vmatprep.mubr.msk.bf16.mxu1 %vm14169_vm1, %v18432_v11  ;;  %v6105_v49 = vsel %vm18403_vm9, %v6102_v32, %v6104_v3  ;;  %v17139_v32 = vld [vmem:[%s18567_s14] ss:$0 sm:$0xff] }
 0x91b   : > { %12336 = vmatprep.subr.bf16.mxu1 %v18432_v11  ;;  %v6107_v20 = vsel %vm18403_vm9, %v6104_v3, %v6106_v53 }
 0x921   : > { %12203 = vmatmul.mubr.msk.bf16.gmra.mrb[36].mxu1 %vm4722_vm12, %v6085_v55  ;;  %v6108_v55 = vrot.slane %v16288_v44, 5 }
 0x922   : > { %12206 = vmatprep.mubr.msk.bf16.mxu1 %vm14169_vm1, %v18432_v11 }
 0x923   : > { %v6109_v59 = vsel %vm18403_vm9, %v6106_v53, %v6108_v55  ;;  %v17145_v53 = vld [vmem:[%s18567_s14 + $0x1] ss:$0 sm:$0xff] }
 0x929   : > { %12207 = vmatmul.mubr.msk.bf16.gmra.mrb[40].mxu1 %vm4722_vm12, %v6087_v54  ;;  %v6110_v54 = vrot.slane %v16313_v63, 5 }
 0x92a   : > { %12210 = vmatprep.mubr.msk.bf16.mxu1 %vm14169_vm1, %v18432_v11 }
 0x92b   : > { %v6111_v43 = vsel %vm18403_vm9, %v6108_v55, %v6110_v54  ;;  %v18571_v55 = vld [vmem:[#allocation21_spill] sm:$0xff] }
 0x92c   : > { %vm7248_vm14 = vcmp.ge.s32.totalorder %v18571_v55, 1 }
 0x931   : > { %12211 = vmatmul.mubr.msk.bf16.gmra.mrb[44].mxu1 %vm4722_vm12, %v6089_v8  ;;  %v6112_v8 = vrot.slane %v16351_v39, 5 }
 0x932   : > { %12214 = vmatprep.mubr.msk.bf16.mxu1 %vm14169_vm1, %v18432_v11 }
 0x933   : > { %v6113_v57 = vsel %vm18403_vm9, %v6110_v54, %v6112_v8 }
 0x939   : > { %12215 = vmatmul.mubr.msk.bf16.gmra.mrb[48].mxu1 %vm4722_vm12, %v6091_v7  ;;  %v6114_v7 = vrot.slane %v16381_v45, 5 }
 0x93a   : > { %12218 = vmatprep.mubr.msk.bf16.mxu1 %vm14169_vm1, %v18432_v11 }
 0x93b   : > { %v6115_v22 = vsel %vm18403_vm9, %v6112_v8, %v6114_v7  ;;  %v18572_v8 = vld [vmem:[#allocation12_spill] sm:$0xff] }
 0x941   : > { %12219 = vmatmul.mubr.msk.bf16.gmra.mrb[52].mxu1 %vm4722_vm12, %v6093_v60  ;;  %v10399_v60 = vld [vmem:[%s18334_s9 + $0xe] sm:$0x3] }
 0x942   : > { %12222 = vmatprep.mubr.msk.bf16.mxu1 %vm14169_vm1, %v18432_v11  ;;  %v6610_v30 = vsel %vm4774_vm5, %v10399_v60, 0 }
 0x949   : > { %12223 = vmatmul.mubr.msk.bf16.gmra.mrb[56].mxu1 %vm4722_vm12, %v6095_v48  ;;  %v18563_v48 = vld [vmem:[#allocation9_spill] sm:$0xff] }
 0x94a   : > { %12226 = vmatprep.mubr.msk.bf16.mxu1 %vm14169_vm1, %v18432_v11 }
 0x951   : > { %12227 = vmatmul.mubr.msk.bf16.gmra.mrb[60].mxu1 %vm4722_vm12, %v6097_v23  ;;  %v6590_v23 = vshll.u32 %v16407_v42, 16 }
 0x952   : > { %12230 = vmatprep.mubr.msk.bf16.mxu1 %vm14169_vm1, %v18432_v11 }
 0x959   : > { %12231 = vmatmul.mubr.msk.bf16.gmra.mrb[64].mxu1 %vm4722_vm12, %v6099_v1  ;;  %v6589_v1 = vor.u32 %v6587_v0, %v16396_v46  ;;  %v10469_v46 = vld [vmem:[%s18336_s11 + $0x2] sm:$0x3] }
 0x95a   : > { %12234 = vmatprep.mubr.msk.bf16.mxu1 %vm14169_vm1, %v18432_v11 }
 0x95c   : > { %v5707_v2 = vpop.f32.mrb[76].mxu1 }
 0x95d   : > { %v12124_v40 = vpop.f32.mrb[77].mxu1 }
 0x95e   : > { %v5709_v34 = vpop.f32.mrb[78].mxu1 }
 0x95f   : > { %v12125_v52 = vpop.f32.mrb[79].mxu1 }
 0x960   : > { %v17132_v52 = vstv %s14320_s26  ;;  %s14172_s26 = smov 4  }
 0x961   : > { %12235 = vmatmul.mubr.msk.bf16.gmra.mrb[0].mxu1 %vm4722_vm12, %v6101_v6  ;;  %vm7215_vm10 = vcmp.ge.s32.totalorder %v17132_v52, 0  ;;  %v7205_v54 = vadd.s32 1, %v17132_v52 }
 0x962   : > { %12238 = vmatprep.mubr.msk.bf16.mxu1 %vm14169_vm1, %v18432_v11 }
 0x963   : > { %vm7216_vm3 = vcmp.ge.s32.totalorder %v7205_v54, 0  ;;  %vm7227_vm15 = vcmp.lt.s32.totalorder %v7205_v54, 16 }
 0x969   : > { %12239 = vmatmul.mubr.msk.bf16.gmra.mrb[4].mxu1 %vm4722_vm12, %v6103_v21  ;;  %v18568_v21 = vld [vmem:[#allocation11_spill] sm:$0xff] }
 0x96a   : > { %12242 = vmatprep.mubr.msk.bf16.mxu1 %vm14169_vm1, %v18432_v11 }
 0x971   : > { %12243 = vmatmul.mubr.msk.bf16.gmra.mrb[8].mxu1 %vm4722_vm12, %v6105_v49 }
 0x972   : > { %12246 = vmatprep.mubr.msk.bf16.mxu1 %vm14169_vm1, %v18432_v11 }
 0x979   : > { %12247 = vmatmul.mubr.msk.bf16.gmra.mrb[12].mxu1 %vm4722_vm12, %v6107_v20 }
 0x97a   : > { %12250 = vmatprep.mubr.msk.bf16.mxu1 %vm14169_vm1, %v18432_v11 }
 0x981   : > { %12251 = vmatmul.mubr.msk.bf16.gmra.mrb[16].mxu1 %vm4722_vm12, %v6109_v59 }
 0x982   : > { %12254 = vmatprep.mubr.msk.bf16.mxu1 %vm14169_vm1, %v18432_v11 }
 0x989   : > { %12255 = vmatmul.mubr.msk.bf16.gmra.mrb[20].mxu1 %vm4722_vm12, %v6111_v43 }
 0x98a   : > { %12258 = vmatprep.mubr.msk.bf16.mxu1 %vm14169_vm1, %v18432_v11 }
 0x991   : > { %12259 = vmatmul.mubr.msk.bf16.gmra.mrb[24].mxu1 %vm4722_vm12, %v6113_v57 }
 0x992   : > { %12262 = vmatprep.mubr.msk.bf16.mxu1 %vm14169_vm1, %v18432_v11 }
 0x999   : > { %12263 = vmatmul.mubr.msk.bf16.gmra.mrb[84].mxu1 %vm4722_vm12, %v6115_v22 }
 0x99a   : > { %12268 = vmatprep.mubr.msk.bf16.mxu1 %vm14169_vm1, %v18432_v11 }
 0x9a1   : > { %12269 = vmatmul.mubr.msk.bf16.vlgmr.msra.gmra.mrb[32].mxu1 %vm4722_vm12, %v15883_v36 }
 0x9a2   : > { %12337 = vmatpush3.bf16.msra.mxu1 %v6610_v30  ;;  %12272 = vmatprep.mubr.msk.bf16.mxu1 %vm14169_vm1, %v18432_v11 }
 0x9a3   : > { %12406 = vmatprep.subr.bf16.mxu1 %v18432_v11 }
 0x9a9   : > { %12273 = vmatmul.mubr.msk.bf16.gmra.mrb[36].mxu1 %vm4722_vm12, %v15907_v56 }
 0x9aa   : > { %12276 = vmatprep.mubr.msk.bf16.mxu1 %vm14169_vm1, %v18432_v11 }
 0x9b1   : > { %12277 = vmatmul.mubr.msk.bf16.gmra.mrb[40].mxu1 %vm4722_vm12, %v15945_v50 }
 0x9b2   : > { %12280 = vmatprep.mubr.msk.bf16.mxu1 %vm14169_vm1, %v18432_v11 }
 0x9b9   : > { %12281 = vmatmul.mubr.msk.bf16.gmra.mrb[44].mxu1 %vm4722_vm12, %v15978_v41 }
 0x9ba   : > { %12284 = vmatprep.mubr.msk.bf16.mxu1 %vm14169_vm1, %v18432_v11 }
 0x9c1   : > { %12285 = vmatmul.mubr.msk.bf16.gmra.mrb[48].mxu1 %vm4722_vm12, %v16005_v47  ;;  %v10417_v47 = vld [vmem:[%s18334_s9 + $0x10] sm:$0x3] }
 0x9c2   : > { %12288 = vmatprep.mubr.msk.bf16.mxu1 %vm14169_vm1, %v18432_v11 }
 0x9c9   : > { %12289 = vmatmul.mubr.msk.bf16.gmra.mrb[52].mxu1 %vm4722_vm12, %v16043_v19  ;;  %v6833_v19 = vsel %vm4774_vm5, %v10417_v47, 0  ;;  %v18573_v47 = vld [vmem:[#allocation18_spill] sm:$0xff] }
 0x9ca   : > { %12292 = vmatprep.mubr.msk.bf16.mxu1 %vm14169_vm1, %v18432_v11  ;;  %vm7313_vm13 = vcmp.lt.s32.totalorder %v18573_v47, 17 }
 0x9d1   : > { %12293 = vmatmul.mubr.msk.bf16.gmra.mrb[56].mxu1 %vm4722_vm12, %v16076_v28  ;;  %v18556_v28 = vld [vmem:[#allocation23_spill] sm:$0xff] }
 0x9d2   : > { %12296 = vmatprep.mubr.msk.bf16.mxu1 %vm14169_vm1, %v18432_v11 }
 0x9d9   : > { %12297 = vmatmul.mubr.msk.bf16.gmra.mrb[60].mxu1 %vm4722_vm12, %v16103_v27  ;;  %v18560_v27 = vld [vmem:[#allocation27_spill] sm:$0xff] }
 0x9da   : > { %12300 = vmatprep.mubr.msk.bf16.mxu1 %vm14169_vm1, %v18432_v11 }
 0x9e1   : > { %12301 = vmatmul.mubr.msk.bf16.gmra.mrb[64].mxu1 %vm4722_vm12, %v16143_v9  ;;  %v18561_v9 = vld [vmem:[#allocation30_spill] sm:$0xff] }
 0x9e2   : > { %12304 = vmatprep.mubr.msk.bf16.mxu1 %vm14169_vm1, %v18432_v11 }
 0x9e4   : > { %v6040_v36 = vpop.f32.mrb[80].mxu1 }
 0x9e5   : > { %v12194_v56 = vpop.f32.mrb[81].mxu1 }
 0x9e6   : > { %v6042_v50 = vpop.f32.mrb[82].mxu1 }
 0x9e7   : > { %v12195_v41 = vpop.f32.mrb[83].mxu1 }
 0x9e9   : > { %12305 = vmatmul.mubr.msk.bf16.gmra.mrb[0].mxu1 %vm4722_vm12, %v16177_v10 }
 0x9ea   : > { %12308 = vmatprep.mubr.msk.bf16.mxu1 %vm14169_vm1, %v18432_v11 }
 0x9f1   : > { %12309 = vmatmul.mubr.msk.bf16.gmra.mrb[4].mxu1 %vm4722_vm12, %v16204_v17 }
 0x9f2   : > { %12312 = vmatprep.mubr.msk.bf16.mxu1 %vm14169_vm1, %v18432_v11 }
 0x9f9   : > { %12313 = vmatmul.mubr.msk.bf16.gmra.mrb[8].mxu1 %vm4722_vm12, %v16256_v18 }
 0x9fa   : > { %12316 = vmatprep.mubr.msk.bf16.mxu1 %vm14169_vm1, %v18432_v11 }
 0xa01   : > { %12317 = vmatmul.mubr.msk.bf16.gmra.mrb[12].mxu1 %vm4722_vm12, %v16288_v44 }
 0xa02   : > { %12320 = vmatprep.mubr.msk.bf16.mxu1 %vm14169_vm1, %v18432_v11 }
 0xa09   : > { %12321 = vmatmul.mubr.msk.bf16.gmra.mrb[16].mxu1 %vm4722_vm12, %v16313_v63  ;;  %v18562_v63 = vld [vmem:[#allocation8_spill] sm:$0xff] }
 0xa0a   : > { %12324 = vmatprep.mubr.msk.bf16.mxu1 %vm14169_vm1, %v18432_v11 }
 0xa11   : > { %12325 = vmatmul.mubr.msk.bf16.gmra.mrb[20].mxu1 %vm4722_vm12, %v16351_v39 }
 0xa12   : > { %12328 = vmatprep.mubr.msk.bf16.mxu1 %vm14169_vm1, %v18432_v11 }
 0xa19   : > { %12329 = vmatmul.mubr.msk.bf16.gmra.mrb[24].mxu1 %vm4722_vm12, %v16381_v45 }
 0xa1a   : > { %12332 = vmatprep.mubr.msk.bf16.mxu1 %vm14169_vm1, %v18432_v11 }
 0xa21   : > { %12333 = vmatmul.mubr.msk.bf16.gmra.mrb[88].mxu1 %vm4722_vm12, %v16407_v42 }
 0xa22   : > { %12338 = vmatprep.mubr.msk.bf16.mxu1 %vm14169_vm1, %v18432_v11 }
 0xa29   : > { %12339 = vmatmul.mubr.msk.bf16.vlgmr.msra.gmra.mrb[32].mxu1 %vm4722_vm12, %v15938_v38  ;;  %v18557_v38 = vld [vmem:[#allocation20_spill] sm:$0xff] }
 0xa2a   : > { %12407 = vmatpush3.bf16.msra.mxu1 %v6833_v19  ;;  %12342 = vmatprep.mubr.msk.bf16.mxu1 %vm14169_vm1, %v18432_v11 }
 0xa2b   : > { %14038 = vmatprep.subr.msk.bf16.mxu1 %vm4774_vm5, %v10469_v46 }
 0xa31   : > { %12343 = vmatmul.mubr.msk.bf16.gmra.mrb[36].mxu1 %vm4722_vm12, %v15968_v37  ;;  %v18558_v37 = vld [vmem:[#allocation26_spill] sm:$0xff] }
 0xa32   : > { %12346 = vmatprep.mubr.msk.bf16.mxu1 %vm14169_vm1, %v18432_v11 }
 0xa39   : > { %12347 = vmatmul.mubr.msk.bf16.gmra.mrb[40].mxu1 %vm4722_vm12, %v15999_v51  ;;  %v18559_v51 = vld [vmem:[#allocation24_spill] sm:$0xff] }
 0xa3a   : > { %12350 = vmatprep.mubr.msk.bf16.mxu1 %vm14169_vm1, %v18432_v11 }
 0xa41   : > { %12351 = vmatmul.mubr.msk.bf16.gmra.mrb[44].mxu1 %vm4722_vm12, %v18556_v28 }
 0xa42   : > { %12354 = vmatprep.mubr.msk.bf16.mxu1 %vm14169_vm1, %v18432_v11 }
 0xa49   : > { %12355 = vmatmul.mubr.msk.bf16.gmra.mrb[48].mxu1 %vm4722_vm12, %v18557_v38  ;;  %v18574_v38 = vld [vmem:[#allocation13_spill] sm:$0xff] }
 0xa4a   : > { %12358 = vmatprep.mubr.msk.bf16.mxu1 %vm14169_vm1, %v18432_v11 }
 0xa51   : > { %12359 = vmatmul.mubr.msk.bf16.gmra.mrb[52].mxu1 %vm4722_vm12, %v18558_v37 }
 0xa52   : > { %12362 = vmatprep.mubr.msk.bf16.mxu1 %vm14169_vm1, %v18432_v11 }
 0xa59   : > { %12363 = vmatmul.mubr.msk.bf16.gmra.mrb[56].mxu1 %vm4722_vm12, %v18559_v51 }
 0xa5a   : > { %12366 = vmatprep.mubr.msk.bf16.mxu1 %vm14169_vm1, %v18432_v11 }
 0xa61   : > { %12367 = vmatmul.mubr.msk.bf16.gmra.mrb[60].mxu1 %vm4722_vm12, %v18560_v27 }
 0xa62   : > { %12370 = vmatprep.mubr.msk.bf16.mxu1 %vm14169_vm1, %v18432_v11 }
 0xa69   : > { %12371 = vmatmul.mubr.msk.bf16.gmra.mrb[64].mxu1 %vm4722_vm12, %v18561_v9 }
 0xa6a   : > { %12374 = vmatprep.mubr.msk.bf16.mxu1 %vm14169_vm1, %v18432_v11 }
 0xa6c   : > { %v6332_v10 = vpop.f32.mrb[84].mxu1 }
 0xa6d   : > { %v12264_v17 = vpop.f32.mrb[85].mxu1 }
 0xa6e   : > { %v6334_v18 = vpop.f32.mrb[86].mxu1 }
 0xa6f   : > { %v12265_v44 = vpop.f32.mrb[87].mxu1  ;;  %v18577_v18 = vld [vmem:[#allocation14_spill] sm:$0xff] }
 0xa71   : > { %12375 = vmatmul.mubr.msk.bf16.gmra.mrb[0].mxu1 %vm4722_vm12, %v18562_v63 }
 0xa72   : > { %12378 = vmatprep.mubr.msk.bf16.mxu1 %vm14169_vm1, %v18432_v11 }
 0xa79   : > { %12379 = vmatmul.mubr.msk.bf16.gmra.mrb[4].mxu1 %vm4722_vm12, %v18563_v48 }
 0xa7a   : > { %12382 = vmatprep.mubr.msk.bf16.mxu1 %vm14169_vm1, %v18432_v11 }
 0xa81   : > { %12383 = vmatmul.mubr.msk.bf16.gmra.mrb[8].mxu1 %vm4722_vm12, %v18564_v29 }
 0xa82   : > { %12386 = vmatprep.mubr.msk.bf16.mxu1 %vm14169_vm1, %v18432_v11 }
 0xa89   : > { %12387 = vmatmul.mubr.msk.bf16.gmra.mrb[12].mxu1 %vm4722_vm12, %v16338_v12  ;;  %v6592_v12 = vrot.slane %v6590_v23, 1 }
 0xa8a   : > { %12390 = vmatprep.mubr.msk.bf16.mxu1 %vm14169_vm1, %v18432_v11 }
 0xa8b   : > { %v6593_v2 = vsel %vm1156_vm2, %v6589_v1, %v6592_v12 }
 0xa91   : > { %12391 = vmatmul.mubr.msk.bf16.gmra.mrb[16].mxu1 %vm4722_vm12, %v16377_v14  ;;  %v6594_v14 = vshrl.u32 %v16407_v42, 16 }
 0xa92   : > { %12394 = vmatprep.mubr.msk.bf16.mxu1 %vm14169_vm1, %v18432_v11 }
 0xa93   : > { %v6596_v13 = vor.u32 %v6594_v14, %v6592_v12 }
 0xa99   : > { %12395 = vmatmul.mubr.msk.bf16.gmra.mrb[20].mxu1 %vm4722_vm12, %v16401_v58  ;;  %v7604_v58 = vsel %vm4774_vm5, %v10469_v46, 0 }
 0xa9a   : > { %12398 = vmatprep.mubr.msk.bf16.mxu1 %vm14169_vm1, %v18432_v11 }
 0xaa1   : > { %12399 = vmatmul.mubr.msk.bf16.gmra.mrb[24].mxu1 %vm4722_vm12, %v6593_v2 }
 0xaa2   : > { %12402 = vmatprep.mubr.msk.bf16.mxu1 %vm14169_vm1, %v18432_v11 }
 0xaa9   : > { %12403 = vmatmul.mubr.msk.bf16.gmra.mrb[92].mxu1 %vm4722_vm12, %v6596_v13 }
 0xaaa   : > { %12408 = vmatprep.mubr.msk.bf16.mxu1 %vm14169_vm1, %v18432_v11 }
 0xab1   : > { %12409 = vmatmul.mubr.msk.bf16.vlgmr.msra.gmra.mrb[32].mxu1 %vm4722_vm12, %v16533_v25 }
 0xab2   : > { %12412 = vmatprep.mubr.msk.bf16.mxu1 %vm14169_vm1, %v18432_v11  ;;  %12477 = vmatpush3.bf16.msra.mxu1 %v7604_v58  ;;  %v7206_v58 = vadd.s32 2, %v17132_v52 }
 0xab9   : > { %12413 = vmatmul.mubr.msk.bf16.gmra.mrb[36].mxu1 %vm4722_vm12, %v16541_v24 }
 0xaba   : > { %12416 = vmatprep.mubr.msk.bf16.mxu1 %vm14169_vm1, %v18432_v11 }
 0xac1   : > { %12417 = vmatmul.mubr.msk.bf16.gmra.mrb[40].mxu1 %vm4722_vm12, %v16549_v31 }
 0xac2   : > { %12420 = vmatprep.mubr.msk.bf16.mxu1 %vm14169_vm1, %v18432_v11 }
 0xac9   : > { %12421 = vmatmul.mubr.msk.bf16.gmra.mrb[44].mxu1 %vm4722_vm12, %v16557_v35 }
 0xaca   : > { %12424 = vmatprep.mubr.msk.bf16.mxu1 %vm14169_vm1, %v18432_v11 }
 0xad1   : > { %12425 = vmatmul.mubr.msk.bf16.gmra.mrb[48].mxu1 %vm4722_vm12, %v16565_v26  ;;  %v18566_v26 = vld [vmem:[#allocation37_spill] sm:$0xff] }
 0xad2   : > { %12428 = vmatprep.mubr.msk.bf16.mxu1 %vm14169_vm1, %v18432_v11 }
 0xad9   : > { %12429 = vmatmul.mubr.msk.bf16.gmra.mrb[52].mxu1 %vm4722_vm12, %v16573_v16 }
 0xada   : > { %12432 = vmatprep.mubr.msk.bf16.mxu1 %vm14169_vm1, %v18432_v11 }
 0xae1   : > { %12433 = vmatmul.mubr.msk.bf16.gmra.mrb[56].mxu1 %vm4722_vm12, %v16581_v62  ;;  %v6814_v62 = vrot.slane %v16351_v39, 1  ;;  %v6818_v39 = vrot.slane %v16407_v42, 1 }
 0xae2   : > { %12436 = vmatprep.mubr.msk.bf16.mxu1 %vm14169_vm1, %v18432_v11 }
 0xae3   : > { %v6815_v16 = vsel %vm1842_vm4, %v18566_v26, %v6814_v62 }
 0xae9   : > { %12437 = vmatmul.mubr.msk.bf16.gmra.mrb[60].mxu1 %vm4722_vm12, %v16589_v61  ;;  %v18565_v61 = vld [vmem:[#allocation38_spill] sm:$0xff] }
 0xaea   : > { %12440 = vmatprep.mubr.msk.bf16.mxu1 %vm14169_vm1, %v18432_v11 }
 0xaf1   : > { %12441 = vmatmul.mubr.msk.bf16.gmra.mrb[64].mxu1 %vm4722_vm12, %v16597_v33  ;;  %v6816_v33 = vrot.slane %v16381_v45, 1  ;;  %v17127_v45 = vld [vmem:[%s18336_s11] sm:$0x3] }
 0xaf2   : > { %12444 = vmatprep.mubr.msk.bf16.mxu1 %vm14169_vm1, %v18432_v11  ;;  %14039 = vmatprep.subr.msk.bf16.mxu1 %vm4774_vm5, %v17127_v45 }
 0xaf4   : > { %v6543_v25 = vpop.f32.mrb[88].mxu1 }
 0xaf5   : > { %v12334_v24 = vpop.f32.mrb[89].mxu1 }
 0xaf6   : > { %v6545_v31 = vpop.f32.mrb[90].mxu1 }
 0xaf7   : > { %v12335_v35 = vpop.f32.mrb[91].mxu1  ;;  %v18578_v31 = vld [vmem:[#allocation15_spill] sm:$0xff] }
 0xaf9   : > { %12445 = vmatmul.mubr.msk.bf16.gmra.mrb[0].mxu1 %vm4722_vm12, %v16605_v4  ;;  %v6817_v4 = vsel %vm1842_vm4, %v6814_v62, %v6816_v33 }
 0xafa   : > { %12448 = vmatprep.mubr.msk.bf16.mxu1 %vm14169_vm1, %v18432_v11 }
 0xb01   : > { %12449 = vmatmul.mubr.msk.bf16.gmra.mrb[4].mxu1 %vm4722_vm12, %v16613_v5  ;;  %v6819_v5 = vsel %vm1842_vm4, %v6816_v33, %v6818_v39 }
 0xb02   : > { %12452 = vmatprep.mubr.msk.bf16.mxu1 %vm14169_vm1, %v18432_v11 }
 0xb09   : > { %12453 = vmatmul.mubr.msk.bf16.gmra.mrb[8].mxu1 %vm4722_vm12, %v16621_v15 }
 0xb0a   : > { %12456 = vmatprep.mubr.msk.bf16.mxu1 %vm14169_vm1, %v18432_v11 }
 0xb11   : > { %12457 = vmatmul.mubr.msk.bf16.gmra.mrb[12].mxu1 %vm4722_vm12, %v18565_v61 }
 0xb12   : > { %12460 = vmatprep.mubr.msk.bf16.mxu1 %vm14169_vm1, %v18432_v11 }
 0xb19   : > { %12461 = vmatmul.mubr.msk.bf16.gmra.mrb[16].mxu1 %vm4722_vm12, %v6815_v16 }
 0xb1a   : > { %12464 = vmatprep.mubr.msk.bf16.mxu1 %vm14169_vm1, %v18432_v11 }
 0xb21   : > { %12465 = vmatmul.mubr.msk.bf16.gmra.mrb[20].mxu1 %vm4722_vm12, %v6817_v4 }
 0xb22   : > { %12468 = vmatprep.mubr.msk.bf16.mxu1 %vm14169_vm1, %v18432_v11 }
 0xb29   : > { %12469 = vmatmul.mubr.msk.bf16.gmra.mrb[24].mxu1 %vm4722_vm12, %v6819_v5 }
 0xb2a   : > { %12472 = vmatprep.mubr.msk.bf16.mxu1 %vm14169_vm1, %v18432_v11  ;;  %vm7226_vm1 = vcmp.lt.s32.totalorder %v17132_v52, 16 }
 0xb2b   : > { %vm17147_vm7 = vmand %vm7215_vm10, %vm7226_vm1 }
 0xb2c   : > { %vm7279_vm8 = vmand %vm17147_vm7, %vm7248_vm14  ;;  %v10438_v50 = vsel %vm17147_vm7, 1.0, %v18432_v11 }
 0xb2d   : > { %v10437_v56 = vsel %vm7279_vm8, 1.0, %v18432_v11  ;;  %vm17169_vm1 = vmand %vm7216_vm3, %vm7227_vm15 }
 0xb2e   : > { %vm7322_vm8 = vmand %vm17147_vm7, %vm7313_vm13 }
 0xb2f   : > { %vm7282_vm3 = vmand %vm17169_vm1, %vm7248_vm14  ;;  %v10439_v14 = vsel %vm7322_vm8, 1.0, %v18432_v11  ;;  %vm7228_vm8 = vcmp.lt.s32.totalorder %v7206_v58, 16 }
 0xb30   : > { %v10440_v13 = vsel %vm7282_vm3, 1.0, %v18432_v11  ;;  %vm7325_vm15 = vmand %vm17169_vm1, %vm7313_vm13  ;;  %vm9371_vm3 = vcmask 1040384  }
 0xb31   : > { %12473 = vmatmul.mubr.msk.bf16.gmra.mrb[96].mxu1 %vm4722_vm12, %v6818_v39  ;;  %v18579_v39 = vld [vmem:[#allocation16_spill] sm:$0xff] }
 0xb7c   : > { %v6774_v15 = vpop.f32.mrb[92].mxu1 }
 0xb7d   : > { %v12404_v40 = vpop.f32.mrb[93].mxu1 }
 0xb7e   : > { %v6776_v42 = vpop.f32.mrb[94].mxu1 }
 0xb7f   : > { %v12405_v34 = vpop.f32.mrb[95].mxu1 }
 0xb84   : > { %v6869_v6 = vpop.f32.mrb[32].mxu1 }
 0xb85   : > { %v12712_v3 = vadd.f32 %v6869_v6, %v18568_v21  ;;  %v12410_v49 = vpop.f32.mrb[33].mxu1 }
 0xb86   : > { %v6872_v59 = vpop.f32.mrb[34].mxu1 }
 0xb87   : > { %v7039_v43 = vmul.f32 %v12712_v3, %v17139_v32  ;;  %v12713_v57 = vadd.f32 %v6872_v59, %v18572_v8  ;;  %v12411_v7 = vpop.f32.mrb[35].mxu1  ;;  %v10441_v3 = vsel %vm17169_vm1, 1.0, %v18432_v11 }
 0xb89   : > { %v7076_v22 = vadd.f32 %v17145_v53, %v7039_v43  ;;  %v7040_v60 = vmul.f32 %v12713_v57, %v17139_v32  ;;  %v10442_v43 = vsel %vm7325_vm15, 1.0, %v18432_v11  ;;  %v7752_v57 = vsel %vm4774_vm5, %v17127_v45, 0 }
 0xb8b   : > { %vm7108_vm11 = vcmp.ge.f32.partialorder %v7076_v22, 0.0  ;;  %v7140_v30 = vmul.f32 0.1, %v7076_v22  ;;  %v7077_v36 = vadd.f32 %v17145_v53, %v7040_v60  ;;  %v7207_v60 = vadd.s32 3, %v17132_v52 }
 0xb8c   : > { %v6877_v41 = vpop.f32.mrb[36].mxu1 }
 0xb8d   : > { %v7172_v19 = vsel %vm7108_vm11, %v7076_v22, %v7140_v30  ;;  %vm7109_vm10 = vcmp.ge.f32.partialorder %v7077_v36, 0.0  ;;  %v7141_v28 = vmul.f32 0.1, %v7077_v36  ;;  %v12714_v37 = vadd.f32 %v6877_v41, %v18574_v38  ;;  %v12414_v51 = vpop.f32.mrb[37].mxu1 }
 0xb8e   : > { %v6880_v27 = vpop.f32.mrb[38].mxu1  ;;  %v7416_v48 = vmul.f32 %v10437_v56, %v7172_v19  ;;  %v18582_v56 = vld [vmem:[#allocation17_spill] sm:$0xff] }
 0xb8f   : > { %v7173_v10 = vsel %vm7109_vm10, %v7077_v36, %v7141_v28  ;;  %v7041_v17 = vmul.f32 %v12714_v37, %v17139_v32  ;;  %v12715_v44 = vadd.f32 %v6880_v27, %v18577_v18  ;;  %v12415_v63 = vpop.f32.mrb[39].mxu1  ;;  %vm7217_vm10 = vcmp.ge.s32.totalorder %v7206_v58, 0 }
 0xb90   : > { %v7417_v29 = vmul.f32 %v10438_v50, %v7173_v10 }
 0xb91   : > { %v7078_v23 = vadd.f32 %v17145_v53, %v7041_v17  ;;  %v7042_v0 = vmul.f32 %v12715_v44, %v17139_v32  ;;  %v18585_v17 = vld [vmem:[#allocation19_spill] sm:$0xff] }
 0xb92   : > { %v17185_v12 = vpack.c.bf16 %v7417_v29, %v7416_v48 }
 0xb93   : > { %vm7110_vm11 = vcmp.ge.f32.partialorder %v7078_v23, 0.0  ;;  %v7142_v1 = vmul.f32 0.1, %v7078_v23  ;;  %v7079_v2 = vadd.f32 %v17145_v53, %v7042_v0 }
 0xb94   : > { %v6885_v46 = vpop.f32.mrb[40].mxu1  ;;  %v7470_v16 = vshll.u32 %v17185_v12, 16  ;;  %v7468_v7 = vshrl.u32 %v17185_v12, 16 }
 0xb95   : > { %v7174_v25 = vsel %vm7110_vm11, %v7078_v23, %v7142_v1  ;;  %vm7111_vm7 = vcmp.ge.f32.partialorder %v7079_v2, 0.0  ;;  %v7143_v24 = vmul.f32 0.1, %v7079_v2  ;;  %v12716_v35 = vadd.f32 %v6885_v46, %v18578_v31  ;;  %v12418_v61 = vpop.f32.mrb[41].mxu1 }
 0xb96   : > { %v6888_v62 = vpop.f32.mrb[42].mxu1  ;;  %v9372_v26 = vrot.slane %v7079_v2, 7  ;;  %v7418_v40 = vmul.f32 %v10439_v14, %v7174_v25  ;;  %v7472_v49 = vrot.slane %v7470_v16, 1 }
 0xb97   : > { %v7175_v33 = vsel %vm7111_vm7, %v7079_v2, %v7143_v24  ;;  %v7043_v4 = vmul.f32 %v12716_v35, %v17139_v32  ;;  %v12717_v5 = vadd.f32 %v6888_v62, %v18579_v39  ;;  %v12419_v15 = vpop.f32.mrb[43].mxu1  ;;  %vm17209_vm7 = vmand %vm7217_vm10, %vm7228_vm8  ;;  %vm7218_vm10 = vcmp.ge.s32.totalorder %v7207_v60, 0  ;;  %v18588_v39 = vld [vmem:[#allocation22_spill] sm:$0xff] }
 0xb98   : > { %v7419_v42 = vmul.f32 %v10440_v13, %v7175_v33  ;;  %9412 = vrot.lane.b32.xlu0 %v9372_v26, %s14172_s26  ;;  %v7473_v37 = vor.u32 %v7472_v49, %v7468_v7  ;;  %vm17223_vm15 = vmand %vm17209_vm7, %vm7248_vm14  ;;  %vm7229_vm8 = vcmp.lt.s32.totalorder %v7207_v60, 16  ;;  %v10444_v46 = vsel %vm17209_vm7, 1.0, %v18432_v11 }
 0xb99   : > { %v7080_v34 = vadd.f32 %v17145_v53, %v7043_v4  ;;  %v7044_v6 = vmul.f32 %v12717_v5, %v17139_v32  ;;  %v10443_v13 = vsel %vm17223_vm15, 1.0, %v18432_v11 }
 0xb9a   : > { %v17202_v21 = vpack.c.bf16 %v7419_v42, %v7418_v40 }
 0xb9b   : > { %vm7112_vm11 = vcmp.ge.f32.partialorder %v7080_v34, 0.0  ;;  %v7144_v20 = vmul.f32 0.1, %v7080_v34  ;;  %v7081_v59 = vadd.f32 %v17145_v53, %v7044_v6  ;;  %v9373_v54 = vrot.slane %v7080_v34, 7 }
 0xb9c   : > { %v6893_v8 = vpop.f32.mrb[44].mxu1  ;;  %v7475_v22 = vshll.u32 %v17202_v21, 16  ;;  %v7479_v63 = vshrl.u32 %v17202_v21, 16 }
 0xb9d   : > { %v7176_v30 = vsel %vm7112_vm11, %v7080_v34, %v7144_v20  ;;  %vm7113_vm1 = vcmp.ge.f32.partialorder %v7081_v59, 0.0  ;;  %v7145_v36 = vmul.f32 0.1, %v7081_v59  ;;  %v12718_v50 = vadd.f32 %v6893_v8, %v18582_v56  ;;  %v12422_v41 = vpop.f32.mrb[45].mxu1 }
 0xb9e   : > { %v6896_v19 = vpop.f32.mrb[46].mxu1  ;;  %v9374_v28 = vsel %vm9371_vm3, %v9372_v26, %v9373_v54  ;;  %v9375_v38 = vrot.slane %v7081_v59, 7  ;;  %v7477_v51 = vrot.slane %v7475_v22, 1  ;;  %v7420_v48 = vmul.f32 %v10441_v3, %v7176_v30 }
 0xb9f   : > { %v7177_v27 = vsel %vm7113_vm1, %v7081_v59, %v7145_v36  ;;  %v7045_v9 = vmul.f32 %v12718_v50, %v17139_v32  ;;  %v12719_v18 = vadd.f32 %v6896_v19, %v18585_v17  ;;  %9414 = vrot.lane.b32.xlu1 %v9374_v28, %s14172_s26  ;;  %v12423_v44 = vpop.f32.mrb[47].mxu1  ;;  %vm17245_vm1 = vmand %vm7218_vm10, %vm7229_vm8  ;;  %v17251_v26 = vrot.slane %v7479_v63, 4  ;;  %v18591_v59 = vld [vmem:[#allocation25_spill] sm:$0xff]  ;;  %v17282_v36 = vld [vmem:[%s18336_s11 + $0x4] sm:$0x3] }
 0xba0   : > { %v7421_v29 = vmul.f32 %v10442_v43, %v7177_v27  ;;  %v9376_v23 = vsel %vm9371_vm3, %v9373_v54, %v9375_v38  ;;  %v7478_v0 = vsel %vm1156_vm2, %v7473_v37, %v7477_v51  ;;  %v17253_v16 = vrot.slane %v7475_v22, 5  ;;  %vm17261_vm10 = vmand %vm17209_vm7, %vm7313_vm13 }
 0xba1   : > { %v7082_v1 = vadd.f32 %v17145_v53, %v7045_v9  ;;  %v7046_v2 = vmul.f32 %v12719_v18, %v17139_v32  ;;  %9416 = vrot.lane.b32.xlu0 %v9376_v23, %s14172_s26  ;;  %12478 = vmatprep.mubr.msk.bf16.mxu1 %vm4722_vm12, %v7478_v0  ;;  %v7481_v40 = vor.u32 %v7479_v63, %v7477_v51  ;;  %vm17271_vm8 = vmand %vm17245_vm1, %vm7248_vm14  ;;  %v10445_v28 = vsel %vm17261_vm10, 1.0, %v18432_v11  ;;  %v18594_v23 = vld [vmem:[#allocation28_spill] sm:$0xff] }
 0xba2   : > { %v17236_v14 = vpack.c.bf16 %v7421_v29, %v7420_v48  ;;  %v8299_v45 = vor.u32 %v17253_v16, %v17251_v26  ;;  %v10446_v38 = vsel %vm17271_vm8, 1.0, %v18432_v11  ;;  %v7208_v18 = vadd.s32 4, %v17132_v52 }
 0xba3   : > { %vm7114_vm11 = vcmp.ge.f32.partialorder %v7082_v1, 0.0  ;;  %v7146_v58 = vmul.f32 0.1, %v7082_v1  ;;  %v7083_v25 = vadd.f32 %v17145_v53, %v7046_v2  ;;  %v9377_v24 = vrot.slane %v7082_v1, 7 }
 0xba4   : > { %v6901_v31 = vpop.f32.mrb[48].mxu1  ;;  %v7483_v61 = vshll.u32 %v17236_v14, 16  ;;  %v7487_v62 = vshrl.u32 %v17236_v14, 16  ;;  %vm7219_vm10 = vcmp.ge.s32.totalorder %v7208_v18, 0  ;;  %vm7230_vm8 = vcmp.lt.s32.totalorder %v7208_v18, 16 }
 0xba5   : > { %v7178_v33 = vsel %vm7114_vm11, %v7082_v1, %v7146_v58  ;;  %vm7115_vm15 = vcmp.ge.f32.partialorder %v7083_v25, 0.0  ;;  %v7147_v4 = vmul.f32 0.1, %v7083_v25  ;;  %v12720_v5 = vadd.f32 %v6901_v31, %v18588_v39  ;;  %v12426_v15 = vpop.f32.mrb[49].mxu1  ;;  %9418 = vrot.lane.b32.xlu1 %v9377_v24, %s14172_s26  ;;  %vm17338_vm9 = vmand %vm7219_vm10, %vm7230_vm8 }
 0xba6   : > { %v6904_v34 = vpop.f32.mrb[50].mxu1  ;;  %v9378_v6 = vrot.slane %v7083_v25, 7  ;;  %v7485_v3 = vrot.slane %v7483_v61, 1  ;;  %v7422_v7 = vmul.f32 %v10443_v13, %v7178_v33  ;;  %v8300_v41 = vrot.slane %v7487_v62, 4 }
 0xba7   : > { %v7179_v49 = vsel %vm7115_vm15, %v7083_v25, %v7147_v4  ;;  %v7047_v20 = vmul.f32 %v12720_v5, %v17139_v32  ;;  %v12721_v54 = vadd.f32 %v6904_v34, %v18591_v59  ;;  %v12427_v8 = vpop.f32.mrb[51].mxu1  ;;  %v8301_v37 = vrot.slane %v7483_v61, 5  ;;  %v18595_v61 = vld [vmem:[#allocation29_spill] sm:$0xff]  ;;  %vm7331_vm15 = vmand %vm17245_vm1, %vm7313_vm13 }
 0xba8   : > { %v7423_v22 = vmul.f32 %v10444_v46, %v7179_v49  ;;  %v9379_v60 = vsel %vm9371_vm3, %v9377_v24, %v9378_v6  ;;  %v7486_v30 = vsel %vm1156_vm2, %v7481_v40, %v7485_v3  ;;  %v7489_v58 = vor.u32 %v7487_v62, %v7485_v3 }
 0xba9   : > { %v7084_v56 = vadd.f32 %v17145_v53, %v7047_v20  ;;  %v7048_v50 = vmul.f32 %v12721_v54, %v17139_v32  ;;  %9420 = vrot.lane.b32.xlu0 %v9379_v60, %s14172_s26  ;;  %12479 = vmatmul.mubr.msk.bf16.vlgmr.msra.gmra.mrb[100].mxu1 %vm4722_vm12, %v7486_v30  ;;  %v17304_v63 = vor.u32 %v8301_v37, %v8300_v41  ;;  %v7209_v34 = vadd.s32 5, %v17132_v52  ;;  %v18596_v60 = vld [vmem:[#allocation31_spill] sm:$0xff] }
 0xbaa   : > { %v17290_v19 = vpack.c.bf16 %v7423_v22, %v7422_v7  ;;  %12503 = vmatpush3.bf16.msra.mxu1 %v7752_v57  ;;  %v10447_v54 = vsel %vm17245_vm1, 1.0, %v18432_v11  ;;  %v10448_v43 = vsel %vm7331_vm15, 1.0, %v18432_v11  ;;  %vm7291_vm15 = vmand %vm17338_vm9, %vm7248_vm14 }
 0xbab   : > { %vm7116_vm7 = vcmp.ge.f32.partialorder %v7084_v56, 0.0  ;;  %v7148_v51 = vmul.f32 0.1, %v7084_v56  ;;  %v7085_v27 = vadd.f32 %v17145_v53, %v7048_v50  ;;  %v9380_v9 = vrot.slane %v7084_v56, 7  ;;  %14040 = vmatprep.subr.msk.bf16.mxu1 %vm4774_vm5, %v17282_v36 }
 0xbac   : > { %v6909_v10 = vpop.f32.mrb[52].mxu1  ;;  %v7491_v17 = vshll.u32 %v17290_v19, 16  ;;  %v7495_v44 = vshrl.u32 %v17290_v19, 16  ;;  %vm7220_vm1 = vcmp.ge.s32.totalorder %v7209_v34, 0  ;;  %vm7231_vm10 = vcmp.lt.s32.totalorder %v7209_v34, 16 }
 0xbad   : > { %v7180_v48 = vsel %vm7116_vm7, %v7084_v56, %v7148_v51  ;;  %vm7117_vm11 = vcmp.ge.f32.partialorder %v7085_v27, 0.0  ;;  %v7149_v29 = vmul.f32 0.1, %v7085_v27  ;;  %v12722_v0 = vadd.f32 %v6909_v10, %v18594_v23  ;;  %v12430_v1 = vpop.f32.mrb[53].mxu1 }
 0xbae   : > { %v6912_v2 = vpop.f32.mrb[54].mxu1  ;;  %v9381_v13 = vsel %vm9371_vm3, %v9378_v6, %v9380_v9  ;;  %v9382_v46 = vrot.slane %v7085_v27, 7  ;;  %v7493_v25 = vrot.slane %v7491_v17, 1  ;;  %v8305_v33 = vrot.slane %v7491_v17, 5 }
 0xbaf   : > { %v7181_v24 = vsel %vm7117_vm11, %v7085_v27, %v7149_v29  ;;  %v7049_v31 = vmul.f32 %v12722_v0, %v17139_v32  ;;  %v12723_v26 = vadd.f32 %v6912_v2, %v18595_v61  ;;  %9422 = vrot.lane.b32.xlu1 %v9381_v13, %s14172_s26  ;;  %v12431_v16 = vpop.f32.mrb[55].mxu1  ;;  %v7424_v4 = vmul.f32 %v10445_v28, %v7180_v48  ;;  %v18599_v27 = vld [vmem:[#allocation32_spill] sm:$0xff] }
 0xbb0   : > { %v7425_v39 = vmul.f32 %v10446_v38, %v7181_v24  ;;  %9424 = vrot.lane.b32.xlu0 %v9382_v46, %s14172_s26  ;;  %v7494_v5 = vsel %vm1156_vm2, %v7489_v58, %v7493_v25  ;;  %v8304_v15 = vrot.slane %v7495_v44, 4  ;;  %v17325_v6 = vsel %vm5746_vm6, %v8299_v45, %v17304_v63 }
 0xbb1   : > { %v7086_v40 = vadd.f32 %v17145_v53, %v7049_v31  ;;  %v7050_v62 = vmul.f32 %v12723_v26, %v17139_v32  ;;  %12482 = vmatprep.mubr.msk.bf16.mxu1 %vm4722_vm12, %v7494_v5  ;;  %v7497_v28 = vor.u32 %v7495_v44, %v7493_v25  ;;  %v10450_v2 = vsel %vm17338_vm9, 1.0, %v18432_v11 }
 0xbb2   : > { %v17320_v42 = vpack.c.bf16 %v7425_v39, %v7424_v4  ;;  %v17327_v3 = vor.u32 %v8305_v33, %v8304_v15  ;;  %v10449_v24 = vsel %vm7291_vm15, 1.0, %v18432_v11  ;;  %v7210_v16 = vadd.s32 6, %v17132_v52  ;;  %v18602_v39 = vld [vmem:[#allocation33_spill] sm:$0xff] }
 0xbb3   : > { %vm7118_vm7 = vcmp.ge.f32.partialorder %v7086_v40, 0.0  ;;  %v7150_v49 = vmul.f32 0.1, %v7086_v40  ;;  %v7087_v20 = vadd.f32 %v17145_v53, %v7050_v62  ;;  %v9383_v59 = vrot.slane %v7086_v40, 7 }
 0xbb4   : > { %v6917_v8 = vpop.f32.mrb[56].mxu1  ;;  %v7499_v57 = vshll.u32 %v17320_v42, 16  ;;  %v17362_v0 = vsel %vm5746_vm6, %v17304_v63, %v17327_v3  ;;  %v7503_v13 = vshrl.u32 %v17320_v42, 16  ;;  %v7211_v63 = vadd.s32 7, %v17132_v52 }
 0xbb5   : > { %v7182_v7 = vsel %vm7118_vm7, %v7086_v40, %v7150_v49  ;;  %vm7119_vm11 = vcmp.ge.f32.partialorder %v7087_v20, 0.0  ;;  %v7151_v22 = vmul.f32 0.1, %v7087_v20  ;;  %v12724_v30 = vadd.f32 %v6917_v8, %v18596_v60  ;;  %v12434_v56 = vpop.f32.mrb[57].mxu1  ;;  %vm17373_vm7 = vmand %vm7220_vm1, %vm7231_vm10  ;;  %v18605_v8 = vld [vmem:[#allocation34_spill] sm:$0xff] }
 0xbb6   : > { %v6920_v45 = vpop.f32.mrb[58].mxu1  ;;  %v9384_v35 = vsel %vm9371_vm3, %v9382_v46, %v9383_v59  ;;  %v9385_v41 = vrot.slane %v7087_v20, 7  ;;  %v7501_v38 = vrot.slane %v7499_v57, 1  ;;  %v7426_v17 = vmul.f32 %v10447_v54, %v7182_v7  ;;  %vm17385_vm1 = vmand %vm17338_vm9, %vm7313_vm13 }
 0xbb7   : > { %v7183_v37 = vsel %vm7119_vm11, %v7087_v20, %v7151_v22  ;;  %v7051_v51 = vmul.f32 %v12724_v30, %v17139_v32  ;;  %v12725_v9 = vadd.f32 %v6920_v45, %v18599_v27  ;;  %9426 = vrot.lane.b32.xlu1 %v9384_v35, %s14172_s26  ;;  %v12435_v10 = vpop.f32.mrb[59].mxu1  ;;  %v8308_v20 = vrot.slane %v7503_v13, 4  ;;  %vm7294_vm15 = vmand %vm17373_vm7, %vm7248_vm14 }
 0xbb8   : > { %v7427_v18 = vmul.f32 %v10448_v43, %v7183_v37  ;;  %v9386_v48 = vsel %vm9371_vm3, %v9383_v59, %v9385_v41  ;;  %v17348_v29 = vsel %vm1156_vm2, %v7497_v28, %v7501_v38  ;;  %v7505_v61 = vor.u32 %v7503_v13, %v7501_v38 }
 0xbb9   : > { %v7088_v23 = vadd.f32 %v17145_v53, %v7051_v51  ;;  %v7052_v44 = vmul.f32 %v12725_v9, %v17139_v32  ;;  %9428 = vrot.lane.b32.xlu0 %v9386_v48, %s14172_s26  ;;  %12483 = vmatmul.mubr.msk.bf16.gmra.mrb[104].mxu1 %vm4722_vm12, %v17348_v29  ;;  %v8309_v59 = vrot.slane %v7499_v57, 5  ;;  %vm7221_vm9 = vcmp.ge.s32.totalorder %v7210_v16, 0 }
 0xbba   : > { %v17364_v1 = vpack.c.bf16 %v7427_v18, %v7426_v17  ;;  %vm7232_vm10 = vcmp.lt.s32.totalorder %v7210_v16, 16  ;;  %v10451_v28 = vsel %vm17385_vm1, 1.0, %v18432_v11  ;;  %v10452_v38 = vsel %vm7294_vm15, 1.0, %v18432_v11  ;;  %vm17427_vm15 = vmand %vm17373_vm7, %vm7313_vm13 }
 0xbbb   : > { %vm7120_vm8 = vcmp.ge.f32.partialorder %v7088_v23, 0.0  ;;  %v7152_v46 = vmul.f32 0.1, %v7088_v23  ;;  %v7089_v58 = vadd.f32 %v17145_v53, %v7052_v44  ;;  %v9387_v25 = vrot.slane %v7088_v23, 7 }
 0xbbc   : > { %v6925_v31 = vpop.f32.mrb[60].mxu1  ;;  %v7507_v26 = vshll.u32 %v17364_v1, 16  ;;  %v7511_v60 = vshrl.u32 %v17364_v1, 16  ;;  %v17411_v37 = vor.u32 %v8309_v59, %v8308_v20  ;;  %v10453_v17 = vsel %vm17373_vm7, 1.0, %v18432_v11 }
 0xbbd   : > { %v7184_v33 = vsel %vm7120_vm8, %v7088_v23, %v7152_v46  ;;  %vm7121_vm11 = vcmp.ge.f32.partialorder %v7089_v58, 0.0  ;;  %v7153_v4 = vmul.f32 0.1, %v7089_v58  ;;  %v12726_v5 = vadd.f32 %v6925_v31, %v18602_v39  ;;  %v12438_v15 = vpop.f32.mrb[61].mxu1  ;;  %9430 = vrot.lane.b32.xlu1 %v9387_v25, %s14172_s26  ;;  %v18608_v46 = vld [vmem:[#allocation35_spill] sm:$0xff] }
 0xbbe   : > { %v6928_v62 = vpop.f32.mrb[62].mxu1  ;;  %v9388_v34 = vrot.slane %v7089_v58, 7  ;;  %v7509_v49 = vrot.slane %v7507_v26, 1  ;;  %v7428_v30 = vmul.f32 %v10449_v24, %v7184_v33  ;;  %v8312_v23 = vrot.slane %v7511_v60, 4 }
 0xbbf   : > { %v7185_v54 = vsel %vm7121_vm11, %v7089_v58, %v7153_v4  ;;  %v7053_v43 = vmul.f32 %v12726_v5, %v17139_v32  ;;  %v12727_v7 = vadd.f32 %v6928_v62, %v18605_v8  ;;  %v12439_v22 = vpop.f32.mrb[63].mxu1  ;;  %vm17418_vm11 = vmand %vm7221_vm9, %vm7232_vm10  ;;  %v8313_v44 = vrot.slane %v7507_v26, 5  ;;  %v18611_v5 = vld [vmem:[#allocation36_spill] sm:$0xff] }
 0xbc0   : > { %v7429_v56 = vmul.f32 %v10450_v2, %v7185_v54  ;;  %v9389_v50 = vsel %vm9371_vm3, %v9387_v25, %v9388_v34  ;;  %v17398_v45 = vsel %vm1156_vm2, %v7505_v61, %v7509_v49  ;;  %v7513_v33 = vor.u32 %v7511_v60, %v7509_v49  ;;  %vm7297_vm7 = vmand %vm17418_vm11, %vm7248_vm14 }
 0xbc1   : > { %v7090_v57 = vadd.f32 %v17145_v53, %v7053_v43  ;;  %v7054_v35 = vmul.f32 %v12727_v7, %v17139_v32  ;;  %9432 = vrot.lane.b32.xlu0 %v9389_v50, %s14172_s26  ;;  %12486 = vmatprep.mubr.msk.bf16.mxu1 %vm4722_vm12, %v17398_v45  ;;  %v17452_v43 = vsel %vm5746_vm6, %v17327_v3, %v17411_v37  ;;  %v10454_v22 = vsel %vm17427_vm15, 1.0, %v18432_v11 }
 0xbc2   : > { %v17405_v41 = vpack.c.bf16 %v7429_v56, %v7428_v30  ;;  %v17454_v8 = vor.u32 %v8313_v44, %v8312_v23  ;;  %v10455_v60 = vsel %vm7297_vm7, 1.0, %v18432_v11  ;;  %v10456_v30 = vsel %vm17418_vm11, 1.0, %v18432_v11 }
 0xbc3   : > { %vm7122_vm8 = vcmp.ge.f32.partialorder %v7090_v57, 0.0  ;;  %v7154_v51 = vmul.f32 0.1, %v7090_v57  ;;  %v7091_v27 = vadd.f32 %v17145_v53, %v7054_v35  ;;  %v9390_v9 = vrot.slane %v7090_v57, 7 }
 0xbc4   : > { %v6933_v10 = vpop.f32.mrb[64].mxu1  ;;  %v7515_v18 = vshll.u32 %v17405_v41, 16  ;;  %v7519_v20 = vshrl.u32 %v17405_v41, 16  ;;  %vm7222_vm10 = vcmp.ge.s32.totalorder %v7211_v63, 0 }
 0xbc5   : > { %v7186_v2 = vsel %vm7122_vm8, %v7090_v57, %v7154_v51  ;;  %vm7123_vm1 = vcmp.ge.f32.partialorder %v7091_v27, 0.0  ;;  %v7155_v13 = vmul.f32 0.1, %v7091_v27  ;;  %v12728_v58 = vadd.f32 %v6933_v10, %v18608_v46  ;;  %v12442_v25 = vpop.f32.mrb[65].mxu1 }
 0xbc6   : > { %v6936_v24 = vpop.f32.mrb[66].mxu1  ;;  %v9391_v61 = vsel %vm9371_vm3, %v9388_v34, %v9390_v9  ;;  %v9392_v16 = vrot.slane %v7091_v27, 7  ;;  %v7517_v26 = vrot.slane %v7515_v18, 1  ;;  %v7430_v62 = vmul.f32 %v10451_v28, %v7186_v2 }
 0xbc7   : > { %v7187_v4 = vsel %vm7123_vm1, %v7091_v27, %v7155_v13  ;;  %v7055_v39 = vmul.f32 %v12728_v58, %v17139_v32  ;;  %v12729_v15 = vadd.f32 %v6936_v24, %v18611_v5  ;;  %9434 = vrot.lane.b32.xlu1 %v9391_v61, %s14172_s26  ;;  %v12443_v40 = vpop.f32.mrb[67].mxu1  ;;  %v8317_v46 = vrot.slane %v7515_v18, 5 }
 0xbc8   : > { %v7431_v34 = vmul.f32 %v10452_v38, %v7187_v4  ;;  %9436 = vrot.lane.b32.xlu0 %v9392_v16, %s14172_s26  ;;  %v17442_v49 = vsel %vm1156_vm2, %v7513_v33, %v7517_v26  ;;  %v7521_v35 = vor.u32 %v7519_v20, %v7517_v26  ;;  %v8316_v38 = vrot.slane %v7519_v20, 4 }
 0xbc9   : > { %v7092_v59 = vadd.f32 %v17145_v53, %v7055_v39  ;;  %v7056_v54 = vmul.f32 %v12729_v15, %v17139_v32  ;;  %12487 = vmatmul.mubr.msk.bf16.gmra.mrb[108].mxu1 %vm4722_vm12, %v17442_v49  ;;  %vm7233_vm1 = vcmp.lt.s32.totalorder %v7211_v63, 16  ;;  %v17486_v15 = vsel %vm5746_vm6, %v17411_v37, %v17454_v8 }
 0xbca   : > { %v17456_v7 = vpack.c.bf16 %v7431_v34, %v7430_v62  ;;  %v17488_v40 = vor.u32 %v8317_v46, %v8316_v38 }
 0xbcb   : > { %vm7124_vm9 = vcmp.ge.f32.partialorder %v7092_v59, 0.0  ;;  %v7156_v56 = vmul.f32 0.1, %v7092_v59  ;;  %v7093_v50 = vadd.f32 %v17145_v53, %v7056_v54  ;;  %v9393_v3 = vrot.slane %v7092_v59, 7 }
 0xbcc   : > { %v6941_v57 = vpop.f32.mrb[0].mxu1  ;;  %v7523_v28 = vshll.u32 %v17456_v7, 16 }
 0xbcd   : > { %v7188_v51 = vsel %vm7124_vm9, %v7092_v59, %v7156_v56  ;;  %vm7125_vm8 = vcmp.ge.f32.partialorder %v7093_v50, 0.0  ;;  %v7157_v27 = vmul.f32 0.1, %v7093_v50  ;;  %v7057_v9 = vmul.f32 %v17139_v32, %v6941_v57  ;;  %v12446_v10 = vpop.f32.mrb[1].mxu1  ;;  %vm17493_vm9 = vmand %vm7222_vm10, %vm7233_vm1 }
 0xbce   : > { %v6944_v23 = vpop.f32.mrb[2].mxu1  ;;  %v9394_v44 = vsel %vm9371_vm3, %v9392_v16, %v9393_v3  ;;  %v9395_v2 = vrot.slane %v7093_v50, 7  ;;  %v7525_v13 = vrot.slane %v7523_v28, 1  ;;  %v7432_v61 = vmul.f32 %v10453_v17, %v7188_v51 }
 0xbcf   : > { %v7189_v58 = vsel %vm7125_vm8, %v7093_v50, %v7157_v27  ;;  %v7094_v25 = vadd.f32 %v17145_v53, %v7057_v9  ;;  %v7058_v24 = vmul.f32 %v17139_v32, %v6944_v23  ;;  %9438 = vrot.lane.b32.xlu1 %v9394_v44, %s14172_s26  ;;  %v12447_v31 = vpop.f32.mrb[3].mxu1  ;;  %v7527_v17 = vshrl.u32 %v17456_v7, 16  ;;  %vm17504_vm8 = vmand %vm17418_vm11, %vm7313_vm13 }
 0xbd0   : > { %v7433_v33 = vmul.f32 %v10454_v22, %v7189_v58  ;;  %v9396_v26 = vsel %vm9371_vm3, %v9393_v3, %v9395_v2  ;;  %v17474_v4 = vsel %vm1156_vm2, %v7521_v35, %v7525_v13  ;;  %v17512_v9 = vsel %vm5746_vm6, %v17454_v8, %v17488_v40  ;;  %vm7300_vm11 = vmand %vm17493_vm9, %vm7248_vm14 }
 0xbd1   : > { %vm7126_vm15 = vcmp.ge.f32.partialorder %v7094_v25, 0.0  ;;  %v7158_v16 = vmul.f32 0.1, %v7094_v25  ;;  %v7095_v18 = vadd.f32 %v17145_v53, %v7058_v24  ;;  %9440 = vrot.lane.b32.xlu0 %v9396_v26, %s14172_s26  ;;  %12490 = vmatprep.mubr.msk.bf16.mxu1 %vm4722_vm12, %v17474_v4  ;;  %v9397_v39 = vrot.slane %v7094_v25, 7 }
 0xbd2   : > { %v17480_v5 = vpack.c.bf16 %v7433_v33, %v7432_v61  ;;  %v7529_v57 = vor.u32 %v7527_v17, %v7525_v13  ;;  %v7212_v10 = vadd.s32 8, %v17132_v52  ;;  %v8320_v2 = vrot.slane %v7527_v17, 4 }
 0xbd3   : > { %v7190_v62 = vsel %vm7126_vm15, %v7094_v25, %v7158_v16  ;;  %vm7127_vm7 = vcmp.ge.f32.partialorder %v7095_v18, 0.0  ;;  %v7159_v34 = vmul.f32 0.1, %v7095_v18  ;;  %9442 = vrot.lane.b32.xlu1 %v9397_v39, %s14172_s26  ;;  %v9398_v20 = vrot.slane %v7095_v18, 7  ;;  %vm17544_vm15 = vmand %vm17493_vm9, %vm7313_vm13 }
 0xbd4   : > { %v6949_v59 = vpop.f32.mrb[4].mxu1  ;;  %v7531_v22 = vshll.u32 %v17480_v5, 16  ;;  %v7434_v35 = vmul.f32 %v10455_v60, %v7190_v62  ;;  %v8321_v8 = vrot.slane %v7523_v28, 5  ;;  %v10457_v25 = vsel %vm17504_vm8, 1.0, %v18432_v11 }
 0xbd5   : > { %v7191_v56 = vsel %vm7127_vm7, %v7095_v18, %v7159_v34  ;;  %v7059_v37 = vmul.f32 %v17139_v32, %v6949_v59  ;;  %v12450_v50 = vpop.f32.mrb[5].mxu1  ;;  %v9399_v3 = vsel %vm9371_vm3, %v9397_v39, %v9398_v20  ;;  %v10458_v24 = vsel %vm7300_vm11, 1.0, %v18432_v11 }
 0xbd6   : > { %v7435_v38 = vmul.f32 %v10456_v30, %v7191_v56  ;;  %v6952_v51 = vpop.f32.mrb[6].mxu1  ;;  %9444 = vrot.lane.b32.xlu0 %v9399_v3, %s14172_s26  ;;  %v7533_v27 = vrot.slane %v7531_v22, 1  ;;  %v7535_v31 = vshrl.u32 %v17480_v5, 16  ;;  %v10459_v18 = vsel %vm17493_vm9, 1.0, %v18432_v11 }
 0xbd7   : > { %v7096_v60 = vadd.f32 %v17145_v53, %v7059_v37  ;;  %v7060_v30 = vmul.f32 %v17139_v32, %v6952_v51  ;;  %v12451_v48 = vpop.f32.mrb[7].mxu1  ;;  %vm7223_vm7 = vcmp.ge.s32.totalorder %v7212_v10, 0  ;;  %v8322_v37 = vor.u32 %v8321_v8, %v8320_v2 }
 0xbd8   : > { %v17521_v23 = vpack.c.bf16 %v7435_v38, %v7434_v35  ;;  %v17524_v44 = vsel %vm1156_vm2, %v7529_v57, %v7533_v27  ;;  %v7537_v62 = vor.u32 %v7535_v31, %v7533_v27  ;;  %vm7234_vm9 = vcmp.lt.s32.totalorder %v7212_v10, 16 }
 0xbd9   : > { %vm7128_vm10 = vcmp.ge.f32.partialorder %v7096_v60, 0.0  ;;  %v7160_v13 = vmul.f32 0.1, %v7096_v60  ;;  %v7097_v46 = vadd.f32 %v17145_v53, %v7060_v30  ;;  %12491 = vmatmul.mubr.msk.bf16.gmra.mrb[112].mxu1 %vm4722_vm12, %v17524_v44  ;;  %v9400_v58 = vrot.slane %v7096_v60, 7  ;;  %vm17569_vm11 = vmand %vm7223_vm7, %vm7234_vm9 }
 0xbda   : > { %v7539_v61 = vshll.u32 %v17521_v23, 16  ;;  %v10460_v63 = vsel %vm17544_vm15, 1.0, %v18432_v11  ;;  %v17562_v27 = vsel %vm5746_vm6, %v17488_v40, %v8322_v37  ;;  %v7543_v30 = vshrl.u32 %v17521_v23, 16 }
 0xbdb   : > { %v7192_v33 = vsel %vm7128_vm10, %v7096_v60, %v7160_v13  ;;  %vm7129_vm1 = vcmp.ge.f32.partialorder %v7097_v46, 0.0  ;;  %v7161_v28 = vmul.f32 0.1, %v7097_v46  ;;  %v9401_v26 = vsel %vm9371_vm3, %v9398_v20, %v9400_v58 }
 0xbdc   : > { %v6957_v16 = vpop.f32.mrb[8].mxu1  ;;  %9446 = vrot.lane.b32.xlu1 %v9401_v26, %s14172_s26  ;;  %v9402_v39 = vrot.slane %v7097_v46, 7  ;;  %v7541_v34 = vrot.slane %v7539_v61, 1  ;;  %v7436_v50 = vmul.f32 %v10457_v25, %v7192_v33  ;;  %v8324_v48 = vrot.slane %v7535_v31, 4 }
 0xbdd   : > { %v7193_v59 = vsel %vm7129_vm1, %v7097_v46, %v7161_v28  ;;  %v7061_v20 = vmul.f32 %v17139_v32, %v6957_v16  ;;  %v12454_v56 = vpop.f32.mrb[9].mxu1  ;;  %v8325_v2 = vrot.slane %v7531_v22, 5  ;;  %v10462_v40 = vsel %vm17569_vm11, 1.0, %v18432_v11  ;;  %vm17583_vm1 = vmand %vm17569_vm11, %vm7248_vm14 }
 0xbde   : > { %v7437_v3 = vmul.f32 %v10458_v24, %v7193_v59  ;;  %9448 = vrot.lane.b32.xlu0 %v9402_v39, %s14172_s26  ;;  %v6960_v57 = vpop.f32.mrb[10].mxu1  ;;  %v17551_v35 = vsel %vm1156_vm2, %v7537_v62, %v7541_v34  ;;  %v7545_v25 = vor.u32 %v7543_v30, %v7541_v34  ;;  %v7213_v31 = vadd.s32 9, %v17132_v52 }
 0xbdf   : > { %v7098_v54 = vadd.f32 %v17145_v53, %v7061_v20  ;;  %v7062_v38 = vmul.f32 %v17139_v32, %v6960_v57  ;;  %v12455_v51 = vpop.f32.mrb[11].mxu1  ;;  %12494 = vmatprep.mubr.msk.bf16.mxu1 %vm4722_vm12, %v17551_v35  ;;  %v8328_v62 = vrot.slane %v7543_v30, 4  ;;  %v8329_v34 = vrot.slane %v7539_v61, 5 }
 0xbe0   : > { %v17564_v60 = vpack.c.bf16 %v7437_v3, %v7436_v50  ;;  %v8326_v50 = vor.u32 %v8325_v2, %v8324_v48  ;;  %v10461_v61 = vsel %vm17583_vm1, 1.0, %v18432_v11  ;;  %vm7224_vm15 = vcmp.ge.s32.totalorder %v7213_v31, 0  ;;  %vm17622_vm1 = vmand %vm17569_vm11, %vm7313_vm13 }
 0xbe1   : > { %vm7130_vm8 = vcmp.ge.f32.partialorder %v7098_v54, 0.0  ;;  %v7162_v8 = vmul.f32 0.1, %v7098_v54  ;;  %v7099_v13 = vadd.f32 %v17145_v53, %v7062_v38  ;;  %v9403_v58 = vrot.slane %v7098_v54, 7 }
 0xbe2   : > { %v7547_v24 = vshll.u32 %v17564_v60, 16  ;;  %vm7235_vm7 = vcmp.lt.s32.totalorder %v7213_v31, 16  ;;  %v8330_v48 = vor.u32 %v8329_v34, %v8328_v62 }
 0xbe3   : > { %v7194_v22 = vsel %vm7130_vm8, %v7098_v54, %v7162_v8  ;;  %vm7131_vm10 = vcmp.ge.f32.partialorder %v7099_v13, 0.0  ;;  %v7163_v33 = vmul.f32 0.1, %v7099_v13  ;;  %v9404_v28 = vsel %vm9371_vm3, %v9402_v39, %v9403_v58 }
 0xbe4   : > { %v6965_v10 = vpop.f32.mrb[12].mxu1  ;;  %9450 = vrot.lane.b32.xlu1 %v9404_v28, %s14172_s26  ;;  %v9405_v16 = vrot.slane %v7099_v13, 7  ;;  %v7549_v17 = vrot.slane %v7547_v24, 1  ;;  %v7551_v39 = vshrl.u32 %v17564_v60, 16  ;;  %v7438_v3 = vmul.f32 %v10459_v18, %v7194_v22 }
 0xbe5   : > { %v7195_v59 = vsel %vm7131_vm10, %v7099_v13, %v7163_v33  ;;  %v7063_v20 = vmul.f32 %v17139_v32, %v6965_v10  ;;  %v12458_v56 = vpop.f32.mrb[13].mxu1  ;;  %v17603_v18 = vsel %vm5746_vm6, %v8322_v37, %v8326_v50  ;;  %v8333_v10 = vrot.slane %v7547_v24, 5  ;;  %vm17613_vm10 = vmand %vm7224_vm15, %vm7235_vm7 }
 0xbe6   : > { %v7439_v57 = vmul.f32 %v10460_v63, %v7195_v59  ;;  %v6968_v54 = vpop.f32.mrb[14].mxu1  ;;  %v9406_v38 = vsel %vm9371_vm3, %v9403_v58, %v9405_v16  ;;  %v17592_v51 = vsel %vm1156_vm2, %v7545_v25, %v7549_v17  ;;  %v8332_v28 = vrot.slane %v7551_v39, 4  ;;  %vm7306_vm11 = vmand %vm17613_vm10, %vm7248_vm14 }
 0xbe7   : > { %v7100_v8 = vadd.f32 %v17145_v53, %v7063_v20  ;;  %v7064_v30 = vmul.f32 %v17139_v32, %v6968_v54  ;;  %9452 = vrot.lane.b32.xlu0 %v9406_v38, %s14172_s26  ;;  %v12459_v13 = vpop.f32.mrb[15].mxu1  ;;  %12495 = vmatmul.mubr.msk.bf16.gmra.mrb[116].mxu1 %vm4722_vm12, %v17592_v51  ;;  %v7553_v34 = vor.u32 %v7551_v39, %v7549_v17 }
 0xbe8   : > { %v17605_v63 = vpack.c.bf16 %v7439_v57, %v7438_v3  ;;  %v17628_v54 = vsel %vm5746_vm6, %v8326_v50, %v8330_v48 }
 0xbe9   : > { %vm7132_vm9 = vcmp.ge.f32.partialorder %v7100_v8, 0.0  ;;  %v7164_v2 = vmul.f32 0.1, %v7100_v8  ;;  %v7101_v58 = vadd.f32 %v17145_v53, %v7064_v30  ;;  %v9407_v25 = vrot.slane %v7100_v8, 7 }
 0xbea   : > { %v7555_v22 = vshll.u32 %v17605_v63, 16  ;;  %v7559_v33 = vshrl.u32 %v17605_v63, 16  ;;  %v8334_v30 = vor.u32 %v8333_v10, %v8332_v28 }
 0xbeb   : > { %v7196_v26 = vsel %vm7132_vm9, %v7100_v8, %v7164_v2  ;;  %vm7133_vm8 = vcmp.ge.f32.partialorder %v7101_v58, 0.0  ;;  %v7165_v37 = vmul.f32 0.1, %v7101_v58  ;;  %9454 = vrot.lane.b32.xlu1 %v9407_v25, %s14172_s26  ;;  %v9408_v16 = vrot.slane %v7101_v58, 7 }
 0xbec   : > { %v6973_v59 = vpop.f32.mrb[16].mxu1  ;;  %v7557_v20 = vrot.slane %v7555_v22, 1  ;;  %v7440_v38 = vmul.f32 %v10461_v61, %v7196_v26  ;;  %v8337_v61 = vrot.slane %v7555_v22, 5  ;;  %v10464_v26 = vsel %vm7306_vm11, 1.0, %v18432_v11 }
 0xbed   : > { %v7197_v56 = vsel %vm7133_vm8, %v7101_v58, %v7165_v37  ;;  %v7065_v3 = vmul.f32 %v17139_v32, %v6973_v59  ;;  %v12462_v57 = vpop.f32.mrb[17].mxu1  ;;  %v9409_v31 = vsel %vm9371_vm3, %v9407_v25, %v9408_v16  ;;  %v10463_v58 = vsel %vm17622_vm1, 1.0, %v18432_v11 }
 0xbee   : > { %v7441_v17 = vmul.f32 %v10462_v40, %v7197_v56  ;;  %v6976_v39 = vpop.f32.mrb[18].mxu1  ;;  %9456 = vrot.lane.b32.xlu0 %v9409_v31, %s14172_s26  ;;  %v17632_v8 = vsel %vm1156_vm2, %v7553_v34, %v7557_v20  ;;  %v8336_v40 = vrot.slane %v7559_v33, 4  ;;  %v17648_v25 = vsel %vm5746_vm6, %v8330_v48, %v8334_v30 }
 0xbef   : > { %v7102_v46 = vadd.f32 %v17145_v53, %v7065_v3  ;;  %v7066_v13 = vmul.f32 %v17139_v32, %v6976_v39  ;;  %v12463_v50 = vpop.f32.mrb[19].mxu1  ;;  %12498 = vmatprep.mubr.msk.bf16.mxu1 %vm4722_vm12, %v17632_v8  ;;  %v7561_v48 = vor.u32 %v7559_v33, %v7557_v20  ;;  %v7214_v33 = vadd.s32 10, %v17132_v52 }
 0xbf0   : > { %v17642_v2 = vpack.c.bf16 %v7441_v17, %v7440_v38  ;;  %v8338_v59 = vor.u32 %v8337_v61, %v8336_v40  ;;  %v14127_v40 = vld [vmem:[%s18567_s14 + $0x1] ss:$0 sm:$0xff]  ;;  %v10465_v52 = vsel %vm17613_vm10, 1.0, %v18432_v11 }
 0xbf1   : > { %vm7134_vm15 = vcmp.ge.f32.partialorder %v7102_v46, 0.0  ;;  %v7166_v32 = vmul.f32 0.1, %v7102_v46  ;;  %v7103_v28 = vadd.f32 %v17145_v53, %v7066_v13  ;;  %v9410_v10 = vrot.slane %v7102_v46, 7  ;;  %v14126_v53 = vld [vmem:[%s18567_s14] ss:$0 sm:$0xff] }
 0xbf2   : > { %v7563_v37 = vshll.u32 %v17642_v2, 16  ;;  %v17659_v39 = vsel %vm5746_vm6, %v8334_v30, %v8338_v59  ;;  %vm7236_vm8 = vcmp.lt.s32.totalorder %v7214_v33, 16 }
 0xbf3   : > { %v7198_v22 = vsel %vm7134_vm15, %v7102_v46, %v7166_v32  ;;  %vm7135_vm7 = vcmp.ge.f32.partialorder %v7103_v28, 0.0  ;;  %v7167_v34 = vmul.f32 0.1, %v7103_v28  ;;  %v9411_v56 = vsel %vm9371_vm3, %v9408_v16, %v9410_v10  ;;  %vm7349_vm3 = vmand %vm17613_vm10, %vm7313_vm13 }
 0xbf4   : > { %v7442_v3 = vmul.f32 %v10463_v58, %v7198_v22  ;;  %v6981_v24 = vpop.f32.mrb[20].mxu1  ;;  %9458 = vrot.lane.b32.xlu1 %v9411_v56, %s14172_s26  ;;  %v7565_v57 = vrot.slane %v7563_v37, 1  ;;  %v8340_v46 = vshrl.u32 %v17642_v2, 16  ;;  %v8343_v20 = vrot.slane %v7563_v37, 5 }
 0xbf5   : > { %v7199_v31 = vsel %vm7135_vm7, %v7103_v28, %v7167_v34  ;;  %v7067_v38 = vmul.f32 %v14126_v53, %v6981_v24  ;;  %v12466_v17 = vpop.f32.mrb[21].mxu1  ;;  %v10466_v37 = vsel %vm7349_vm3, 1.0, %v18432_v11  ;;  %vm7225_vm13 = vcmp.ge.s32.totalorder %v7214_v33, 0  ;;  %v10507_v33 = vld [vmem:[%s18336_s11 + $0x6] sm:$0x3] }
 0xbf6   : > { %v7443_v13 = vmul.f32 %v10464_v26, %v7199_v31  ;;  %v6984_v16 = vpop.f32.mrb[22].mxu1  ;;  %v17663_v50 = vsel %vm1156_vm2, %v7561_v48, %v7565_v57  ;;  %v8342_v32 = vrot.slane %v8340_v46, 4  ;;  %vm17689_vm10 = vmand %vm7225_vm13, %vm7236_vm8  ;;  %v7952_v17 = vsel %vm4774_vm5, %v17282_v36, 0 }
 0xbf7   : > { %v7104_v61 = vadd.f32 %v14127_v40, %v7067_v38  ;;  %v7068_v58 = vmul.f32 %v14126_v53, %v6984_v16  ;;  %v12467_v30 = vpop.f32.mrb[23].mxu1  ;;  %12499 = vmatmul.mubr.msk.bf16.gmra.mrb[120].mxu1 %vm4722_vm12, %v17663_v50  ;;  %vm7309_vm11 = vmand %vm17689_vm10, %vm7248_vm14 }
 0xbf8   : > { %v17675_v28 = vpack.c.bf16 %v7443_v13, %v7442_v3  ;;  %12504 = vmatprep.mubr.msk.bf16.mxu1 %vm4722_vm12, %v17185_v12  ;;  %v17682_v26 = vor.u32 %v8343_v20, %v8342_v32 }
 0xbf9   : > { %vm7136_vm9 = vcmp.ge.f32.partialorder %v7104_v61, 0.0  ;;  %v7168_v10 = vmul.f32 0.1, %v7104_v61  ;;  %v7105_v47 = vadd.f32 %v14127_v40, %v7068_v58 }
 0xbfa   : > { %v17687_v56 = vsel %vm5746_vm6, %v8338_v59, %v17682_v26  ;;  %v8350_v59 = vshll.u32 %v17675_v28, 16  ;;  %v8347_v55 = vshrl.u32 %v17675_v28, 16 }
 0xbfb   : > { %v7200_v22 = vsel %vm7136_vm9, %v7104_v61, %v7168_v10  ;;  %vm7137_vm1 = vcmp.ge.f32.partialorder %v7105_v47, 0.0  ;;  %v7169_v34 = vmul.f32 0.1, %v7105_v47 }
 0xbfc   : > { %v7444_v62 = vmul.f32 %v10465_v52, %v7200_v22  ;;  %v6989_v3 = vpop.f32.mrb[24].mxu1  ;;  %v8885_v52 = vor.u32 %v8340_v46, %v7565_v57  ;;  %v8886_v10 = vrot.slane %v8350_v59, 1 }
 0xbfd   : > { %v7201_v24 = vsel %vm7137_vm1, %v7105_v47, %v7169_v34  ;;  %v7069_v48 = vmul.f32 %v14126_v53, %v6989_v3  ;;  %v12470_v38 = vpop.f32.mrb[25].mxu1 }
 0xbfe   : > { %v7445_v13 = vmul.f32 %v10466_v37, %v7201_v24  ;;  %v6992_v16 = vpop.f32.mrb[26].mxu1  ;;  %v10467_v37 = vsel %vm7309_vm11, 1.0, %v18432_v11  ;;  %v7891_v38 = vrot.slane %v17202_v21, 1 }
 0xbff   : > { %v7106_v20 = vadd.f32 %v14127_v40, %v7069_v48  ;;  %v7070_v61 = vmul.f32 %v14126_v53, %v6992_v16  ;;  %v12471_v58 = vpop.f32.mrb[27].mxu1  ;;  %12505 = vmatmul.mubr.msk.bf16.vlgmr.msra.gmra.mrb[100].mxu1 %vm4722_vm12, %v17202_v21  ;;  %v10468_v53 = vsel %vm17689_vm10, 1.0, %v18432_v11  ;;  %v7893_v16 = vrot.slane %v17236_v14, 1 }
 0xc00   : > { %12529 = vmatpush3.bf16.msra.mxu1 %v7952_v17  ;;  %12508 = vmatprep.mubr.msk.bf16.mxu1 %vm4722_vm12, %v17236_v14  ;;  %v17707_v36 = vpack.c.bf16 %v7445_v13, %v7444_v62  ;;  %v17722_v62 = vor.u32 %v8886_v10, %v8347_v55  ;;  %v7890_v17 = vrot.slane %v17185_v12, 1 }
 0xc01   : > { %vm7138_vm15 = vcmp.ge.f32.partialorder %v7106_v20, 0.0  ;;  %v7170_v30 = vmul.f32 0.1, %v7106_v20  ;;  %v7107_v32 = vadd.f32 %v14127_v40, %v7070_v61  ;;  %14041 = vmatprep.subr.msk.bf16.mxu1 %vm4774_vm5, %v10507_v33  ;;  %v17718_v40 = vsel %vm1156_vm2, %v8885_v52, %v8886_v10 }
 0xc02   : > { %v7892_v13 = vsel %vm1842_vm4, %v7890_v17, %v7891_v38  ;;  %v8156_v61 = vsel %vm4774_vm5, %v10507_v33, 0  ;;  %v7894_v58 = vsel %vm1842_vm4, %v7891_v38, %v7893_v16  ;;  %v7901_v10 = vrot.slane %v17405_v41, 1 }
 0xc03   : > { %v7202_v47 = vsel %vm7138_vm15, %v7106_v20, %v7170_v30  ;;  %vm7139_vm14 = vcmp.ge.f32.partialorder %v7107_v32, 0.0  ;;  %v7171_v22 = vmul.f32 0.1, %v7107_v32  ;;  %v7895_v20 = vrot.slane %v17290_v19, 1  ;;  %v10520_v30 = vld [vmem:[%s18336_s11 + $0x8] sm:$0x3] }
 0xc04   : > { %v6997_v34 = vpop.f32.mrb[96].mxu1  ;;  %v7446_v48 = vmul.f32 %v10467_v37, %v7202_v47  ;;  %v7903_v47 = vrot.slane %v17456_v7, 1  ;;  %v7913_v17 = vrot.slane %v17642_v2, 1 }
 0xc05   : > { %v7203_v3 = vsel %vm7139_vm14, %v7107_v32, %v7171_v22  ;;  %v12474_v24 = vpop.f32.mrb[97].mxu1  ;;  %v7896_v12 = vsel %vm1842_vm4, %v7893_v16, %v7895_v20  ;;  %v7897_v32 = vrot.slane %v17320_v42, 1  ;;  %v7905_v34 = vrot.slane %v17480_v5, 1 }
 0xc06   : > { %v7447_v57 = vmul.f32 %v10468_v53, %v7203_v3  ;;  %v6999_v46 = vpop.f32.mrb[98].mxu1  ;;  %v7899_v53 = vrot.slane %v17364_v1, 1  ;;  %v17779_v22 = vsel %vm1842_vm4, %v7901_v10, %v7903_v47  ;;  %v7907_v3 = vrot.slane %v17521_v23, 1 }
 0xc07   : > { %v12475_v31 = vpop.f32.mrb[99].mxu1  ;;  %12509 = vmatmul.mubr.msk.bf16.gmra.mrb[104].mxu1 %vm4722_vm12, %v17290_v19  ;;  %v17762_v33 = vsel %vm1842_vm4, %v7895_v20, %v7897_v32  ;;  %v17786_v24 = vsel %vm1842_vm4, %v7903_v47, %v7905_v34  ;;  %v7911_v46 = vrot.slane %v17605_v63, 1  ;;  %v8094_v16 = vrot.slane %v17202_v21, 4 }
 0xc08   : > { %v17726_v11 = vpack.c.bf16 %v7447_v57, %v7446_v48  ;;  %12512 = vmatprep.mubr.msk.bf16.mxu1 %vm4722_vm12, %v17320_v42  ;;  %v17767_v52 = vsel %vm1842_vm4, %v7897_v32, %v7899_v53  ;;  %v17774_v37 = vsel %vm1842_vm4, %v7899_v53, %v7901_v10  ;;  %v17791_v48 = vsel %vm1842_vm4, %v7905_v34, %v7907_v3  ;;  %v10533_v10 = vld [vmem:[%s18336_s11 + $0xa] sm:$0x3] }
 0xc09   : > { %v7909_v57 = vrot.slane %v17564_v60, 1  ;;  %v17813_v20 = vsel %vm1842_vm4, %v7911_v46, %v7913_v17  ;;  %v8392_v32 = vsel %vm4774_vm5, %v10520_v30, 0  ;;  %v8101_v34 = vrot.slane %v17364_v1, 4 }
 0xc0b   : > { %v17798_v31 = vsel %vm1842_vm4, %v7907_v3, %v7909_v57  ;;  %v17803_v38 = vsel %vm1842_vm4, %v7909_v57, %v7911_v46  ;;  %v8103_v3 = vrot.slane %v17405_v41, 4  ;;  %v8105_v46 = vrot.slane %v17456_v7, 4 }
 0xc0d   : > { %v8104_v57 = vsel %vm1393_vm0, %v8101_v34, %v8103_v3 }
 0xc0f   : > { %12513 = vmatmul.mubr.msk.bf16.gmra.mrb[108].mxu1 %vm4722_vm12, %v17364_v1 }
 0xc10   : > { %12516 = vmatprep.mubr.msk.bf16.mxu1 %vm4722_vm12, %v17405_v41 }
 0xc17   : > { %12517 = vmatmul.mubr.msk.bf16.gmra.mrb[112].mxu1 %vm4722_vm12, %v17456_v7 }
 0xc18   : > { %12520 = vmatprep.mubr.msk.bf16.mxu1 %vm4722_vm12, %v17480_v5 }
 0xc1f   : > { %12521 = vmatmul.mubr.msk.bf16.gmra.mrb[116].mxu1 %vm4722_vm12, %v17521_v23 }
 0xc20   : > { %12524 = vmatprep.mubr.msk.bf16.mxu1 %vm4722_vm12, %v17564_v60 }
 0xc27   : > { %12525 = vmatmul.mubr.msk.bf16.gmra.mrb[120].mxu1 %vm4722_vm12, %v17605_v63 }
 0xc28   : > { %12530 = vmatprep.mubr.msk.bf16.mxu1 %vm4722_vm12, %v7892_v13  ;;  %v8095_v13 = vrot.slane %v17236_v14, 4 }
 0xc2f   : > { %12531 = vmatmul.mubr.msk.bf16.vlgmr.msra.gmra.mrb[100].mxu1 %vm4722_vm12, %v7894_v58  ;;  %v8097_v58 = vrot.slane %v17290_v19, 4 }
 0xc30   : > { %12555 = vmatpush3.bf16.msra.mxu1 %v8156_v61  ;;  %12534 = vmatprep.mubr.msk.bf16.mxu1 %vm4722_vm12, %v7896_v12  ;;  %v8096_v61 = vsel %vm1393_vm0, %v8094_v16, %v8095_v13  ;;  %v8099_v12 = vrot.slane %v17320_v42, 4  ;;  %v8106_v16 = vsel %vm1393_vm0, %v8103_v3, %v8105_v46 }
 0xc31   : > { %14042 = vmatprep.subr.msk.bf16.mxu1 %vm4774_vm5, %v10520_v30  ;;  %v8098_v53 = vsel %vm1393_vm0, %v8095_v13, %v8097_v58  ;;  %v8107_v13 = vrot.slane %v17480_v5, 4 }
 0xc32   : > { %v8100_v47 = vsel %vm1393_vm0, %v8097_v58, %v8099_v12  ;;  %v8102_v30 = vsel %vm1393_vm0, %v8099_v12, %v8101_v34  ;;  %v8109_v58 = vrot.slane %v17521_v23, 4  ;;  %v8111_v12 = vrot.slane %v17564_v60, 4 }
 0xc33   : > { %v8115_v34 = vrot.slane %v17642_v2, 4 }
 0xc37   : > { %12535 = vmatmul.mubr.msk.bf16.gmra.mrb[104].mxu1 %vm4722_vm12, %v17762_v33 }
 0xc38   : > { %12538 = vmatprep.mubr.msk.bf16.mxu1 %vm4722_vm12, %v17767_v52 }
 0xc3f   : > { %12539 = vmatmul.mubr.msk.bf16.gmra.mrb[108].mxu1 %vm4722_vm12, %v17774_v37 }
 0xc40   : > { %12542 = vmatprep.mubr.msk.bf16.mxu1 %vm4722_vm12, %v17779_v22 }
 0xc47   : > { %12543 = vmatmul.mubr.msk.bf16.gmra.mrb[112].mxu1 %vm4722_vm12, %v17786_v24 }
 0xc48   : > { %12546 = vmatprep.mubr.msk.bf16.mxu1 %vm4722_vm12, %v17791_v48 }
 0xc4f   : > { %12547 = vmatmul.mubr.msk.bf16.gmra.mrb[116].mxu1 %vm4722_vm12, %v17798_v31 }
 0xc50   : > { %12550 = vmatprep.mubr.msk.bf16.mxu1 %vm4722_vm12, %v17803_v38 }
 0xc57   : > { %12551 = vmatmul.mubr.msk.bf16.gmra.mrb[120].mxu1 %vm4722_vm12, %v17813_v20 }
 0xc58   : > { %12556 = vmatprep.mubr.msk.bf16.mxu1 %vm4722_vm12, %v8096_v61  ;;  %v8108_v61 = vsel %vm1393_vm0, %v8105_v46, %v8107_v13 }
 0xc5f   : > { %12557 = vmatmul.mubr.msk.bf16.vlgmr.msra.gmra.mrb[100].mxu1 %vm4722_vm12, %v8098_v53  ;;  %v8112_v53 = vsel %vm1393_vm0, %v8109_v58, %v8111_v12 }
 0xc60   : > { %12581 = vmatpush3.bf16.msra.mxu1 %v8392_v32  ;;  %12560 = vmatprep.mubr.msk.bf16.mxu1 %vm4722_vm12, %v8100_v47  ;;  %v8110_v32 = vsel %vm1393_vm0, %v8107_v13, %v8109_v58  ;;  %v8113_v47 = vrot.slane %v17605_v63, 4  ;;  %v8595_v13 = vsel %vm4774_vm5, %v10533_v10, 0  ;;  %v8546_v58 = vrot.slane %v17480_v5, 5 }
 0xc61   : > { %14043 = vmatprep.subr.msk.bf16.mxu1 %vm4774_vm5, %v10533_v10 }
 0xc62   : > { %v8114_v3 = vsel %vm1393_vm0, %v8111_v12, %v8113_v47 }
 0xc67   : > { %12561 = vmatmul.mubr.msk.bf16.gmra.mrb[104].mxu1 %vm4722_vm12, %v8102_v30  ;;  %v8116_v30 = vsel %vm1393_vm0, %v8113_v47, %v8115_v34  ;;  %v8550_v47 = vrot.slane %v17564_v60, 5 }
 0xc68   : > { %12564 = vmatprep.mubr.msk.bf16.mxu1 %vm4722_vm12, %v8104_v57  ;;  %v8117_v57 = vrot.slane %v17675_v28, 4 }
 0xc6a   : > { %v8118_v46 = vsel %vm1393_vm0, %v8115_v34, %v8117_v57  ;;  %vm18628_vm0 = vcmask 1042432   ;;  %v8554_v57 = vrot.slane %v17642_v2, 5 }
 0xc6b   : > { %vm18629_vm7 = vmmov %vm18628_vm0 }
 0xc6c   : > { %vm18631_vm3 = vmmov %vm18628_vm0 }
 0xc6d   : > { %vm18632_vm9 = vmmov %vm18628_vm0 }
 0xc6e   : > { %vm18633_vm13 = vmmov %vm18628_vm0 }
 0xc6f   : > { %12565 = vmatmul.mubr.msk.bf16.gmra.mrb[108].mxu1 %vm4722_vm12, %v8106_v16  ;;  %v10546_v16 = vld [vmem:[%s18336_s11 + $0xc] sm:$0x3]  ;;  %vm18634_vm8 = vmmov %vm18628_vm0 }
 0xc70   : > { %12568 = vmatprep.mubr.msk.bf16.mxu1 %vm4722_vm12, %v8108_v61  ;;  %v8544_v61 = vrot.slane %v17456_v7, 5  ;;  %vm18635_vm1 = vmmov %vm18628_vm0 }
 0xc71   : > { %vm18636_vm10 = vmmov %vm18628_vm0 }
 0xc72   : > { %vm18637_vm11 = vmmov %vm18628_vm0 }
 0xc73   : > { %vm18638_vm15 = vmmov %vm18628_vm0 }
 0xc74   : > { %vm18639_vm14 = vmmov %vm18628_vm0 }
 0xc77   : > { %12569 = vmatmul.mubr.msk.bf16.gmra.mrb[112].mxu1 %vm4722_vm12, %v8110_v32  ;;  %v8547_v32 = vsel %vm18634_vm8, %v8544_v61, %v8546_v58 }
 0xc78   : > { %12572 = vmatprep.mubr.msk.bf16.mxu1 %vm4722_vm12, %v8112_v53  ;;  %v8548_v53 = vrot.slane %v17521_v23, 5 }
 0xc7a   : > { %v8549_v34 = vsel %vm18635_vm1, %v8546_v58, %v8548_v53 }
 0xc7f   : > { %12573 = vmatmul.mubr.msk.bf16.gmra.mrb[116].mxu1 %vm4722_vm12, %v8114_v3  ;;  %v8551_v3 = vsel %vm18636_vm10, %v8548_v53, %v8550_v47 }
 0xc80   : > { %12576 = vmatprep.mubr.msk.bf16.mxu1 %vm4722_vm12, %v8116_v30  ;;  %v8552_v30 = vrot.slane %v17605_v63, 5 }
 0xc87   : > { %12577 = vmatmul.mubr.msk.bf16.gmra.mrb[120].mxu1 %vm4722_vm12, %v8118_v46  ;;  %v8553_v46 = vsel %vm18637_vm11, %v8550_v47, %v8552_v30 }
 0xc88   : > { %12582 = vmatprep.mubr.msk.bf16.mxu1 %vm4722_vm12, %v17325_v6  ;;  %v8349_v6 = vrot.slane %v8347_v55, 4 }
 0xc8f   : > { %12583 = vmatmul.mubr.msk.bf16.vlgmr.msra.gmra.mrb[100].mxu1 %vm4722_vm12, %v17362_v0  ;;  %v8352_v0 = vrot.slane %v8350_v59, 5  ;;  %v8542_v59 = vrot.slane %v17405_v41, 5 }
 0xc90   : > { %12607 = vmatpush3.bf16.msra.mxu1 %v8595_v13  ;;  %12586 = vmatprep.mubr.msk.bf16.mxu1 %vm4722_vm12, %v17452_v43  ;;  %v8555_v13 = vsel %vm18638_vm15, %v8552_v30, %v8554_v57  ;;  %v18059_v30 = vpop.permute.xlu0 %9275 }
 0xc91   : > { %14044 = vmatprep.subr.msk.bf16.mxu1 %vm4774_vm5, %v10546_v16  ;;  %v8353_v43 = vor.u32 %v8352_v0, %v8349_v6  ;;  %v8545_v12 = vsel %vm18633_vm13, %v8542_v59, %v8544_v61 }
 0xc97   : > { %12587 = vmatmul.mubr.msk.bf16.gmra.mrb[104].mxu1 %vm4722_vm12, %v17486_v15  ;;  %v8534_v15 = vrot.slane %v17236_v14, 5 }
 0xc98   : > { %12590 = vmatprep.mubr.msk.bf16.mxu1 %vm4722_vm12, %v17512_v9  ;;  %v8533_v9 = vrot.slane %v17202_v21, 5  ;;  %v10559_v21 = vld [vmem:[%s18336_s11 + $0xe] sm:$0x3] }
 0xc99   : > { %v8911_v0 = vsel %vm4774_vm5, %v10559_v21, 0 }
 0xc9f   : > { %12591 = vmatmul.mubr.msk.bf16.gmra.mrb[108].mxu1 %vm4722_vm12, %v17562_v27  ;;  %v8354_v27 = vsel %vm5746_vm6, %v17682_v26, %v8353_v43  ;;  %vm18630_vm6 = vmmov %vm18628_vm0  ;;  %v8540_v26 = vrot.slane %v17364_v1, 5  ;;  %v10572_v43 = vld [vmem:[%s18336_s11 + $0x10] sm:$0x3] }
 0xca0   : > { %12594 = vmatprep.mubr.msk.bf16.mxu1 %vm4722_vm12, %v17603_v18  ;;  %v8535_v18 = vsel %vm18628_vm0, %v8533_v9, %v8534_v15 }
 0xca1   : > { %v8543_v10 = vsel %vm18632_vm9, %v8540_v26, %v8542_v59 }
 0xca7   : > { %12595 = vmatmul.mubr.msk.bf16.gmra.mrb[112].mxu1 %vm4722_vm12, %v17628_v54  ;;  %v8536_v54 = vrot.slane %v17290_v19, 5 }
 0xca8   : > { %12598 = vmatprep.mubr.msk.bf16.mxu1 %vm4722_vm12, %v17648_v25  ;;  %v8538_v25 = vrot.slane %v17320_v42, 5 }
 0xcaa   : > { %v8539_v14 = vsel %vm18630_vm6, %v8536_v54, %v8538_v25  ;;  %v8541_v55 = vsel %vm18631_vm3, %v8538_v25, %v8540_v26  ;;  %vm9673_vm6 = vcmask 123904   ;;  %vm9671_vm3 = vcmask 130048  }
 0xcaf   : > { %12599 = vmatmul.mubr.msk.bf16.gmra.mrb[116].mxu1 %vm4722_vm12, %v17659_v39  ;;  %v8744_v39 = vsel %vm4774_vm5, %v10546_v16, 0  ;;  %v8556_v16 = vrot.slane %v17675_v28, 5 }
 0xcb0   : > { %12602 = vmatprep.mubr.msk.bf16.mxu1 %vm4722_vm12, %v17687_v56  ;;  %v8537_v56 = vsel %vm18629_vm7, %v8534_v15, %v8536_v54 }
 0xcb1   : > { %v8557_v6 = vsel %vm18639_vm14, %v8554_v57, %v8556_v16 }
 0xcb7   : > { %12603 = vmatmul.mubr.msk.bf16.gmra.mrb[120].mxu1 %vm4722_vm12, %v8354_v27 }
 0xcb8   : > { %12608 = vmatprep.mubr.msk.bf16.mxu1 %vm4722_vm12, %v8535_v18 }
 0xcbf   : > { %12609 = vmatmul.mubr.msk.bf16.vlgmr.msra.gmra.mrb[100].mxu1 %vm4722_vm12, %v8537_v56 }
 0xcc0   : > { %12633 = vmatpush3.bf16.msra.mxu1 %v8744_v39  ;;  %12612 = vmatprep.mubr.msk.bf16.mxu1 %vm4722_vm12, %v8539_v14 }
 0xcc1   : > { %14045 = vmatprep.subr.msk.bf16.mxu1 %vm4774_vm5, %v10559_v21 }
 0xcc7   : > { %12613 = vmatmul.mubr.msk.bf16.gmra.mrb[104].mxu1 %vm4722_vm12, %v8541_v55 }
 0xcc8   : > { %12616 = vmatprep.mubr.msk.bf16.mxu1 %vm4722_vm12, %v8543_v10 }
 0xccf   : > { %12617 = vmatmul.mubr.msk.bf16.gmra.mrb[108].mxu1 %vm4722_vm12, %v8545_v12 }
 0xcd0   : > { %12620 = vmatprep.mubr.msk.bf16.mxu1 %vm4722_vm12, %v8547_v32 }
 0xcd7   : > { %12621 = vmatmul.mubr.msk.bf16.gmra.mrb[112].mxu1 %vm4722_vm12, %v8549_v34  ;;  %v18057_v34 = vpop.permute.xlu1 %9279 }
 0xcd8   : > { %12624 = vmatprep.mubr.msk.bf16.mxu1 %vm4722_vm12, %v8551_v3 }
 0xcdf   : > { %12625 = vmatmul.mubr.msk.bf16.gmra.mrb[116].mxu1 %vm4722_vm12, %v8553_v46 }
 0xce0   : > { %12628 = vmatprep.mubr.msk.bf16.mxu1 %vm4722_vm12, %v8555_v13 }
 0xce7   : > { %12629 = vmatmul.mubr.msk.bf16.gmra.mrb[120].mxu1 %vm4722_vm12, %v8557_v6 }
 0xce8   : > { %12634 = vmatprep.mubr.msk.bf16.mxu1 %vm4722_vm12, %v17290_v19  ;;  %v9070_v19 = vsel %vm4774_vm5, %v10572_v43, 0 }
 0xcef   : > { %12635 = vmatmul.mubr.msk.bf16.vlgmr.msra.gmra.mrb[100].mxu1 %vm4722_vm12, %v17320_v42  ;;  %v8889_v42 = vshll.u32 %v17707_v36, 16 }
 0xcf0   : > { %12659 = vmatpush3.bf16.msra.mxu1 %v8911_v0  ;;  %12638 = vmatprep.mubr.msk.bf16.mxu1 %vm4722_vm12, %v17364_v1  ;;  %v8897_v1 = vshll.u32 %v17726_v11, 16 }
 0xcf1   : > { %14046 = vmatprep.subr.msk.bf16.mxu1 %vm4774_vm5, %v10572_v43 }
 0xcf7   : > { %12639 = vmatmul.mubr.msk.bf16.gmra.mrb[104].mxu1 %vm4722_vm12, %v17405_v41  ;;  %v8893_v41 = vshrl.u32 %v17707_v36, 16 }
 0xcf8   : > { %12642 = vmatprep.mubr.msk.bf16.mxu1 %vm4722_vm12, %v17456_v7 }
 0xcff   : > { %12643 = vmatmul.mubr.msk.bf16.gmra.mrb[108].mxu1 %vm4722_vm12, %v17480_v5  ;;  %v9054_v5 = vrot.slane %v17675_v28, 1 }
 0xd00   : > { %12646 = vmatprep.mubr.msk.bf16.mxu1 %vm4722_vm12, %v17521_v23  ;;  %v9056_v23 = vrot.slane %v17707_v36, 1 }
 0xd07   : > { %12647 = vmatmul.mubr.msk.bf16.gmra.mrb[112].mxu1 %vm4722_vm12, %v17564_v60  ;;  %v9058_v60 = vrot.slane %v17726_v11, 1 }
 0xd08   : > { %12650 = vmatprep.mubr.msk.bf16.mxu1 %vm4722_vm12, %v17605_v63  ;;  %v18023_v63 = vld [vmem:[%s18640_s24] ss:$0 sm:$0xff] }
 0xd0f   : > { %12651 = vmatmul.mubr.msk.bf16.gmra.mrb[116].mxu1 %vm4722_vm12, %v17642_v2 }
 0xd10   : > { %12654 = vmatprep.mubr.msk.bf16.mxu1 %vm4722_vm12, %v17675_v28 }
 0xd17   : > { %12655 = vmatmul.mubr.msk.bf16.gmra.mrb[120].mxu1 %vm4722_vm12, %v17707_v36 }
 0xd18   : > { %12660 = vmatprep.mubr.msk.bf16.mxu1 %vm4722_vm12, %v17348_v29  ;;  %v8891_v29 = vrot.slane %v8889_v42, 1 }
 0xd1a   : > { %v8895_v7 = vor.u32 %v8893_v41, %v8891_v29  ;;  %v18073_v41 = vpop.permute.xlu0 %9277 }
 0xd1f   : > { %12661 = vmatmul.mubr.msk.bf16.vlgmr.msra.gmra.mrb[100].mxu1 %vm4722_vm12, %v17398_v45  ;;  %v8892_v45 = vsel %vm1156_vm2, %v17722_v62, %v8891_v29 }
 0xd20   : > { %12685 = vmatpush3.bf16.msra.mxu1 %v9070_v19  ;;  %12664 = vmatprep.mubr.msk.bf16.mxu1 %vm4722_vm12, %v17442_v49  ;;  %v8899_v49 = vrot.slane %v8897_v1, 1  ;;  %v18069_v1 = vpop.permute.xlu1 %9281 }
 0xd27   : > { %12665 = vmatmul.mubr.msk.bf16.gmra.mrb[104].mxu1 %vm4722_vm12, %v17474_v4  ;;  %v8900_v4 = vsel %vm1156_vm2, %v8895_v7, %v8899_v49  ;;  %vm9620_vm2 = vcmask 97280  }
 0xd28   : > { %12668 = vmatprep.mubr.msk.bf16.mxu1 %vm4722_vm12, %v17524_v44  ;;  %v9055_v44 = vsel %vm1842_vm4, %v7913_v17, %v9054_v5 }
 0xd2f   : > { %12669 = vmatmul.mubr.msk.bf16.gmra.mrb[108].mxu1 %vm4722_vm12, %v17551_v35  ;;  %v9057_v35 = vsel %vm1842_vm4, %v9054_v5, %v9056_v23 }
 0xd30   : > { %12672 = vmatprep.mubr.msk.bf16.mxu1 %vm4722_vm12, %v17592_v51  ;;  %v9059_v51 = vsel %vm1842_vm4, %v9056_v23, %v9058_v60  ;;  %vm18642_vm4 = vcmask 64512  }
 0xd31   : > { %vm18645_vm0 = vmmov %vm18642_vm4 }
 0xd32   : > { %vm18646_vm7 = vmmov %vm18645_vm0 }
 0xd33   : > { %vm18647_vm9 = vmmov %vm18645_vm0 }
 0xd34   : > { %vm18648_vm13 = vmmov %vm18645_vm0 }
 0xd35   : > { %vm18649_vm8 = vmmov %vm18645_vm0 }
 0xd36   : > { %vm18650_vm1 = vmmov %vm18645_vm0 }
 0xd37   : > { %12673 = vmatmul.mubr.msk.bf16.gmra.mrb[112].mxu1 %vm4722_vm12, %v17632_v8  ;;  %vm18651_vm10 = vmmov %vm18645_vm0 }
 0xd38   : > { %12676 = vmatprep.mubr.msk.bf16.mxu1 %vm4722_vm12, %v17663_v50  ;;  %v18028_v50 = vld [vmem:[%s18640_s24 + $0x1] ss:$0 sm:$0xff]  ;;  %vm18652_vm11 = vmmov %vm18645_vm0 }
 0xd39   : > { %vm18653_vm15 = vmmov %vm18645_vm0 }
 0xd3a   : > { %vm18654_vm14 = vmmov %vm18645_vm0 }
 0xd3f   : > { %12677 = vmatmul.mubr.msk.bf16.gmra.mrb[116].mxu1 %vm4722_vm12, %v17718_v40 }
 0xd40   : > { %12680 = vmatprep.mubr.msk.bf16.mxu1 %vm4722_vm12, %v8892_v45 }
 0xd47   : > { %12681 = vmatmul.mubr.msk.bf16.gmra.mrb[120].mxu1 %vm4722_vm12, %v8900_v4 }
 0xd48   : > { %12686 = vmatprep.mubr.msk.bf16.mxu1 %vm4722_vm12, %v17762_v33 }
 0xd4f   : > { %12687 = vmatmul.mubr.msk.bf16.vlgmr.msra.gmra.mrb[100].mxu1 %vm4722_vm12, %v17767_v52 }
 0xd50   : > { %12690 = vmatprep.mubr.msk.bf16.mxu1 %vm4722_vm12, %v17774_v37 }
 0xd57   : > { %12691 = vmatmul.mubr.msk.bf16.gmra.mrb[104].mxu1 %vm4722_vm12, %v17779_v22 }
 0xd58   : > { %12694 = vmatprep.mubr.msk.bf16.mxu1 %vm4722_vm12, %v17786_v24 }
 0xd5f   : > { %12695 = vmatmul.mubr.msk.bf16.gmra.mrb[108].mxu1 %vm4722_vm12, %v17791_v48 }
 0xd60   : > { %12698 = vmatprep.mubr.msk.bf16.mxu1 %vm4722_vm12, %v17798_v31 }
 0xd67   : > { %12699 = vmatmul.mubr.msk.bf16.gmra.mrb[112].mxu1 %vm4722_vm12, %v17803_v38 }
 0xd68   : > { %12702 = vmatprep.mubr.msk.bf16.mxu1 %vm4722_vm12, %v17813_v20 }
 0xd6f   : > { %12703 = vmatmul.mubr.msk.bf16.gmra.mrb[116].mxu1 %vm4722_vm12, %v9055_v44  ;;  %v18077_v44 = vpop.permute.xlu1 %9285 }
 0xd70   : > { %12706 = vmatprep.mubr.msk.bf16.mxu1 %vm4722_vm12, %v9057_v35 }
 0xd77   : > { %12707 = vmatmul.mubr.msk.bf16.gmra.mrb[120].mxu1 %vm4722_vm12, %v9059_v51  ;;  %v18081_v51 = vpop.permute.xlu0 %9283  ;;  %vm9669_vm12 = vcmask 130050  }
 0xe22   : > { %v12688_v8 = vpop.f32.mrb[100].mxu1 }
 0xe23   : > { %v9106_v2 = vpop.f32.mrb[101].mxu1 }
 0xe24   : > { %v9214_v28 = vmul.f32 %v18023_v63, %v9106_v2  ;;  %v12689_v36 = vpop.f32.mrb[102].mxu1 }
 0xe25   : > { %v9216_v40 = vmul.f32 %v12689_v36, %v18023_v63  ;;  %v9109_v62 = vpop.f32.mrb[103].mxu1 }
 0xe26   : > { %v9235_v11 = vadd.f32 %v18028_v50, %v9214_v28  ;;  %v9215_v33 = vmul.f32 %v18023_v63, %v9109_v62 }
 0xe27   : > { %v9237_v52 = vadd.f32 %v18028_v50, %v9216_v40 }
 0xe28   : > { %v9500_v37 = vrot.slane %v9235_v11, 6  ;;  %v9236_v22 = vadd.f32 %v18028_v50, %v9215_v33  ;;  %v18089_v33 = vpop.permute.xlu1 %9289 }
 0xe29   : > { %v9503_v24 = vrot.slane %v9237_v52, 6 }
 0xe2a   : > { %v9501_v48 = vrot.slane %v9236_v22, 6  ;;  %9524 = vrot.lane.b32.xlu0 %v9500_v37, %s14173_s30  ;;  %v12692_v31 = vpop.f32.mrb[104].mxu1  ;;  %v18093_v22 = vpop.permute.xlu0 %9287 }
 0xe2b   : > { %v9218_v38 = vmul.f32 %v12692_v31, %v18023_v63  ;;  %9530 = vrot.lane.b32.xlu1 %v9503_v24, %s14173_s30  ;;  %v9121_v17 = vpop.f32.mrb[105].mxu1 }
 0xe2c   : > { %v9217_v20 = vmul.f32 %v18023_v63, %v9121_v17  ;;  %v12693_v15 = vpop.f32.mrb[106].mxu1  ;;  %v9502_v9 = vsel %vm4774_vm5, %v9500_v37, %v9501_v48  ;;  %v18097_v17 = vpop.permute.xlu1 %9293 }
 0xe2d   : > { %v9239_v27 = vadd.f32 %v18028_v50, %v9218_v38  ;;  %v9219_v18 = vmul.f32 %v12693_v15, %v18023_v63  ;;  %v9124_v54 = vpop.f32.mrb[107].mxu1 }
 0xe2e   : > { %v9238_v25 = vadd.f32 %v18028_v50, %v9217_v20  ;;  %9528 = vrot.lane.b32.xlu0 %v9501_v48, %s14173_s30 }
 0xe2f   : > { %v9506_v39 = vrot.slane %v9239_v27, 6  ;;  %v9240_v56 = vadd.f32 %v18028_v50, %v9219_v18  ;;  %9526 = vrot.lane.b32.xlu1 %v9502_v9, %s14173_s30  ;;  %v18102_v27 = vpop.permute.xlu0 %9291 }
 0xe30   : > { %v9504_v21 = vrot.slane %v9238_v25, 6 }
 0xe31   : > { %v9507_v14 = vrot.slane %v9240_v56, 6  ;;  %v18107_v56 = vpop.permute.xlu1 %9297 }
 0xe32   : > { %9536 = vrot.lane.b32.xlu0 %v9506_v39, %s14173_s30  ;;  %v12696_v26 = vpop.f32.mrb[108].mxu1  ;;  %v9505_v59 = vsel %vm4774_vm5, %v9503_v24, %v9504_v21 }
 0xe33   : > { %v9221_v55 = vmul.f32 %v12696_v26, %v18023_v63  ;;  %9534 = vrot.lane.b32.xlu1 %v9504_v21, %s14173_s30  ;;  %v9136_v10 = vpop.f32.mrb[109].mxu1  ;;  %v9508_v61 = vsel %vm4774_vm5, %v9506_v39, %v9507_v14  ;;  %v18110_v21 = vpop.permute.xlu0 %9295 }
 0xe34   : > { %v12697_v58 = vpop.f32.mrb[110].mxu1 }
 0xe35   : > { %v9242_v12 = vadd.f32 %v18028_v50, %v9221_v55  ;;  %v9138_v32 = vpop.f32.mrb[111].mxu1  ;;  %v18114_v55 = vpop.permute.xlu1 %9301 }
 0xe36   : > { %v9220_v53 = vmul.f32 %v18023_v63, %v9138_v32  ;;  %9532 = vrot.lane.b32.xlu0 %v9505_v59, %s14173_s30 }
 0xe37   : > { %9538 = vrot.lane.b32.xlu1 %v9508_v61, %s14173_s30  ;;  %v9510_v3 = vrot.slane %v9242_v12, 6  ;;  %v18116_v10 = vpop.permute.xlu0 %9299 }
 0xe38   : > { %v9241_v47 = vadd.f32 %v18028_v50, %v9220_v53 }
 0xe39   : > { %v18121_v61 = vpop.permute.xlu1 %9305 }
 0xe3a   : > { %v9509_v57 = vrot.slane %v9241_v47, 6  ;;  %9540 = vrot.lane.b32.xlu0 %v9507_v14, %s14173_s30  ;;  %v12700_v46 = vpop.f32.mrb[112].mxu1 }
 0xe3b   : > { %9546 = vrot.lane.b32.xlu1 %v9510_v3, %s14173_s30  ;;  %v9150_v13 = vpop.f32.mrb[113].mxu1  ;;  %v18123_v58 = vpop.permute.xlu0 %9303 }
 0xe3c   : > { %v9222_v16 = vmul.f32 %v18023_v63, %v9150_v13  ;;  %v12701_v6 = vpop.f32.mrb[114].mxu1  ;;  %v9511_v0 = vsel %vm4774_vm5, %v9509_v57, %v9510_v3 }
 0xe3d   : > { %v9224_v43 = vmul.f32 %v12701_v6, %v18023_v63  ;;  %v9153_v19 = vpop.f32.mrb[115].mxu1 }
 0xe3e   : > { %v9243_v42 = vadd.f32 %v18028_v50, %v9222_v16  ;;  %v9223_v29 = vmul.f32 %v18023_v63, %v9153_v19  ;;  %9544 = vrot.lane.b32.xlu0 %v9511_v0, %s14173_s30 }
 0xe3f   : > { %v9245_v45 = vadd.f32 %v18028_v50, %v9224_v43  ;;  %9542 = vrot.lane.b32.xlu1 %v9509_v57, %s14173_s30  ;;  %v18128_v12 = vpop.permute.xlu0 %9307 }
 0xe40   : > { %v9512_v49 = vrot.slane %v9243_v42, 6  ;;  %v9244_v7 = vadd.f32 %v18028_v50, %v9223_v29 }
 0xe41   : > { %v9515_v4 = vrot.slane %v9245_v45, 6 }
 0xe42   : > { %v9513_v5 = vrot.slane %v9244_v7, 6  ;;  %9548 = vrot.lane.b32.xlu0 %v9512_v49, %s14173_s30  ;;  %v12704_v23 = vpop.f32.mrb[116].mxu1 }
 0xe43   : > { %v9226_v35 = vmul.f32 %v12704_v23, %v18023_v63  ;;  %9554 = vrot.lane.b32.xlu1 %v9515_v4, %s14173_s30  ;;  %v9165_v60 = vpop.f32.mrb[117].mxu1  ;;  %v18132_v53 = vpop.permute.xlu0 %9311 }
 0xe44   : > { %v9225_v8 = vmul.f32 %v18023_v63, %v9165_v60  ;;  %v12705_v2 = vpop.f32.mrb[118].mxu1  ;;  %v9514_v28 = vsel %vm4774_vm5, %v9512_v49, %v9513_v5 }
 0xe45   : > { %v9247_v36 = vadd.f32 %v18028_v50, %v9226_v35  ;;  %v9227_v40 = vmul.f32 %v12705_v2, %v18023_v63  ;;  %v9168_v62 = vpop.f32.mrb[119].mxu1 }
 0xe46   : > { %v9246_v11 = vadd.f32 %v18028_v50, %v9225_v8  ;;  %9552 = vrot.lane.b32.xlu0 %v9513_v5, %s14173_s30 }
 0xe47   : > { %v9518_v52 = vrot.slane %v9247_v36, 6  ;;  %v9248_v37 = vadd.f32 %v18028_v50, %v9227_v40  ;;  %9550 = vrot.lane.b32.xlu1 %v9514_v28, %s14173_s30  ;;  %v18136_v3 = vpop.permute.xlu0 %9315 }
 0xe48   : > { %v9516_v24 = vrot.slane %v9246_v11, 6 }
 0xe49   : > { %v9519_v48 = vrot.slane %v9248_v37, 6 }
 0xe4a   : > { %9560 = vrot.lane.b32.xlu0 %v9518_v52, %s14173_s30  ;;  %v12708_v31 = vpop.f32.mrb[120].mxu1  ;;  %v9517_v38 = vsel %vm4774_vm5, %v9515_v4, %v9516_v24 }
 0xe4b   : > { %v9229_v20 = vmul.f32 %v12708_v31, %v18023_v63  ;;  %9558 = vrot.lane.b32.xlu1 %v9516_v24, %s14173_s30  ;;  %v9180_v15 = vpop.f32.mrb[121].mxu1  ;;  %v9520_v9 = vsel %vm4774_vm5, %v9518_v52, %v9519_v48  ;;  %v18140_v46 = vpop.permute.xlu0 %9319 }
 0xe4c   : > { %v12709_v18 = vpop.f32.mrb[122].mxu1 }
 0xe4d   : > { %v9182_v54 = vpop.f32.mrb[123].mxu1  ;;  %v9250_v25 = vadd.f32 %v18028_v50, %v9229_v20 }
 0xe4e   : > { %v9228_v39 = vmul.f32 %v18023_v63, %v9182_v54  ;;  %9556 = vrot.lane.b32.xlu0 %v9517_v38, %s14173_s30 }
 0xe4f   : > { %9562 = vrot.lane.b32.xlu1 %v9520_v9, %s14173_s30  ;;  %v9522_v26 = vrot.slane %v9250_v25, 6  ;;  %v9413_v16 = vpop.permute.xlu0 %9412 }
 0xe50   : > { %v9249_v14 = vadd.f32 %v18028_v50, %v9228_v39  ;;  %v18126_v50 = vpop.permute.xlu1 %9309  ;;  %v9596_v37 = vsel %vm18642_vm4, %v18059_v30, %v9413_v16 }
 0xe52   : > { %v9521_v59 = vrot.slane %v9249_v14, 6  ;;  %9564 = vrot.lane.b32.xlu0 %v9519_v48, %s14173_s30 }
 0xe53   : > { %v9417_v0 = vpop.permute.xlu0 %9416 }
 0xe54   : > { %9566 = vrot.lane.b32.xlu1 %v9521_v59, %s14173_s30  ;;  %v9523_v63 = vsel %vm4774_vm5, %v9521_v59, %v9522_v26  ;;  %v18130_v32 = vpop.permute.xlu1 %9313  ;;  %vm18644_vm5 = vmmov %vm18642_vm4  ;;  %v9598_v9 = vsel %vm18645_vm0, %v18057_v34, %v9417_v0 }
 0xe55   : > { %vm18655_vm4 = vmmov %vm18645_vm0 }
 0xe56   : > { %9568 = vrot.lane.b32.xlu0 %v9523_v63, %s14173_s30 }
 0xe57   : > { %v9421_v19 = vpop.permute.xlu0 %9420 }
 0xe58   : > { %9570 = vrot.lane.b32.xlu1 %v9522_v26, %s14173_s30  ;;  %v18134_v47 = vpop.permute.xlu1 %9317 }
 0xe5b   : > { %v9425_v29 = vpop.permute.xlu0 %9424 }
 0xe5c   : > { %v18138_v57 = vpop.permute.xlu1 %9321  ;;  %v9602_v26 = vsel %vm18647_vm9, %v18093_v22, %v9425_v29  ;;  %v9600_v22 = vsel %vm18649_vm8, %v18081_v51, %v9421_v19  ;;  %vm18658_vm9 = vmmov %vm18645_vm0 }
 0xe5d   : > { %vm18660_vm8 = vmmov %vm18645_vm0 }
 0xe5f   : > { %v9429_v49 = vpop.permute.xlu0 %9428 }
 0xe60   : > { %v9415_v13 = vpop.permute.xlu1 %9414  ;;  %v9604_v51 = vsel %vm18651_vm10, %v18102_v27, %v9429_v49  ;;  %vm18662_vm10 = vmmov %vm18645_vm0 }
 0xe61   : > { %v9597_v54 = vsel %vm18646_vm7, %v18073_v41, %v9415_v13  ;;  %vm18657_vm7 = vmmov %vm18645_vm0 }
 0xe63   : > { %v18144_v4 = vpop.permute.xlu0 %9432 }
 0xe64   : > { %v9419_v6 = vpop.permute.xlu1 %9418  ;;  %v9606_v27 = vsel %vm18653_vm15, %v18110_v21, %v18144_v4  ;;  %vm18664_vm15 = vmmov %vm18645_vm0 }
 0xe65   : > { %v9599_v48 = vsel %vm18644_vm5, %v18069_v1, %v9419_v6  ;;  %vm18656_vm5 = vmmov %vm18645_vm0 }
 0xe67   : > { %v18148_v23 = vpop.permute.xlu0 %9436 }
 0xe68   : > { %v9423_v43 = vpop.permute.xlu1 %9422  ;;  %v9608_v21 = vsel %vm18655_vm4, %v18116_v10, %v18148_v23 }
 0xe69   : > { %v9601_v41 = vsel %vm18648_vm13, %v18077_v44, %v9423_v43  ;;  %vm18659_vm13 = vmmov %vm18645_vm0 }
 0xe6b   : > { %v18150_v35 = vpop.permute.xlu0 %9440 }
 0xe6c   : > { %v9427_v42 = vpop.permute.xlu1 %9426  ;;  %v9610_v10 = vsel %vm18645_vm0, %v18123_v58, %v18150_v35 }
 0xe6d   : > { %v9603_v44 = vsel %vm18650_vm1, %v18089_v33, %v9427_v42  ;;  %vm18661_vm1 = vmmov %vm18645_vm0 }
 0xe6f   : > { %v18154_v8 = vpop.permute.xlu0 %9444 }
 0xe70   : > { %v18142_v45 = vpop.permute.xlu1 %9430 }
 0xe73   : > { %v18158_v28 = vpop.permute.xlu0 %9448 }
 0xe74   : > { %v9435_v7 = vpop.permute.xlu1 %9434  ;;  %v9614_v58 = vsel %vm18658_vm9, %v18132_v53, %v18158_v28  ;;  %v9612_v53 = vsel %vm18660_vm8, %v18128_v12, %v18154_v8 }
 0xe75   : > { %v9607_v33 = vsel %vm18652_vm11, %v18107_v56, %v9435_v7  ;;  %v9605_v56 = vsel %vm18654_vm14, %v18097_v17, %v18142_v45  ;;  %vm18663_vm11 = vmmov %vm18645_vm0 }
 0xe76   : > { %vm18665_vm14 = vmmov %vm18645_vm0 }
 0xe77   : > { %v18162_v40 = vpop.permute.xlu0 %9452 }
 0xe78   : > { %v18146_v5 = vpop.permute.xlu1 %9438  ;;  %v9616_v12 = vsel %vm18662_vm10, %v18136_v3, %v18162_v40 }
 0xe7b   : > { %v18166_v11 = vpop.permute.xlu0 %9456 }
 0xe7c   : > { %v18152_v60 = vpop.permute.xlu1 %9442  ;;  %v9618_v3 = vsel %vm18664_vm15, %v18140_v46, %v18166_v11 }
 0xe7d   : > { %v9611_v17 = vsel %vm18656_vm5, %v18121_v61, %v18152_v60  ;;  %v9609_v61 = vsel %vm18657_vm7, %v18114_v55, %v18146_v5 }
 0xe80   : > { %v18156_v2 = vpop.permute.xlu1 %9446 }
 0xe81   : > { %v9613_v55 = vsel %vm18659_vm13, %v18126_v50, %v18156_v2 }
 0xe84   : > { %v18160_v36 = vpop.permute.xlu1 %9450 }
 0xe85   : > { %v9615_v50 = vsel %vm18661_vm1, %v18130_v32, %v18160_v36 }
 0xe88   : > { %v18164_v62 = vpop.permute.xlu1 %9454 }
 0xe89   : > { %v9617_v36 = vsel %vm18663_vm11, %v18134_v47, %v18164_v62 }
 0xe8c   : > { %v18168_v52 = vpop.permute.xlu1 %9458 }
 0xe9c   : > { %v9525_v24 = vpop.permute.xlu0 %9524 }
 0xe9d   : > { %v9621_v31 = vsel %vm9620_vm2, %v9596_v37, %v9525_v24  ;;  %v9531_v38 = vpop.permute.xlu1 %9530 }
 0xe9e   : > { %v9645_v20 = vmax.f32 %v9621_v31, 0.0  ;;  %v9624_v15 = vsel %vm9620_vm2, %v9599_v48, %v9531_v38 }
 0xe9f   : > { %v9648_v30 = vmax.f32 %v9624_v15, 0.0 }
 0xea0   : > { %9670 = vst.msk [vmem:[%s18176_s18 - $0x2] sm:$0xfc] %vm9669_vm12, %v9645_v20  ;;  %v9529_v18 = vpop.permute.xlu0 %9528 }
 0xea1   : > { %9675 = vst.msk [vmem:[%s18176_s18 + $0xe] sm:$0xfc] %vm9669_vm12, %v9648_v30  ;;  %v9623_v1 = vsel %vm9620_vm2, %v9598_v9, %v9529_v18  ;;  %v9527_v25 = vpop.permute.xlu1 %9526 }
 0xea2   : > { %v9647_v39 = vmax.f32 %v9623_v1, 0.0  ;;  %v9622_v14 = vsel %vm9620_vm2, %v9597_v54, %v9527_v25 }
 0xea3   : > { %v9646_v34 = vmax.f32 %v9622_v14, 0.0 }
 0xea4   : > { %9674 = vst.msk [vmem:[%s18176_s18 + $0xe] sm:$0x3] %vm9673_vm6, %v9647_v39  ;;  %v9537_v59 = vpop.permute.xlu0 %9536 }
 0xea5   : > { %9672 = vst.msk [vmem:[%s18176_s18 + $0x6] sm:$0xff] %vm9671_vm3, %v9646_v34  ;;  %v9627_v63 = vsel %vm9620_vm2, %v9602_v26, %v9537_v59  ;;  %v9535_v13 = vpop.permute.xlu1 %9534 }
 0xea6   : > { %v9651_v16 = vmax.f32 %v9627_v63, 0.0  ;;  %v9626_v6 = vsel %vm9620_vm2, %v9601_v41, %v9535_v13 }
 0xea7   : > { %v9650_v0 = vmax.f32 %v9626_v6, 0.0 }
 0xea8   : > { %9678 = vst.msk [vmem:[%s18176_s18 + $0x1e] sm:$0xfc] %vm9669_vm12, %v9651_v16  ;;  %v9533_v29 = vpop.permute.xlu0 %9532 }
 0xea9   : > { %9677 = vst.msk [vmem:[%s18176_s18 + $0x1e] sm:$0x3] %vm9673_vm6, %v9650_v0  ;;  %v9625_v43 = vsel %vm9620_vm2, %v9600_v22, %v9533_v29  ;;  %v9539_v37 = vpop.permute.xlu1 %9538 }
 0xeaa   : > { %v9649_v24 = vmax.f32 %v9625_v43, 0.0  ;;  %v9628_v48 = vsel %vm9620_vm2, %v9603_v44, %v9539_v37 }
 0xeab   : > { %v9652_v31 = vmax.f32 %v9628_v48, 0.0 }
 0xeac   : > { %9676 = vst.msk [vmem:[%s18176_s18 + $0x16] sm:$0xff] %vm9671_vm3, %v9649_v24  ;;  %v9541_v19 = vpop.permute.xlu0 %9540 }
 0xead   : > { %9679 = vst.msk [vmem:[%s18176_s18 + $0x26] sm:$0xff] %vm9671_vm3, %v9652_v31  ;;  %v9629_v42 = vsel %vm9620_vm2, %v9604_v51, %v9541_v19  ;;  %v9547_v38 = vpop.permute.xlu1 %9546  ;;  %v9619_v19 = vsel %vm18665_vm14, %v18138_v57, %v18168_v52 }
 0xeae   : > { %v9653_v20 = vmax.f32 %v9629_v42, 0.0  ;;  %v9632_v15 = vsel %vm9620_vm2, %v9607_v33, %v9547_v38 }
 0xeaf   : > { %v9656_v30 = vmax.f32 %v9632_v15, 0.0 }
 0xeb0   : > { %9680 = vst.msk [vmem:[%s18176_s18 + $0x2e] sm:$0x3] %vm9673_vm6, %v9653_v20  ;;  %v9545_v49 = vpop.permute.xlu0 %9544 }
 0xeb1   : > { %9683 = vst.msk [vmem:[%s18176_s18 + $0x3e] sm:$0x3] %vm9673_vm6, %v9656_v30  ;;  %v9631_v7 = vsel %vm9620_vm2, %v9606_v27, %v9545_v49  ;;  %v9543_v9 = vpop.permute.xlu1 %9542 }
 0xeb2   : > { %v9655_v18 = vmax.f32 %v9631_v7, 0.0  ;;  %v9630_v54 = vsel %vm9620_vm2, %v9605_v56, %v9543_v9 }
 0xeb3   : > { %v9654_v1 = vmax.f32 %v9630_v54, 0.0 }
 0xeb4   : > { %9682 = vst.msk [vmem:[%s18176_s18 + $0x36] sm:$0xff] %vm9671_vm3, %v9655_v18  ;;  %v9549_v4 = vpop.permute.xlu0 %9548 }
 0xeb5   : > { %9681 = vst.msk [vmem:[%s18176_s18 + $0x2e] sm:$0xfc] %vm9669_vm12, %v9654_v1  ;;  %v9633_v45 = vsel %vm9620_vm2, %v9608_v21, %v9549_v4  ;;  %v9555_v25 = vpop.permute.xlu1 %9554 }
 0xeb6   : > { %v9657_v39 = vmax.f32 %v9633_v45, 0.0  ;;  %v9636_v14 = vsel %vm9620_vm2, %v9611_v17, %v9555_v25 }
 0xeb7   : > { %v9660_v34 = vmax.f32 %v9636_v14, 0.0 }
 0xeb8   : > { %9684 = vst.msk [vmem:[%s18176_s18 + $0x3e] sm:$0xfc] %vm9669_vm12, %v9657_v39  ;;  %v9553_v23 = vpop.permute.xlu0 %9552 }
 0xeb9   : > { %9687 = vst.msk [vmem:[%s18176_s18 + $0x4e] sm:$0xfc] %vm9669_vm12, %v9660_v34  ;;  %v9635_v60 = vsel %vm9620_vm2, %v9610_v10, %v9553_v23  ;;  %v9551_v26 = vpop.permute.xlu1 %9550 }
 0xeba   : > { %v9659_v59 = vmax.f32 %v9635_v60, 0.0  ;;  %v9634_v41 = vsel %vm9620_vm2, %v9609_v61, %v9551_v26 }
 0xebb   : > { %v9658_v63 = vmax.f32 %v9634_v41, 0.0 }
 0xebc   : > { %9686 = vst.msk [vmem:[%s18176_s18 + $0x4e] sm:$0x3] %vm9673_vm6, %v9659_v59  ;;  %v9561_v35 = vpop.permute.xlu0 %9560 }
 0xebd   : > { %9685 = vst.msk [vmem:[%s18176_s18 + $0x46] sm:$0xff] %vm9671_vm3, %v9658_v63  ;;  %v9639_v5 = vsel %vm9620_vm2, %v9614_v58, %v9561_v35  ;;  %v9559_v13 = vpop.permute.xlu1 %9558 }
 0xebe   : > { %v9663_v16 = vmax.f32 %v9639_v5, 0.0  ;;  %v9638_v6 = vsel %vm9620_vm2, %v9613_v55, %v9559_v13 }
 0xebf   : > { %v9662_v0 = vmax.f32 %v9638_v6, 0.0 }
 0xec0   : > { %9690 = vst.msk [vmem:[%s18176_s18 + $0x5e] sm:$0xfc] %vm9669_vm12, %v9663_v16  ;;  %v9557_v28 = vpop.permute.xlu0 %9556 }
 0xec1   : > { %9689 = vst.msk [vmem:[%s18176_s18 + $0x5e] sm:$0x3] %vm9673_vm6, %v9662_v0  ;;  %v9637_v2 = vsel %vm9620_vm2, %v9612_v53, %v9557_v28  ;;  %v9563_v22 = vpop.permute.xlu1 %9562 }
 0xec2   : > { %v9661_v29 = vmax.f32 %v9637_v2, 0.0  ;;  %v9640_v44 = vsel %vm9620_vm2, %v9615_v50, %v9563_v22 }
 0xec3   : > { %v9664_v43 = vmax.f32 %v9640_v44, 0.0 }
 0xec4   : > { %9688 = vst.msk [vmem:[%s18176_s18 + $0x56] sm:$0xff] %vm9671_vm3, %v9661_v29  ;;  %v9565_v8 = vpop.permute.xlu0 %9564 }
 0xec5   : > { %9691 = vst.msk [vmem:[%s18176_s18 + $0x66] sm:$0xff] %vm9671_vm3, %v9664_v43  ;;  %v9641_v32 = vsel %vm9620_vm2, %v9616_v12, %v9565_v8 }
 0xec6   : > { %v9665_v37 = vmax.f32 %v9641_v32, 0.0  ;;  %v9567_v24 = vpop.permute.xlu1 %9566 }
 0xec7   : > { %v9642_v48 = vsel %vm9620_vm2, %v9617_v36, %v9567_v24 }
 0xec8   : > { %9692 = vst.msk [vmem:[%s18176_s18 + $0x6e] sm:$0x3] %vm9673_vm6, %v9665_v37  ;;  %v9666_v40 = vmax.f32 %v9642_v48, 0.0  ;;  %v9569_v31 = vpop.permute.xlu0 %9568 }
 0xec9   : > { %v9643_v51 = vsel %vm9620_vm2, %v9618_v3, %v9569_v31 }
 0xeca   : > { %9693 = vst.msk [vmem:[%s18176_s18 + $0x6e] sm:$0xfc] %vm9669_vm12, %v9666_v40  ;;  %v9667_v47 = vmax.f32 %v9643_v51, 0.0  ;;  %v9571_v62 = vpop.permute.xlu1 %9570 }
 0xecb   : > { %v9644_v33 = vsel %vm9620_vm2, %v9619_v19, %v9571_v62 }
 0xecc   : > { %9694 = vst.msk [vmem:[%s18176_s18 + $0x76] sm:$0xff] %vm9671_vm3, %v9667_v47  ;;  %v9668_v42 = vmax.f32 %v9644_v33, 0.0 }
 0xece   : > { %9695 = vst.msk [vmem:[%s18176_s18 + $0x7e] sm:$0x3] %vm9673_vm6, %v9668_v42 }
 0xecf PF: > { %s18666_s20 = sld [smem:[#allocation4_spill]]  ;;  %s18667_s25 = sld [smem:[#allocation2_spill]] }
 0xed0   : > { %s18668_s26 = sld [smem:[#allocation3_spill]]  ;;  %s18669_s27 = sld [smem:[#allocation5_spill]] }
 0xed1   : > { %s18670_s28 = sld [smem:[#allocation6_spill]] }
 0xed5   : > { %s23_s29 = sadd.s32 1, %s18666_s20  }
 0xed6   : > { %p20_p12 = scmp.ge.s32.totalorder %s23_s29, 6  }
 0xed8   :  { %22 = sbr.rel (!%p20_p12) target bundleno = 5 (0x5), region = 144 }

</bundles_post_ra>
